<compile_context>
chip_gen: v6e
topology: v6e:2x2x1
jax: 0.10.0
libtpu: 0.0.40
codegen_flags: <defaults>
</compile_context>

<pallas_src>
import functools
import numpy as np
import jax
import jax.numpy as jnp
from jax.experimental import pallas as pl
from jax.experimental.pallas import tpu as pltpu

TPM = 256                 # pooling rows-per-block

_BN_EPS = 1e-3
_BN_FOLD = 1.0 / np.sqrt(1.0 + _BN_EPS)   # gamma=1, running_var=1, running_mean=0

# Full weight panel (Kp x Np, bf16) kept resident in VMEM if below this size.
_WEIGHT_PANEL_BYTES = 3 * 1024 * 1024


def _rup(x, m):
    return (x + m - 1) // m * m


# ----------------------------------------------------------------------------
# Fused GEMM (conv-as-matmul) Pallas kernel
# ----------------------------------------------------------------------------

def _make_gemm_kernel(relu, has_res):
    """bf16 GEMM (f32 acc) + per-out-channel affine (+ residual) (+ ReLU)."""
    def kernel(*refs):
        if has_res:
            a_ref, b_ref, s_ref, c_ref, r_ref, o_ref = refs
        else:
            a_ref, b_ref, s_ref, c_ref, o_ref = refs
        acc = jnp.dot(a_ref[...], b_ref[...],
                      preferred_element_type=jnp.float32)
        y = acc * s_ref[...] + c_ref[...]          # f32 epilogue (v5e friendly)
        if has_res:
            y = y + r_ref[...].astype(jnp.float32)
        if relu:
            y = jnp.maximum(y, 0.0)
        o_ref[...] = y.astype(o_ref.dtype)
    return kernel


def _choose_tm(M, Kp):
    if M >= 2048 and Kp <= 1536:
        return 512
    if M >= 1024:
        return 256
    return 128


def _choose_tn(Np, Kp, m_blocks):
    # Keep the whole weight panel resident if it fits (no B re-fetch per M block).
    if Kp * Np * 2 <= _WEIGHT_PANEL_BYTES:
        return Np
    if m_blocks == 1:
        for tn in (512, 256, 128):
            if Np % tn == 0:
                return tn
    return 256 if Np % 256 == 0 else 128


def fused_matmul(a, w, scale, bias, relu=True, residual=None):
    """y = [relu]((a @ w) * scale + bias [+ residual]); a/w/residual bf16, out bf16."""
    M, K = a.shape
    K2, N = w.shape
    assert K == K2
    Kp = _rup(K, 128)
    Np = _rup(N, 128)
    TM = _choose_tm(M, Kp)
    Mp = _rup(M, TM)
    TN = _choose_tn(Np, Kp, Mp // TM)

    a_p = a.astype(jnp.bfloat16)
    if (Mp, Kp) != (M, K):
        a_p = jnp.pad(a_p, ((0, Mp - M), (0, Kp - K)))
    w_p = w.astype(jnp.bfloat16)
    if (Kp, Np) != (K, N):
        w_p = jnp.pad(w_p, ((0, Kp - K), (0, Np - N)))
    s_p = scale.astype(jnp.float32)
    c_p = bias.astype(jnp.float32)
    if Np != N:
        s_p = jnp.pad(s_p, (0, Np - N))
        c_p = jnp.pad(c_p, (0, Np - N))
    s_p = s_p.reshape(1, Np)
    c_p = c_p.reshape(1, Np)

    args = [a_p, w_p, s_p, c_p]
    in_specs = [
        pl.BlockSpec((TM, Kp), lambda i, j: (i, 0)),
        pl.BlockSpec((Kp, TN), lambda i, j: (0, j)),
        pl.BlockSpec((1, TN), lambda i, j: (0, j)),
        pl.BlockSpec((1, TN), lambda i, j: (0, j)),
    ]
    if residual is not None:
        r_p = residual.astype(jnp.bfloat16)
        if (Mp, Np) != (M, N):
            r_p = jnp.pad(r_p, ((0, Mp - M), (0, Np - N)))
        args.append(r_p)
        in_specs.append(pl.BlockSpec((TM, TN), lambda i, j: (i, j)))

    out = pl.pallas_call(
        _make_gemm_kernel(relu, residual is not None),
        out_shape=jax.ShapeDtypeStruct((Mp, Np), jnp.bfloat16),
        grid_spec=pltpu.PrefetchScalarGridSpec(
            num_scalar_prefetch=0,
            grid=(Mp // TM, Np // TN),
            in_specs=in_specs,
            out_specs=pl.BlockSpec((TM, TN), lambda i, j: (i, j)),
        ),
        compiler_params=pltpu.CompilerParams(
            dimension_semantics=("parallel", "parallel")),
    )(*args)
    if (Mp, Np) != (M, N):
        out = out[:M, :N]
    return out


# ----------------------------------------------------------------------------
# Pooling Pallas kernels (window reduction, C-tiled)
# ----------------------------------------------------------------------------

def _maxpool_kernel(w_ref, o_ref):
    o_ref[...] = jnp.max(w_ref[...], axis=0)


def _avgpool_kernel(w_ref, inv_ref, o_ref):
    s = jnp.sum(w_ref[...].astype(jnp.float32), axis=0)
    o_ref[...] = (s * inv_ref[...]).astype(o_ref.dtype)


def _pick_tc(Cp):
    for tc in (512, 384, 256, 128):
        if Cp % tc == 0:
            return tc
    return 128


def _window_reduce(wnd, inv=None):
    """wnd: (k*k, Mp, Cp) bf16.  max-reduce if inv is None else sum*inv."""
    KK, Mp, Cp = wnd.shape
    TC = _pick_tc(Cp)
    grid = (Mp // TPM, Cp // TC)
    if inv is None:
        return pl.pallas_call(
            _maxpool_kernel,
            out_shape=jax.ShapeDtypeStruct((Mp, Cp), jnp.bfloat16),
            grid_spec=pltpu.PrefetchScalarGridSpec(
                num_scalar_prefetch=0, grid=grid,
                in_specs=[pl.BlockSpec((KK, TPM, TC), lambda i, j: (0, i, j))],
                out_specs=pl.BlockSpec((TPM, TC), lambda i, j: (i, j))),
            compiler_params=pltpu.CompilerParams(
                dimension_semantics=("parallel", "parallel")),
        )(wnd)
    return pl.pallas_call(
        _avgpool_kernel,
        out_shape=jax.ShapeDtypeStruct((Mp, Cp), jnp.bfloat16),
        grid_spec=pltpu.PrefetchScalarGridSpec(
            num_scalar_prefetch=0, grid=grid,
            in_specs=[pl.BlockSpec((KK, TPM, TC), lambda i, j: (0, i, j)),
                      pl.BlockSpec((TPM, 1), lambda i, j: (i, 0))],
            out_specs=pl.BlockSpec((TPM, TC), lambda i, j: (i, j))),
        compiler_params=pltpu.CompilerParams(
            dimension_semantics=("parallel", "parallel")),
    )(wnd, inv)


def _head_kernel(f_ref, w_ref, g_ref, b_ref, o_ref):
    # AvgPool2d(8) over the 8x8=64 flattened spatial positions (f32)
    f = jnp.mean(f_ref[...].astype(jnp.float32), axis=1)   # (Bp, 1536)
    # Linear(1536, E, bias=False)
    z = jnp.dot(f, w_ref[...], preferred_element_type=jnp.float32)
    # BatchNorm1d(E, eps=1e-3) in inference mode, folded to scale/bias
    z = z * g_ref[...] + b_ref[...]
    # F.normalize(p=2, dim=1, eps=1e-12)
    norm = jnp.sqrt(jnp.sum(z * z, axis=1, keepdims=True))
    o_ref[...] = z / jnp.maximum(norm, 1e-12)


# ----------------------------------------------------------------------------
# Convolution / pooling wrappers (glue: padding, im2col, reshapes)
# ----------------------------------------------------------------------------

def _im2col(x, kh, kw, stride):
    B, H, W, C = x.shape
    oh = (H - kh) // stride + 1
    ow = (W - kw) // stride + 1
    if kh == 1 and kw == 1 and stride == 1:
        return x.reshape(B * H * W, C), H, W
    cols = []
    for i in range(kh):
        for j in range(kw):
            cols.append(jax.lax.slice(
                x, (0, i, j, 0),
                (B, i + (oh - 1) * stride + 1, j + (ow - 1) * stride + 1, C),
                (1, stride, stride, 1)))
    patches = jnp.stack(cols, axis=3)                 # (B, oh, ow, kh*kw, C)
    return patches.reshape(B * oh * ow, kh * kw * C), oh, ow


def conv2d(x, p, kh, kw, stride=1, padding=(0, 0), relu=True, residual=None):
    B = x.shape[0]
    ph, pw = padding
    if ph or pw:
        x = jnp.pad(x, ((0, 0), (ph, ph), (pw, pw), (0, 0)))
    patches, oh, ow = _im2col(x, kh, kw, stride)
    res = None
    if residual is not None:
        res = residual.reshape(-1, residual.shape[-1])
    y = fused_matmul(patches, p["w"], p["scale"], p["bias"],
                     relu=relu, residual=res)
    return y.reshape(B, oh, ow, -1)


def basic(x, p, k, stride=1, padding=(0, 0)):
    """BasicConv2d: Conv2d(bias=False) + BatchNorm2d(folded) + ReLU."""
    kh, kw = (k, k) if isinstance(k, int) else k
    return conv2d(x, p, kh, kw, stride, padding, relu=True)


def _pool_windows(x, k, stride, pad):
    if pad:
        x = jnp.pad(x, ((0, 0), (pad, pad), (pad, pad), (0, 0)))
    B, H, W, C = x.shape
    oh = (H - k) // stride + 1
    ow = (W - k) // stride + 1
    cols = []
    for i in range(k):
        for j in range(k):
            cols.append(jax.lax.slice(
                x, (0, i, j, 0),
                (B, i + (oh - 1) * stride + 1, j + (ow - 1) * stride + 1, C),
                (1, stride, stride, 1)))
    wnd = jnp.stack(cols, axis=0)                     # (k*k, B, oh, ow, C)
    return wnd.reshape(k * k, B * oh * ow, C), oh, ow


def max_pool(x, k=3, stride=2):
    B, H, W, C = x.shape
    wnd, oh, ow = _pool_windows(x, k, stride, 0)
    M = B * oh * ow
    Mp, Cp = _rup(M, TPM), _rup(C, 128)
    if (Mp, Cp) != (M, C):
        wnd = jnp.pad(wnd, ((0, 0), (0, Mp - M), (0, Cp - C)))
    out = _window_reduce(wnd)
    if (Mp, Cp) != (M, C):
        out = out[:M, :C]
    return out.reshape(B, oh, ow, C)


def avg_pool_3x3_s1_p1(x):
    """AvgPool2d(3, stride=1, padding=1, count_include_pad=False)."""
    B, H, W, C = x.shape
    wnd, oh, ow = _pool_windows(x, 3, 1, 1)
    # static per-position divisor (excludes zero padding)
    ones = np.zeros((H + 2, W + 2), np.float32)
    ones[1:1 + H, 1:1 + W] = 1.0
    cnt = np.zeros((oh, ow), np.float32)
    for i in range(oh):
        for j in range(ow):
            cnt[i, j] = ones[i:i + 3, j:j + 3].sum()
    inv = np.tile((1.0 / cnt)[None], (B, 1, 1)).reshape(B * oh * ow, 1)
    M = B * oh * ow
    Mp, Cp = _rup(M, TPM), _rup(C, 128)
    if (Mp, Cp) != (M, C):
        wnd = jnp.pad(wnd, ((0, 0), (0, Mp - M), (0, Cp - C)))
    inv = jnp.pad(jnp.asarray(inv, jnp.float32), ((0, Mp - M), (0, 0)))
    out = _window_reduce(wnd, inv)
    if (Mp, Cp) != (M, C):
        out = out[:M, :C]
    return out.reshape(B, oh, ow, C)


# ----------------------------------------------------------------------------
# Deterministic parameter initialization (synthetic weights, PyTorch shapes).
# Sibling 1x1 branches that read the same input are pre-fused along Cout.
# ----------------------------------------------------------------------------

class _Rng:
    def __init__(self, seed):
        self._key = jax.random.PRNGKey(seed)
        self._i = 0

    def next(self):
        self._i += 1
        return jax.random.fold_in(self._key, self._i)


def init_basic(r, cin, cout, k):
    kh, kw = (k, k) if isinstance(k, int) else k
    fan_in = cin * kh * kw
    w = jax.random.normal(r.next(), (kh * kw * cin, cout), jnp.float32)
    w = (w * np.sqrt(2.0 / fan_in)).astype(jnp.bfloat16)
    return {"w": w,
            "scale": jnp.full((cout,), _BN_FOLD, jnp.float32),  # gamma/sqrt(var+eps)
            "bias": jnp.zeros((cout,), jnp.float32)}            # beta


def init_up(r, cin, cout, block_scale):
    # 1x1 Conv2d with bias (no BN, no ReLU inside); the residual scaling of
    # the Inception-ResNet block is folded: y = block_scale*(x@w + b).
    w = jax.random.normal(r.next(), (cin, cout), jnp.float32) * np.sqrt(1.0 / cin)
    return {"w": w.astype(jnp.bfloat16),
            "scale": jnp.full((cout,), block_scale, jnp.float32),
            "bias": jnp.zeros((cout,), jnp.float32)}


def init_block35(r, scale):
    return {"b012": init_basic(r, 320, 96, 1),       # fused b0(32)|b1_0(32)|b2_0(32)
            "b1_1": init_basic(r, 32, 32, 3),
            "b2_1": init_basic(r, 32, 48, 3),
            "b2_2": init_basic(r, 48, 64, 3),
            "up": init_up(r, 128, 320, scale)}


def init_block17(r, scale):
    return {"b01": init_basic(r, 1088, 320, 1),      # fused b0(192)|b1_0(128)
            "b1_1": init_basic(r, 128, 160, (1, 7)),
            "b1_2": init_basic(r, 160, 192, (7, 1)),
            "up": init_up(r, 384, 1088, scale)}


def init_block8(r, scale):
    return {"b01": init_basic(r, 2080, 384, 1),      # fused b0(192)|b1_0(192)
            "b1_1": init_basic(r, 192, 224, (1, 3)),
            "b1_2": init_basic(r, 224, 256, (3, 1)),
            "up": init_up(r, 448, 2080, scale)}


def init_params(seed=0, embedding_dimension=512):
    r = _Rng(seed)
    P = {}
    P["stem"] = {"1a": init_basic(r, 3, 32, 3),
                 "2a": init_basic(r, 32, 32, 3),
                 "2b": init_basic(r, 32, 64, 3),
                 "3b": init_basic(r, 64, 80, 1),
                 "4a": init_basic(r, 80, 192, 3)}
    P["mixed_5b"] = {"b012": init_basic(r, 192, 208, 1),   # b0(96)|b1_0(48)|b2_0(64)
                     "b1_1": init_basic(r, 48, 64, 5),
                     "b2_1": init_basic(r, 64, 96, 3),
                     "b2_2": init_basic(r, 96, 96, 3),
                     "b3": init_basic(r, 192, 64, 1)}
    P["repeat"] = [init_block35(r, 0.17) for _ in range(10)]
    P["mixed_6a"] = {"b0": init_basic(r, 320, 384, 3),
                     "b1_0": init_basic(r, 320, 256, 1),
                     "b1_1": init_basic(r, 256, 256, 3),
                     "b1_2": init_basic(r, 256, 384, 3)}
    P["repeat_1"] = [init_block17(r, 0.10) for _ in range(20)]
    P["mixed_7a"] = {"b012_0": init_basic(r, 1088, 768, 1),  # b0_0|b1_0|b2_0 (256 each)
                     "b0_1": init_basic(r, 256, 384, 3),
                     "b1_1": init_basic(r, 256, 288, 3),
                     "b2_1": init_basic(r, 256, 288, 3),
                     "b2_2": init_basic(r, 288, 320, 3)}
    P["repeat_2"] = [init_block8(r, 0.20) for _ in range(9)]
    P["block8"] = init_block8(r, 1.0)                       # noReLU block
    P["conv2d_7b"] = init_basic(r, 2080, 1536, 1)
    # head: Linear(1536, E, bias=False) + BatchNorm1d(E, eps=1e-3) (inference)
    w = jax.random.normal(r.next(), (1536, embedding_dimension), jnp.float32)
    w = w * np.sqrt(1.0 / 1536)
    P["head"] = {"w": w,
                 "g": jnp.full((embedding_dimension,), _BN_FOLD, jnp.float32),
                 "b": jnp.zeros((embedding_dimension,), jnp.float32)}
    return P


# ----------------------------------------------------------------------------
# Network stages (each jitted once; repeated blocks reuse the compiled program)
# ----------------------------------------------------------------------------

@jax.jit
def stem_fwd(x, p):
    x = basic(x, p["1a"], 3, stride=2)
    x = basic(x, p["2a"], 3)
    x = basic(x, p["2b"], 3, padding=(1, 1))
    x = max_pool(x, 3, 2)
    x = basic(x, p["3b"], 1)
    x = basic(x, p["4a"], 3)
    x = max_pool(x, 3, 2)
    return x


@jax.jit
def mixed_5b_fwd(x, p):
    y = basic(x, p["b012"], 1)                   # fused 1x1 branches: 96|48|64
    x0 = y[..., :96]
    x1 = basic(y[..., 96:144], p["b1_1"], 5, padding=(2, 2))
    x2 = basic(basic(y[..., 144:208], p["b2_1"], 3, padding=(1, 1)),
               p["b2_2"], 3, padding=(1, 1))
    x3 = basic(avg_pool_3x3_s1_p1(x), p["b3"], 1)
    return jnp.concatenate([x0, x1, x2, x3], axis=-1)


@jax.jit
def block35_fwd(x, p):
    y = basic(x, p["b012"], 1)                   # fused 1x1 branches: 32|32|32
    x0 = y[..., :32]
    x1 = basic(y[..., 32:64], p["b1_1"], 3, padding=(1, 1))
    x2 = basic(basic(y[..., 64:96], p["b2_1"], 3, padding=(1, 1)),
               p["b2_2"], 3, padding=(1, 1))
    cat = jnp.concatenate([x0, x1, x2], axis=-1)
    return conv2d(cat, p["up"], 1, 1, relu=True, residual=x)


@jax.jit
def mixed_6a_fwd(x, p):
    x0 = basic(x, p["b0"], 3, stride=2)
    x1 = basic(basic(basic(x, p["b1_0"], 1), p["b1_1"], 3, padding=(1, 1)),
               p["b1_2"], 3, stride=2)
    x2 = max_pool(x, 3, 2)
    return jnp.concatenate([x0, x1, x2], axis=-1)


@jax.jit
def block17_fwd(x, p):
    y = basic(x, p["b01"], 1)                    # fused 1x1 branches: 192|128
    x0 = y[..., :192]
    x1 = basic(basic(y[..., 192:], p["b1_1"], (1, 7), padding=(0, 3)),
               p["b1_2"], (7, 1), padding=(3, 0))
    cat = jnp.concatenate([x0, x1], axis=-1)
    return conv2d(cat, p["up"], 1, 1, relu=True, residual=x)


@jax.jit
def mixed_7a_fwd(x, p):
    y = basic(x, p["b012_0"], 1)                 # fused 1x1 branches: 256|256|256
    x0 = basic(y[..., :256], p["b0_1"], 3, stride=2)
    x1 = basic(y[..., 256:512], p["b1_1"], 3, stride=2)
    x2 = basic(basic(y[..., 512:768], p["b2_1"], 3, padding=(1, 1)),
               p["b2_2"], 3, stride=2)
    x3 = max_pool(x, 3, 2)
    return jnp.concatenate([x0, x1, x2, x3], axis=-1)


@functools.partial(jax.jit, static_argnames=("relu",))
def block8_fwd(x, p, relu=True):
    y = basic(x, p["b01"], 1)                    # fused 1x1 branches: 192|192
    x0 = y[..., :192]
    x1 = basic(basic(y[..., 192:], p["b1_1"], (1, 3), padding=(0, 1)),
               p["b1_2"], (3, 1), padding=(1, 0))
    cat = jnp.concatenate([x0, x1], axis=-1)
    return conv2d(cat, p["up"], 1, 1, relu=relu, residual=x)


@jax.jit
def tail_fwd(x, p7b, phead):
    x = basic(x, p7b, 1)                                  # (B, 8, 8, 1536) bf16
    B = x.shape[0]
    E = phead["w"].shape[1]
    feat = x.reshape(B, 64, 1536)
    Bp = _rup(B, 8)
    if Bp != B:
        feat = jnp.pad(feat, ((0, Bp - B), (0, 0), (0, 0)))   # pad batch to sublanes
    emb = pl.pallas_call(
        _head_kernel,
        out_shape=jax.ShapeDtypeStruct((Bp, E), jnp.float32),
    )(feat, phead["w"], phead["g"].reshape(1, E), phead["b"].reshape(1, E))
    return emb[:B]


def inception_resnet_v2_triplet_forward(images_nchw, params):
    """InceptionResnetV2Triplet.forward: backbone -> 512-d embedding -> L2 norm.
    images_nchw: (B, 3, 299, 299) float32 (PyTorch NCHW convention)."""
    x = jnp.transpose(images_nchw, (0, 2, 3, 1)).astype(jnp.bfloat16)  # -> NHWC bf16
    x = stem_fwd(x, params["stem"])
    x = mixed_5b_fwd(x, params["mixed_5b"])
    for bp in params["repeat"]:
        x = block35_fwd(x, bp)
    x = mixed_6a_fwd(x, params["mixed_6a"])
    for bp in params["repeat_1"]:
        x = block17_fwd(x, bp)
    x = mixed_7a_fwd(x, params["mixed_7a"])
    for bp in params["repeat_2"]:
        x = block8_fwd(x, bp, relu=True)
    x = block8_fwd(x, params["block8"], relu=False)
    return tail_fwd(x, params["conv2d_7b"], params["head"])


if __name__ == "__main__":
    # Smallest input consistent with the architecture: the VALID-padded stem
    # convolutions and the final AvgPool2d(8) require 299x299 spatial input.
    key = jax.random.PRNGKey(0)
    images = jax.random.normal(key, (2, 3, 299, 299), jnp.float32)

    params = init_params(seed=0, embedding_dimension=512)
    emb = inception_resnet_v2_triplet_forward(images, params)
    emb = jax.block_until_ready(emb)

    assert emb.shape == (2, 512), emb.shape
    assert bool(jnp.all(jnp.isfinite(emb))), "non-finite embedding"
    norms = jnp.sqrt(jnp.sum(emb * emb, axis=1))
    assert bool(jnp.all(jnp.abs(norms - 1.0) < 1e-3)), norms
    print("KERNEL_OK")
</pallas_src>

<mosaic_0001>
module attributes {stable_mosaic.version = 11 : i64} {
  func.func @kernel(%arg0: i32, %arg1: i32, %arg2: memref<512x128xbf16, #tpu.memory_space<vmem>>, %arg3: memref<128x128xbf16, #tpu.memory_space<vmem>>, %arg4: memref<1x128xf32, #tpu.memory_space<vmem>>, %arg5: memref<1x128xf32, #tpu.memory_space<vmem>>, %arg6: memref<512x128xbf16, #tpu.memory_space<vmem>>) attributes {dimension_semantics = [#tpu.dimension_semantics<parallel>, #tpu.dimension_semantics<parallel>], iteration_bounds = array<i64: 87, 1>, scalar_prefetch = 0 : i64, scratch_operands = 0 : i64, tpu.core_type = #tpu.core_type<tc>, window_params = [{transform_indices = @transform_0, window_bounds = array<i64: 512, 128>}, {transform_indices = @transform_1, window_bounds = array<i64: 128, 128>}, {transform_indices = @transform_2, window_bounds = array<i64: 1, 128>}, {transform_indices = @transform_3, window_bounds = array<i64: 1, 128>}, {transform_indices = @transform_4, window_bounds = array<i64: 512, 128>}]} {
    %c0 = arith.constant 0 : index
    %c0_0 = arith.constant 0 : index
    %0 = vector.load %arg2[%c0, %c0_0] : memref<512x128xbf16, #tpu.memory_space<vmem>>, vector<512x128xbf16>
    %c0_1 = arith.constant 0 : index
    %c0_2 = arith.constant 0 : index
    %1 = vector.load %arg3[%c0_1, %c0_2] : memref<128x128xbf16, #tpu.memory_space<vmem>>, vector<128x128xbf16>
    %cst = arith.constant dense<0.000000e+00> : vector<512x128xf32>
    %2 = tpu.matmul %0, %1, %cst {dimension_numbers = #tpu.dot_dimension_numbers<[1], [0], [0], [1], [0, 0, 1, 1], [], []>} : vector<512x128xbf16>, vector<128x128xbf16>, vector<512x128xf32> -> vector<512x128xf32>
    %c0_3 = arith.constant 0 : index
    %c0_4 = arith.constant 0 : index
    %3 = vector.load %arg4[%c0_3, %c0_4] : memref<1x128xf32, #tpu.memory_space<vmem>>, vector<1x128xf32>
    %4 = vector.broadcast %3 : vector<1x128xf32> to vector<512x128xf32>
    %5 = arith.mulf %2, %4 : vector<512x128xf32>
    %c0_5 = arith.constant 0 : index
    %c0_6 = arith.constant 0 : index
    %6 = vector.load %arg5[%c0_5, %c0_6] : memref<1x128xf32, #tpu.memory_space<vmem>>, vector<1x128xf32>
    %7 = vector.broadcast %6 : vector<1x128xf32> to vector<512x128xf32>
    %8 = arith.addf %5, %7 : vector<512x128xf32>
    %cst_7 = arith.constant 0.000000e+00 : f32
    %9 = vector.broadcast %cst_7 : f32 to vector<512x128xf32>
    %10 = arith.maximumf %8, %9 : vector<512x128xf32>
    %11 = arith.truncf %10 : vector<512x128xf32> to vector<512x128xbf16>
    %c0_8 = arith.constant 0 : index
    %c0_9 = arith.constant 0 : index
    %12 = vector.load %arg6[%c0_8, %c0_9] : memref<512x128xbf16, #tpu.memory_space<vmem>>, vector<512x128xbf16>
    tpu.vector_store %arg6[%c0_8, %c0_9], %11 {strides = array<i32>} : memref<512x128xbf16, #tpu.memory_space<vmem>>, vector<512x128xbf16>,
    return
  }
  func.func @transform_0(%arg0: i32, %arg1: i32) -> (i32, i32) {
    %c0_i32 = arith.constant 0 : i32
    %c0_i32_0 = arith.constant 0 : i32
    return %arg0, %c0_i32 : i32, i32
  }
  func.func @transform_1(%arg0: i32, %arg1: i32) -> (i32, i32) {
    %c0_i32 = arith.constant 0 : i32
    %c0_i32_0 = arith.constant 0 : i32
    return %c0_i32, %arg1 : i32, i32
  }
  func.func @transform_2(%arg0: i32, %arg1: i32) -> (i32, i32) {
    %c0_i32 = arith.constant 0 : i32
    %c0_i32_0 = arith.constant 0 : i32
    return %c0_i32, %arg1 : i32, i32
  }
  func.func @transform_3(%arg0: i32, %arg1: i32) -> (i32, i32) {
    %c0_i32 = arith.constant 0 : i32
    %c0_i32_0 = arith.constant 0 : i32
    return %c0_i32, %arg1 : i32, i32
  }
  func.func @transform_4(%arg0: i32, %arg1: i32) -> (i32, i32) {
    %c0_i32 = arith.constant 0 : i32
    return %arg0, %arg1 : i32, i32
  }
}

module attributes {stable_mosaic.version = 11 : i64} {
  func.func @kernel(%arg0: i32, %arg1: i32, %arg2: memref<512x384xbf16, #tpu.memory_space<vmem>>, %arg3: memref<384x128xbf16, #tpu.memory_space<vmem>>, %arg4: memref<1x128xf32, #tpu.memory_space<vmem>>, %arg5: memref<1x128xf32, #tpu.memory_space<vmem>>, %arg6: memref<512x128xbf16, #tpu.memory_space<vmem>>) attributes {dimension_semantics = [#tpu.dimension_semantics<parallel>, #tpu.dimension_semantics<parallel>], iteration_bounds = array<i64: 85, 1>, scalar_prefetch = 0 : i64, scratch_operands = 0 : i64, tpu.core_type = #tpu.core_type<tc>, window_params = [{transform_indices = @transform_0, window_bounds = array<i64: 512, 384>}, {transform_indices = @transform_1, window_bounds = array<i64: 384, 128>}, {transform_indices = @transform_2, window_bounds = array<i64: 1, 128>}, {transform_indices = @transform_3, window_bounds = array<i64: 1, 128>}, {transform_indices = @transform_4, window_bounds = array<i64: 512, 128>}]} {
    %c0 = arith.constant 0 : index
    %c0_0 = arith.constant 0 : index
    %0 = vector.load %arg2[%c0, %c0_0] : memref<512x384xbf16, #tpu.memory_space<vmem>>, vector<512x384xbf16>
    %c0_1 = arith.constant 0 : index
    %c0_2 = arith.constant 0 : index
    %1 = vector.load %arg3[%c0_1, %c0_2] : memref<384x128xbf16, #tpu.memory_space<vmem>>, vector<384x128xbf16>
    %cst = arith.constant dense<0.000000e+00> : vector<512x128xf32>
    %2 = tpu.matmul %0, %1, %cst {dimension_numbers = #tpu.dot_dimension_numbers<[1], [0], [0], [1], [0, 0, 1, 1], [], []>} : vector<512x384xbf16>, vector<384x128xbf16>, vector<512x128xf32> -> vector<512x128xf32>
    %c0_3 = arith.constant 0 : index
    %c0_4 = arith.constant 0 : index
    %3 = vector.load %arg4[%c0_3, %c0_4] : memref<1x128xf32, #tpu.memory_space<vmem>>, vector<1x128xf32>
    %4 = vector.broadcast %3 : vector<1x128xf32> to vector<512x128xf32>
    %5 = arith.mulf %2, %4 : vector<512x128xf32>
    %c0_5 = arith.constant 0 : index
    %c0_6 = arith.constant 0 : index
    %6 = vector.load %arg5[%c0_5, %c0_6] : memref<1x128xf32, #tpu.memory_space<vmem>>, vector<1x128xf32>
    %7 = vector.broadcast %6 : vector<1x128xf32> to vector<512x128xf32>
    %8 = arith.addf %5, %7 : vector<512x128xf32>
    %cst_7 = arith.constant 0.000000e+00 : f32
    %9 = vector.broadcast %cst_7 : f32 to vector<512x128xf32>
    %10 = arith.maximumf %8, %9 : vector<512x128xf32>
    %11 = arith.truncf %10 : vector<512x128xf32> to vector<512x128xbf16>
    %c0_8 = arith.constant 0 : index
    %c0_9 = arith.constant 0 : index
    %12 = vector.load %arg6[%c0_8, %c0_9] : memref<512x128xbf16, #tpu.memory_space<vmem>>, vector<512x128xbf16>
    tpu.vector_store %arg6[%c0_8, %c0_9], %11 {strides = array<i32>} : memref<512x128xbf16, #tpu.memory_space<vmem>>, vector<512x128xbf16>,
    return
  }
  func.func @transform_0(%arg0: i32, %arg1: i32) -> (i32, i32) {
    %c0_i32 = arith.constant 0 : i32
    %c0_i32_0 = arith.constant 0 : i32
    return %arg0, %c0_i32 : i32, i32
  }
  func.func @transform_1(%arg0: i32, %arg1: i32) -> (i32, i32) {
    %c0_i32 = arith.constant 0 : i32
    %c0_i32_0 = arith.constant 0 : i32
    return %c0_i32, %arg1 : i32, i32
  }
  func.func @transform_2(%arg0: i32, %arg1: i32) -> (i32, i32) {
    %c0_i32 = arith.constant 0 : i32
    %c0_i32_0 = arith.constant 0 : i32
    return %c0_i32, %arg1 : i32, i32
  }
  func.func @transform_3(%arg0: i32, %arg1: i32) -> (i32, i32) {
    %c0_i32 = arith.constant 0 : i32
    %c0_i32_0 = arith.constant 0 : i32
    return %c0_i32, %arg1 : i32, i32
  }
  func.func @transform_4(%arg0: i32, %arg1: i32) -> (i32, i32) {
    %c0_i32 = arith.constant 0 : i32
    return %arg0, %arg1 : i32, i32
  }
}

module attributes {stable_mosaic.version = 11 : i64} {
  func.func @_maxpool_kernel(%arg0: i32, %arg1: i32, %arg2: memref<9x256x128xbf16, #tpu.memory_space<vmem>>, %arg3: memref<256x128xbf16, #tpu.memory_space<vmem>>) attributes {dimension_semantics = [#tpu.dimension_semantics<parallel>, #tpu.dimension_semantics<parallel>], iteration_bounds = array<i64: 42, 1>, scalar_prefetch = 0 : i64, scratch_operands = 0 : i64, tpu.core_type = #tpu.core_type<tc>, window_params = [{transform_indices = @transform_0, window_bounds = array<i64: 9, 256, 128>}, {transform_indices = @transform_1, window_bounds = array<i64: 256, 128>}]} {
    %c0 = arith.constant 0 : index
    %c0_0 = arith.constant 0 : index
    %c0_1 = arith.constant 0 : index
    %0 = vector.load %arg2[%c0, %c0_0, %c0_1] : memref<9x256x128xbf16, #tpu.memory_space<vmem>>, vector<9x256x128xbf16>
    %cst = arith.constant dense<0xFF80> : vector<256x128xbf16>
    %1 = vector.multi_reduction <maximumf>, %0, %cst [0] : vector<9x256x128xbf16> to vector<256x128xbf16>
    %c0_2 = arith.constant 0 : index
    %c0_3 = arith.constant 0 : index
    %2 = vector.load %arg3[%c0_2, %c0_3] : memref<256x128xbf16, #tpu.memory_space<vmem>>, vector<256x128xbf16>
    tpu.vector_store %arg3[%c0_2, %c0_3], %1 {strides = array<i32>} : memref<256x128xbf16, #tpu.memory_space<vmem>>, vector<256x128xbf16>,
    return
  }
  func.func @transform_0(%arg0: i32, %arg1: i32) -> (i32, i32, i32) {
    %c0_i32 = arith.constant 0 : i32
    %c0_i32_0 = arith.constant 0 : i32
    return %c0_i32, %arg0, %arg1 : i32, i32, i32
  }
  func.func @transform_1(%arg0: i32, %arg1: i32) -> (i32, i32) {
    %c0_i32 = arith.constant 0 : i32
    return %arg0, %arg1 : i32, i32
  }
}

module attributes {stable_mosaic.version = 11 : i64} {
  func.func @kernel(%arg0: i32, %arg1: i32, %arg2: memref<512x128xbf16, #tpu.memory_space<vmem>>, %arg3: memref<128x128xbf16, #tpu.memory_space<vmem>>, %arg4: memref<1x128xf32, #tpu.memory_space<vmem>>, %arg5: memref<1x128xf32, #tpu.memory_space<vmem>>, %arg6: memref<512x128xbf16, #tpu.memory_space<vmem>>) attributes {dimension_semantics = [#tpu.dimension_semantics<parallel>, #tpu.dimension_semantics<parallel>], iteration_bounds = array<i64: 21, 1>, scalar_prefetch = 0 : i64, scratch_operands = 0 : i64, tpu.core_type = #tpu.core_type<tc>, window_params = [{transform_indices = @transform_0, window_bounds = array<i64: 512, 128>}, {transform_indices = @transform_1, window_bounds = array<i64: 128, 128>}, {transform_indices = @transform_2, window_bounds = array<i64: 1, 128>}, {transform_indices = @transform_3, window_bounds = array<i64: 1, 128>}, {transform_indices = @transform_4, window_bounds = array<i64: 512, 128>}]} {
    %c0 = arith.constant 0 : index
    %c0_0 = arith.constant 0 : index
    %0 = vector.load %arg2[%c0, %c0_0] : memref<512x128xbf16, #tpu.memory_space<vmem>>, vector<512x128xbf16>
    %c0_1 = arith.constant 0 : index
    %c0_2 = arith.constant 0 : index
    %1 = vector.load %arg3[%c0_1, %c0_2] : memref<128x128xbf16, #tpu.memory_space<vmem>>, vector<128x128xbf16>
    %cst = arith.constant dense<0.000000e+00> : vector<512x128xf32>
    %2 = tpu.matmul %0, %1, %cst {dimension_numbers = #tpu.dot_dimension_numbers<[1], [0], [0], [1], [0, 0, 1, 1], [], []>} : vector<512x128xbf16>, vector<128x128xbf16>, vector<512x128xf32> -> vector<512x128xf32>
    %c0_3 = arith.constant 0 : index
    %c0_4 = arith.constant 0 : index
    %3 = vector.load %arg4[%c0_3, %c0_4] : memref<1x128xf32, #tpu.memory_space<vmem>>, vector<1x128xf32>
    %4 = vector.broadcast %3 : vector<1x128xf32> to vector<512x128xf32>
    %5 = arith.mulf %2, %4 : vector<512x128xf32>
    %c0_5 = arith.constant 0 : index
    %c0_6 = arith.constant 0 : index
    %6 = vector.load %arg5[%c0_5, %c0_6] : memref<1x128xf32, #tpu.memory_space<vmem>>, vector<1x128xf32>
    %7 = vector.broadcast %6 : vector<1x128xf32> to vector<512x128xf32>
    %8 = arith.addf %5, %7 : vector<512x128xf32>
    %cst_7 = arith.constant 0.000000e+00 : f32
    %9 = vector.broadcast %cst_7 : f32 to vector<512x128xf32>
    %10 = arith.maximumf %8, %9 : vector<512x128xf32>
    %11 = arith.truncf %10 : vector<512x128xf32> to vector<512x128xbf16>
    %c0_8 = arith.constant 0 : index
    %c0_9 = arith.constant 0 : index
    %12 = vector.load %arg6[%c0_8, %c0_9] : memref<512x128xbf16, #tpu.memory_space<vmem>>, vector<512x128xbf16>
    tpu.vector_store %arg6[%c0_8, %c0_9], %11 {strides = array<i32>} : memref<512x128xbf16, #tpu.memory_space<vmem>>, vector<512x128xbf16>,
    return
  }
  func.func @transform_0(%arg0: i32, %arg1: i32) -> (i32, i32) {
    %c0_i32 = arith.constant 0 : i32
    %c0_i32_0 = arith.constant 0 : i32
    return %arg0, %c0_i32 : i32, i32
  }
  func.func @transform_1(%arg0: i32, %arg1: i32) -> (i32, i32) {
    %c0_i32 = arith.constant 0 : i32
    %c0_i32_0 = arith.constant 0 : i32
    return %c0_i32, %arg1 : i32, i32
  }
  func.func @transform_2(%arg0: i32, %arg1: i32) -> (i32, i32) {
    %c0_i32 = arith.constant 0 : i32
    %c0_i32_0 = arith.constant 0 : i32
    return %c0_i32, %arg1 : i32, i32
  }
  func.func @transform_3(%arg0: i32, %arg1: i32) -> (i32, i32) {
    %c0_i32 = arith.constant 0 : i32
    %c0_i32_0 = arith.constant 0 : i32
    return %c0_i32, %arg1 : i32, i32
  }
  func.func @transform_4(%arg0: i32, %arg1: i32) -> (i32, i32) {
    %c0_i32 = arith.constant 0 : i32
    return %arg0, %arg1 : i32, i32
  }
}

module attributes {stable_mosaic.version = 11 : i64} {
  func.func @kernel(%arg0: i32, %arg1: i32, %arg2: memref<512x768xbf16, #tpu.memory_space<vmem>>, %arg3: memref<768x256xbf16, #tpu.memory_space<vmem>>, %arg4: memref<1x256xf32, #tpu.memory_space<vmem>>, %arg5: memref<1x256xf32, #tpu.memory_space<vmem>>, %arg6: memref<512x256xbf16, #tpu.memory_space<vmem>>) attributes {dimension_semantics = [#tpu.dimension_semantics<parallel>, #tpu.dimension_semantics<parallel>], iteration_bounds = array<i64: 20, 1>, scalar_prefetch = 0 : i64, scratch_operands = 0 : i64, tpu.core_type = #tpu.core_type<tc>, window_params = [{transform_indices = @transform_0, window_bounds = array<i64: 512, 768>}, {transform_indices = @transform_1, window_bounds = array<i64: 768, 256>}, {transform_indices = @transform_2, window_bounds = array<i64: 1, 256>}, {transform_indices = @transform_3, window_bounds = array<i64: 1, 256>}, {transform_indices = @transform_4, window_bounds = array<i64: 512, 256>}]} {
    %c0 = arith.constant 0 : index
    %c0_0 = arith.constant 0 : index
    %0 = vector.load %arg2[%c0, %c0_0] : memref<512x768xbf16, #tpu.memory_space<vmem>>, vector<512x768xbf16>
    %c0_1 = arith.constant 0 : index
    %c0_2 = arith.constant 0 : index
    %1 = vector.load %arg3[%c0_1, %c0_2] : memref<768x256xbf16, #tpu.memory_space<vmem>>, vector<768x256xbf16>
    %cst = arith.constant dense<0.000000e+00> : vector<512x256xf32>
    %2 = tpu.matmul %0, %1, %cst {dimension_numbers = #tpu.dot_dimension_numbers<[1], [0], [0], [1], [0, 0, 1, 1], [], []>} : vector<512x768xbf16>, vector<768x256xbf16>, vector<512x256xf32> -> vector<512x256xf32>
    %c0_3 = arith.constant 0 : index
    %c0_4 = arith.constant 0 : index
    %3 = vector.load %arg4[%c0_3, %c0_4] : memref<1x256xf32, #tpu.memory_space<vmem>>, vector<1x256xf32>
    %4 = vector.broadcast %3 : vector<1x256xf32> to vector<512x256xf32>
    %5 = arith.mulf %2, %4 : vector<512x256xf32>
    %c0_5 = arith.constant 0 : index
    %c0_6 = arith.constant 0 : index
    %6 = vector.load %arg5[%c0_5, %c0_6] : memref<1x256xf32, #tpu.memory_space<vmem>>, vector<1x256xf32>
    %7 = vector.broadcast %6 : vector<1x256xf32> to vector<512x256xf32>
    %8 = arith.addf %5, %7 : vector<512x256xf32>
    %cst_7 = arith.constant 0.000000e+00 : f32
    %9 = vector.broadcast %cst_7 : f32 to vector<512x256xf32>
    %10 = arith.maximumf %8, %9 : vector<512x256xf32>
    %11 = arith.truncf %10 : vector<512x256xf32> to vector<512x256xbf16>
    %c0_8 = arith.constant 0 : index
    %c0_9 = arith.constant 0 : index
    %12 = vector.load %arg6[%c0_8, %c0_9] : memref<512x256xbf16, #tpu.memory_space<vmem>>, vector<512x256xbf16>
    tpu.vector_store %arg6[%c0_8, %c0_9], %11 {strides = array<i32>} : memref<512x256xbf16, #tpu.memory_space<vmem>>, vector<512x256xbf16>,
    return
  }
  func.func @transform_0(%arg0: i32, %arg1: i32) -> (i32, i32) {
    %c0_i32 = arith.constant 0 : i32
    %c0_i32_0 = arith.constant 0 : i32
    return %arg0, %c0_i32 : i32, i32
  }
  func.func @transform_1(%arg0: i32, %arg1: i32) -> (i32, i32) {
    %c0_i32 = arith.constant 0 : i32
    %c0_i32_0 = arith.constant 0 : i32
    return %c0_i32, %arg1 : i32, i32
  }
  func.func @transform_2(%arg0: i32, %arg1: i32) -> (i32, i32) {
    %c0_i32 = arith.constant 0 : i32
    %c0_i32_0 = arith.constant 0 : i32
    return %c0_i32, %arg1 : i32, i32
  }
  func.func @transform_3(%arg0: i32, %arg1: i32) -> (i32, i32) {
    %c0_i32 = arith.constant 0 : i32
    %c0_i32_0 = arith.constant 0 : i32
    return %c0_i32, %arg1 : i32, i32
  }
  func.func @transform_4(%arg0: i32, %arg1: i32) -> (i32, i32) {
    %c0_i32 = arith.constant 0 : i32
    return %arg0, %arg1 : i32, i32
  }
}

module attributes {stable_mosaic.version = 11 : i64} {
  func.func @_maxpool_kernel(%arg0: i32, %arg1: i32, %arg2: memref<9x256x256xbf16, #tpu.memory_space<vmem>>, %arg3: memref<256x256xbf16, #tpu.memory_space<vmem>>) attributes {dimension_semantics = [#tpu.dimension_semantics<parallel>, #tpu.dimension_semantics<parallel>], iteration_bounds = array<i64: 10, 1>, scalar_prefetch = 0 : i64, scratch_operands = 0 : i64, tpu.core_type = #tpu.core_type<tc>, window_params = [{transform_indices = @transform_0, window_bounds = array<i64: 9, 256, 256>}, {transform_indices = @transform_1, window_bounds = array<i64: 256, 256>}]} {
    %c0 = arith.constant 0 : index
    %c0_0 = arith.constant 0 : index
    %c0_1 = arith.constant 0 : index
    %0 = vector.load %arg2[%c0, %c0_0, %c0_1] : memref<9x256x256xbf16, #tpu.memory_space<vmem>>, vector<9x256x256xbf16>
    %cst = arith.constant dense<0xFF80> : vector<256x256xbf16>
    %1 = vector.multi_reduction <maximumf>, %0, %cst [0] : vector<9x256x256xbf16> to vector<256x256xbf16>
    %c0_2 = arith.constant 0 : index
    %c0_3 = arith.constant 0 : index
    %2 = vector.load %arg3[%c0_2, %c0_3] : memref<256x256xbf16, #tpu.memory_space<vmem>>, vector<256x256xbf16>
    tpu.vector_store %arg3[%c0_2, %c0_3], %1 {strides = array<i32>} : memref<256x256xbf16, #tpu.memory_space<vmem>>, vector<256x256xbf16>,
    return
  }
  func.func @transform_0(%arg0: i32, %arg1: i32) -> (i32, i32, i32) {
    %c0_i32 = arith.constant 0 : i32
    %c0_i32_0 = arith.constant 0 : i32
    return %c0_i32, %arg0, %arg1 : i32, i32, i32
  }
  func.func @transform_1(%arg0: i32, %arg1: i32) -> (i32, i32) {
    %c0_i32 = arith.constant 0 : i32
    return %arg0, %arg1 : i32, i32
  }
}

</mosaic_0001>

<bundles_post_ra>
// kernel: stem_fwd.7
= control target key start
LH: loop header
LB: loop body
LE: loop exit
PB: predicated region body
PF: predicated region fallthrough
CT: control target
= control target key end

     0   :  { %s2140_s15 = smov 0   ;;  %s2142_s16 = smov 0   ;;  %s2410_s0 = inlined_call_operand.vmem [shape: bf16[44544,128], index: 0, kind: input, shape index: {}]   ;;  %s2411_s1 = inlined_call_operand.vmem [shape: bf16[128,128], index: 1, kind: input, shape index: {}]   ;;  %s2412_s2 = inlined_call_operand.vmem [shape: f32[1,128], index: 2, kind: input, shape index: {}]   ;;  %s2413_s3 = inlined_call_operand.vmem [shape: f32[1,128], index: 3, kind: input, shape index: {}]   ;;  %s2414_s4 = inlined_call_operand.vmem [shape: bf16[44544,128], index: 4, kind: output, shape index: {}]  }
   0x1   :  { %s2144_s17 = smov 0  }
   0x2 LB: > { %s26_s18 = sadd.s32 1, %s2109_s16  ;;  %p1523_p0 = scmp.ge.s32.totalorder %s2113_s17, 1  ;;  %s2113_s17 = sphi %s2144_s17, %s14_s17   ;;  %s2109_s16 = sphi %s2142_s16, %s2416_s16   ;;  %s2105_s15 = sphi %s2140_s15, %s2415_s15  }
   0x3   : > { %p28_p1 = scmp.ge.s32.totalorder %s26_s18, 87  ;;  %p202_p2 = scmp.lt.s32.totalorder %s2113_s17, 88 }
   0x5   : > { %s2418_s18 = smov (%p28_p1, %s26_s18), 0  ;;  %p203_p3 = pnand %p1523_p0, %p202_p2 }
   0x6   : > { %s1524_s21 = sshll.u32 (!%p203_p3), %s2105_s15, 6 }
   0x7   : > { %206 = sbr.rel (%p203_p3) target bundleno = 309 (0x135), region = 36  ;;  %p242_p4 = scmp.lt.s32.totalorder (!%p203_p3), %s1524_s21, 5567 }
   0xc   : > { %v2051_v0 = vld [vmem:[%s2411_s1 + $0x38] sm:$0xff]   ;;  %v2052_v1 = vld [vmem:[%s2411_s1 + $0x30] sm:$0xff]   ;;  %s2420_s21 = smov (!%p242_p4, %s1524_s21), 5567  ;;  %v2053_v2 = vld [vmem:[%s2411_s1 + $0x28] sm:$0xff]  }
   0xd   : > { %1931 = vmatprep.subr.bf16.mxu0 %v2051_v0  ;;  %2011 = vmatprep.subr.bf16.mxu1 %v2051_v0  ;;  %s1525_s26 = sshll.u32 %s2420_s21, 2  ;;  %v2054_v3 = vld [vmem:[%s2411_s1 + $0x20] sm:$0xff]   ;;  %v2055_v6 = vld [vmem:[%s2411_s1 + $0x18] sm:$0xff]   ;;  %v2056_v7 = vld [vmem:[%s2411_s1 + $0x10] sm:$0xff]  }
   0xe   : > { %1932 = vmatpush3.bf16.msra.mxu0 %v2051_v0  ;;  %2019 = vmatpush3.bf16.msra.mxu1 %v2051_v0  ;;  %s2175_s29 = scalar_lea.vmem %s2410_s0, %s1525_s26  ;;  %v2057_v8 = vld [vmem:[%s2411_s1 + $0x8] sm:$0xff]   ;;  %v2058_v9 = vld [vmem:[%s2411_s1] sm:$0xff]   ;;  %s2257_s24 = scalar_lea.vmem %s2414_s4, %s1525_s26 }
   0xf   : > { %1933 = vmatprep.subr.bf16.mxu0 %v2052_v1  ;;  %2012 = vmatprep.subr.bf16.mxu1 %v2052_v1  ;;  %v2059_v4 = vld [vmem:[%s2175_s29] sm:$0xff]   ;;  %v2061_v10 = vld [vmem:[%s2175_s29 + $0x8] sm:$0xff]   ;;  %v2063_v12 = vld [vmem:[%s2175_s29 + $0x10] sm:$0xff]  }
  0x10   : > { %v2060_v5 = vld [vmem:[%s2175_s29 + $0x80] sm:$0xff]   ;;  %1947 = vmatprep.mubr.bf16.mxu0 %v2059_v4  ;;  %v2062_v11 = vld [vmem:[%s2175_s29 + $0x88] sm:$0xff]   ;;  %v2064_v13 = vld [vmem:[%s2175_s29 + $0x90] sm:$0xff]  }
  0x11   : > { %1979 = vmatprep.mubr.bf16.mxu1 %v2060_v5  ;;  %v2065_v14 = vld [vmem:[%s2175_s29 + $0x18] sm:$0xff]   ;;  %v2067_v16 = vld [vmem:[%s2175_s29 + $0x20] sm:$0xff]   ;;  %v2069_v18 = vld [vmem:[%s2175_s29 + $0x28] sm:$0xff]  }
  0x12   : > { %1934 = vmatpush3.bf16.msra.mxu0 %v2052_v1  ;;  %2020 = vmatpush3.bf16.msra.mxu1 %v2052_v1  ;;  %v2066_v15 = vld [vmem:[%s2175_s29 + $0x98] sm:$0xff]   ;;  %v2068_v17 = vld [vmem:[%s2175_s29 + $0xa0] sm:$0xff]   ;;  %v2070_v19 = vld [vmem:[%s2175_s29 + $0xa8] sm:$0xff]  }
  0x13   : > { %1935 = vmatprep.subr.bf16.mxu0 %v2053_v2  ;;  %2013 = vmatprep.subr.bf16.mxu1 %v2053_v2  ;;  %v2071_v20 = vld [vmem:[%s2175_s29 + $0x30] sm:$0xff]   ;;  %v2073_v22 = vld [vmem:[%s2175_s29 + $0x38] sm:$0xff]   ;;  %v2075_v24 = vld [vmem:[%s2175_s29 + $0x40] sm:$0xff]  }
  0x14   : > { %v2072_v21 = vld [vmem:[%s2175_s29 + $0xb0] sm:$0xff]   ;;  %v2074_v23 = vld [vmem:[%s2175_s29 + $0xb8] sm:$0xff]   ;;  %v2076_v25 = vld [vmem:[%s2175_s29 + $0xc0] sm:$0xff]  }
  0x15   : > { %v2077_v26 = vld [vmem:[%s2175_s29 + $0x48] sm:$0xff]   ;;  %v2079_v28 = vld [vmem:[%s2175_s29 + $0x50] sm:$0xff]   ;;  %v2081_v30 = vld [vmem:[%s2175_s29 + $0x58] sm:$0xff]  }
  0x16   : > { %1936 = vmatpush3.bf16.msra.mxu0 %v2053_v2  ;;  %2021 = vmatpush3.bf16.msra.mxu1 %v2053_v2  ;;  %v2078_v27 = vld [vmem:[%s2175_s29 + $0xc8] sm:$0xff]   ;;  %v2080_v29 = vld [vmem:[%s2175_s29 + $0xd0] sm:$0xff]   ;;  %v2082_v31 = vld [vmem:[%s2175_s29 + $0xd8] sm:$0xff]  }
  0x17   : > { %1937 = vmatprep.subr.bf16.mxu0 %v2054_v3  ;;  %2014 = vmatprep.subr.bf16.mxu1 %v2054_v3  ;;  %v2083_v32 = vld [vmem:[%s2175_s29 + $0x60] sm:$0xff]   ;;  %v2085_v34 = vld [vmem:[%s2175_s29 + $0x68] sm:$0xff]   ;;  %v2087_v36 = vld [vmem:[%s2175_s29 + $0x70] sm:$0xff]  }
  0x18   : > { %v2084_v33 = vld [vmem:[%s2175_s29 + $0xe0] sm:$0xff]   ;;  %v2086_v35 = vld [vmem:[%s2175_s29 + $0xe8] sm:$0xff]   ;;  %v2088_v37 = vld [vmem:[%s2175_s29 + $0xf0] sm:$0xff]  }
  0x19   : > { %v2089_v38 = vld [vmem:[%s2175_s29 + $0x78] sm:$0xff]   ;;  %v2227_v40 = vld [vmem:[%s2412_s2] ss:$0 sm:$0xff] }
  0x1a   : > { %1938 = vmatpush3.bf16.msra.mxu0 %v2054_v3  ;;  %2022 = vmatpush3.bf16.msra.mxu1 %v2054_v3  ;;  %v2090_v39 = vld [vmem:[%s2175_s29 + $0xf8] sm:$0xff]   ;;  %v2234_v45 = vld [vmem:[%s2413_s3] ss:$0 sm:$0xff] }
  0x1b   : > { %1939 = vmatprep.subr.bf16.mxu0 %v2055_v6  ;;  %2015 = vmatprep.subr.bf16.mxu1 %v2055_v6 }
  0x1e   : > { %1940 = vmatpush3.bf16.msra.mxu0 %v2055_v6  ;;  %2023 = vmatpush3.bf16.msra.mxu1 %v2055_v6 }
  0x1f   : > { %1941 = vmatprep.subr.bf16.mxu0 %v2056_v7  ;;  %2016 = vmatprep.subr.bf16.mxu1 %v2056_v7 }
  0x22   : > { %1942 = vmatpush3.bf16.msra.mxu0 %v2056_v7  ;;  %2024 = vmatpush3.bf16.msra.mxu1 %v2056_v7 }
  0x23   : > { %1943 = vmatprep.subr.bf16.mxu0 %v2057_v8  ;;  %2017 = vmatprep.subr.bf16.mxu1 %v2057_v8 }
  0x26   : > { %1944 = vmatpush3.bf16.msra.mxu0 %v2057_v8  ;;  %2025 = vmatpush3.bf16.msra.mxu1 %v2057_v8 }
  0x27   : > { %1945 = vmatprep.subr.bf16.mxu0 %v2058_v9  ;;  %2018 = vmatprep.subr.bf16.mxu1 %v2058_v9 }
  0x2a   : > { %1946 = vmatpush3.bf16.msra.mxu0 %v2058_v9  ;;  %2026 = vmatpush3.bf16.msra.mxu1 %v2058_v9 }
  0x2d   : > { %1948 = vmatmul.mubr.bf16.vlgmr.msra.gmra.mxu0 %v2061_v10  ;;  %1980 = vmatmul.mubr.bf16.vlgmr.msra.gmra.mxu1 %v2062_v11 }
  0x2e   : > { %1951 = vmatprep.mubr.bf16.mxu0 %v2063_v12  ;;  %1983 = vmatprep.mubr.bf16.mxu1 %v2064_v13 }
  0x35   : > { %1952 = vmatmul.mubr.bf16.gmra.mxu0 %v2065_v14  ;;  %1984 = vmatmul.mubr.bf16.gmra.mxu1 %v2066_v15 }
  0x36   : > { %1955 = vmatprep.mubr.bf16.mxu0 %v2067_v16  ;;  %1987 = vmatprep.mubr.bf16.mxu1 %v2068_v17 }
  0x3d   : > { %1956 = vmatmul.mubr.bf16.gmra.mxu0 %v2069_v18  ;;  %1988 = vmatmul.mubr.bf16.gmra.mxu1 %v2070_v19 }
  0x3e   : > { %1959 = vmatprep.mubr.bf16.mxu0 %v2071_v20  ;;  %1991 = vmatprep.mubr.bf16.mxu1 %v2072_v21 }
  0x45   : > { %1960 = vmatmul.mubr.bf16.gmra.mxu0 %v2073_v22  ;;  %1992 = vmatmul.mubr.bf16.gmra.mxu1 %v2074_v23 }
  0x46   : > { %1963 = vmatprep.mubr.bf16.mxu0 %v2075_v24  ;;  %1995 = vmatprep.mubr.bf16.mxu1 %v2076_v25 }
  0x4d   : > { %1964 = vmatmul.mubr.bf16.gmra.mxu0 %v2077_v26  ;;  %1996 = vmatmul.mubr.bf16.gmra.mxu1 %v2078_v27 }
  0x4e   : > { %1967 = vmatprep.mubr.bf16.mxu0 %v2079_v28  ;;  %1999 = vmatprep.mubr.bf16.mxu1 %v2080_v29 }
  0x55   : > { %1968 = vmatmul.mubr.bf16.gmra.mxu0 %v2081_v30  ;;  %2000 = vmatmul.mubr.bf16.gmra.mxu1 %v2082_v31 }
  0x56   : > { %1971 = vmatprep.mubr.bf16.mxu0 %v2083_v32  ;;  %2003 = vmatprep.mubr.bf16.mxu1 %v2084_v33 }
  0x5d   : > { %1972 = vmatmul.mubr.bf16.gmra.mxu0 %v2085_v34  ;;  %2004 = vmatmul.mubr.bf16.gmra.mxu1 %v2086_v35 }
  0x5e   : > { %1975 = vmatprep.mubr.bf16.mxu0 %v2087_v36  ;;  %2007 = vmatprep.mubr.bf16.mxu1 %v2088_v37 }
  0x65   : > { %1976 = vmatmul.mubr.bf16.gmra.mxu0 %v2089_v38  ;;  %2008 = vmatmul.mubr.bf16.gmra.mxu1 %v2090_v39 }
  0xed   : > { %v1949_v41 = vpop.f32.mrf.mxu0  ;;  %v1981_v42 = vpop.f32.mrf.mxu1 }
  0xee   : > { %v885_v43 = vmul.f32 %v1949_v41, %v2227_v40  ;;  %v917_v44 = vmul.f32 %v1981_v42, %v2227_v40 }
  0xef   : > { %v621_v46 = vpop.f32.mrf.mxu0  ;;  %v749_v47 = vpop.f32.mrf.mxu1 }
  0xf0   : > { %v883_v48 = vmul.f32 %v2227_v40, %v621_v46  ;;  %v915_v49 = vmul.f32 %v2227_v40, %v749_v47  ;;  %v956_v52 = vadd.f32 %v2234_v45, %v885_v43  ;;  %v988_v53 = vadd.f32 %v2234_v45, %v917_v44 }
  0xf1   : > { %v1950_v50 = vpop.f32.mrf.mxu0  ;;  %v1982_v51 = vpop.f32.mrf.mxu1 }
  0xf2   : > { %v886_v54 = vmul.f32 %v1950_v50, %v2227_v40  ;;  %v918_v55 = vmul.f32 %v1982_v51, %v2227_v40  ;;  %v954_v58 = vadd.f32 %v2234_v45, %v883_v48  ;;  %v986_v59 = vadd.f32 %v2234_v45, %v915_v49 }
  0xf3   : > { %v624_v56 = vpop.f32.mrf.mxu0  ;;  %v752_v57 = vpop.f32.mrf.mxu1  ;;  %v1020_v2 = vmax.f32 %v956_v52, 0.0  ;;  %v1052_v3 = vmax.f32 %v988_v53, 0.0 }
  0xf4   : > { %v884_v60 = vmul.f32 %v2227_v40, %v624_v56  ;;  %v916_v61 = vmul.f32 %v2227_v40, %v752_v57  ;;  %v957_v62 = vadd.f32 %v2234_v45, %v886_v54  ;;  %v989_v63 = vadd.f32 %v2234_v45, %v918_v55 }
  0xf5   : > { %v1953_v0 = vpop.f32.mrf.mxu0  ;;  %v1985_v1 = vpop.f32.mrf.mxu1  ;;  %v1018_v12 = vmax.f32 %v954_v58, 0.0  ;;  %v1050_v13 = vmax.f32 %v986_v59, 0.0 }
  0xf6   : > { %v955_v4 = vadd.f32 %v2234_v45, %v884_v60  ;;  %v987_v5 = vadd.f32 %v2234_v45, %v916_v61  ;;  %v1021_v6 = vmax.f32 %v957_v62, 0.0  ;;  %v1053_v7 = vmax.f32 %v989_v63, 0.0 }
  0xf7   : > { %v889_v8 = vmul.f32 %v1953_v0, %v2227_v40  ;;  %v921_v9 = vmul.f32 %v1985_v1, %v2227_v40  ;;  %v637_v10 = vpop.f32.mrf.mxu0  ;;  %v765_v11 = vpop.f32.mrf.mxu1 }
  0xf8   : > { %v1019_v14 = vmax.f32 %v955_v4, 0.0  ;;  %v1051_v15 = vmax.f32 %v987_v5, 0.0  ;;  %v1708_v16 = vpack.c.bf16 %v1021_v6, %v1020_v2  ;;  %v1788_v17 = vpack.c.bf16 %v1053_v7, %v1052_v3 }
  0xf9   : > { %v887_v18 = vmul.f32 %v2227_v40, %v637_v10  ;;  %v919_v19 = vmul.f32 %v2227_v40, %v765_v11  ;;  %v1954_v20 = vpop.f32.mrf.mxu0  ;;  %v1986_v21 = vpop.f32.mrf.mxu1  ;;  %v960_v24 = vadd.f32 %v2234_v45, %v889_v8  ;;  %v992_v25 = vadd.f32 %v2234_v45, %v921_v9 }
  0xfa   : > { %v1703_v22 = vpack.c.bf16 %v1019_v14, %v1018_v12  ;;  %v1783_v23 = vpack.c.bf16 %v1051_v15, %v1050_v13  ;;  %1860 = vst [vmem:[%s2257_s24 + $0x8] sm:$0xff] %v1708_v16   ;;  %1876 = vst [vmem:[%s2257_s24 + $0x88] sm:$0xff] %v1788_v17   ;;  %v890_v26 = vmul.f32 %v1954_v20, %v2227_v40 }
  0xfb   : > { %v922_v27 = vmul.f32 %v1986_v21, %v2227_v40  ;;  %v640_v28 = vpop.f32.mrf.mxu0  ;;  %v768_v29 = vpop.f32.mrf.mxu1  ;;  %v958_v30 = vadd.f32 %v2234_v45, %v887_v18  ;;  %v990_v31 = vadd.f32 %v2234_v45, %v919_v19  ;;  %v1024_v43 = vmax.f32 %v960_v24, 0.0 }
  0xfc   : > { %1704 = vst [vmem:[%s2257_s24] sm:$0xff] %v1703_v22   ;;  %1875 = vst [vmem:[%s2257_s24 + $0x80] sm:$0xff] %v1783_v23   ;;  %v888_v32 = vmul.f32 %v2227_v40, %v640_v28  ;;  %v920_v33 = vmul.f32 %v2227_v40, %v768_v29  ;;  %v961_v34 = vadd.f32 %v2234_v45, %v890_v26  ;;  %v1056_v44 = vmax.f32 %v992_v25, 0.0 }
  0xfd   : > { %v993_v35 = vadd.f32 %v2234_v45, %v922_v27  ;;  %v1957_v36 = vpop.f32.mrf.mxu0  ;;  %v1989_v37 = vpop.f32.mrf.mxu1  ;;  %v1022_v50 = vmax.f32 %v958_v30, 0.0  ;;  %v1054_v51 = vmax.f32 %v990_v31, 0.0 }
  0xfe   : > { %v959_v38 = vadd.f32 %v2234_v45, %v888_v32  ;;  %v991_v39 = vadd.f32 %v2234_v45, %v920_v33  ;;  %v893_v41 = vmul.f32 %v1957_v36, %v2227_v40  ;;  %v925_v42 = vmul.f32 %v1989_v37, %v2227_v40 }
  0xff   : > { %v1025_v46 = vmax.f32 %v961_v34, 0.0  ;;  %v1057_v47 = vmax.f32 %v993_v35, 0.0  ;;  %v653_v48 = vpop.f32.mrf.mxu0  ;;  %v781_v49 = vpop.f32.mrf.mxu1 }
 0x100   : > { %v1023_v52 = vmax.f32 %v959_v38, 0.0  ;;  %v1055_v53 = vmax.f32 %v991_v39, 0.0  ;;  %v891_v56 = vmul.f32 %v2227_v40, %v653_v48  ;;  %v923_v57 = vmul.f32 %v2227_v40, %v781_v49 }
 0x101   : > { %v1718_v54 = vpack.c.bf16 %v1025_v46, %v1024_v43  ;;  %v1798_v55 = vpack.c.bf16 %v1057_v47, %v1056_v44  ;;  %v1958_v58 = vpop.f32.mrf.mxu0  ;;  %v1990_v59 = vpop.f32.mrf.mxu1  ;;  %v964_v62 = vadd.f32 %v2234_v45, %v893_v41  ;;  %v996_v63 = vadd.f32 %v2234_v45, %v925_v42 }
 0x102   : > { %v1713_v60 = vpack.c.bf16 %v1023_v52, %v1022_v50  ;;  %v1793_v61 = vpack.c.bf16 %v1055_v53, %v1054_v51  ;;  %v894_v0 = vmul.f32 %v1958_v58, %v2227_v40  ;;  %v926_v1 = vmul.f32 %v1990_v59, %v2227_v40 }
 0x103   : > { %1862 = vst [vmem:[%s2257_s24 + $0x18] sm:$0xff] %v1718_v54   ;;  %1878 = vst [vmem:[%s2257_s24 + $0x98] sm:$0xff] %v1798_v55   ;;  %v656_v2 = vpop.f32.mrf.mxu0  ;;  %v784_v3 = vpop.f32.mrf.mxu1  ;;  %v962_v4 = vadd.f32 %v2234_v45, %v891_v56  ;;  %v994_v5 = vadd.f32 %v2234_v45, %v923_v57  ;;  %v1028_v12 = vmax.f32 %v964_v62, 0.0  ;;  %v1060_v13 = vmax.f32 %v996_v63, 0.0 }
 0x104   : > { %1861 = vst [vmem:[%s2257_s24 + $0x10] sm:$0xff] %v1713_v60   ;;  %1877 = vst [vmem:[%s2257_s24 + $0x90] sm:$0xff] %v1793_v61   ;;  %v892_v6 = vmul.f32 %v2227_v40, %v656_v2  ;;  %v924_v7 = vmul.f32 %v2227_v40, %v784_v3  ;;  %v965_v8 = vadd.f32 %v2234_v45, %v894_v0 }
 0x105   : > { %v997_v9 = vadd.f32 %v2234_v45, %v926_v1  ;;  %v1961_v10 = vpop.f32.mrf.mxu0  ;;  %v1993_v11 = vpop.f32.mrf.mxu1  ;;  %v1026_v22 = vmax.f32 %v962_v4, 0.0  ;;  %v1058_v23 = vmax.f32 %v994_v5, 0.0 }
 0x106   : > { %v963_v14 = vadd.f32 %v2234_v45, %v892_v6  ;;  %v995_v15 = vadd.f32 %v2234_v45, %v924_v7  ;;  %v1029_v16 = vmax.f32 %v965_v8, 0.0  ;;  %v897_v18 = vmul.f32 %v1961_v10, %v2227_v40 }
 0x107   : > { %v1061_v17 = vmax.f32 %v997_v9, 0.0  ;;  %v929_v19 = vmul.f32 %v1993_v11, %v2227_v40  ;;  %v669_v20 = vpop.f32.mrf.mxu0  ;;  %v797_v21 = vpop.f32.mrf.mxu1 }
 0x108   : > { %v1027_v24 = vmax.f32 %v963_v14, 0.0  ;;  %v1059_v25 = vmax.f32 %v995_v15, 0.0  ;;  %v1728_v26 = vpack.c.bf16 %v1029_v16, %v1028_v12  ;;  %v895_v28 = vmul.f32 %v2227_v40, %v669_v20 }
 0x109   : > { %v1808_v27 = vpack.c.bf16 %v1061_v17, %v1060_v13  ;;  %v927_v29 = vmul.f32 %v2227_v40, %v797_v21  ;;  %v1962_v30 = vpop.f32.mrf.mxu0  ;;  %v1994_v31 = vpop.f32.mrf.mxu1  ;;  %v968_v34 = vadd.f32 %v2234_v45, %v897_v18  ;;  %v1000_v35 = vadd.f32 %v2234_v45, %v929_v19 }
 0x10a   : > { %v1723_v32 = vpack.c.bf16 %v1027_v24, %v1026_v22  ;;  %v1803_v33 = vpack.c.bf16 %v1059_v25, %v1058_v23  ;;  %1864 = vst [vmem:[%s2257_s24 + $0x28] sm:$0xff] %v1728_v26   ;;  %v898_v36 = vmul.f32 %v1962_v30, %v2227_v40  ;;  %v930_v37 = vmul.f32 %v1994_v31, %v2227_v40 }
 0x10b   : > { %1880 = vst [vmem:[%s2257_s24 + $0xa8] sm:$0xff] %v1808_v27   ;;  %v672_v38 = vpop.f32.mrf.mxu0  ;;  %v800_v39 = vpop.f32.mrf.mxu1  ;;  %v966_v41 = vadd.f32 %v2234_v45, %v895_v28  ;;  %v998_v42 = vadd.f32 %v2234_v45, %v927_v29  ;;  %v1032_v54 = vmax.f32 %v968_v34, 0.0  ;;  %v1064_v55 = vmax.f32 %v1000_v35, 0.0 }
 0x10c   : > { %1863 = vst [vmem:[%s2257_s24 + $0x20] sm:$0xff] %v1723_v32   ;;  %1879 = vst [vmem:[%s2257_s24 + $0xa0] sm:$0xff] %v1803_v33   ;;  %v896_v43 = vmul.f32 %v2227_v40, %v672_v38  ;;  %v928_v44 = vmul.f32 %v2227_v40, %v800_v39  ;;  %v969_v46 = vadd.f32 %v2234_v45, %v898_v36 }
 0x10d   : > { %v1001_v47 = vadd.f32 %v2234_v45, %v930_v37  ;;  %v1965_v48 = vpop.f32.mrf.mxu0  ;;  %v1997_v49 = vpop.f32.mrf.mxu1  ;;  %v1030_v60 = vmax.f32 %v966_v41, 0.0  ;;  %v1062_v61 = vmax.f32 %v998_v42, 0.0 }
 0x10e   : > { %v967_v50 = vadd.f32 %v2234_v45, %v896_v43  ;;  %v999_v51 = vadd.f32 %v2234_v45, %v928_v44  ;;  %v901_v52 = vmul.f32 %v1965_v48, %v2227_v40  ;;  %v933_v53 = vmul.f32 %v1997_v49, %v2227_v40 }
 0x10f   : > { %v1033_v56 = vmax.f32 %v969_v46, 0.0  ;;  %v1065_v57 = vmax.f32 %v1001_v47, 0.0  ;;  %v685_v58 = vpop.f32.mrf.mxu0  ;;  %v813_v59 = vpop.f32.mrf.mxu1 }
 0x110   : > { %v1031_v62 = vmax.f32 %v967_v50, 0.0  ;;  %v1063_v63 = vmax.f32 %v999_v51, 0.0  ;;  %v899_v2 = vmul.f32 %v2227_v40, %v685_v58  ;;  %v931_v3 = vmul.f32 %v2227_v40, %v813_v59 }
 0x111   : > { %v1738_v0 = vpack.c.bf16 %v1033_v56, %v1032_v54  ;;  %v1818_v1 = vpack.c.bf16 %v1065_v57, %v1064_v55  ;;  %v1966_v4 = vpop.f32.mrf.mxu0  ;;  %v1998_v5 = vpop.f32.mrf.mxu1  ;;  %v972_v8 = vadd.f32 %v2234_v45, %v901_v52  ;;  %v1004_v9 = vadd.f32 %v2234_v45, %v933_v53 }
 0x112   : > { %v1733_v6 = vpack.c.bf16 %v1031_v62, %v1030_v60  ;;  %v1813_v7 = vpack.c.bf16 %v1063_v63, %v1062_v61  ;;  %v902_v10 = vmul.f32 %v1966_v4, %v2227_v40  ;;  %v934_v11 = vmul.f32 %v1998_v5, %v2227_v40 }
 0x113   : > { %1866 = vst [vmem:[%s2257_s24 + $0x38] sm:$0xff] %v1738_v0   ;;  %1882 = vst [vmem:[%s2257_s24 + $0xb8] sm:$0xff] %v1818_v1   ;;  %v688_v12 = vpop.f32.mrf.mxu0  ;;  %v816_v13 = vpop.f32.mrf.mxu1  ;;  %v970_v14 = vadd.f32 %v2234_v45, %v899_v2  ;;  %v1002_v15 = vadd.f32 %v2234_v45, %v931_v3  ;;  %v1036_v22 = vmax.f32 %v972_v8, 0.0  ;;  %v1068_v23 = vmax.f32 %v1004_v9, 0.0 }
 0x114   : > { %1865 = vst [vmem:[%s2257_s24 + $0x30] sm:$0xff] %v1733_v6   ;;  %1881 = vst [vmem:[%s2257_s24 + $0xb0] sm:$0xff] %v1813_v7   ;;  %v900_v16 = vmul.f32 %v2227_v40, %v688_v12  ;;  %v932_v17 = vmul.f32 %v2227_v40, %v816_v13  ;;  %v973_v18 = vadd.f32 %v2234_v45, %v902_v10 }
 0x115   : > { %v1005_v19 = vadd.f32 %v2234_v45, %v934_v11  ;;  %v1969_v20 = vpop.f32.mrf.mxu0  ;;  %v2001_v21 = vpop.f32.mrf.mxu1  ;;  %v1034_v32 = vmax.f32 %v970_v14, 0.0  ;;  %v1066_v33 = vmax.f32 %v1002_v15, 0.0 }
 0x116   : > { %v971_v24 = vadd.f32 %v2234_v45, %v900_v16  ;;  %v1003_v25 = vadd.f32 %v2234_v45, %v932_v17  ;;  %v1037_v26 = vmax.f32 %v973_v18, 0.0  ;;  %v905_v28 = vmul.f32 %v1969_v20, %v2227_v40 }
 0x117   : > { %v1069_v27 = vmax.f32 %v1005_v19, 0.0  ;;  %v937_v29 = vmul.f32 %v2001_v21, %v2227_v40  ;;  %v701_v30 = vpop.f32.mrf.mxu0  ;;  %v829_v31 = vpop.f32.mrf.mxu1 }
 0x118   : > { %v1035_v34 = vmax.f32 %v971_v24, 0.0  ;;  %v1067_v35 = vmax.f32 %v1003_v25, 0.0  ;;  %v1748_v36 = vpack.c.bf16 %v1037_v26, %v1036_v22  ;;  %v903_v38 = vmul.f32 %v2227_v40, %v701_v30 }
 0x119   : > { %v1828_v37 = vpack.c.bf16 %v1069_v27, %v1068_v23  ;;  %v935_v39 = vmul.f32 %v2227_v40, %v829_v31  ;;  %v1970_v41 = vpop.f32.mrf.mxu0  ;;  %v2002_v42 = vpop.f32.mrf.mxu1  ;;  %v976_v46 = vadd.f32 %v2234_v45, %v905_v28  ;;  %v1008_v47 = vadd.f32 %v2234_v45, %v937_v29 }
 0x11a   : > { %v1743_v43 = vpack.c.bf16 %v1035_v34, %v1034_v32  ;;  %v1823_v44 = vpack.c.bf16 %v1067_v35, %v1066_v33  ;;  %1868 = vst [vmem:[%s2257_s24 + $0x48] sm:$0xff] %v1748_v36   ;;  %v906_v48 = vmul.f32 %v1970_v41, %v2227_v40  ;;  %v938_v49 = vmul.f32 %v2002_v42, %v2227_v40 }
 0x11b   : > { %1884 = vst [vmem:[%s2257_s24 + $0xc8] sm:$0xff] %v1828_v37   ;;  %v704_v50 = vpop.f32.mrf.mxu0  ;;  %v832_v51 = vpop.f32.mrf.mxu1  ;;  %v974_v52 = vadd.f32 %v2234_v45, %v903_v38  ;;  %v1006_v53 = vadd.f32 %v2234_v45, %v935_v39  ;;  %v1040_v0 = vmax.f32 %v976_v46, 0.0  ;;  %v1072_v1 = vmax.f32 %v1008_v47, 0.0 }
 0x11c   : > { %1867 = vst [vmem:[%s2257_s24 + $0x40] sm:$0xff] %v1743_v43   ;;  %1883 = vst [vmem:[%s2257_s24 + $0xc0] sm:$0xff] %v1823_v44   ;;  %v904_v54 = vmul.f32 %v2227_v40, %v704_v50  ;;  %v936_v55 = vmul.f32 %v2227_v40, %v832_v51  ;;  %v977_v56 = vadd.f32 %v2234_v45, %v906_v48 }
 0x11d   : > { %v1009_v57 = vadd.f32 %v2234_v45, %v938_v49  ;;  %v1973_v58 = vpop.f32.mrf.mxu0  ;;  %v2005_v59 = vpop.f32.mrf.mxu1  ;;  %v1038_v6 = vmax.f32 %v974_v52, 0.0  ;;  %v1070_v7 = vmax.f32 %v1006_v53, 0.0 }
 0x11e   : > { %v975_v60 = vadd.f32 %v2234_v45, %v904_v54  ;;  %v1007_v61 = vadd.f32 %v2234_v45, %v936_v55  ;;  %v909_v62 = vmul.f32 %v1973_v58, %v2227_v40  ;;  %v941_v63 = vmul.f32 %v2005_v59, %v2227_v40 }
 0x11f   : > { %v1041_v2 = vmax.f32 %v977_v56, 0.0  ;;  %v1073_v3 = vmax.f32 %v1009_v57, 0.0  ;;  %v717_v4 = vpop.f32.mrf.mxu0  ;;  %v845_v5 = vpop.f32.mrf.mxu1 }
 0x120   : > { %v1039_v8 = vmax.f32 %v975_v60, 0.0  ;;  %v1071_v9 = vmax.f32 %v1007_v61, 0.0  ;;  %v907_v12 = vmul.f32 %v2227_v40, %v717_v4  ;;  %v939_v13 = vmul.f32 %v2227_v40, %v845_v5 }
 0x121   : > { %v1758_v10 = vpack.c.bf16 %v1041_v2, %v1040_v0  ;;  %v1838_v11 = vpack.c.bf16 %v1073_v3, %v1072_v1  ;;  %v1974_v14 = vpop.f32.mrf.mxu0  ;;  %v2006_v15 = vpop.f32.mrf.mxu1  ;;  %v980_v18 = vadd.f32 %v2234_v45, %v909_v62  ;;  %v1012_v19 = vadd.f32 %v2234_v45, %v941_v63 }
 0x122   : > { %v1753_v16 = vpack.c.bf16 %v1039_v8, %v1038_v6  ;;  %v1833_v17 = vpack.c.bf16 %v1071_v9, %v1070_v7  ;;  %v910_v20 = vmul.f32 %v1974_v14, %v2227_v40  ;;  %v942_v21 = vmul.f32 %v2006_v15, %v2227_v40 }
 0x123   : > { %1870 = vst [vmem:[%s2257_s24 + $0x58] sm:$0xff] %v1758_v10   ;;  %1886 = vst [vmem:[%s2257_s24 + $0xd8] sm:$0xff] %v1838_v11   ;;  %v720_v22 = vpop.f32.mrf.mxu0  ;;  %v848_v23 = vpop.f32.mrf.mxu1  ;;  %v978_v24 = vadd.f32 %v2234_v45, %v907_v12  ;;  %v1010_v25 = vadd.f32 %v2234_v45, %v939_v13  ;;  %v1044_v32 = vmax.f32 %v980_v18, 0.0  ;;  %v1076_v33 = vmax.f32 %v1012_v19, 0.0 }
 0x124   : > { %1869 = vst [vmem:[%s2257_s24 + $0x50] sm:$0xff] %v1753_v16   ;;  %1885 = vst [vmem:[%s2257_s24 + $0xd0] sm:$0xff] %v1833_v17   ;;  %v908_v26 = vmul.f32 %v2227_v40, %v720_v22  ;;  %v940_v27 = vmul.f32 %v2227_v40, %v848_v23  ;;  %v981_v28 = vadd.f32 %v2234_v45, %v910_v20 }
 0x125   : > { %v1013_v29 = vadd.f32 %v2234_v45, %v942_v21  ;;  %v1977_v30 = vpop.f32.mrf.mxu0  ;;  %v2009_v31 = vpop.f32.mrf.mxu1  ;;  %v1042_v43 = vmax.f32 %v978_v24, 0.0  ;;  %v1074_v44 = vmax.f32 %v1010_v25, 0.0 }
 0x126   : > { %v979_v34 = vadd.f32 %v2234_v45, %v908_v26  ;;  %v1011_v35 = vadd.f32 %v2234_v45, %v940_v27  ;;  %v1045_v36 = vmax.f32 %v981_v28, 0.0  ;;  %v913_v38 = vmul.f32 %v1977_v30, %v2227_v40 }
 0x127   : > { %v1077_v37 = vmax.f32 %v1013_v29, 0.0  ;;  %v945_v39 = vmul.f32 %v2009_v31, %v2227_v40  ;;  %v733_v41 = vpop.f32.mrf.mxu0  ;;  %v861_v42 = vpop.f32.mrf.mxu1 }
 0x128   : > { %v1043_v46 = vmax.f32 %v979_v34, 0.0  ;;  %v1075_v47 = vmax.f32 %v1011_v35, 0.0  ;;  %v1768_v48 = vpack.c.bf16 %v1045_v36, %v1044_v32  ;;  %v911_v50 = vmul.f32 %v2227_v40, %v733_v41 }
 0x129   : > { %v1848_v49 = vpack.c.bf16 %v1077_v37, %v1076_v33  ;;  %v943_v51 = vmul.f32 %v2227_v40, %v861_v42  ;;  %v1978_v52 = vpop.f32.mrf.mxu0  ;;  %v2010_v53 = vpop.f32.mrf.mxu1  ;;  %v984_v56 = vadd.f32 %v2234_v45, %v913_v38  ;;  %v1016_v57 = vadd.f32 %v2234_v45, %v945_v39 }
 0x12a   : > { %v1763_v54 = vpack.c.bf16 %v1043_v46, %v1042_v43  ;;  %v1843_v55 = vpack.c.bf16 %v1075_v47, %v1074_v44  ;;  %1872 = vst [vmem:[%s2257_s24 + $0x68] sm:$0xff] %v1768_v48   ;;  %v914_v58 = vmul.f32 %v1978_v52, %v2227_v40  ;;  %v946_v59 = vmul.f32 %v2010_v53, %v2227_v40 }
 0x12b   : > { %1888 = vst [vmem:[%s2257_s24 + $0xe8] sm:$0xff] %v1848_v49   ;;  %v736_v60 = vpop.f32.mrf.mxu0  ;;  %v864_v61 = vpop.f32.mrf.mxu1  ;;  %v982_v62 = vadd.f32 %v2234_v45, %v911_v50  ;;  %v1014_v63 = vadd.f32 %v2234_v45, %v943_v51  ;;  %v1048_v6 = vmax.f32 %v984_v56, 0.0  ;;  %v1080_v7 = vmax.f32 %v1016_v57, 0.0 }
 0x12c   : > { %1871 = vst [vmem:[%s2257_s24 + $0x60] sm:$0xff] %v1763_v54   ;;  %1887 = vst [vmem:[%s2257_s24 + $0xe0] sm:$0xff] %v1843_v55   ;;  %v912_v0 = vmul.f32 %v2227_v40, %v736_v60  ;;  %v944_v1 = vmul.f32 %v2227_v40, %v864_v61  ;;  %v985_v2 = vadd.f32 %v2234_v45, %v914_v58 }
 0x12d   : > { %v1017_v3 = vadd.f32 %v2234_v45, %v946_v59  ;;  %v1046_v10 = vmax.f32 %v982_v62, 0.0  ;;  %v1078_v11 = vmax.f32 %v1014_v63, 0.0 }
 0x12e   : > { %v983_v4 = vadd.f32 %v2234_v45, %v912_v0  ;;  %v1015_v5 = vadd.f32 %v2234_v45, %v944_v1  ;;  %v1049_v8 = vmax.f32 %v985_v2, 0.0 }
 0x12f   : > { %v1081_v9 = vmax.f32 %v1017_v3, 0.0 }
 0x130   : > { %v1047_v12 = vmax.f32 %v983_v4, 0.0  ;;  %v1079_v40 = vmax.f32 %v1015_v5, 0.0  ;;  %v1778_v13 = vpack.c.bf16 %v1049_v8, %v1048_v6 }
 0x131   : > { %v1858_v14 = vpack.c.bf16 %v1081_v9, %v1080_v7 }
 0x132   : > { %v1773_v15 = vpack.c.bf16 %v1047_v12, %v1046_v10  ;;  %v1853_v16 = vpack.c.bf16 %v1079_v40, %v1078_v11  ;;  %1874 = vst [vmem:[%s2257_s24 + $0x78] sm:$0xff] %v1778_v13  }
 0x133   : > { %1890 = vst [vmem:[%s2257_s24 + $0xf8] sm:$0xff] %v1858_v14  }
 0x134   : > { %1873 = vst [vmem:[%s2257_s24 + $0x70] sm:$0xff] %v1773_v15   ;;  %1889 = vst [vmem:[%s2257_s24 + $0xf0] sm:$0xff] %v1853_v16  }
 0x135 PF: > { %s14_s17 = sadd.s32 1, %s2113_s17   ;;  %s2415_s15 = smov %s2109_s16 }
 0x136   : > { %p11_p5 = scmp.ge.s32.totalorder %s14_s17, 89   ;;  %s2416_s16 = smov %s2418_s18 }
 0x138   :  { %13 = sbr.rel (!%p11_p5) target bundleno = 2 (0x2), region = 75 }

// kernel: stem_fwd.8
= control target key start
LH: loop header
LB: loop body
LE: loop exit
PB: predicated region body
PF: predicated region fallthrough
CT: control target
= control target key end

     0   :  { %s3155_s15 = smov 0   ;;  %s3157_s16 = smov 0   ;;  %s3701_s0 = inlined_call_operand.vmem [shape: bf16[43520,384], index: 0, kind: input, shape index: {}]   ;;  %s3702_s1 = inlined_call_operand.vmem [shape: bf16[384,128], index: 1, kind: input, shape index: {}]   ;;  %s3703_s2 = inlined_call_operand.vmem [shape: f32[1,128], index: 2, kind: input, shape index: {}]   ;;  %s3704_s3 = inlined_call_operand.vmem [shape: f32[1,128], index: 3, kind: input, shape index: {}]   ;;  %s3705_s4 = inlined_call_operand.vmem [shape: bf16[43520,128], index: 4, kind: output, shape index: {}]  }
   0x1   :  { %s3159_s17 = smov 0  }
   0x2 LB: > { %s26_s18 = sadd.s32 1, %s3123_s16  ;;  %p2327_p0 = scmp.ge.s32.totalorder %s3127_s17, 1  ;;  %s3127_s17 = sphi %s3159_s17, %s14_s17   ;;  %s3123_s16 = sphi %s3157_s16, %s3707_s16   ;;  %s3119_s15 = sphi %s3155_s15, %s3706_s15  }
   0x3   : > { %p28_p1 = scmp.ge.s32.totalorder %s26_s18, 85  ;;  %p203_p2 = scmp.lt.s32.totalorder %s3127_s17, 86 }
   0x5   : > { %s3709_s18 = smov (%p28_p1, %s26_s18), 0  ;;  %p204_p3 = pnand %p2327_p0, %p203_p2 }
   0x6   : > { %s2328_s21 = sshll.u32 (!%p204_p3), %s3119_s15, 6 }
   0x7   : > { %207 = sbr.rel (%p204_p3) target bundleno = 471 (0x1d7), region = 36  ;;  %p244_p4 = scmp.lt.s32.totalorder (!%p204_p3), %s2328_s21, 5439 }
   0xc   : > { %v2953_v0 = vld [vmem:[%s3702_s1 + $0x38] sm:$0xff]   ;;  %v3129_v1 = vmov 0   ;;  %v2954_v2 = vld [vmem:[%s3702_s1 + $0x30] sm:$0xff]   ;;  %v2955_v3 = vld [vmem:[%s3702_s1 + $0x28] sm:$0xff]   ;;  %s3711_s21 = smov (!%p244_p4, %s2328_s21), 5439 }
   0xd   : > { %1102 = vmatprep.subr.bf16.mxu0 %v3129_v1  ;;  %2895 = vmatprep.subr.bf16.mxu1 %v3129_v1  ;;  %v2956_v4 = vld [vmem:[%s3702_s1 + $0x20] sm:$0xff]   ;;  %s2927_s28 = smul.u32 12, %s3711_s21  ;;  %v2957_v5 = vld [vmem:[%s3702_s1 + $0x18] sm:$0xff]   ;;  %v2958_v7 = vld [vmem:[%s3702_s1 + $0x10] sm:$0xff]   ;;  %s2331_s6 = sshll.u32 %s3711_s21, 2 }
   0xe   : > { %1103 = vmatpush1.bf16.msra.mxu0 %v2953_v0  ;;  %2911 = vmatpush1.bf16.msra.mxu1 %v2953_v0  ;;  %v2959_v9 = vld [vmem:[%s3702_s1 + $0x8] sm:$0xff]   ;;  %v2960_v10 = vld [vmem:[%s3702_s1] sm:$0xff]   ;;  %v2961_v11 = vld [vmem:[%s3702_s1 + $0x78] sm:$0xff]   ;;  %s3476_s10 = scalar_lea.vmem %s3705_s4, %s2331_s6 }
   0xf   : > { %1104 = vmatprep.subr.bf16.mxu0 %v3129_v1  ;;  %2896 = vmatprep.subr.bf16.mxu1 %v3129_v1  ;;  %s3202_s7 = scalar_lea.vmem %s3701_s0, %s2927_s28  ;;  %v2962_v12 = vld [vmem:[%s3702_s1 + $0x70] sm:$0xff]   ;;  %v2963_v13 = vld [vmem:[%s3702_s1 + $0x68] sm:$0xff]   ;;  %v2964_v14 = vld [vmem:[%s3702_s1 + $0x60] sm:$0xff]  }
  0x10   : > { %v2971_v6 = vld [vmem:[%s3202_s7 + $0x4] ss:$12 sps:$4 sm:$0xff]   ;;  %v2965_v15 = vld [vmem:[%s3702_s1 + $0x58] sm:$0xff]   ;;  %v2967_v17 = vld [vmem:[%s3702_s1 + $0x48] sm:$0xff]  }
  0x11   : > { %v2974_v8 = vld [vmem:[%s3202_s7 + $0x244] ss:$12 sps:$4 sm:$0xff]   ;;  %1134 = vmatprep.mubr.bf16.mxu0 %v2971_v6  ;;  %v2975_v19 = vld [vmem:[%s3702_s1 + $0xb8] sm:$0xff]   ;;  %v2969_v20 = vld [vmem:[%s3202_s7] ss:$12 sps:$4 sm:$0xff]  }
  0x12   : > { %1105 = vmatpush1.bf16.msra.mxu0 %v2954_v2  ;;  %2912 = vmatpush1.bf16.msra.mxu1 %v2954_v2  ;;  %v2966_v16 = vld [vmem:[%s3702_s1 + $0x50] sm:$0xff]   ;;  %v2968_v18 = vld [vmem:[%s3702_s1 + $0x40] sm:$0xff]   ;;  %v2976_v22 = vld [vmem:[%s3202_s7 + $0x1c] ss:$12 sps:$4 sm:$0xff]  }
  0x13   : > { %1106 = vmatprep.subr.bf16.mxu0 %v3129_v1  ;;  %2897 = vmatprep.subr.bf16.mxu1 %v3129_v1  ;;  %v2972_v21 = vld [vmem:[%s3202_s7 + $0x240] ss:$12 sps:$4 sm:$0xff]   ;;  %v2978_v23 = vld [vmem:[%s3202_s7 + $0x25c] ss:$12 sps:$4 sm:$0xff]   ;;  %v2982_v24 = vld [vmem:[%s3702_s1 + $0xb0] sm:$0xff]  }
  0x14   : > { %1326 = vmatprep.mubr.bf16.mxu1 %v2974_v8  ;;  %v2989_v25 = vld [vmem:[%s3702_s1 + $0xa8] sm:$0xff]   ;;  %v2980_v26 = vld [vmem:[%s3202_s7 + $0x18] ss:$12 sps:$4 sm:$0xff]   ;;  %v2983_v28 = vld [vmem:[%s3202_s7 + $0x34] ss:$12 sps:$4 sm:$0xff]  }
  0x15   : > { %v2981_v27 = vld [vmem:[%s3202_s7 + $0x258] ss:$12 sps:$4 sm:$0xff]   ;;  %v2985_v29 = vld [vmem:[%s3202_s7 + $0x274] ss:$12 sps:$4 sm:$0xff]   ;;  %v2987_v31 = vld [vmem:[%s3202_s7 + $0x30] ss:$12 sps:$4 sm:$0xff]  }
  0x16   : > { %1107 = vmatpush1.bf16.msra.mxu0 %v2955_v3  ;;  %2913 = vmatpush1.bf16.msra.mxu1 %v2955_v3  ;;  %v2996_v30 = vld [vmem:[%s3702_s1 + $0xa0] sm:$0xff]   ;;  %v3003_v32 = vld [vmem:[%s3702_s1 + $0x98] sm:$0xff]   ;;  %v3010_v36 = vld [vmem:[%s3702_s1 + $0x90] sm:$0xff]  }
  0x17   : > { %1108 = vmatprep.subr.bf16.mxu0 %v3129_v1  ;;  %2898 = vmatprep.subr.bf16.mxu1 %v3129_v1  ;;  %v2988_v33 = vld [vmem:[%s3202_s7 + $0x270] ss:$12 sps:$4 sm:$0xff]   ;;  %v2990_v34 = vld [vmem:[%s3202_s7 + $0x4c] ss:$12 sps:$4 sm:$0xff]   ;;  %v2994_v37 = vld [vmem:[%s3202_s7 + $0x48] ss:$12 sps:$4 sm:$0xff]  }
  0x18   : > { %v2992_v35 = vld [vmem:[%s3202_s7 + $0x28c] ss:$12 sps:$4 sm:$0xff]   ;;  %v2995_v38 = vld [vmem:[%s3202_s7 + $0x288] ss:$12 sps:$4 sm:$0xff]   ;;  %v2997_v39 = vld [vmem:[%s3202_s7 + $0x64] ss:$12 sps:$4 sm:$0xff]  }
  0x19   : > { %v2999_v40 = vld [vmem:[%s3202_s7 + $0x2a4] ss:$12 sps:$4 sm:$0xff]   ;;  %v3017_v41 = vld [vmem:[%s3702_s1 + $0x88] sm:$0xff]   ;;  %v3011_v49 = vld [vmem:[%s3202_s7 + $0x94] ss:$12 sps:$4 sm:$0xff]  }
  0x1a   : > { %1109 = vmatpush1.bf16.msra.mxu0 %v2956_v4  ;;  %2914 = vmatpush1.bf16.msra.mxu1 %v2956_v4  ;;  %v3024_v42 = vld [vmem:[%s3702_s1 + $0x80] sm:$0xff]   ;;  %v3004_v45 = vld [vmem:[%s3202_s7 + $0x7c] ss:$12 sps:$4 sm:$0xff]   ;;  %v3018_v53 = vld [vmem:[%s3202_s7 + $0xac] ss:$12 sps:$4 sm:$0xff]  }
  0x1b   : > { %1110 = vmatprep.subr.bf16.mxu0 %v3129_v1  ;;  %2899 = vmatprep.subr.bf16.mxu1 %v3129_v1  ;;  %v3001_v43 = vld [vmem:[%s3202_s7 + $0x60] ss:$12 sps:$4 sm:$0xff]   ;;  %v3006_v46 = vld [vmem:[%s3202_s7 + $0x2bc] ss:$12 sps:$4 sm:$0xff]   ;;  %v3008_v47 = vld [vmem:[%s3202_s7 + $0x78] ss:$12 sps:$4 sm:$0xff]  }
  0x1c   : > { %v3002_v44 = vld [vmem:[%s3202_s7 + $0x2a0] ss:$12 sps:$4 sm:$0xff]   ;;  %v3009_v48 = vld [vmem:[%s3202_s7 + $0x2b8] ss:$12 sps:$4 sm:$0xff]   ;;  %v3015_v51 = vld [vmem:[%s3202_s7 + $0x90] ss:$12 sps:$4 sm:$0xff]  }
  0x1d   : > { %v3013_v50 = vld [vmem:[%s3202_s7 + $0x2d4] ss:$12 sps:$4 sm:$0xff]   ;;  %v3016_v52 = vld [vmem:[%s3202_s7 + $0x2d0] ss:$12 sps:$4 sm:$0xff]   ;;  %v3020_v54 = vld [vmem:[%s3202_s7 + $0x2ec] ss:$12 sps:$4 sm:$0xff]  }
  0x1e   : > { %1111 = vmatpush1.bf16.msra.mxu0 %v2957_v5  ;;  %2915 = vmatpush1.bf16.msra.mxu1 %v2957_v5  ;;  %v3022_v55 = vld [vmem:[%s3202_s7 + $0xa8] ss:$12 sps:$4 sm:$0xff]   ;;  %v3025_v57 = vld [vmem:[%s3202_s7 + $0xc4] ss:$12 sps:$4 sm:$0xff]   ;;  %v3028_v59 = vld [vmem:[%s3202_s7 + $0xc0] ss:$12 sps:$4 sm:$0xff]  }
  0x1f   : > { %1112 = vmatprep.subr.bf16.mxu0 %v3129_v1  ;;  %2900 = vmatprep.subr.bf16.mxu1 %v3129_v1  ;;  %v3023_v56 = vld [vmem:[%s3202_s7 + $0x2e8] ss:$12 sps:$4 sm:$0xff]   ;;  %v3029_v60 = vld [vmem:[%s3202_s7 + $0x20] ss:$12 sps:$4 sm:$0xff]   ;;  %v3032_v62 = vld [vmem:[%s3202_s7 + $0x38] ss:$12 sps:$4 sm:$0xff]  }
  0x20   : > { %v3027_v58 = vld [vmem:[%s3202_s7 + $0x8] ss:$12 sps:$4 sm:$0xff]   ;;  %v3033_v63 = vld [vmem:[%s3202_s7 + $0xd8] ss:$12 sps:$4 sm:$0xff]   ;;  %v3034_v0 = vld [vmem:[%s3202_s7 + $0x50] ss:$12 sps:$4 sm:$0xff]  }
  0x21   : > { %v3030_v61 = vld [vmem:[%s3202_s7 + $0xdc] ss:$12 sps:$4 sm:$0xff]   ;;  %v3039_v4 = vld [vmem:[%s3202_s7 + $0x80] ss:$12 sps:$4 sm:$0xff]   ;;  %v3042_v6 = vld [vmem:[%s3202_s7 + $0x98] ss:$12 sps:$4 sm:$0xff]  }
  0x22   : > { %1113 = vmatpush1.bf16.msra.mxu0 %v2958_v7  ;;  %2916 = vmatpush1.bf16.msra.mxu1 %v2958_v7  ;;  %v3037_v2 = vld [vmem:[%s3202_s7 + $0x68] ss:$12 sps:$4 sm:$0xff]   ;;  %v3038_v3 = vld [vmem:[%s3202_s7 + $0xf0] ss:$12 sps:$4 sm:$0xff]   ;;  %v3040_v5 = vld [vmem:[%s3202_s7 + $0x10c] ss:$12 sps:$4 sm:$0xff]  }
  0x23   : > { %1114 = vmatprep.subr.bf16.mxu0 %v3129_v1  ;;  %2901 = vmatprep.subr.bf16.mxu1 %v3129_v1  ;;  %v3043_v7 = vld [vmem:[%s3202_s7 + $0x108] ss:$12 sps:$4 sm:$0xff]   ;;  %v3044_v8 = vld [vmem:[%s3202_s7 + $0xb0] ss:$12 sps:$4 sm:$0xff]  }
  0x26   : > { %1115 = vmatpush1.bf16.msra.mxu0 %v2959_v9  ;;  %2917 = vmatpush1.bf16.msra.mxu1 %v2959_v9  ;;  %v3045_v9 = vld [vmem:[%s3202_s7 + $0x124] ss:$12 sps:$4 sm:$0xff]  }
  0x27   : > { %1116 = vmatprep.subr.bf16.mxu0 %v3129_v1  ;;  %2902 = vmatprep.subr.bf16.mxu1 %v3129_v1 }
  0x2a   : > { %1117 = vmatpush1.bf16.msra.mxu0 %v2960_v10  ;;  %2918 = vmatpush1.bf16.msra.mxu1 %v2960_v10  ;;  %v3047_v10 = vld [vmem:[%s3202_s7 + $0xc8] ss:$12 sps:$4 sm:$0xff]  }
  0x2b   : > { %1118 = vmatprep.subr.bf16.mxu0 %v3129_v1  ;;  %2903 = vmatprep.subr.bf16.mxu1 %v3129_v1 }
  0x2e   : > { %1119 = vmatpush2.bf16.msra.mxu0 %v2961_v11  ;;  %2919 = vmatpush2.bf16.msra.mxu1 %v2961_v11  ;;  %v3048_v11 = vld [vmem:[%s3202_s7 + $0x120] ss:$12 sps:$4 sm:$0xff]  }
  0x2f   : > { %1120 = vmatprep.subr.bf16.mxu0 %v3129_v1  ;;  %2904 = vmatprep.subr.bf16.mxu1 %v3129_v1 }
  0x32   : > { %1121 = vmatpush2.bf16.msra.mxu0 %v2962_v12  ;;  %2920 = vmatpush2.bf16.msra.mxu1 %v2962_v12  ;;  %v3049_v12 = vld [vmem:[%s3202_s7 + $0xe0] ss:$12 sps:$4 sm:$0xff]  }
  0x33   : > { %1122 = vmatprep.subr.bf16.mxu0 %v3129_v1  ;;  %2905 = vmatprep.subr.bf16.mxu1 %v3129_v1 }
  0x36   : > { %1123 = vmatpush2.bf16.msra.mxu0 %v2963_v13  ;;  %2921 = vmatpush2.bf16.msra.mxu1 %v2963_v13  ;;  %v3050_v13 = vld [vmem:[%s3202_s7 + $0x13c] ss:$12 sps:$4 sm:$0xff]  }
  0x37   : > { %1124 = vmatprep.subr.bf16.mxu0 %v3129_v1  ;;  %2906 = vmatprep.subr.bf16.mxu1 %v3129_v1 }
  0x3a   : > { %1125 = vmatpush2.bf16.msra.mxu0 %v2964_v14  ;;  %2922 = vmatpush2.bf16.msra.mxu1 %v2964_v14  ;;  %v3052_v14 = vld [vmem:[%s3202_s7 + $0xf8] ss:$12 sps:$4 sm:$0xff]  }
  0x3b   : > { %1126 = vmatprep.subr.bf16.mxu0 %v3129_v1  ;;  %2907 = vmatprep.subr.bf16.mxu1 %v3129_v1 }
  0x3e   : > { %1127 = vmatpush2.bf16.msra.mxu0 %v2965_v15  ;;  %2923 = vmatpush2.bf16.msra.mxu1 %v2965_v15  ;;  %v3053_v15 = vld [vmem:[%s3202_s7 + $0x138] ss:$12 sps:$4 sm:$0xff]  }
  0x3f   : > { %1128 = vmatprep.subr.bf16.mxu0 %v3129_v1  ;;  %2908 = vmatprep.subr.bf16.mxu1 %v3129_v1 }
  0x42   : > { %1129 = vmatpush2.bf16.msra.mxu0 %v2966_v16  ;;  %2924 = vmatpush2.bf16.msra.mxu1 %v2966_v16  ;;  %v3054_v16 = vld [vmem:[%s3202_s7 + $0x110] ss:$12 sps:$4 sm:$0xff]  }
  0x43   : > { %1130 = vmatprep.subr.bf16.mxu0 %v3129_v1  ;;  %2909 = vmatprep.subr.bf16.mxu1 %v3129_v1 }
  0x46   : > { %1131 = vmatpush2.bf16.msra.mxu0 %v2967_v17  ;;  %2925 = vmatpush2.bf16.msra.mxu1 %v2967_v17  ;;  %v3055_v17 = vld [vmem:[%s3202_s7 + $0x154] ss:$12 sps:$4 sm:$0xff]  }
  0x47   : > { %1132 = vmatprep.subr.bf16.mxu0 %v3129_v1  ;;  %2910 = vmatprep.subr.bf16.mxu1 %v3129_v1  ;;  %v3035_v1 = vld [vmem:[%s3202_s7 + $0xf4] ss:$12 sps:$4 sm:$0xff]  }
  0x4a   : > { %1133 = vmatpush2.bf16.msra.mxu0 %v2968_v18  ;;  %2926 = vmatpush2.bf16.msra.mxu1 %v2968_v18  ;;  %v3057_v18 = vld [vmem:[%s3202_s7 + $0x128] ss:$12 sps:$4 sm:$0xff]  }
  0x4b   : > { %2815 = vmatprep.subr.bf16.mxu1 %v2975_v19 }
  0x4d   : > { %1135 = vmatmul.mubr.bf16.vlgmr.msra.gmra.mxu0 %v2969_v20  ;;  %1327 = vmatmul.mubr.bf16.vlgmr.msra.gmra.mxu1 %v2972_v21  ;;  %v3059_v20 = vld [vmem:[%s3202_s7 + $0x140] ss:$12 sps:$4 sm:$0xff]  }
  0x4e   : > { %2816 = vmatpush3.bf16.msra.mxu1 %v2975_v19  ;;  %1142 = vmatprep.mubr.bf16.mxu0 %v2976_v22  ;;  %v3058_v19 = vld [vmem:[%s3202_s7 + $0x150] ss:$12 sps:$4 sm:$0xff]   ;;  %v3060_v21 = vld [vmem:[%s3202_s7 + $0x16c] ss:$12 sps:$4 sm:$0xff]  }
  0x4f   : > { %1334 = vmatprep.mubr.bf16.mxu1 %v2978_v23  ;;  %2817 = vmatprep.subr.bf16.mxu1 %v2982_v24  ;;  %v3062_v22 = vld [vmem:[%s3202_s7 + $0x158] ss:$12 sps:$4 sm:$0xff]   ;;  %v3063_v23 = vld [vmem:[%s3202_s7 + $0x168] ss:$12 sps:$4 sm:$0xff]  }
  0x52   : > { %2818 = vmatpush3.bf16.msra.mxu1 %v2982_v24  ;;  %v3064_v24 = vld [vmem:[%s3202_s7 + $0x170] ss:$12 sps:$4 sm:$0xff]  }
  0x53   : > { %2819 = vmatprep.subr.bf16.mxu1 %v2989_v25 }
  0x55   : > { %1143 = vmatmul.mubr.bf16.gmra.mxu0 %v2980_v26  ;;  %1335 = vmatmul.mubr.bf16.gmra.mxu1 %v2981_v27  ;;  %v3067_v26 = vld [vmem:[%s3202_s7 + $0x188] ss:$12 sps:$4 sm:$0xff]   ;;  %v3068_v27 = vld [vmem:[%s3202_s7 + $0x180] ss:$12 sps:$4 sm:$0xff]  }
  0x56   : > { %1150 = vmatprep.mubr.bf16.mxu0 %v2983_v28  ;;  %1342 = vmatprep.mubr.bf16.mxu1 %v2985_v29  ;;  %v3069_v28 = vld [vmem:[%s3202_s7 + $0x1a0] ss:$12 sps:$4 sm:$0xff]   ;;  %v3070_v29 = vld [vmem:[%s3202_s7 + $0x19c] ss:$12 sps:$4 sm:$0xff]  }
  0x57   : > { %2820 = vmatpush3.bf16.msra.mxu1 %v2989_v25  ;;  %v3065_v25 = vld [vmem:[%s3202_s7 + $0x184] ss:$12 sps:$4 sm:$0xff]  }
  0x58   : > { %2821 = vmatprep.subr.bf16.mxu1 %v2996_v30 }
  0x5b   : > { %2822 = vmatpush3.bf16.msra.mxu1 %v2996_v30  ;;  %v3072_v30 = vld [vmem:[%s3202_s7 + $0x1b8] ss:$12 sps:$4 sm:$0xff]  }
  0x5c   : > { %2823 = vmatprep.subr.bf16.mxu1 %v3003_v32 }
  0x5d   : > { %1151 = vmatmul.mubr.bf16.gmra.mxu0 %v2987_v31  ;;  %1343 = vmatmul.mubr.bf16.gmra.mxu1 %v2988_v33  ;;  %v3073_v31 = vld [vmem:[%s3202_s7 + $0x198] ss:$12 sps:$4 sm:$0xff]   ;;  %v3075_v33 = vld [vmem:[%s3202_s7 + $0x1b4] ss:$12 sps:$4 sm:$0xff]  }
  0x5e   : > { %1158 = vmatprep.mubr.bf16.mxu0 %v2990_v34  ;;  %1350 = vmatprep.mubr.bf16.mxu1 %v2992_v35  ;;  %v3077_v34 = vld [vmem:[%s3202_s7 + $0x1e8] ss:$12 sps:$4 sm:$0xff]   ;;  %v3078_v35 = vld [vmem:[%s3202_s7 + $0x1b0] ss:$12 sps:$4 sm:$0xff]  }
  0x5f   : > { %2824 = vmatpush3.bf16.msra.mxu1 %v3003_v32  ;;  %v3074_v32 = vld [vmem:[%s3202_s7 + $0x1d0] ss:$12 sps:$4 sm:$0xff]  }
  0x60   : > { %2825 = vmatprep.subr.bf16.mxu1 %v3010_v36 }
  0x63   : > { %2826 = vmatpush3.bf16.msra.mxu1 %v3010_v36  ;;  %v3079_v36 = vld [vmem:[%s3202_s7 + $0x200] ss:$12 sps:$4 sm:$0xff]  }
  0x64   : > { %2827 = vmatprep.subr.bf16.mxu1 %v3017_v41 }
  0x65   : > { %1159 = vmatmul.mubr.bf16.gmra.mxu0 %v2994_v37  ;;  %1351 = vmatmul.mubr.bf16.gmra.mxu1 %v2995_v38  ;;  %v3080_v37 = vld [vmem:[%s3202_s7 + $0x1cc] ss:$12 sps:$4 sm:$0xff]  }
  0x66   : > { %1166 = vmatprep.mubr.bf16.mxu0 %v2997_v39  ;;  %1358 = vmatprep.mubr.bf16.mxu1 %v2999_v40  ;;  %v3082_v38 = vld [vmem:[%s3202_s7 + $0x218] ss:$12 sps:$4 sm:$0xff]   ;;  %v3083_v39 = vld [vmem:[%s3202_s7 + $0x1c8] ss:$12 sps:$4 sm:$0xff]   ;;  %v3084_v40 = vld [vmem:[%s3202_s7 + $0x230] ss:$12 sps:$4 sm:$0xff]  }
  0x67   : > { %2828 = vmatpush3.bf16.msra.mxu1 %v3017_v41  ;;  %v3085_v41 = vld [vmem:[%s3202_s7 + $0x1e4] ss:$12 sps:$4 sm:$0xff]  }
  0x68   : > { %2829 = vmatprep.subr.bf16.mxu1 %v3024_v42 }
  0x6b   : > { %2830 = vmatpush3.bf16.msra.mxu1 %v3024_v42  ;;  %v3087_v42 = vld [vmem:[%s3202_s7 + $0x248] ss:$12 sps:$4 sm:$0xff]  }
  0x6d   : > { %1167 = vmatmul.mubr.bf16.gmra.mxu0 %v3001_v43  ;;  %1359 = vmatmul.mubr.bf16.gmra.mxu1 %v3002_v44  ;;  %v3088_v43 = vld [vmem:[%s3202_s7 + $0x1e0] ss:$12 sps:$4 sm:$0xff]  }
  0x6e   : > { %1174 = vmatprep.mubr.bf16.mxu0 %v3004_v45  ;;  %1366 = vmatprep.mubr.bf16.mxu1 %v3006_v46  ;;  %v3089_v44 = vld [vmem:[%s3202_s7 + $0x260] ss:$12 sps:$4 sm:$0xff]   ;;  %v3090_v45 = vld [vmem:[%s3202_s7 + $0x1fc] ss:$12 sps:$4 sm:$0xff]   ;;  %v3092_v46 = vld [vmem:[%s3202_s7 + $0x278] ss:$12 sps:$4 sm:$0xff]  }
  0x75   : > { %1175 = vmatmul.mubr.bf16.gmra.mxu0 %v3008_v47  ;;  %1367 = vmatmul.mubr.bf16.gmra.mxu1 %v3009_v48  ;;  %v3093_v47 = vld [vmem:[%s3202_s7 + $0x1f8] ss:$12 sps:$4 sm:$0xff]   ;;  %v3094_v48 = vld [vmem:[%s3202_s7 + $0x290] ss:$12 sps:$4 sm:$0xff]  }
  0x76   : > { %1182 = vmatprep.mubr.bf16.mxu0 %v3011_v49  ;;  %1374 = vmatprep.mubr.bf16.mxu1 %v3013_v50  ;;  %v3095_v49 = vld [vmem:[%s3202_s7 + $0x214] ss:$12 sps:$4 sm:$0xff]  }
  0x77   : > { %v3097_v50 = vld [vmem:[%s3202_s7 + $0x2a8] ss:$12 sps:$4 sm:$0xff]  }
  0x7d   : > { %1183 = vmatmul.mubr.bf16.gmra.mxu0 %v3015_v51  ;;  %1375 = vmatmul.mubr.bf16.gmra.mxu1 %v3016_v52  ;;  %v3098_v51 = vld [vmem:[%s3202_s7 + $0x210] ss:$12 sps:$4 sm:$0xff]   ;;  %v3099_v52 = vld [vmem:[%s3202_s7 + $0x2c0] ss:$12 sps:$4 sm:$0xff]  }
  0x7e   : > { %1190 = vmatprep.mubr.bf16.mxu0 %v3018_v53  ;;  %1382 = vmatprep.mubr.bf16.mxu1 %v3020_v54  ;;  %v3100_v53 = vld [vmem:[%s3202_s7 + $0x22c] ss:$12 sps:$4 sm:$0xff]  }
  0x7f   : > { %v3102_v54 = vld [vmem:[%s3202_s7 + $0x2d8] ss:$12 sps:$4 sm:$0xff]  }
  0x85   : > { %1191 = vmatmul.mubr.bf16.gmra.mxu0 %v3022_v55  ;;  %1383 = vmatmul.mubr.bf16.gmra.mxu1 %v3023_v56  ;;  %v3103_v55 = vld [vmem:[%s3202_s7 + $0x228] ss:$12 sps:$4 sm:$0xff]   ;;  %v3104_v56 = vld [vmem:[%s3202_s7 + $0x2f0] ss:$12 sps:$4 sm:$0xff]  }
  0x86   : > { %1198 = vmatprep.mubr.bf16.mxu0 %v3025_v57  ;;  %2831 = vmatprep.mubr.bf16.mxu1 %v3027_v58 }
  0x8d   : > { %1199 = vmatmul.mubr.bf16.gmra.mxu0 %v3028_v59  ;;  %2832 = vmatmul.mubr.bf16.vlgmr.msra.gmra.mxu1 %v3029_v60 }
  0x8e   : > { %1206 = vmatprep.mubr.bf16.mxu0 %v3030_v61  ;;  %2835 = vmatprep.mubr.bf16.mxu1 %v3032_v62 }
  0x95   : > { %1207 = vmatmul.mubr.bf16.gmra.mxu0 %v3033_v63  ;;  %2836 = vmatmul.mubr.bf16.gmra.mxu1 %v3034_v0 }
  0x96   : > { %1214 = vmatprep.mubr.bf16.mxu0 %v3035_v1  ;;  %2839 = vmatprep.mubr.bf16.mxu1 %v3037_v2 }
  0x9d   : > { %1215 = vmatmul.mubr.bf16.gmra.mxu0 %v3038_v3  ;;  %2840 = vmatmul.mubr.bf16.gmra.mxu1 %v3039_v4 }
  0x9e   : > { %1222 = vmatprep.mubr.bf16.mxu0 %v3040_v5  ;;  %2843 = vmatprep.mubr.bf16.mxu1 %v3042_v6 }
  0xa5   : > { %1223 = vmatmul.mubr.bf16.gmra.mxu0 %v3043_v7  ;;  %2844 = vmatmul.mubr.bf16.gmra.mxu1 %v3044_v8 }
  0xa6   : > { %1230 = vmatprep.mubr.bf16.mxu0 %v3045_v9  ;;  %2847 = vmatprep.mubr.bf16.mxu1 %v3047_v10 }
  0xad   : > { %1231 = vmatmul.mubr.bf16.gmra.mxu0 %v3048_v11  ;;  %2848 = vmatmul.mubr.bf16.gmra.mxu1 %v3049_v12 }
  0xae   : > { %1238 = vmatprep.mubr.bf16.mxu0 %v3050_v13  ;;  %2851 = vmatprep.mubr.bf16.mxu1 %v3052_v14 }
  0xb5   : > { %1239 = vmatmul.mubr.bf16.gmra.mxu0 %v3053_v15  ;;  %2852 = vmatmul.mubr.bf16.gmra.mxu1 %v3054_v16 }
  0xb6   : > { %1246 = vmatprep.mubr.bf16.mxu0 %v3055_v17  ;;  %2855 = vmatprep.mubr.bf16.mxu1 %v3057_v18 }
  0xbd   : > { %1247 = vmatmul.mubr.bf16.gmra.mxu0 %v3058_v19  ;;  %2856 = vmatmul.mubr.bf16.gmra.mxu1 %v3059_v20 }
  0xbe   : > { %1254 = vmatprep.mubr.bf16.mxu0 %v3060_v21  ;;  %2859 = vmatprep.mubr.bf16.mxu1 %v3062_v22 }
  0xc5   : > { %1255 = vmatmul.mubr.bf16.gmra.mxu0 %v3063_v23  ;;  %2860 = vmatmul.mubr.bf16.gmra.mxu1 %v3064_v24 }
  0xc6   : > { %1262 = vmatprep.mubr.bf16.mxu0 %v3065_v25  ;;  %2863 = vmatprep.mubr.bf16.mxu1 %v3067_v26 }
  0xcd   : > { %1263 = vmatmul.mubr.bf16.gmra.mxu0 %v3068_v27  ;;  %2864 = vmatmul.mubr.bf16.gmra.mxu1 %v3069_v28 }
  0xce   : > { %1270 = vmatprep.mubr.bf16.mxu0 %v3070_v29  ;;  %2867 = vmatprep.mubr.bf16.mxu1 %v3072_v30 }
  0xd5   : > { %1271 = vmatmul.mubr.bf16.gmra.mxu0 %v3073_v31  ;;  %2868 = vmatmul.mubr.bf16.gmra.mxu1 %v3074_v32 }
  0xd6   : > { %1278 = vmatprep.mubr.bf16.mxu0 %v3075_v33  ;;  %2871 = vmatprep.mubr.bf16.mxu1 %v3077_v34 }
  0xdd   : > { %1279 = vmatmul.mubr.bf16.gmra.mxu0 %v3078_v35  ;;  %2872 = vmatmul.mubr.bf16.gmra.mxu1 %v3079_v36 }
  0xde   : > { %1286 = vmatprep.mubr.bf16.mxu0 %v3080_v37  ;;  %2875 = vmatprep.mubr.bf16.mxu1 %v3082_v38 }
  0xe5   : > { %1287 = vmatmul.mubr.bf16.gmra.mxu0 %v3083_v39  ;;  %2876 = vmatmul.mubr.bf16.gmra.mxu1 %v3084_v40 }
  0xe6   : > { %1294 = vmatprep.mubr.bf16.mxu0 %v3085_v41  ;;  %2879 = vmatprep.mubr.bf16.mxu1 %v3087_v42 }
  0xed   : > { %1295 = vmatmul.mubr.bf16.gmra.mxu0 %v3088_v43  ;;  %2880 = vmatmul.mubr.bf16.gmra.mxu1 %v3089_v44 }
  0xee   : > { %1302 = vmatprep.mubr.bf16.mxu0 %v3090_v45  ;;  %2883 = vmatprep.mubr.bf16.mxu1 %v3092_v46 }
  0xf5   : > { %1303 = vmatmul.mubr.bf16.gmra.mxu0 %v3093_v47  ;;  %2884 = vmatmul.mubr.bf16.gmra.mxu1 %v3094_v48 }
  0xf6   : > { %1310 = vmatprep.mubr.bf16.mxu0 %v3095_v49  ;;  %2887 = vmatprep.mubr.bf16.mxu1 %v3097_v50 }
  0xfd   : > { %1311 = vmatmul.mubr.bf16.gmra.mxu0 %v3098_v51  ;;  %2888 = vmatmul.mubr.bf16.gmra.mxu1 %v3099_v52 }
  0xfe   : > { %1318 = vmatprep.mubr.bf16.mxu0 %v3100_v53  ;;  %2891 = vmatprep.mubr.bf16.mxu1 %v3102_v54 }
 0x105   : > { %1319 = vmatmul.mubr.bf16.gmra.mxu0 %v3103_v55  ;;  %2892 = vmatmul.mubr.bf16.gmra.mxu1 %v3104_v56 }
 0x10d   : > { %v3381_v57 = vpop.f32.mrf.mxu0  ;;  %v3383_v58 = vpop.f32.mrf.mxu1 }
 0x10f   : > { %v1138_v59 = vpop.f32.mrf.mxu0  ;;  %v1330_v60 = vpop.f32.mrf.mxu1 }
 0x111   : > { %v3385_v61 = vpop.f32.mrf.mxu0  ;;  %v3387_v62 = vpop.f32.mrf.mxu1 }
 0x113   : > { %v1141_v63 = vpop.f32.mrf.mxu0  ;;  %v1333_v0 = vpop.f32.mrf.mxu1 }
 0x114   : > { %v3448_v63 = vld [vmem:[%s3703_s2] ss:$0 sm:$0xff] }
 0x115   : > { %v1144_v1 = vpop.f32.mrf.mxu0  ;;  %v3389_v2 = vpop.f32.mrf.mxu1 }
 0x117   : > { %v1146_v3 = vpop.f32.mrf.mxu0  ;;  %v1338_v4 = vpop.f32.mrf.mxu1 }
 0x119   : > { %v3391_v5 = vpop.f32.mrf.mxu0  ;;  %v3393_v6 = vpop.f32.mrf.mxu1 }
 0x11b   : > { %v1149_v7 = vpop.f32.mrf.mxu0  ;;  %v1341_v8 = vpop.f32.mrf.mxu1 }
 0x11d   : > { %v3395_v9 = vpop.f32.mrf.mxu0  ;;  %v3397_v10 = vpop.f32.mrf.mxu1 }
 0x11f   : > { %v1154_v11 = vpop.f32.mrf.mxu0  ;;  %v1346_v12 = vpop.f32.mrf.mxu1 }
 0x120   : > { %v3455_v11 = vld [vmem:[%s3704_s3] ss:$0 sm:$0xff] }
 0x121   : > { %v3399_v13 = vpop.f32.mrf.mxu0  ;;  %v3401_v14 = vpop.f32.mrf.mxu1 }
 0x123   : > { %v1157_v15 = vpop.f32.mrf.mxu0  ;;  %v1349_v16 = vpop.f32.mrf.mxu1 }
 0x125   : > { %v3403_v17 = vpop.f32.mrf.mxu0  ;;  %v3405_v18 = vpop.f32.mrf.mxu1 }
 0x127   : > { %v1162_v19 = vpop.f32.mrf.mxu0  ;;  %v1354_v20 = vpop.f32.mrf.mxu1 }
 0x129   : > { %v3407_v21 = vpop.f32.mrf.mxu0  ;;  %v3409_v22 = vpop.f32.mrf.mxu1 }
 0x12b   : > { %v1165_v23 = vpop.f32.mrf.mxu0  ;;  %v1357_v24 = vpop.f32.mrf.mxu1 }
 0x12d   : > { %v3411_v25 = vpop.f32.mrf.mxu0  ;;  %v3413_v26 = vpop.f32.mrf.mxu1 }
 0x12f   : > { %v1170_v27 = vpop.f32.mrf.mxu0  ;;  %v1362_v28 = vpop.f32.mrf.mxu1 }
 0x131   : > { %v3415_v29 = vpop.f32.mrf.mxu0  ;;  %v3417_v30 = vpop.f32.mrf.mxu1 }
 0x133   : > { %v1173_v31 = vpop.f32.mrf.mxu0  ;;  %v1365_v32 = vpop.f32.mrf.mxu1 }
 0x135   : > { %v3419_v33 = vpop.f32.mrf.mxu0  ;;  %v3421_v34 = vpop.f32.mrf.mxu1 }
 0x137   : > { %v1178_v35 = vpop.f32.mrf.mxu0  ;;  %v1370_v36 = vpop.f32.mrf.mxu1 }
 0x139   : > { %v3423_v37 = vpop.f32.mrf.mxu0  ;;  %v3425_v38 = vpop.f32.mrf.mxu1 }
 0x13b   : > { %v1181_v39 = vpop.f32.mrf.mxu0  ;;  %v1373_v40 = vpop.f32.mrf.mxu1 }
 0x13d   : > { %v3427_v41 = vpop.f32.mrf.mxu0  ;;  %v3429_v42 = vpop.f32.mrf.mxu1 }
 0x13f   : > { %v1186_v43 = vpop.f32.mrf.mxu0  ;;  %v1378_v44 = vpop.f32.mrf.mxu1 }
 0x141   : > { %v3431_v45 = vpop.f32.mrf.mxu0  ;;  %v3433_v46 = vpop.f32.mrf.mxu1 }
 0x143   : > { %v1189_v47 = vpop.f32.mrf.mxu0  ;;  %v1381_v48 = vpop.f32.mrf.mxu1 }
 0x145   : > { %v3435_v49 = vpop.f32.mrf.mxu0  ;;  %v3437_v50 = vpop.f32.mrf.mxu1 }
 0x147   : > { %v1194_v51 = vpop.f32.mrf.mxu0  ;;  %v1386_v52 = vpop.f32.mrf.mxu1 }
 0x149   : > { %v3439_v53 = vpop.f32.mrf.mxu0  ;;  %v3441_v54 = vpop.f32.mrf.mxu1 }
 0x14b   : > { %v1197_v55 = vpop.f32.mrf.mxu0  ;;  %v1389_v56 = vpop.f32.mrf.mxu1 }
 0x14d   : > { %v3443_v59 = vpop.f32.mrf.mxu0  ;;  %v2833_v60 = vpop.f32.mrf.mxu1 }
 0x14e   : > { %v1434_v0 = vadd.f32 %v2833_v60, %v1144_v1 }
 0x14f   : > { %v1202_v3 = vpop.f32.mrf.mxu0  ;;  %v1425_v4 = vpop.f32.mrf.mxu1 }
 0x150   : > { %v1689_v7 = vmul.f32 %v3448_v63, %v1434_v0  ;;  %v1426_v8 = vadd.f32 %v1425_v4, %v3381_v57 }
 0x151   : > { %v3457_v12 = vpop.f32.mrf.mxu0  ;;  %v2834_v15 = vpop.f32.mrf.mxu1 }
 0x152   : > { %v1687_v16 = vmul.f32 %v3448_v63, %v1426_v8  ;;  %v1437_v19 = vadd.f32 %v2834_v15, %v3391_v5  ;;  %v1760_v23 = vadd.f32 %v3455_v11, %v1689_v7 }
 0x153   : > { %v1205_v1 = vpop.f32.mrf.mxu0  ;;  %v1428_v20 = vpop.f32.mrf.mxu1 }
 0x154   : > { %v1690_v24 = vmul.f32 %v3448_v63, %v1437_v19  ;;  %v1429_v57 = vadd.f32 %v1428_v20, %v3385_v61  ;;  %v1758_v31 = vadd.f32 %v3455_v11, %v1687_v16  ;;  %v1824_v40 = vmax.f32 %v1760_v23, 0.0 }
 0x155   : > { %v3464_v27 = vpop.f32.mrf.mxu0  ;;  %v2837_v28 = vpop.f32.mrf.mxu1 }
 0x156   : > { %v1761_v32 = vadd.f32 %v3455_v11, %v1690_v24  ;;  %v1688_v35 = vmul.f32 %v3448_v63, %v1429_v57  ;;  %v1450_v5 = vadd.f32 %v2837_v28, %v3403_v17  ;;  %v1822_v51 = vmax.f32 %v1758_v31, 0.0 }
 0x157   : > { %v1210_v36 = vpop.f32.mrf.mxu0  ;;  %v1441_v39 = vpop.f32.mrf.mxu1 }
 0x158   : > { %v1825_v43 = vmax.f32 %v1761_v32, 0.0  ;;  %v1759_v44 = vadd.f32 %v3455_v11, %v1688_v35  ;;  %v1442_v61 = vadd.f32 %v1441_v39, %v3395_v9  ;;  %v1693_v47 = vmul.f32 %v3448_v63, %v1450_v5 }
 0x159   : > { %v3479_v48 = vpop.f32.mrf.mxu0  ;;  %v2838_v17 = vpop.f32.mrf.mxu1 }
 0x15a   : > { %v2592_v52 = vpack.c.bf16 %v1825_v43, %v1824_v40  ;;  %v1823_v55 = vmax.f32 %v1759_v44, 0.0  ;;  %v1691_v56 = vmul.f32 %v3448_v63, %v1442_v61  ;;  %v1453_v60 = vadd.f32 %v2838_v17, %v3407_v21 }
 0x15b   : > { %v1213_v9 = vpop.f32.mrf.mxu0  ;;  %v1444_v0 = vpop.f32.mrf.mxu1  ;;  %v1764_v7 = vadd.f32 %v3455_v11, %v1693_v47 }
 0x15c   : > { %2744 = vst [vmem:[%s3476_s10 + $0x8] sm:$0xff] %v2592_v52   ;;  %v2587_v3 = vpack.c.bf16 %v1823_v55, %v1822_v51  ;;  %v1445_v4 = vadd.f32 %v1444_v0, %v3399_v13  ;;  %v1694_v8 = vmul.f32 %v3448_v63, %v1453_v60  ;;  %v1762_v19 = vadd.f32 %v3455_v11, %v1691_v56 }
 0x15d   : > { %v3487_v15 = vpop.f32.mrf.mxu0  ;;  %v2841_v16 = vpop.f32.mrf.mxu1  ;;  %v1828_v31 = vmax.f32 %v1764_v7, 0.0 }
 0x15e   : > { %2588 = vst [vmem:[%s3476_s10] sm:$0xff] %v2587_v3   ;;  %v1692_v1 = vmul.f32 %v3448_v63, %v1445_v4  ;;  %v1466_v21 = vadd.f32 %v2841_v16, %v3419_v33  ;;  %v1765_v20 = vadd.f32 %v3455_v11, %v1694_v8  ;;  %v1826_v36 = vmax.f32 %v1762_v19, 0.0 }
 0x15f   : > { %v1218_v23 = vpop.f32.mrf.mxu0  ;;  %v1457_v24 = vpop.f32.mrf.mxu1 }
 0x160   : > { %v1763_v13 = vadd.f32 %v3455_v11, %v1692_v1  ;;  %v1697_v57 = vmul.f32 %v3448_v63, %v1466_v21  ;;  %v1458_v28 = vadd.f32 %v1457_v24, %v3411_v25  ;;  %v1829_v32 = vmax.f32 %v1765_v20, 0.0 }
 0x161   : > { %v3497_v35 = vpop.f32.mrf.mxu0  ;;  %v2842_v5 = vpop.f32.mrf.mxu1 }
 0x162   : > { %v1827_v39 = vmax.f32 %v1763_v13, 0.0  ;;  %v1469_v33 = vadd.f32 %v2842_v5, %v3423_v37  ;;  %v2602_v40 = vpack.c.bf16 %v1829_v32, %v1828_v31  ;;  %v1695_v43 = vmul.f32 %v3448_v63, %v1458_v28 }
 0x163   : > { %v1221_v44 = vpop.f32.mrf.mxu0  ;;  %v1460_v61 = vpop.f32.mrf.mxu1  ;;  %v1768_v17 = vadd.f32 %v3455_v11, %v1697_v57 }
 0x164   : > { %v2597_v47 = vpack.c.bf16 %v1827_v39, %v1826_v36  ;;  %v1698_v25 = vmul.f32 %v3448_v63, %v1469_v33  ;;  %2746 = vst [vmem:[%s3476_s10 + $0x18] sm:$0xff] %v2602_v40   ;;  %v1461_v51 = vadd.f32 %v1460_v61, %v3415_v29  ;;  %v1766_v60 = vadd.f32 %v3455_v11, %v1695_v43 }
 0x165   : > { %v1224_v52 = vpop.f32.mrf.mxu0  ;;  %v2845_v55 = vpop.f32.mrf.mxu1  ;;  %v1832_v4 = vmax.f32 %v1768_v17, 0.0 }
 0x166   : > { %2745 = vst [vmem:[%s3476_s10 + $0x10] sm:$0xff] %v2597_v47   ;;  %v1769_v56 = vadd.f32 %v3455_v11, %v1698_v25  ;;  %v1482_v37 = vadd.f32 %v2845_v55, %v3435_v49  ;;  %v1696_v9 = vmul.f32 %v3448_v63, %v1461_v51  ;;  %v1830_v23 = vmax.f32 %v1766_v60, 0.0 }
 0x167   : > { %v1226_v0 = vpop.f32.mrf.mxu0  ;;  %v1473_v3 = vpop.f32.mrf.mxu1 }
 0x168   : > { %v1833_v7 = vmax.f32 %v1769_v56, 0.0  ;;  %v1701_v8 = vmul.f32 %v3448_v63, %v1482_v37  ;;  %v1474_v29 = vadd.f32 %v1473_v3, %v3427_v41  ;;  %v1767_v16 = vadd.f32 %v3455_v11, %v1696_v9 }
 0x169   : > { %v1227_v19 = vpop.f32.mrf.mxu0  ;;  %v2846_v1 = vpop.f32.mrf.mxu1 }
 0x16a   : > { %v2612_v21 = vpack.c.bf16 %v1833_v7, %v1832_v4  ;;  %v1699_v49 = vmul.f32 %v3448_v63, %v1474_v29  ;;  %v1485_v20 = vadd.f32 %v2846_v1, %v3439_v53  ;;  %v1831_v24 = vmax.f32 %v1767_v16, 0.0 }
 0x16b   : > { %v1229_v13 = vpop.f32.mrf.mxu0  ;;  %v1476_v57 = vpop.f32.mrf.mxu1  ;;  %v1772_v28 = vadd.f32 %v3455_v11, %v1701_v8 }
 0x16c   : > { %2748 = vst [vmem:[%s3476_s10 + $0x28] sm:$0xff] %v2612_v21   ;;  %v1702_v31 = vmul.f32 %v3448_v63, %v1485_v20  ;;  %v1477_v41 = vadd.f32 %v1476_v57, %v3431_v45  ;;  %v2607_v32 = vpack.c.bf16 %v1831_v24, %v1830_v23  ;;  %v1770_v39 = vadd.f32 %v3455_v11, %v1699_v49 }
 0x16d   : > { %v3519_v5 = vpop.f32.mrf.mxu0  ;;  %v2849_v36 = vpop.f32.mrf.mxu1  ;;  %v1836_v61 = vmax.f32 %v1772_v28, 0.0 }
 0x16e   : > { %v1773_v53 = vadd.f32 %v3455_v11, %v1702_v31  ;;  %v1700_v33 = vmul.f32 %v3448_v63, %v1477_v41  ;;  %v1498_v40 = vadd.f32 %v2849_v36, %v3464_v27  ;;  %2747 = vst [vmem:[%s3476_s10 + $0x20] sm:$0xff] %v2607_v32   ;;  %v1834_v56 = vmax.f32 %v1770_v39, 0.0 }
 0x16f   : > { %v1234_v43 = vpop.f32.mrf.mxu0  ;;  %v1489_v44 = vpop.f32.mrf.mxu1 }
 0x170   : > { %v1837_v47 = vmax.f32 %v1773_v53, 0.0  ;;  %v1771_v45 = vadd.f32 %v3455_v11, %v1700_v33  ;;  %v1490_v17 = vadd.f32 %v1489_v44, %v3443_v59  ;;  %v1705_v25 = vmul.f32 %v3448_v63, %v1498_v40 }
 0x171   : > { %v3529_v51 = vpop.f32.mrf.mxu0  ;;  %v2850_v55 = vpop.f32.mrf.mxu1 }
 0x172   : > { %v2622_v37 = vpack.c.bf16 %v1837_v47, %v1836_v61  ;;  %v1835_v60 = vmax.f32 %v1771_v45, 0.0  ;;  %v1703_v27 = vmul.f32 %v3448_v63, %v1490_v17  ;;  %v1501_v9 = vadd.f32 %v2850_v55, %v3479_v48 }
 0x173   : > { %v1237_v0 = vpop.f32.mrf.mxu0  ;;  %v1492_v3 = vpop.f32.mrf.mxu1  ;;  %v1776_v59 = vadd.f32 %v3455_v11, %v1705_v25 }
 0x174   : > { %2750 = vst [vmem:[%s3476_s10 + $0x38] sm:$0xff] %v2622_v37   ;;  %v2617_v4 = vpack.c.bf16 %v1835_v60, %v1834_v56  ;;  %v1493_v7 = vadd.f32 %v1492_v3, %v3457_v12  ;;  %v1706_v8 = vmul.f32 %v3448_v63, %v1501_v9  ;;  %v1774_v1 = vadd.f32 %v3455_v11, %v1703_v27 }
 0x175   : > { %v1240_v29 = vpop.f32.mrf.mxu0  ;;  %v2853_v16 = vpop.f32.mrf.mxu1  ;;  %v1840_v57 = vmax.f32 %v1776_v59, 0.0 }
 0x176   : > { %2749 = vst [vmem:[%s3476_s10 + $0x30] sm:$0xff] %v2617_v4   ;;  %v1704_v21 = vmul.f32 %v3448_v63, %v1493_v7  ;;  %v1514_v49 = vadd.f32 %v2853_v16, %v1224_v52  ;;  %v1777_v48 = vadd.f32 %v3455_v11, %v1706_v8  ;;  %v1838_v32 = vmax.f32 %v1774_v1, 0.0 }
 0x177   : > { %v1242_v20 = vpop.f32.mrf.mxu0  ;;  %v1505_v23 = vpop.f32.mrf.mxu1 }
 0x178   : > { %v1775_v24 = vadd.f32 %v3455_v11, %v1704_v21  ;;  %v1709_v12 = vmul.f32 %v3448_v63, %v1514_v49  ;;  %v1506_v13 = vadd.f32 %v1505_v23, %v3487_v15  ;;  %v1841_v28 = vmax.f32 %v1777_v48, 0.0 }
 0x179   : > { %v1243_v31 = vpop.f32.mrf.mxu0  ;;  %v2854_v41 = vpop.f32.mrf.mxu1 }
 0x17a   : > { %v1839_v36 = vmax.f32 %v1775_v24, 0.0  ;;  %v1517_v39 = vadd.f32 %v2854_v41, %v1227_v19  ;;  %v2632_v52 = vpack.c.bf16 %v1841_v28, %v1840_v57  ;;  %v1707_v53 = vmul.f32 %v3448_v63, %v1506_v13 }
 0x17b   : > { %v1245_v33 = vpop.f32.mrf.mxu0  ;;  %v1508_v40 = vpop.f32.mrf.mxu1  ;;  %v1780_v44 = vadd.f32 %v3455_v11, %v1709_v12 }
 0x17c   : > { %v2627_v43 = vpack.c.bf16 %v1839_v36, %v1838_v32  ;;  %v1710_v61 = vmul.f32 %v3448_v63, %v1517_v39  ;;  %2752 = vst [vmem:[%s3476_s10 + $0x48] sm:$0xff] %v2632_v52   ;;  %v1509_v15 = vadd.f32 %v1508_v40, %v3497_v35  ;;  %v1778_v19 = vadd.f32 %v3455_v11, %v1707_v53 }
 0x17d   : > { %v1248_v47 = vpop.f32.mrf.mxu0  ;;  %v2857_v45 = vpop.f32.mrf.mxu1  ;;  %v1844_v60 = vmax.f32 %v1780_v44, 0.0 }
 0x17e   : > { %2751 = vst [vmem:[%s3476_s10 + $0x40] sm:$0xff] %v2627_v43   ;;  %v1781_v17 = vadd.f32 %v3455_v11, %v1710_v61  ;;  %v1530_v25 = vadd.f32 %v2857_v45, %v1240_v29  ;;  %v1708_v55 = vmul.f32 %v3448_v63, %v1509_v15  ;;  %v1842_v29 = vmax.f32 %v1778_v19, 0.0 }
 0x17f   : > { %v1250_v56 = vpop.f32.mrf.mxu0  ;;  %v1521_v37 = vpop.f32.mrf.mxu1 }
 0x180   : > { %v1845_v27 = vmax.f32 %v1781_v17, 0.0  ;;  %v1713_v9 = vmul.f32 %v3448_v63, %v1530_v25  ;;  %v1522_v0 = vadd.f32 %v1521_v37, %v3519_v5  ;;  %v1779_v35 = vadd.f32 %v3455_v11, %v1708_v55 }
 0x181   : > { %v1251_v3 = vpop.f32.mrf.mxu0  ;;  %v2858_v4 = vpop.f32.mrf.mxu1 }
 0x182   : > { %v2642_v7 = vpack.c.bf16 %v1845_v27, %v1844_v60  ;;  %v1711_v59 = vmul.f32 %v3448_v63, %v1522_v0  ;;  %v1533_v8 = vadd.f32 %v2858_v4, %v1243_v31  ;;  %v1843_v16 = vmax.f32 %v1779_v35, 0.0 }
 0x183   : > { %v1253_v1 = vpop.f32.mrf.mxu0  ;;  %v1524_v21 = vpop.f32.mrf.mxu1  ;;  %v1784_v49 = vadd.f32 %v3455_v11, %v1713_v9 }
 0x184   : > { %2754 = vst [vmem:[%s3476_s10 + $0x58] sm:$0xff] %v2642_v7   ;;  %v1714_v48 = vmul.f32 %v3448_v63, %v1533_v8  ;;  %v1525_v5 = vadd.f32 %v1524_v21, %v3529_v51  ;;  %v2637_v20 = vpack.c.bf16 %v1843_v16, %v1842_v29  ;;  %v1782_v12 = vadd.f32 %v3455_v11, %v1711_v59 }
 0x185   : > { %v1256_v23 = vpop.f32.mrf.mxu0  ;;  %v2861_v24 = vpop.f32.mrf.mxu1  ;;  %v1848_v32 = vmax.f32 %v1784_v49, 0.0 }
 0x186   : > { %v1785_v13 = vadd.f32 %v3455_v11, %v1714_v48  ;;  %v1712_v57 = vmul.f32 %v3448_v63, %v1525_v5  ;;  %v1546_v28 = vadd.f32 %v2861_v24, %v1256_v23  ;;  %2753 = vst [vmem:[%s3476_s10 + $0x50] sm:$0xff] %v2637_v20   ;;  %v1846_v40 = vmax.f32 %v1782_v12, 0.0 }
 0x187   : > { %v1258_v31 = vpop.f32.mrf.mxu0  ;;  %v1537_v41 = vpop.f32.mrf.mxu1 }
 0x188   : > { %v1849_v36 = vmax.f32 %v1785_v13, 0.0  ;;  %v1783_v39 = vadd.f32 %v3455_v11, %v1712_v57  ;;  %v1538_v52 = vadd.f32 %v1537_v41, %v1248_v47  ;;  %v1717_v51 = vmul.f32 %v3448_v63, %v1546_v28 }
 0x189   : > { %v1259_v53 = vpop.f32.mrf.mxu0  ;;  %v2862_v33 = vpop.f32.mrf.mxu1 }
 0x18a   : > { %v2652_v43 = vpack.c.bf16 %v1849_v36, %v1848_v32  ;;  %v1847_v44 = vmax.f32 %v1783_v39, 0.0  ;;  %v1715_v61 = vmul.f32 %v3448_v63, %v1538_v52  ;;  %v1549_v15 = vadd.f32 %v2862_v33, %v1259_v53 }
 0x18b   : > { %v1261_v45 = vpop.f32.mrf.mxu0  ;;  %v1540_v17 = vpop.f32.mrf.mxu1  ;;  %v1788_v55 = vadd.f32 %v3455_v11, %v1717_v51 }
 0x18c   : > { %2756 = vst [vmem:[%s3476_s10 + $0x68] sm:$0xff] %v2652_v43   ;;  %v2647_v25 = vpack.c.bf16 %v1847_v44, %v1846_v40  ;;  %v1541_v19 = vadd.f32 %v1540_v17, %v1251_v3  ;;  %v1718_v47 = vmul.f32 %v3448_v63, %v1549_v15  ;;  %v1786_v60 = vadd.f32 %v3455_v11, %v1715_v61 }
 0x18d   : > { %v1264_v56 = vpop.f32.mrf.mxu0  ;;  %v2865_v37 = vpop.f32.mrf.mxu1  ;;  %v1852_v3 = vmax.f32 %v1788_v55, 0.0 }
 0x18e   : > { %2755 = vst [vmem:[%s3476_s10 + $0x60] sm:$0xff] %v2647_v25   ;;  %v1716_v27 = vmul.f32 %v3448_v63, %v1541_v19  ;;  %v1789_v9 = vadd.f32 %v3455_v11, %v1718_v47  ;;  %v1850_v16 = vmax.f32 %v1786_v60, 0.0 }
 0x18f   : > { %v1266_v0 = vpop.f32.mrf.mxu0  ;;  %v1553_v35 = vpop.f32.mrf.mxu1 }
 0x190   : > { %v1787_v4 = vadd.f32 %v3455_v11, %v1716_v27  ;;  %v1554_v7 = vadd.f32 %v1553_v35, %v1264_v56  ;;  %v1853_v59 = vmax.f32 %v1789_v9, 0.0 }
 0x191   : > { %v1267_v8 = vpop.f32.mrf.mxu0  ;;  %v2866_v29 = vpop.f32.mrf.mxu1 }
 0x192   : > { %v1851_v1 = vmax.f32 %v1787_v4, 0.0  ;;  %v1719_v21 = vmul.f32 %v3448_v63, %v1554_v7  ;;  %v2662_v49 = vpack.c.bf16 %v1853_v59, %v1852_v3 }
 0x193   : > { %v1269_v48 = vpop.f32.mrf.mxu0  ;;  %v1556_v5 = vpop.f32.mrf.mxu1 }
 0x194   : > { %v2657_v20 = vpack.c.bf16 %v1851_v1, %v1850_v16  ;;  %v1557_v23 = vadd.f32 %v1556_v5, %v1267_v8  ;;  %2758 = vst [vmem:[%s3476_s10 + $0x78] sm:$0xff] %v2662_v49   ;;  %v1790_v13 = vadd.f32 %v3455_v11, %v1719_v21 }
 0x195   : > { %v1272_v24 = vpop.f32.mrf.mxu0  ;;  %v2869_v12 = vpop.f32.mrf.mxu1 }
 0x196   : > { %2757 = vst [vmem:[%s3476_s10 + $0x70] sm:$0xff] %v2657_v20   ;;  %v1720_v57 = vmul.f32 %v3448_v63, %v1557_v23  ;;  %v1562_v28 = vadd.f32 %v2865_v37, %v1272_v24  ;;  %v1854_v51 = vmax.f32 %v1790_v13, 0.0 }
 0x197   : > { %v1274_v31 = vpop.f32.mrf.mxu0  ;;  %v1569_v41 = vpop.f32.mrf.mxu1 }
 0x198   : > { %v1791_v32 = vadd.f32 %v3455_v11, %v1720_v57  ;;  %v1721_v36 = vmul.f32 %v3448_v63, %v1562_v28 }
 0x199   : > { %v1275_v39 = vpop.f32.mrf.mxu0  ;;  %v2870_v52 = vpop.f32.mrf.mxu1 }
 0x19a   : > { %v1855_v53 = vmax.f32 %v1791_v32, 0.0  ;;  %v1565_v33 = vadd.f32 %v2866_v29, %v1275_v39  ;;  %v1792_v61 = vadd.f32 %v3455_v11, %v1721_v36 }
 0x19b   : > { %v1277_v40 = vpop.f32.mrf.mxu0  ;;  %v1572_v43 = vpop.f32.mrf.mxu1 }
 0x19c   : > { %v2667_v44 = vpack.c.bf16 %v1855_v53, %v1854_v51  ;;  %v1722_v15 = vmul.f32 %v3448_v63, %v1565_v33  ;;  %v1856_v56 = vmax.f32 %v1792_v61, 0.0 }
 0x19d   : > { %v1280_v45 = vpop.f32.mrf.mxu0  ;;  %v3585_v17 = vpop.f32.mrf.mxu1 }
 0x19e   : > { %2759 = vst [vmem:[%s3476_s10 + $0x80] sm:$0xff] %v2667_v44   ;;  %v1793_v25 = vadd.f32 %v3455_v11, %v1722_v15  ;;  %v1570_v19 = vadd.f32 %v1569_v41, %v1280_v45 }
 0x19f   : > { %v1282_v55 = vpop.f32.mrf.mxu0  ;;  %v1585_v47 = vpop.f32.mrf.mxu1 }
 0x1a0   : > { %v1857_v37 = vmax.f32 %v1793_v25, 0.0  ;;  %v1723_v60 = vmul.f32 %v3448_v63, %v1570_v19 }
 0x1a1   : > { %v1283_v27 = vpop.f32.mrf.mxu0  ;;  %v3590_v9 = vpop.f32.mrf.mxu1 }
 0x1a2   : > { %v2672_v0 = vpack.c.bf16 %v1857_v37, %v1856_v56  ;;  %v1573_v35 = vadd.f32 %v1572_v43, %v1283_v27  ;;  %v1794_v3 = vadd.f32 %v3455_v11, %v1723_v60 }
 0x1a3   : > { %v1285_v4 = vpop.f32.mrf.mxu0  ;;  %v1588_v7 = vpop.f32.mrf.mxu1 }
 0x1a4   : > { %2760 = vst [vmem:[%s3476_s10 + $0x88] sm:$0xff] %v2672_v0   ;;  %v1724_v59 = vmul.f32 %v3448_v63, %v1573_v35  ;;  %v1858_v48 = vmax.f32 %v1794_v3, 0.0 }
 0x1a5   : > { %v1288_v8 = vpop.f32.mrf.mxu0  ;;  %v3595_v29 = vpop.f32.mrf.mxu1 }
 0x1a6   : > { %v1795_v16 = vadd.f32 %v3455_v11, %v1724_v59  ;;  %v1578_v1 = vadd.f32 %v2869_v12, %v1288_v8 }
 0x1a7   : > { %v1290_v21 = vpop.f32.mrf.mxu0  ;;  %v3598_v49 = vpop.f32.mrf.mxu1 }
 0x1a8   : > { %v1859_v5 = vmax.f32 %v1795_v16, 0.0  ;;  %v1725_v20 = vmul.f32 %v3448_v63, %v1578_v1 }
 0x1a9   : > { %v1291_v23 = vpop.f32.mrf.mxu0  ;;  %v3601_v24 = vpop.f32.mrf.mxu1 }
 0x1aa   : > { %v2677_v13 = vpack.c.bf16 %v1859_v5, %v1858_v48  ;;  %v1581_v57 = vadd.f32 %v2870_v52, %v1291_v23  ;;  %v1796_v41 = vadd.f32 %v3455_v11, %v1725_v20 }
 0x1ab   : > { %v1293_v28 = vpop.f32.mrf.mxu0  ;;  %v3603_v31 = vpop.f32.mrf.mxu1 }
 0x1ac   : > { %2761 = vst [vmem:[%s3476_s10 + $0x90] sm:$0xff] %v2677_v13   ;;  %v1726_v12 = vmul.f32 %v3448_v63, %v1581_v57  ;;  %v1860_v43 = vmax.f32 %v1796_v41, 0.0 }
 0x1ad   : > { %v1296_v32 = vpop.f32.mrf.mxu0  ;;  %v2881_v36 = vpop.f32.mrf.mxu1 }
 0x1ae   : > { %v1797_v39 = vadd.f32 %v3455_v11, %v1726_v12  ;;  %v1586_v51 = vadd.f32 %v1585_v47, %v1296_v32  ;;  %v1626_v53 = vadd.f32 %v2881_v36, %v3389_v2 }
 0x1af   : > { %v1298_v33 = vpop.f32.mrf.mxu0  ;;  %v1617_v40 = vpop.f32.mrf.mxu1 }
 0x1b0   : > { %v1861_v52 = vmax.f32 %v1797_v39, 0.0  ;;  %v1618_v44 = vadd.f32 %v1617_v40, %v3383_v58  ;;  %v1727_v61 = vmul.f32 %v3448_v63, %v1586_v51  ;;  %v1737_v15 = vmul.f32 %v3448_v63, %v1626_v53 }
 0x1b1   : > { %v1299_v45 = vpop.f32.mrf.mxu0  ;;  %v2882_v25 = vpop.f32.mrf.mxu1 }
 0x1b2   : > { %v2682_v19 = vpack.c.bf16 %v1861_v52, %v1860_v43  ;;  %v1735_v55 = vmul.f32 %v3448_v63, %v1618_v44  ;;  %v1589_v56 = vadd.f32 %v1588_v7, %v1299_v45  ;;  %v1629_v47 = vadd.f32 %v2882_v25, %v3393_v6 }
 0x1b3   : > { %v1301_v2 = vpop.f32.mrf.mxu0  ;;  %v1620_v37 = vpop.f32.mrf.mxu1  ;;  %v1798_v27 = vadd.f32 %v3455_v11, %v1727_v61  ;;  %v1808_v58 = vadd.f32 %v3455_v11, %v1737_v15 }
 0x1b4   : > { %2762 = vst [vmem:[%s3476_s10 + $0x98] sm:$0xff] %v2682_v19   ;;  %v1621_v60 = vadd.f32 %v1620_v37, %v3387_v62  ;;  %v1728_v0 = vmul.f32 %v3448_v63, %v1589_v56  ;;  %v1738_v35 = vmul.f32 %v3448_v63, %v1629_v47  ;;  %v1806_v59 = vadd.f32 %v3455_v11, %v1735_v55 }
 0x1b5   : > { %v1304_v4 = vpop.f32.mrf.mxu0  ;;  %v2885_v3 = vpop.f32.mrf.mxu1  ;;  %v1862_v13 = vmax.f32 %v1798_v27, 0.0  ;;  %v1872_v57 = vmax.f32 %v1808_v58, 0.0 }
 0x1b6   : > { %v1736_v7 = vmul.f32 %v3448_v63, %v1621_v60  ;;  %v1594_v6 = vadd.f32 %v3585_v17, %v1304_v4  ;;  %v1642_v8 = vadd.f32 %v2885_v3, %v3405_v18  ;;  %v1799_v62 = vadd.f32 %v3455_v11, %v1728_v0 }
 0x1b7   : > { %v1809_v16 = vadd.f32 %v3455_v11, %v1738_v35  ;;  %v1306_v1 = vpop.f32.mrf.mxu0  ;;  %v1633_v21 = vpop.f32.mrf.mxu1  ;;  %v1870_v12 = vmax.f32 %v1806_v59, 0.0 }
 0x1b8   : > { %v1807_v48 = vadd.f32 %v3455_v11, %v1736_v7  ;;  %v1729_v5 = vmul.f32 %v3448_v63, %v1594_v6  ;;  %v1741_v20 = vmul.f32 %v3448_v63, %v1642_v8  ;;  %v1634_v23 = vadd.f32 %v1633_v21, %v3397_v10 }
 0x1b9   : > { %v1863_v28 = vmax.f32 %v1799_v62, 0.0  ;;  %v1873_v17 = vmax.f32 %v1809_v16, 0.0  ;;  %v1307_v18 = vpop.f32.mrf.mxu0  ;;  %v2886_v41 = vpop.f32.mrf.mxu1 }
 0x1ba   : > { %v1871_v32 = vmax.f32 %v1807_v48, 0.0  ;;  %v1739_v36 = vmul.f32 %v3448_v63, %v1634_v23  ;;  %v1597_v53 = vadd.f32 %v3590_v9, %v1307_v18  ;;  %v1645_v33 = vadd.f32 %v2886_v41, %v3409_v22 }
 0x1bb   : > { %v2687_v39 = vpack.c.bf16 %v1863_v28, %v1862_v13  ;;  %v2712_v51 = vpack.c.bf16 %v1873_v17, %v1872_v57  ;;  %v1309_v10 = vpop.f32.mrf.mxu0  ;;  %v1636_v40 = vpop.f32.mrf.mxu1  ;;  %v1800_v52 = vadd.f32 %v3455_v11, %v1729_v5  ;;  %v1812_v44 = vadd.f32 %v3455_v11, %v1741_v20 }
 0x1bc   : > { %v2707_v43 = vpack.c.bf16 %v1871_v32, %v1870_v12  ;;  %v1730_v61 = vmul.f32 %v3448_v63, %v1597_v53  ;;  %v1742_v15 = vmul.f32 %v3448_v63, %v1645_v33  ;;  %v1637_v45 = vadd.f32 %v1636_v40, %v3401_v14 }
 0x1bd   : > { %2763 = vst [vmem:[%s3476_s10 + $0xa0] sm:$0xff] %v2687_v39   ;;  %2768 = vst [vmem:[%s3476_s10 + $0xc8] sm:$0xff] %v2712_v51   ;;  %v1312_v25 = vpop.f32.mrf.mxu0  ;;  %v2889_v19 = vpop.f32.mrf.mxu1  ;;  %v1810_v22 = vadd.f32 %v3455_v11, %v1739_v36  ;;  %v1864_v27 = vmax.f32 %v1800_v52, 0.0  ;;  %v1876_v58 = vmax.f32 %v1812_v44, 0.0 }
 0x1be   : > { %2767 = vst [vmem:[%s3476_s10 + $0xc0] sm:$0xff] %v2707_v43   ;;  %v1602_v9 = vadd.f32 %v3598_v49, %v1312_v25  ;;  %v1658_v55 = vadd.f32 %v2889_v19, %v3421_v34  ;;  %v1801_v56 = vadd.f32 %v3455_v11, %v1730_v61  ;;  %v1813_v47 = vadd.f32 %v3455_v11, %v1742_v15 }
 0x1bf   : > { %v1740_v2 = vmul.f32 %v3448_v63, %v1637_v45  ;;  %v1314_v37 = vpop.f32.mrf.mxu0  ;;  %v1649_v60 = vpop.f32.mrf.mxu1  ;;  %v1874_v7 = vmax.f32 %v1810_v22, 0.0 }
 0x1c0   : > { %v1731_v14 = vmul.f32 %v3448_v63, %v1602_v9  ;;  %v1650_v0 = vadd.f32 %v1649_v60, %v3413_v26  ;;  %v1865_v35 = vmax.f32 %v1801_v56, 0.0  ;;  %v1877_v4 = vmax.f32 %v1813_v47, 0.0 }
 0x1c1   : > { %v1811_v49 = vadd.f32 %v3455_v11, %v1740_v2  ;;  %v1745_v34 = vmul.f32 %v3448_v63, %v1658_v55  ;;  %v1315_v3 = vpop.f32.mrf.mxu0  ;;  %v2890_v59 = vpop.f32.mrf.mxu1 }
 0x1c2   : > { %v1743_v6 = vmul.f32 %v3448_v63, %v1650_v0  ;;  %v1605_v8 = vadd.f32 %v3603_v31, %v1315_v3  ;;  %v2692_v62 = vpack.c.bf16 %v1865_v35, %v1864_v27  ;;  %v2722_v16 = vpack.c.bf16 %v1877_v4, %v1876_v58 }
 0x1c3   : > { %v1875_v1 = vmax.f32 %v1811_v49, 0.0  ;;  %v1661_v26 = vadd.f32 %v2890_v59, %v3425_v38  ;;  %v1317_v21 = vpop.f32.mrf.mxu0  ;;  %v1652_v48 = vpop.f32.mrf.mxu1  ;;  %v1802_v5 = vadd.f32 %v3455_v11, %v1731_v14  ;;  %v1816_v13 = vadd.f32 %v3455_v11, %v1745_v34 }
 0x1c4   : > { %v1732_v20 = vmul.f32 %v3448_v63, %v1605_v8  ;;  %2764 = vst [vmem:[%s3476_s10 + $0xa8] sm:$0xff] %v2692_v62   ;;  %2770 = vst [vmem:[%s3476_s10 + $0xd8] sm:$0xff] %v2722_v16   ;;  %v1653_v31 = vadd.f32 %v1652_v48, %v3417_v30  ;;  %v1814_v38 = vadd.f32 %v3455_v11, %v1743_v6 }
 0x1c5   : > { %v2717_v23 = vpack.c.bf16 %v1875_v1, %v1874_v7  ;;  %v1746_v57 = vmul.f32 %v3448_v63, %v1661_v26  ;;  %v1320_v28 = vpop.f32.mrf.mxu0  ;;  %v2893_v17 = vpop.f32.mrf.mxu1  ;;  %v1866_v53 = vmax.f32 %v1802_v5, 0.0  ;;  %v1880_v40 = vmax.f32 %v1816_v13, 0.0 }
 0x1c6   : > { %v1803_v18 = vadd.f32 %v3455_v11, %v1732_v20  ;;  %v1610_v41 = vadd.f32 %v3595_v29, %v1320_v28  ;;  %v1674_v12 = vadd.f32 %v2893_v17, %v3437_v50  ;;  %v1744_v36 = vmul.f32 %v3448_v63, %v1653_v31 }
 0x1c7   : > { %2769 = vst [vmem:[%s3476_s10 + $0xd0] sm:$0xff] %v2717_v23   ;;  %v1817_v32 = vadd.f32 %v3455_v11, %v1746_v57  ;;  %v1322_v39 = vpop.f32.mrf.mxu0  ;;  %v1665_v51 = vpop.f32.mrf.mxu1  ;;  %v1878_v61 = vmax.f32 %v1814_v38, 0.0 }
 0x1c8   : > { %v1867_v33 = vmax.f32 %v1803_v18, 0.0  ;;  %v1733_v30 = vmul.f32 %v3448_v63, %v1610_v41  ;;  %v1666_v10 = vadd.f32 %v1665_v51, %v3429_v42  ;;  %v1815_v29 = vadd.f32 %v3455_v11, %v1744_v36 }
 0x1c9   : > { %v1881_v43 = vmax.f32 %v1817_v32, 0.0  ;;  %v1749_v50 = vmul.f32 %v3448_v63, %v1674_v12  ;;  %v1323_v52 = vpop.f32.mrf.mxu0  ;;  %v2894_v44 = vpop.f32.mrf.mxu1 }
 0x1ca   : > { %v2697_v15 = vpack.c.bf16 %v1867_v33, %v1866_v53  ;;  %v1747_v45 = vmul.f32 %v3448_v63, %v1666_v10  ;;  %v1879_v19 = vmax.f32 %v1815_v29, 0.0  ;;  %v1613_v22 = vadd.f32 %v3601_v24, %v1323_v52 }
 0x1cb   : > { %v2732_v25 = vpack.c.bf16 %v1881_v43, %v1880_v40  ;;  %v1677_v42 = vadd.f32 %v2894_v44, %v3441_v54  ;;  %v1325_v9 = vpop.f32.mrf.mxu0  ;;  %v1668_v55 = vpop.f32.mrf.mxu1  ;;  %v1804_v56 = vadd.f32 %v3455_v11, %v1733_v30  ;;  %v1820_v37 = vadd.f32 %v3455_v11, %v1749_v50 }
 0x1cc   : > { %2765 = vst [vmem:[%s3476_s10 + $0xb0] sm:$0xff] %v2697_v15   ;;  %v1669_v47 = vadd.f32 %v1668_v55, %v3433_v46  ;;  %v2727_v2 = vpack.c.bf16 %v1879_v19, %v1878_v61  ;;  %v1734_v60 = vmul.f32 %v3448_v63, %v1613_v22  ;;  %v1818_v24 = vadd.f32 %v3455_v11, %v1747_v45 }
 0x1cd   : > { %2772 = vst [vmem:[%s3476_s10 + $0xe8] sm:$0xff] %v2732_v25   ;;  %v1750_v27 = vmul.f32 %v3448_v63, %v1677_v42  ;;  %v1868_v0 = vmax.f32 %v1804_v56, 0.0  ;;  %v1884_v35 = vmax.f32 %v1820_v37, 0.0 }
 0x1ce   : > { %v1748_v54 = vmul.f32 %v3448_v63, %v1669_v47  ;;  %2771 = vst [vmem:[%s3476_s10 + $0xe0] sm:$0xff] %v2727_v2   ;;  %v1805_v58 = vadd.f32 %v3455_v11, %v1734_v60  ;;  %v1882_v34 = vmax.f32 %v1818_v24, 0.0 }
 0x1cf   : > { %v1821_v46 = vadd.f32 %v3455_v11, %v1750_v27 }
 0x1d0   : > { %v1819_v14 = vadd.f32 %v3455_v11, %v1748_v54  ;;  %v1869_v4 = vmax.f32 %v1805_v58, 0.0 }
 0x1d1   : > { %v1885_v49 = vmax.f32 %v1821_v46, 0.0 }
 0x1d2   : > { %v1883_v3 = vmax.f32 %v1819_v14, 0.0  ;;  %v2702_v59 = vpack.c.bf16 %v1869_v4, %v1868_v0 }
 0x1d3   : > { %v2742_v7 = vpack.c.bf16 %v1885_v49, %v1884_v35 }
 0x1d4   : > { %v2737_v6 = vpack.c.bf16 %v1883_v3, %v1882_v34  ;;  %2766 = vst [vmem:[%s3476_s10 + $0xb8] sm:$0xff] %v2702_v59  }
 0x1d5   : > { %2774 = vst [vmem:[%s3476_s10 + $0xf8] sm:$0xff] %v2742_v7  }
 0x1d6   : > { %2773 = vst [vmem:[%s3476_s10 + $0xf0] sm:$0xff] %v2737_v6  }
 0x1d7 PF: > { %s14_s17 = sadd.s32 1, %s3127_s17   ;;  %s3706_s15 = smov %s3123_s16 }
 0x1d8   : > { %p11_p5 = scmp.ge.s32.totalorder %s14_s17, 87   ;;  %s3707_s16 = smov %s3709_s18 }
 0x1da   :  { %13 = sbr.rel (!%p11_p5) target bundleno = 2 (0x2), region = 75 }

// kernel: stem_fwd.10
= control target key start
LH: loop header
LB: loop body
LE: loop exit
PB: predicated region body
PF: predicated region fallthrough
CT: control target
= control target key end

     0   :  { %s3075_s6 = smov 0   ;;  %s3077_s7 = smov 0   ;;  %s4037_s0 = inlined_call_operand.vmem [shape: bf16[9,10752,128], index: 0, kind: input, shape index: {}]   ;;  %s4038_s1 = inlined_call_operand.vmem [shape: bf16[10752,128], index: 1, kind: output, shape index: {}]  }
   0x1   :  { %s3079_s8 = smov 0   ;;  %s3081_s9 = smov 0  }
   0x2   :  { %s3083_s10 = smov 0  }
   0x3 LB: > { %s23_s11 = sadd.s32 1, %s3059_s9  ;;  %p39_p1 = scmp.ne.s32.totalorder %s3051_s7, %s3047_s6  ;;  %s3063_s10 = sphi %s3083_s10, %s11_s10   ;;  %s3059_s9 = sphi %s3081_s9, %s4043_s9   ;;  %s3055_s8 = sphi %s3079_s8, %s4042_s8   ;;  %s3051_s7 = sphi %s3077_s7, %s4041_s7   ;;  %s3047_s6 = sphi %s3075_s6, %s4040_s6  }
   0x4   : > { %p25_p0 = scmp.ge.s32.totalorder %s23_s11, 42  ;;  %p40_p2 = scmp.eq.s32.totalorder %s3063_s10, 0 }
   0x5   : > { %s32_s13 = sadd.s32 1, %s3051_s7  ;;  %p2863_p5 = scmp.ge.s32.totalorder %s3063_s10, 42 }
   0x6   : > { %s4045_s11 = smov (%p25_p0, %s23_s11), 0  ;;  %p41_p3 = por %p40_p2, %p39_p1 }
   0x7   : > { %s27_s12 = ssub.s32 %s3059_s9, %s4045_s11  ;;  %93 = sbr.rel (%p2863_p5) target bundleno = 89 (0x59), region = 16 }
   0x8   : > { %p30_p4 = scmp.eq.s32.totalorder %s27_s12, 0 }
   0xa   : > { %s3110_s14 = scalar_select %p30_p4, %s3051_s7, %s32_s13  }
   0xc   : > { %96 = sbr.rel (!%p41_p3) target bundleno = 89 (0x59), region = 20  ;;  %s98_s15 = sand.u32 (%p41_p3), 1, %s3051_s7  }
   0xd   : > { %s2871_s16 = sshll.u32 (%p41_p3), %s3059_s9, 7  ;;  %s2983_s17 = smul.u32 (%p41_p3), 1152, %s98_s15 }
   0xe   : > { %s3118_s20 = scalar_lea.vmem (%p41_p3), %s4037_s0, %s2871_s16 }
   0xf   : > { %v121_v0 = vld [vmem:[%s3118_s20] sm:$0xff] (%p41_p3)   ;;  %v125_v1 = vld [vmem:[%s3118_s20 + $0x8] sm:$0xff] (%p41_p3)   ;;  %v129_v2 = vld [vmem:[%s3118_s20 + $0x10] sm:$0xff] (%p41_p3)   ;;  %s3126_s21 = scalar_lea.vmem (%p41_p3), [#allocation2], %s2983_s17 }
  0x10   : > { %v133_v3 = vld [vmem:[%s3118_s20 + $0x18] sm:$0xff] (%p41_p3)   ;;  %v137_v4 = vld [vmem:[%s3118_s20 + $0x20] sm:$0xff] (%p41_p3)   ;;  %v141_v5 = vld [vmem:[%s3118_s20 + $0x28] sm:$0xff] (%p41_p3)   ;;  %122 = vst [vmem:[%s3126_s21] sm:$0xff] (%p41_p3), %v121_v0  }
  0x11   : > { %126 = vst [vmem:[%s3126_s21 + $0x8] sm:$0xff] %v125_v1   ;;  %130 = vst [vmem:[%s3126_s21 + $0x10] sm:$0xff] %v129_v2   ;;  %v145_v6 = vld [vmem:[%s3118_s20 + $0x30] sm:$0xff]   ;;  %v149_v7 = vld [vmem:[%s3118_s20 + $0x38] sm:$0xff]  }
  0x12   : > { %134 = vst [vmem:[%s3126_s21 + $0x18] sm:$0xff] %v133_v3   ;;  %138 = vst [vmem:[%s3126_s21 + $0x20] sm:$0xff] %v137_v4   ;;  %v153_v8 = vld [vmem:[%s3118_s20 + $0x40] sm:$0xff]   ;;  %v157_v9 = vld [vmem:[%s3118_s20 + $0x48] sm:$0xff]  }
  0x13   : > { %142 = vst [vmem:[%s3126_s21 + $0x28] sm:$0xff] %v141_v5   ;;  %146 = vst [vmem:[%s3126_s21 + $0x30] sm:$0xff] %v145_v6   ;;  %v161_v10 = vld [vmem:[%s3118_s20 + $0x50] sm:$0xff]   ;;  %v165_v11 = vld [vmem:[%s3118_s20 + $0x58] sm:$0xff]  }
  0x14   : > { %150 = vst [vmem:[%s3126_s21 + $0x38] sm:$0xff] %v149_v7   ;;  %154 = vst [vmem:[%s3126_s21 + $0x40] sm:$0xff] %v153_v8   ;;  %v169_v12 = vld [vmem:[%s3118_s20 + $0x60] sm:$0xff]   ;;  %v173_v13 = vld [vmem:[%s3118_s20 + $0x68] sm:$0xff]  }
  0x15   : > { %158 = vst [vmem:[%s3126_s21 + $0x48] sm:$0xff] %v157_v9   ;;  %162 = vst [vmem:[%s3126_s21 + $0x50] sm:$0xff] %v161_v10   ;;  %v177_v14 = vld [vmem:[%s3118_s20 + $0x70] sm:$0xff]   ;;  %v181_v15 = vld [vmem:[%s3118_s20 + $0x78] sm:$0xff]  }
  0x16   : > { %166 = vst [vmem:[%s3126_s21 + $0x58] sm:$0xff] %v165_v11   ;;  %170 = vst [vmem:[%s3126_s21 + $0x60] sm:$0xff] %v169_v12   ;;  %v185_v16 = vld [vmem:[%s3118_s20 + $0x1500] sm:$0xff]   ;;  %v189_v17 = vld [vmem:[%s3118_s20 + $0x1508] sm:$0xff]  }
  0x17   : > { %174 = vst [vmem:[%s3126_s21 + $0x68] sm:$0xff] %v173_v13   ;;  %178 = vst [vmem:[%s3126_s21 + $0x70] sm:$0xff] %v177_v14   ;;  %v193_v18 = vld [vmem:[%s3118_s20 + $0x1510] sm:$0xff]   ;;  %v197_v19 = vld [vmem:[%s3118_s20 + $0x1518] sm:$0xff]  }
  0x18   : > { %182 = vst [vmem:[%s3126_s21 + $0x78] sm:$0xff] %v181_v15   ;;  %186 = vst [vmem:[%s3126_s21 + $0x80] sm:$0xff] %v185_v16   ;;  %v201_v20 = vld [vmem:[%s3118_s20 + $0x1520] sm:$0xff]   ;;  %v205_v21 = vld [vmem:[%s3118_s20 + $0x1528] sm:$0xff]  }
  0x19   : > { %190 = vst [vmem:[%s3126_s21 + $0x88] sm:$0xff] %v189_v17   ;;  %194 = vst [vmem:[%s3126_s21 + $0x90] sm:$0xff] %v193_v18   ;;  %v209_v22 = vld [vmem:[%s3118_s20 + $0x1530] sm:$0xff]   ;;  %v213_v23 = vld [vmem:[%s3118_s20 + $0x1538] sm:$0xff]  }
  0x1a   : > { %198 = vst [vmem:[%s3126_s21 + $0x98] sm:$0xff] %v197_v19   ;;  %202 = vst [vmem:[%s3126_s21 + $0xa0] sm:$0xff] %v201_v20   ;;  %v217_v24 = vld [vmem:[%s3118_s20 + $0x1540] sm:$0xff]   ;;  %v221_v25 = vld [vmem:[%s3118_s20 + $0x1548] sm:$0xff]  }
  0x1b   : > { %206 = vst [vmem:[%s3126_s21 + $0xa8] sm:$0xff] %v205_v21   ;;  %210 = vst [vmem:[%s3126_s21 + $0xb0] sm:$0xff] %v209_v22   ;;  %v225_v26 = vld [vmem:[%s3118_s20 + $0x1550] sm:$0xff]   ;;  %v229_v27 = vld [vmem:[%s3118_s20 + $0x1558] sm:$0xff]  }
  0x1c   : > { %214 = vst [vmem:[%s3126_s21 + $0xb8] sm:$0xff] %v213_v23   ;;  %218 = vst [vmem:[%s3126_s21 + $0xc0] sm:$0xff] %v217_v24   ;;  %v233_v28 = vld [vmem:[%s3118_s20 + $0x1560] sm:$0xff]   ;;  %v237_v29 = vld [vmem:[%s3118_s20 + $0x1568] sm:$0xff]  }
  0x1d   : > { %222 = vst [vmem:[%s3126_s21 + $0xc8] sm:$0xff] %v221_v25   ;;  %226 = vst [vmem:[%s3126_s21 + $0xd0] sm:$0xff] %v225_v26   ;;  %v241_v30 = vld [vmem:[%s3118_s20 + $0x1570] sm:$0xff]   ;;  %v245_v31 = vld [vmem:[%s3118_s20 + $0x1578] sm:$0xff]  }
  0x1e   : > { %230 = vst [vmem:[%s3126_s21 + $0xd8] sm:$0xff] %v229_v27   ;;  %234 = vst [vmem:[%s3126_s21 + $0xe0] sm:$0xff] %v233_v28   ;;  %v249_v32 = vld [vmem:[%s3118_s20 + $0x2a00] sm:$0xff]   ;;  %v253_v33 = vld [vmem:[%s3118_s20 + $0x2a08] sm:$0xff]  }
  0x1f   : > { %238 = vst [vmem:[%s3126_s21 + $0xe8] sm:$0xff] %v237_v29   ;;  %242 = vst [vmem:[%s3126_s21 + $0xf0] sm:$0xff] %v241_v30   ;;  %v257_v34 = vld [vmem:[%s3118_s20 + $0x2a10] sm:$0xff]   ;;  %v261_v35 = vld [vmem:[%s3118_s20 + $0x2a18] sm:$0xff]  }
  0x20   : > { %246 = vst [vmem:[%s3126_s21 + $0xf8] sm:$0xff] %v245_v31   ;;  %250 = vst [vmem:[%s3126_s21 + $0x100] sm:$0xff] %v249_v32   ;;  %v265_v36 = vld [vmem:[%s3118_s20 + $0x2a20] sm:$0xff]   ;;  %v269_v37 = vld [vmem:[%s3118_s20 + $0x2a28] sm:$0xff]  }
  0x21   : > { %254 = vst [vmem:[%s3126_s21 + $0x108] sm:$0xff] %v253_v33   ;;  %258 = vst [vmem:[%s3126_s21 + $0x110] sm:$0xff] %v257_v34   ;;  %v273_v38 = vld [vmem:[%s3118_s20 + $0x2a30] sm:$0xff]   ;;  %v277_v39 = vld [vmem:[%s3118_s20 + $0x2a38] sm:$0xff]  }
  0x22   : > { %262 = vst [vmem:[%s3126_s21 + $0x118] sm:$0xff] %v261_v35   ;;  %266 = vst [vmem:[%s3126_s21 + $0x120] sm:$0xff] %v265_v36   ;;  %v281_v40 = vld [vmem:[%s3118_s20 + $0x2a40] sm:$0xff]   ;;  %v285_v41 = vld [vmem:[%s3118_s20 + $0x2a48] sm:$0xff]  }
  0x23   : > { %270 = vst [vmem:[%s3126_s21 + $0x128] sm:$0xff] %v269_v37   ;;  %274 = vst [vmem:[%s3126_s21 + $0x130] sm:$0xff] %v273_v38   ;;  %v289_v42 = vld [vmem:[%s3118_s20 + $0x2a50] sm:$0xff]   ;;  %v293_v43 = vld [vmem:[%s3118_s20 + $0x2a58] sm:$0xff]  }
  0x24   : > { %278 = vst [vmem:[%s3126_s21 + $0x138] sm:$0xff] %v277_v39   ;;  %282 = vst [vmem:[%s3126_s21 + $0x140] sm:$0xff] %v281_v40   ;;  %v297_v44 = vld [vmem:[%s3118_s20 + $0x2a60] sm:$0xff]   ;;  %v301_v45 = vld [vmem:[%s3118_s20 + $0x2a68] sm:$0xff]  }
  0x25   : > { %286 = vst [vmem:[%s3126_s21 + $0x148] sm:$0xff] %v285_v41   ;;  %290 = vst [vmem:[%s3126_s21 + $0x150] sm:$0xff] %v289_v42   ;;  %v305_v46 = vld [vmem:[%s3118_s20 + $0x2a70] sm:$0xff]   ;;  %v309_v47 = vld [vmem:[%s3118_s20 + $0x2a78] sm:$0xff]  }
  0x26   : > { %294 = vst [vmem:[%s3126_s21 + $0x158] sm:$0xff] %v293_v43   ;;  %298 = vst [vmem:[%s3126_s21 + $0x160] sm:$0xff] %v297_v44   ;;  %v313_v48 = vld [vmem:[%s3118_s20 + $0x3f00] sm:$0xff]   ;;  %v317_v49 = vld [vmem:[%s3118_s20 + $0x3f08] sm:$0xff]  }
  0x27   : > { %302 = vst [vmem:[%s3126_s21 + $0x168] sm:$0xff] %v301_v45   ;;  %306 = vst [vmem:[%s3126_s21 + $0x170] sm:$0xff] %v305_v46   ;;  %v321_v50 = vld [vmem:[%s3118_s20 + $0x3f10] sm:$0xff]   ;;  %v325_v51 = vld [vmem:[%s3118_s20 + $0x3f18] sm:$0xff]  }
  0x28   : > { %310 = vst [vmem:[%s3126_s21 + $0x178] sm:$0xff] %v309_v47   ;;  %314 = vst [vmem:[%s3126_s21 + $0x180] sm:$0xff] %v313_v48   ;;  %v329_v52 = vld [vmem:[%s3118_s20 + $0x3f20] sm:$0xff]   ;;  %v333_v53 = vld [vmem:[%s3118_s20 + $0x3f28] sm:$0xff]  }
  0x29   : > { %318 = vst [vmem:[%s3126_s21 + $0x188] sm:$0xff] %v317_v49   ;;  %322 = vst [vmem:[%s3126_s21 + $0x190] sm:$0xff] %v321_v50   ;;  %v337_v54 = vld [vmem:[%s3118_s20 + $0x3f30] sm:$0xff]   ;;  %v341_v55 = vld [vmem:[%s3118_s20 + $0x3f38] sm:$0xff]  }
  0x2a   : > { %326 = vst [vmem:[%s3126_s21 + $0x198] sm:$0xff] %v325_v51   ;;  %330 = vst [vmem:[%s3126_s21 + $0x1a0] sm:$0xff] %v329_v52   ;;  %v345_v56 = vld [vmem:[%s3118_s20 + $0x3f40] sm:$0xff]   ;;  %v349_v57 = vld [vmem:[%s3118_s20 + $0x3f48] sm:$0xff]  }
  0x2b   : > { %334 = vst [vmem:[%s3126_s21 + $0x1a8] sm:$0xff] %v333_v53   ;;  %338 = vst [vmem:[%s3126_s21 + $0x1b0] sm:$0xff] %v337_v54   ;;  %v353_v58 = vld [vmem:[%s3118_s20 + $0x3f50] sm:$0xff]   ;;  %v357_v59 = vld [vmem:[%s3118_s20 + $0x3f58] sm:$0xff]  }
  0x2c   : > { %342 = vst [vmem:[%s3126_s21 + $0x1b8] sm:$0xff] %v341_v55   ;;  %346 = vst [vmem:[%s3126_s21 + $0x1c0] sm:$0xff] %v345_v56   ;;  %v361_v60 = vld [vmem:[%s3118_s20 + $0x3f60] sm:$0xff]   ;;  %v365_v61 = vld [vmem:[%s3118_s20 + $0x3f68] sm:$0xff]  }
  0x2d   : > { %350 = vst [vmem:[%s3126_s21 + $0x1c8] sm:$0xff] %v349_v57   ;;  %354 = vst [vmem:[%s3126_s21 + $0x1d0] sm:$0xff] %v353_v58   ;;  %v369_v62 = vld [vmem:[%s3118_s20 + $0x3f70] sm:$0xff]   ;;  %v373_v63 = vld [vmem:[%s3118_s20 + $0x3f78] sm:$0xff]  }
  0x2e   : > { %358 = vst [vmem:[%s3126_s21 + $0x1d8] sm:$0xff] %v357_v59   ;;  %362 = vst [vmem:[%s3126_s21 + $0x1e0] sm:$0xff] %v361_v60   ;;  %v377_v0 = vld [vmem:[%s3118_s20 + $0x5400] sm:$0xff]   ;;  %v381_v1 = vld [vmem:[%s3118_s20 + $0x5408] sm:$0xff]  }
  0x2f   : > { %366 = vst [vmem:[%s3126_s21 + $0x1e8] sm:$0xff] %v365_v61   ;;  %370 = vst [vmem:[%s3126_s21 + $0x1f0] sm:$0xff] %v369_v62   ;;  %v385_v2 = vld [vmem:[%s3118_s20 + $0x5410] sm:$0xff]   ;;  %v389_v3 = vld [vmem:[%s3118_s20 + $0x5418] sm:$0xff]  }
  0x30   : > { %374 = vst [vmem:[%s3126_s21 + $0x1f8] sm:$0xff] %v373_v63   ;;  %378 = vst [vmem:[%s3126_s21 + $0x200] sm:$0xff] %v377_v0   ;;  %v393_v4 = vld [vmem:[%s3118_s20 + $0x5420] sm:$0xff]   ;;  %v397_v5 = vld [vmem:[%s3118_s20 + $0x5428] sm:$0xff]  }
  0x31   : > { %382 = vst [vmem:[%s3126_s21 + $0x208] sm:$0xff] %v381_v1   ;;  %386 = vst [vmem:[%s3126_s21 + $0x210] sm:$0xff] %v385_v2   ;;  %v401_v6 = vld [vmem:[%s3118_s20 + $0x5430] sm:$0xff]   ;;  %v405_v7 = vld [vmem:[%s3118_s20 + $0x5438] sm:$0xff]  }
  0x32   : > { %390 = vst [vmem:[%s3126_s21 + $0x218] sm:$0xff] %v389_v3   ;;  %394 = vst [vmem:[%s3126_s21 + $0x220] sm:$0xff] %v393_v4   ;;  %v409_v8 = vld [vmem:[%s3118_s20 + $0x5440] sm:$0xff]   ;;  %v413_v9 = vld [vmem:[%s3118_s20 + $0x5448] sm:$0xff]  }
  0x33   : > { %398 = vst [vmem:[%s3126_s21 + $0x228] sm:$0xff] %v397_v5   ;;  %402 = vst [vmem:[%s3126_s21 + $0x230] sm:$0xff] %v401_v6   ;;  %v417_v10 = vld [vmem:[%s3118_s20 + $0x5450] sm:$0xff]   ;;  %v421_v11 = vld [vmem:[%s3118_s20 + $0x5458] sm:$0xff]  }
  0x34   : > { %406 = vst [vmem:[%s3126_s21 + $0x238] sm:$0xff] %v405_v7   ;;  %410 = vst [vmem:[%s3126_s21 + $0x240] sm:$0xff] %v409_v8   ;;  %v425_v12 = vld [vmem:[%s3118_s20 + $0x5460] sm:$0xff]   ;;  %v429_v13 = vld [vmem:[%s3118_s20 + $0x5468] sm:$0xff]  }
  0x35   : > { %414 = vst [vmem:[%s3126_s21 + $0x248] sm:$0xff] %v413_v9   ;;  %418 = vst [vmem:[%s3126_s21 + $0x250] sm:$0xff] %v417_v10   ;;  %v433_v14 = vld [vmem:[%s3118_s20 + $0x5470] sm:$0xff]   ;;  %v437_v15 = vld [vmem:[%s3118_s20 + $0x5478] sm:$0xff]  }
  0x36   : > { %422 = vst [vmem:[%s3126_s21 + $0x258] sm:$0xff] %v421_v11   ;;  %426 = vst [vmem:[%s3126_s21 + $0x260] sm:$0xff] %v425_v12   ;;  %v441_v16 = vld [vmem:[%s3118_s20 + $0x6900] sm:$0xff]   ;;  %v445_v17 = vld [vmem:[%s3118_s20 + $0x6908] sm:$0xff]  }
  0x37   : > { %430 = vst [vmem:[%s3126_s21 + $0x268] sm:$0xff] %v429_v13   ;;  %434 = vst [vmem:[%s3126_s21 + $0x270] sm:$0xff] %v433_v14   ;;  %v449_v18 = vld [vmem:[%s3118_s20 + $0x6910] sm:$0xff]   ;;  %v453_v19 = vld [vmem:[%s3118_s20 + $0x6918] sm:$0xff]  }
  0x38   : > { %438 = vst [vmem:[%s3126_s21 + $0x278] sm:$0xff] %v437_v15   ;;  %442 = vst [vmem:[%s3126_s21 + $0x280] sm:$0xff] %v441_v16   ;;  %v457_v20 = vld [vmem:[%s3118_s20 + $0x6920] sm:$0xff]   ;;  %v461_v21 = vld [vmem:[%s3118_s20 + $0x6928] sm:$0xff]  }
  0x39   : > { %446 = vst [vmem:[%s3126_s21 + $0x288] sm:$0xff] %v445_v17   ;;  %450 = vst [vmem:[%s3126_s21 + $0x290] sm:$0xff] %v449_v18   ;;  %v465_v22 = vld [vmem:[%s3118_s20 + $0x6930] sm:$0xff]   ;;  %v469_v23 = vld [vmem:[%s3118_s20 + $0x6938] sm:$0xff]  }
  0x3a   : > { %454 = vst [vmem:[%s3126_s21 + $0x298] sm:$0xff] %v453_v19   ;;  %458 = vst [vmem:[%s3126_s21 + $0x2a0] sm:$0xff] %v457_v20   ;;  %v473_v24 = vld [vmem:[%s3118_s20 + $0x6940] sm:$0xff]   ;;  %v477_v25 = vld [vmem:[%s3118_s20 + $0x6948] sm:$0xff]  }
  0x3b   : > { %462 = vst [vmem:[%s3126_s21 + $0x2a8] sm:$0xff] %v461_v21   ;;  %466 = vst [vmem:[%s3126_s21 + $0x2b0] sm:$0xff] %v465_v22   ;;  %v481_v26 = vld [vmem:[%s3118_s20 + $0x6950] sm:$0xff]   ;;  %v485_v27 = vld [vmem:[%s3118_s20 + $0x6958] sm:$0xff]  }
  0x3c   : > { %470 = vst [vmem:[%s3126_s21 + $0x2b8] sm:$0xff] %v469_v23   ;;  %474 = vst [vmem:[%s3126_s21 + $0x2c0] sm:$0xff] %v473_v24   ;;  %v489_v28 = vld [vmem:[%s3118_s20 + $0x6960] sm:$0xff]   ;;  %v493_v29 = vld [vmem:[%s3118_s20 + $0x6968] sm:$0xff]  }
  0x3d   : > { %478 = vst [vmem:[%s3126_s21 + $0x2c8] sm:$0xff] %v477_v25   ;;  %482 = vst [vmem:[%s3126_s21 + $0x2d0] sm:$0xff] %v481_v26   ;;  %v497_v30 = vld [vmem:[%s3118_s20 + $0x6970] sm:$0xff]   ;;  %v501_v31 = vld [vmem:[%s3118_s20 + $0x6978] sm:$0xff]  }
  0x3e   : > { %486 = vst [vmem:[%s3126_s21 + $0x2d8] sm:$0xff] %v485_v27   ;;  %490 = vst [vmem:[%s3126_s21 + $0x2e0] sm:$0xff] %v489_v28   ;;  %v505_v32 = vld [vmem:[%s3118_s20 + $0x7e00] sm:$0xff]   ;;  %v509_v33 = vld [vmem:[%s3118_s20 + $0x7e08] sm:$0xff]  }
  0x3f   : > { %494 = vst [vmem:[%s3126_s21 + $0x2e8] sm:$0xff] %v493_v29   ;;  %498 = vst [vmem:[%s3126_s21 + $0x2f0] sm:$0xff] %v497_v30   ;;  %v513_v34 = vld [vmem:[%s3118_s20 + $0x7e10] sm:$0xff]   ;;  %v517_v35 = vld [vmem:[%s3118_s20 + $0x7e18] sm:$0xff]  }
  0x40   : > { %502 = vst [vmem:[%s3126_s21 + $0x2f8] sm:$0xff] %v501_v31   ;;  %506 = vst [vmem:[%s3126_s21 + $0x300] sm:$0xff] %v505_v32   ;;  %v521_v36 = vld [vmem:[%s3118_s20 + $0x7e20] sm:$0xff]   ;;  %v525_v37 = vld [vmem:[%s3118_s20 + $0x7e28] sm:$0xff]  }
  0x41   : > { %510 = vst [vmem:[%s3126_s21 + $0x308] sm:$0xff] %v509_v33   ;;  %514 = vst [vmem:[%s3126_s21 + $0x310] sm:$0xff] %v513_v34   ;;  %v529_v38 = vld [vmem:[%s3118_s20 + $0x7e30] sm:$0xff]   ;;  %v533_v39 = vld [vmem:[%s3118_s20 + $0x7e38] sm:$0xff]  }
  0x42   : > { %518 = vst [vmem:[%s3126_s21 + $0x318] sm:$0xff] %v517_v35   ;;  %522 = vst [vmem:[%s3126_s21 + $0x320] sm:$0xff] %v521_v36   ;;  %v537_v40 = vld [vmem:[%s3118_s20 + $0x7e40] sm:$0xff]   ;;  %v541_v41 = vld [vmem:[%s3118_s20 + $0x7e48] sm:$0xff]  }
  0x43   : > { %526 = vst [vmem:[%s3126_s21 + $0x328] sm:$0xff] %v525_v37   ;;  %530 = vst [vmem:[%s3126_s21 + $0x330] sm:$0xff] %v529_v38   ;;  %v545_v42 = vld [vmem:[%s3118_s20 + $0x7e50] sm:$0xff]   ;;  %v549_v43 = vld [vmem:[%s3118_s20 + $0x7e58] sm:$0xff]  }
  0x44   : > { %534 = vst [vmem:[%s3126_s21 + $0x338] sm:$0xff] %v533_v39   ;;  %538 = vst [vmem:[%s3126_s21 + $0x340] sm:$0xff] %v537_v40   ;;  %v553_v44 = vld [vmem:[%s3118_s20 + $0x7e60] sm:$0xff]   ;;  %v557_v45 = vld [vmem:[%s3118_s20 + $0x7e68] sm:$0xff]  }
  0x45   : > { %542 = vst [vmem:[%s3126_s21 + $0x348] sm:$0xff] %v541_v41   ;;  %546 = vst [vmem:[%s3126_s21 + $0x350] sm:$0xff] %v545_v42   ;;  %v561_v46 = vld [vmem:[%s3118_s20 + $0x7e70] sm:$0xff]   ;;  %v565_v47 = vld [vmem:[%s3118_s20 + $0x7e78] sm:$0xff]  }
  0x46   : > { %550 = vst [vmem:[%s3126_s21 + $0x358] sm:$0xff] %v549_v43   ;;  %554 = vst [vmem:[%s3126_s21 + $0x360] sm:$0xff] %v553_v44   ;;  %v569_v48 = vld [vmem:[%s3118_s20 + $0x9300] sm:$0xff]   ;;  %v573_v49 = vld [vmem:[%s3118_s20 + $0x9308] sm:$0xff]  }
  0x47   : > { %558 = vst [vmem:[%s3126_s21 + $0x368] sm:$0xff] %v557_v45   ;;  %562 = vst [vmem:[%s3126_s21 + $0x370] sm:$0xff] %v561_v46   ;;  %v577_v50 = vld [vmem:[%s3118_s20 + $0x9310] sm:$0xff]   ;;  %v581_v51 = vld [vmem:[%s3118_s20 + $0x9318] sm:$0xff]  }
  0x48   : > { %566 = vst [vmem:[%s3126_s21 + $0x378] sm:$0xff] %v565_v47   ;;  %570 = vst [vmem:[%s3126_s21 + $0x380] sm:$0xff] %v569_v48   ;;  %v585_v52 = vld [vmem:[%s3118_s20 + $0x9320] sm:$0xff]   ;;  %v589_v53 = vld [vmem:[%s3118_s20 + $0x9328] sm:$0xff]  }
  0x49   : > { %574 = vst [vmem:[%s3126_s21 + $0x388] sm:$0xff] %v573_v49   ;;  %578 = vst [vmem:[%s3126_s21 + $0x390] sm:$0xff] %v577_v50   ;;  %v593_v54 = vld [vmem:[%s3118_s20 + $0x9330] sm:$0xff]   ;;  %v597_v55 = vld [vmem:[%s3118_s20 + $0x9338] sm:$0xff]  }
  0x4a   : > { %582 = vst [vmem:[%s3126_s21 + $0x398] sm:$0xff] %v581_v51   ;;  %586 = vst [vmem:[%s3126_s21 + $0x3a0] sm:$0xff] %v585_v52   ;;  %v601_v56 = vld [vmem:[%s3118_s20 + $0x9340] sm:$0xff]   ;;  %v605_v57 = vld [vmem:[%s3118_s20 + $0x9348] sm:$0xff]  }
  0x4b   : > { %590 = vst [vmem:[%s3126_s21 + $0x3a8] sm:$0xff] %v589_v53   ;;  %594 = vst [vmem:[%s3126_s21 + $0x3b0] sm:$0xff] %v593_v54   ;;  %v609_v58 = vld [vmem:[%s3118_s20 + $0x9350] sm:$0xff]   ;;  %v613_v59 = vld [vmem:[%s3118_s20 + $0x9358] sm:$0xff]  }
  0x4c   : > { %598 = vst [vmem:[%s3126_s21 + $0x3b8] sm:$0xff] %v597_v55   ;;  %602 = vst [vmem:[%s3126_s21 + $0x3c0] sm:$0xff] %v601_v56   ;;  %v617_v60 = vld [vmem:[%s3118_s20 + $0x9360] sm:$0xff]   ;;  %v621_v61 = vld [vmem:[%s3118_s20 + $0x9368] sm:$0xff]  }
  0x4d   : > { %606 = vst [vmem:[%s3126_s21 + $0x3c8] sm:$0xff] %v605_v57   ;;  %610 = vst [vmem:[%s3126_s21 + $0x3d0] sm:$0xff] %v609_v58   ;;  %v625_v62 = vld [vmem:[%s3118_s20 + $0x9370] sm:$0xff]   ;;  %v629_v63 = vld [vmem:[%s3118_s20 + $0x9378] sm:$0xff]  }
  0x4e   : > { %614 = vst [vmem:[%s3126_s21 + $0x3d8] sm:$0xff] %v613_v59   ;;  %618 = vst [vmem:[%s3126_s21 + $0x3e0] sm:$0xff] %v617_v60   ;;  %v633_v0 = vld [vmem:[%s3118_s20 + $0xa800] sm:$0xff]   ;;  %v637_v1 = vld [vmem:[%s3118_s20 + $0xa808] sm:$0xff]  }
  0x4f   : > { %622 = vst [vmem:[%s3126_s21 + $0x3e8] sm:$0xff] %v621_v61   ;;  %626 = vst [vmem:[%s3126_s21 + $0x3f0] sm:$0xff] %v625_v62   ;;  %v641_v2 = vld [vmem:[%s3118_s20 + $0xa810] sm:$0xff]   ;;  %v645_v3 = vld [vmem:[%s3118_s20 + $0xa818] sm:$0xff]  }
  0x50   : > { %630 = vst [vmem:[%s3126_s21 + $0x3f8] sm:$0xff] %v629_v63   ;;  %634 = vst [vmem:[%s3126_s21 + $0x400] sm:$0xff] %v633_v0   ;;  %v649_v4 = vld [vmem:[%s3118_s20 + $0xa820] sm:$0xff]   ;;  %v653_v5 = vld [vmem:[%s3118_s20 + $0xa828] sm:$0xff]  }
  0x51   : > { %638 = vst [vmem:[%s3126_s21 + $0x408] sm:$0xff] %v637_v1   ;;  %642 = vst [vmem:[%s3126_s21 + $0x410] sm:$0xff] %v641_v2   ;;  %v657_v6 = vld [vmem:[%s3118_s20 + $0xa830] sm:$0xff]   ;;  %v661_v7 = vld [vmem:[%s3118_s20 + $0xa838] sm:$0xff]  }
  0x52   : > { %646 = vst [vmem:[%s3126_s21 + $0x418] sm:$0xff] %v645_v3   ;;  %650 = vst [vmem:[%s3126_s21 + $0x420] sm:$0xff] %v649_v4   ;;  %v665_v8 = vld [vmem:[%s3118_s20 + $0xa840] sm:$0xff]   ;;  %v669_v9 = vld [vmem:[%s3118_s20 + $0xa848] sm:$0xff]  }
  0x53   : > { %654 = vst [vmem:[%s3126_s21 + $0x428] sm:$0xff] %v653_v5   ;;  %658 = vst [vmem:[%s3126_s21 + $0x430] sm:$0xff] %v657_v6   ;;  %v673_v10 = vld [vmem:[%s3118_s20 + $0xa850] sm:$0xff]   ;;  %v677_v11 = vld [vmem:[%s3118_s20 + $0xa858] sm:$0xff]  }
  0x54   : > { %662 = vst [vmem:[%s3126_s21 + $0x438] sm:$0xff] %v661_v7   ;;  %666 = vst [vmem:[%s3126_s21 + $0x440] sm:$0xff] %v665_v8   ;;  %v681_v12 = vld [vmem:[%s3118_s20 + $0xa860] sm:$0xff]   ;;  %v685_v13 = vld [vmem:[%s3118_s20 + $0xa868] sm:$0xff]  }
  0x55   : > { %670 = vst [vmem:[%s3126_s21 + $0x448] sm:$0xff] %v669_v9   ;;  %674 = vst [vmem:[%s3126_s21 + $0x450] sm:$0xff] %v673_v10   ;;  %v689_v14 = vld [vmem:[%s3118_s20 + $0xa870] sm:$0xff]   ;;  %v693_v15 = vld [vmem:[%s3118_s20 + $0xa878] sm:$0xff]  }
  0x56   : > { %678 = vst [vmem:[%s3126_s21 + $0x458] sm:$0xff] %v677_v11   ;;  %682 = vst [vmem:[%s3126_s21 + $0x460] sm:$0xff] %v681_v12  }
  0x57   : > { %686 = vst [vmem:[%s3126_s21 + $0x468] sm:$0xff] %v685_v13   ;;  %690 = vst [vmem:[%s3126_s21 + $0x470] sm:$0xff] %v689_v14  }
  0x58   : > { %694 = vst [vmem:[%s3126_s21 + $0x478] sm:$0xff] %v693_v15  }
  0x59 PF: > { %p2866_p6 = scmp.ge.s32.totalorder %s3063_s10, 1  ;;  %p1295_p7 = scmp.lt.s32.totalorder %s3063_s10, 43 }
  0x5b   : > { %p1296_p8 = pnand %p2866_p6, %p1295_p7 }
  0x5c   : > { %s1302_s22 = sand.u32 (!%p1296_p8), 1, %s3047_s6   ;;  %s2867_s25 = sshll.u32 (!%p1296_p8), %s3055_s8, 5 }
  0x5d   : > { %1299 = sbr.rel (%p1296_p8) target bundleno = 308 (0x134), region = 61  ;;  %p3426_p9 = scmp.lt.s32.totalorder (!%p1296_p8), %s2867_s25, 1343 }
  0x5e   : > { %s2984_s23 = smul.u32 (!%p1296_p8), 1152, %s1302_s22 }
  0x60   : > { %s3413_s24 = scalar_lea.vmem (!%p1296_p8), [#allocation2], %s2984_s23 }
  0x62   : > { %v1335_v16 = vld [vmem:[%s3413_s24] sm:$0xf]  ;;  %vm1623_vm0 = vcmask 1043456   ;;  %v1336_v19 = vld [vmem:[%s3413_s24 + $0x4] sm:$0xf]  ;;  %s4047_s25 = smov (!%p3426_p9, %s2867_s25), 1343 }
  0x63   : > { %v1367_v17 = vld [vmem:[%s3413_s24 + $0x80] sm:$0xf]  ;;  %v1368_v20 = vld [vmem:[%s3413_s24 + $0x84] sm:$0xf]  ;;  %v1626_v22 = vsel %vm1623_vm0, %v1335_v16, 4286644096 }
  0x64   : > { %v1399_v18 = vld [vmem:[%s3413_s24 + $0x100] sm:$0xf]  ;;  %v1400_v23 = vld [vmem:[%s3413_s24 + $0x104] sm:$0xf]  ;;  %v1629_v24 = vsel %vm1623_vm0, %v1367_v17, 4286644096 }
  0x65   : > { %v1431_v21 = vld [vmem:[%s3413_s24 + $0x180] sm:$0xf]  ;;  %v1633_v25 = vsel %vm1623_vm0, %v1399_v18, 4286644096  ;;  %v1631_v27 = vmax.bf16 %v1629_v24, %v1626_v22  ;;  %v1432_v28 = vld [vmem:[%s3413_s24 + $0x184] sm:$0xf] }
  0x66   : > { %v1463_v26 = vld [vmem:[%s3413_s24 + $0x200] sm:$0xf]  ;;  %v1637_v29 = vsel %vm1623_vm0, %v1431_v21, 4286644096  ;;  %v1661_v30 = vsel %vm1623_vm0, %v1336_v19, 4286644096 }
  0x67   : > { %v1495_v31 = vld [vmem:[%s3413_s24 + $0x280] sm:$0xf]  ;;  %v1635_v32 = vmax.bf16 %v1633_v25, %v1631_v27  ;;  %v1664_v33 = vsel %vm1623_vm0, %v1368_v20, 4286644096  ;;  %v1668_v34 = vsel %vm1623_vm0, %v1400_v23, 4286644096 }
  0x68   : > { %v1464_v35 = vld [vmem:[%s3413_s24 + $0x204] sm:$0xf]  ;;  %v1641_v36 = vsel %vm1623_vm0, %v1463_v26, 4286644096  ;;  %v1666_v37 = vmax.bf16 %v1664_v33, %v1661_v30  ;;  %v1527_v38 = vld [vmem:[%s3413_s24 + $0x300] sm:$0xf] }
  0x69   : > { %v1559_v39 = vld [vmem:[%s3413_s24 + $0x380] sm:$0xf]  ;;  %v1639_v40 = vmax.bf16 %v1637_v29, %v1635_v32  ;;  %v1672_v41 = vsel %vm1623_vm0, %v1432_v28, 4286644096  ;;  %v1496_v42 = vld [vmem:[%s3413_s24 + $0x284] sm:$0xf] }
  0x6a   : > { %v1645_v43 = vsel %vm1623_vm0, %v1495_v31, 4286644096  ;;  %v1670_v44 = vmax.bf16 %v1668_v34, %v1666_v37  ;;  %v1528_v45 = vld [vmem:[%s3413_s24 + $0x304] sm:$0xf]  ;;  %v1591_v46 = vld [vmem:[%s3413_s24 + $0x400] sm:$0xf] }
  0x6b   : > { %v1643_v47 = vmax.bf16 %v1641_v36, %v1639_v40  ;;  %v1676_v48 = vsel %vm1623_vm0, %v1464_v35, 4286644096  ;;  %v1560_v49 = vld [vmem:[%s3413_s24 + $0x384] sm:$0xf]  ;;  %v1649_v51 = vsel %vm1623_vm0, %v1527_v38, 4286644096 }
  0x6c   : > { %v1592_v50 = vld [vmem:[%s3413_s24 + $0x404] sm:$0xf]  ;;  %v1653_v52 = vsel %vm1623_vm0, %v1559_v39, 4286644096  ;;  %v1674_v53 = vmax.bf16 %v1672_v41, %v1670_v44  ;;  %v1337_v54 = vld [vmem:[%s3413_s24 + $0x8] sm:$0xf] }
  0x6d   : > { %v1647_v55 = vmax.bf16 %v1645_v43, %v1643_v47  ;;  %v1680_v56 = vsel %vm1623_vm0, %v1496_v42, 4286644096  ;;  %v1369_v57 = vld [vmem:[%s3413_s24 + $0x88] sm:$0xf]  ;;  %v1657_v59 = vsel %vm1623_vm0, %v1591_v46, 4286644096 }
  0x6e   : > { %v1401_v58 = vld [vmem:[%s3413_s24 + $0x108] sm:$0xf]  ;;  %v1678_v60 = vmax.bf16 %v1676_v48, %v1674_v53  ;;  %v1684_v61 = vsel %vm1623_vm0, %v1528_v45, 4286644096  ;;  %v1338_v62 = vld [vmem:[%s3413_s24 + $0xc] sm:$0xf] }
  0x6f   : > { %v1651_v63 = vmax.bf16 %v1649_v51, %v1647_v55  ;;  %v1370_v0 = vld [vmem:[%s3413_s24 + $0x8c] sm:$0xf]  ;;  %v1433_v1 = vld [vmem:[%s3413_s24 + $0x188] sm:$0xf]  ;;  %v1696_v2 = vsel %vm1623_vm0, %v1337_v54, 4286644096 }
  0x70   : > { %v1682_v3 = vmax.bf16 %v1680_v56, %v1678_v60  ;;  %v1465_v4 = vld [vmem:[%s3413_s24 + $0x208] sm:$0xf]  ;;  %v1699_v5 = vsel %vm1623_vm0, %v1369_v57, 4286644096  ;;  %v1703_v6 = vsel %vm1623_vm0, %v1401_v58, 4286644096 }
  0x71   : > { %v1655_v7 = vmax.bf16 %v1653_v52, %v1651_v63  ;;  %v1688_v8 = vsel %vm1623_vm0, %v1560_v49, 4286644096  ;;  %v1692_v9 = vsel %vm1623_vm0, %v1592_v50, 4286644096  ;;  %v1402_v10 = vld [vmem:[%s3413_s24 + $0x10c] sm:$0xf]  ;;  %v1701_v11 = vmax.bf16 %v1699_v5, %v1696_v2 }
  0x72   : > { %v1686_v12 = vmax.bf16 %v1684_v61, %v1682_v3  ;;  %v1434_v13 = vld [vmem:[%s3413_s24 + $0x18c] sm:$0xf]  ;;  %v1497_v14 = vld [vmem:[%s3413_s24 + $0x288] sm:$0xf]  ;;  %v1707_v15 = vsel %vm1623_vm0, %v1433_v1, 4286644096 }
  0x73   : > { %v1705_v16 = vmax.bf16 %v1703_v6, %v1701_v11  ;;  %v1711_v17 = vsel %vm1623_vm0, %v1465_v4, 4286644096  ;;  %v1731_v18 = vsel %vm1623_vm0, %v1338_v62, 4286644096  ;;  %v1734_v19 = vsel %vm1623_vm0, %v1370_v0, 4286644096 }
  0x74   : > { %s2868_s27 = sshll.u32 %s4047_s25, 2  ;;  %v1659_v20 = vmax.bf16 %v1657_v59, %v1655_v7  ;;  %v1690_v21 = vmax.bf16 %v1688_v8, %v1686_v12  ;;  %v1466_v22 = vld [vmem:[%s3413_s24 + $0x20c] sm:$0xf]  ;;  %v1736_v23 = vmax.bf16 %v1734_v19, %v1731_v18  ;;  %v1738_v24 = vsel %vm1623_vm0, %v1402_v10, 4286644096 }
  0x75   : > { %v1529_v25 = vld [vmem:[%s3413_s24 + $0x308] sm:$0xf]  ;;  %v1709_v27 = vmax.bf16 %v1707_v15, %v1705_v16  ;;  %v1742_v28 = vsel %vm1623_vm0, %v1434_v13, 4286644096  ;;  %v1498_v30 = vld [vmem:[%s3413_s24 + $0x28c] sm:$0xf]  ;;  %s3488_s30 = scalar_lea.vmem %s4038_s1, %s2868_s27 }
  0x76   : > { %v1561_v26 = vld [vmem:[%s3413_s24 + $0x388] sm:$0xf]  ;;  %v1694_v29 = vmax.bf16 %v1692_v9, %v1690_v21  ;;  %v1715_v31 = vsel %vm1623_vm0, %v1497_v14, 4286644096  ;;  %v1740_v32 = vmax.bf16 %v1738_v24, %v1736_v23  ;;  %v1530_v33 = vld [vmem:[%s3413_s24 + $0x30c] sm:$0xf] }
  0x77   : > { %v1593_v34 = vld [vmem:[%s3413_s24 + $0x408] sm:$0xf]  ;;  %v1713_v35 = vmax.bf16 %v1711_v17, %v1709_v27  ;;  %v1746_v36 = vsel %vm1623_vm0, %v1466_v22, 4286644096  ;;  %v1562_v38 = vld [vmem:[%s3413_s24 + $0x38c] sm:$0xf] }
  0x78   : > { %v2952_v37 = vcombine.low %v1659_v20, %v1694_v29  ;;  %v1594_v39 = vld [vmem:[%s3413_s24 + $0x40c] sm:$0xf]  ;;  %v1719_v40 = vsel %vm1623_vm0, %v1529_v25, 4286644096  ;;  %v1723_v41 = vsel %vm1623_vm0, %v1561_v26, 4286644096  ;;  %v1744_v42 = vmax.bf16 %v1742_v28, %v1740_v32 }
  0x79   : > { %v1339_v43 = vld [vmem:[%s3413_s24 + $0x10] sm:$0xf]  ;;  %v1717_v44 = vmax.bf16 %v1715_v31, %v1713_v35  ;;  %v1750_v45 = vsel %vm1623_vm0, %v1498_v30, 4286644096  ;;  %v1727_v48 = vsel %vm1623_vm0, %v1593_v34, 4286644096 }
  0x7a   : > { %v1371_v46 = vld [vmem:[%s3413_s24 + $0x90] sm:$0xf]  ;;  %2876 = vst [vmem:[%s3488_s30] sm:$0xff] %v2952_v37   ;;  %v1748_v49 = vmax.bf16 %v1746_v36, %v1744_v42  ;;  %v1754_v50 = vsel %vm1623_vm0, %v1530_v33, 4286644096  ;;  %v1340_v51 = vld [vmem:[%s3413_s24 + $0x14] sm:$0xf] }
  0x7b   : > { %v1403_v47 = vld [vmem:[%s3413_s24 + $0x110] sm:$0xf]  ;;  %v1721_v52 = vmax.bf16 %v1719_v40, %v1717_v44  ;;  %v1372_v53 = vld [vmem:[%s3413_s24 + $0x94] sm:$0xf]  ;;  %v1766_v55 = vsel %vm1623_vm0, %v1339_v43, 4286644096 }
  0x7c   : > { %v1435_v54 = vld [vmem:[%s3413_s24 + $0x190] sm:$0xf]  ;;  %v1752_v56 = vmax.bf16 %v1750_v45, %v1748_v49  ;;  %v1769_v58 = vsel %vm1623_vm0, %v1371_v46, 4286644096  ;;  %v1773_v59 = vsel %vm1623_vm0, %v1403_v47, 4286644096 }
  0x7d   : > { %v1467_v57 = vld [vmem:[%s3413_s24 + $0x210] sm:$0xf]  ;;  %v1725_v60 = vmax.bf16 %v1723_v41, %v1721_v52  ;;  %v1758_v61 = vsel %vm1623_vm0, %v1562_v38, 4286644096  ;;  %v1762_v62 = vsel %vm1623_vm0, %v1594_v39, 4286644096  ;;  %v1771_v0 = vmax.bf16 %v1769_v58, %v1766_v55 }
  0x7e   : > { %v1404_v63 = vld [vmem:[%s3413_s24 + $0x114] sm:$0xf]  ;;  %v1756_v1 = vmax.bf16 %v1754_v50, %v1752_v56  ;;  %v1499_v3 = vld [vmem:[%s3413_s24 + $0x290] sm:$0xf]  ;;  %v1777_v4 = vsel %vm1623_vm0, %v1435_v54, 4286644096 }
  0x7f   : > { %v1436_v2 = vld [vmem:[%s3413_s24 + $0x194] sm:$0xf]  ;;  %v1775_v5 = vmax.bf16 %v1773_v59, %v1771_v0  ;;  %v1781_v6 = vsel %vm1623_vm0, %v1467_v57, 4286644096  ;;  %v1801_v7 = vsel %vm1623_vm0, %v1340_v51, 4286644096  ;;  %v1729_v9 = vmax.bf16 %v1727_v48, %v1725_v60 }
  0x80   : > { %v1804_v8 = vsel %vm1623_vm0, %v1372_v53, 4286644096  ;;  %v1760_v10 = vmax.bf16 %v1758_v61, %v1756_v1  ;;  %v1468_v11 = vld [vmem:[%s3413_s24 + $0x214] sm:$0xf]  ;;  %v1808_v13 = vsel %vm1623_vm0, %v1404_v63, 4286644096 }
  0x81   : > { %v1806_v12 = vmax.bf16 %v1804_v8, %v1801_v7  ;;  %v1531_v14 = vld [vmem:[%s3413_s24 + $0x310] sm:$0xf]  ;;  %v1779_v16 = vmax.bf16 %v1777_v4, %v1775_v5  ;;  %v1812_v17 = vsel %vm1623_vm0, %v1436_v2, 4286644096  ;;  %v1500_v19 = vld [vmem:[%s3413_s24 + $0x294] sm:$0xf] }
  0x82   : > { %v1563_v15 = vld [vmem:[%s3413_s24 + $0x390] sm:$0xf]  ;;  %v1764_v18 = vmax.bf16 %v1762_v62, %v1760_v10  ;;  %v1785_v20 = vsel %vm1623_vm0, %v1499_v3, 4286644096  ;;  %v1532_v22 = vld [vmem:[%s3413_s24 + $0x314] sm:$0xf] }
  0x83   : > { %v1810_v21 = vmax.bf16 %v1808_v13, %v1806_v12  ;;  %v1595_v23 = vld [vmem:[%s3413_s24 + $0x410] sm:$0xf]  ;;  %v1783_v24 = vmax.bf16 %v1781_v6, %v1779_v16  ;;  %v1816_v25 = vsel %vm1623_vm0, %v1468_v11, 4286644096  ;;  %v1564_v27 = vld [vmem:[%s3413_s24 + $0x394] sm:$0xf] }
  0x84   : > { %v2953_v26 = vcombine.low %v1729_v9, %v1764_v18  ;;  %v1596_v28 = vld [vmem:[%s3413_s24 + $0x414] sm:$0xf]  ;;  %v1789_v29 = vsel %vm1623_vm0, %v1531_v14, 4286644096  ;;  %v1793_v30 = vsel %vm1623_vm0, %v1563_v15, 4286644096 }
  0x85   : > { %v1814_v31 = vmax.bf16 %v1812_v17, %v1810_v21  ;;  %v1341_v32 = vld [vmem:[%s3413_s24 + $0x18] sm:$0xf]  ;;  %v1787_v33 = vmax.bf16 %v1785_v20, %v1783_v24  ;;  %v1820_v34 = vsel %vm1623_vm0, %v1500_v19, 4286644096  ;;  %v1797_v37 = vsel %vm1623_vm0, %v1595_v23, 4286644096 }
  0x86   : > { %v1373_v35 = vld [vmem:[%s3413_s24 + $0x98] sm:$0xf]  ;;  %2954 = vst [vmem:[%s3488_s30 + $0x8] sm:$0xff] %v2953_v26   ;;  %v1824_v39 = vsel %vm1623_vm0, %v1532_v22, 4286644096 }
  0x87   : > { %v1405_v36 = vld [vmem:[%s3413_s24 + $0x118] sm:$0xf]  ;;  %v1818_v38 = vmax.bf16 %v1816_v25, %v1814_v31  ;;  %v1342_v40 = vld [vmem:[%s3413_s24 + $0x1c] sm:$0xf]  ;;  %v1791_v41 = vmax.bf16 %v1789_v29, %v1787_v33  ;;  %v1836_v44 = vsel %vm1623_vm0, %v1341_v32, 4286644096 }
  0x88   : > { %v1374_v42 = vld [vmem:[%s3413_s24 + $0x9c] sm:$0xf]  ;;  %v1437_v43 = vld [vmem:[%s3413_s24 + $0x198] sm:$0xf]  ;;  %v1839_v47 = vsel %vm1623_vm0, %v1373_v35, 4286644096 }
  0x89   : > { %v1822_v45 = vmax.bf16 %v1820_v34, %v1818_v38  ;;  %v1469_v46 = vld [vmem:[%s3413_s24 + $0x218] sm:$0xf]  ;;  %v1843_v48 = vsel %vm1623_vm0, %v1405_v36, 4286644096  ;;  %v1795_v49 = vmax.bf16 %v1793_v30, %v1791_v41  ;;  %v1828_v50 = vsel %vm1623_vm0, %v1564_v27, 4286644096 }
  0x8a   : > { %v1832_v51 = vsel %vm1623_vm0, %v1596_v28, 4286644096  ;;  %v1406_v52 = vld [vmem:[%s3413_s24 + $0x11c] sm:$0xf]  ;;  %v1841_v53 = vmax.bf16 %v1839_v47, %v1836_v44  ;;  %v1501_v56 = vld [vmem:[%s3413_s24 + $0x298] sm:$0xf] }
  0x8b   : > { %v1826_v54 = vmax.bf16 %v1824_v39, %v1822_v45  ;;  %v1438_v55 = vld [vmem:[%s3413_s24 + $0x19c] sm:$0xf]  ;;  %v1847_v57 = vsel %vm1623_vm0, %v1437_v43, 4286644096  ;;  %v1851_v59 = vsel %vm1623_vm0, %v1469_v46, 4286644096  ;;  %v1799_v62 = vmax.bf16 %v1797_v37, %v1795_v49 }
  0x8c   : > { %v1845_v58 = vmax.bf16 %v1843_v48, %v1841_v53  ;;  %v1871_v60 = vsel %vm1623_vm0, %v1342_v40, 4286644096  ;;  %v1874_v61 = vsel %vm1623_vm0, %v1374_v42, 4286644096  ;;  %v1470_v0 = vld [vmem:[%s3413_s24 + $0x21c] sm:$0xf] }
  0x8d   : > { %v1830_v63 = vmax.bf16 %v1828_v50, %v1826_v54  ;;  %v1876_v1 = vmax.bf16 %v1874_v61, %v1871_v60  ;;  %v1878_v2 = vsel %vm1623_vm0, %v1406_v52, 4286644096  ;;  %v1533_v3 = vld [vmem:[%s3413_s24 + $0x318] sm:$0xf]  ;;  %v1882_v6 = vsel %vm1623_vm0, %v1438_v55, 4286644096 }
  0x8e   : > { %v1565_v4 = vld [vmem:[%s3413_s24 + $0x398] sm:$0xf]  ;;  %v1849_v5 = vmax.bf16 %v1847_v57, %v1845_v58  ;;  %v1502_v8 = vld [vmem:[%s3413_s24 + $0x29c] sm:$0xf]  ;;  %v1855_v9 = vsel %vm1623_vm0, %v1501_v56, 4286644096 }
  0x8f   : > { %v1834_v7 = vmax.bf16 %v1832_v51, %v1830_v63  ;;  %v1880_v10 = vmax.bf16 %v1878_v2, %v1876_v1  ;;  %v1534_v11 = vld [vmem:[%s3413_s24 + $0x31c] sm:$0xf]  ;;  %v1597_v12 = vld [vmem:[%s3413_s24 + $0x418] sm:$0xf]  ;;  %v1886_v14 = vsel %vm1623_vm0, %v1470_v0, 4286644096 }
  0x90   : > { %v1853_v13 = vmax.bf16 %v1851_v59, %v1849_v5  ;;  %v1566_v16 = vld [vmem:[%s3413_s24 + $0x39c] sm:$0xf]  ;;  %v1859_v18 = vsel %vm1623_vm0, %v1533_v3, 4286644096  ;;  %v1863_v19 = vsel %vm1623_vm0, %v1565_v4, 4286644096 }
  0x91   : > { %v2955_v15 = vcombine.low %v1799_v62, %v1834_v7  ;;  %v1598_v17 = vld [vmem:[%s3413_s24 + $0x41c] sm:$0xf]  ;;  %v1884_v20 = vmax.bf16 %v1882_v6, %v1880_v10  ;;  %v1343_v21 = vld [vmem:[%s3413_s24 + $0x20] sm:$0xf]  ;;  %v1890_v23 = vsel %vm1623_vm0, %v1502_v8, 4286644096 }
  0x92   : > { %v1857_v22 = vmax.bf16 %v1855_v9, %v1853_v13  ;;  %v1375_v24 = vld [vmem:[%s3413_s24 + $0xa0] sm:$0xf]  ;;  %v1867_v26 = vsel %vm1623_vm0, %v1597_v12, 4286644096  ;;  %v1894_v28 = vsel %vm1623_vm0, %v1534_v11, 4286644096 }
  0x93   : > { %v1407_v25 = vld [vmem:[%s3413_s24 + $0x120] sm:$0xf]  ;;  %2956 = vst [vmem:[%s3488_s30 + $0x10] sm:$0xff] %v2955_v15   ;;  %v1888_v27 = vmax.bf16 %v1886_v14, %v1884_v20  ;;  %v1344_v29 = vld [vmem:[%s3413_s24 + $0x24] sm:$0xf] }
  0x94   : > { %v1861_v30 = vmax.bf16 %v1859_v18, %v1857_v22  ;;  %v1376_v31 = vld [vmem:[%s3413_s24 + $0xa4] sm:$0xf]  ;;  %v1439_v32 = vld [vmem:[%s3413_s24 + $0x1a0] sm:$0xf]  ;;  %v1906_v33 = vsel %vm1623_vm0, %v1343_v21, 4286644096 }
  0x95   : > { %v1892_v34 = vmax.bf16 %v1890_v23, %v1888_v27  ;;  %v1471_v35 = vld [vmem:[%s3413_s24 + $0x220] sm:$0xf]  ;;  %v1909_v36 = vsel %vm1623_vm0, %v1375_v24, 4286644096  ;;  %v1913_v37 = vsel %vm1623_vm0, %v1407_v25, 4286644096 }
  0x96   : > { %v1865_v38 = vmax.bf16 %v1863_v19, %v1861_v30  ;;  %v1898_v39 = vsel %vm1623_vm0, %v1566_v16, 4286644096  ;;  %v1902_v40 = vsel %vm1623_vm0, %v1598_v17, 4286644096  ;;  %v1408_v41 = vld [vmem:[%s3413_s24 + $0x124] sm:$0xf]  ;;  %v1911_v42 = vmax.bf16 %v1909_v36, %v1906_v33 }
  0x97   : > { %v1896_v43 = vmax.bf16 %v1894_v28, %v1892_v34  ;;  %v1440_v44 = vld [vmem:[%s3413_s24 + $0x1a4] sm:$0xf]  ;;  %v1503_v45 = vld [vmem:[%s3413_s24 + $0x2a0] sm:$0xf]  ;;  %v1917_v46 = vsel %vm1623_vm0, %v1439_v32, 4286644096 }
  0x98   : > { %v1915_v47 = vmax.bf16 %v1913_v37, %v1911_v42  ;;  %v1921_v48 = vsel %vm1623_vm0, %v1471_v35, 4286644096  ;;  %v1941_v49 = vsel %vm1623_vm0, %v1344_v29, 4286644096  ;;  %v1944_v50 = vsel %vm1623_vm0, %v1376_v31, 4286644096 }
  0x99   : > { %v1869_v51 = vmax.bf16 %v1867_v26, %v1865_v38  ;;  %v1900_v52 = vmax.bf16 %v1898_v39, %v1896_v43  ;;  %v1472_v53 = vld [vmem:[%s3413_s24 + $0x224] sm:$0xf]  ;;  %v1946_v54 = vmax.bf16 %v1944_v50, %v1941_v49  ;;  %v1948_v55 = vsel %vm1623_vm0, %v1408_v41, 4286644096  ;;  %v1535_v56 = vld [vmem:[%s3413_s24 + $0x320] sm:$0xf] }
  0x9a   : > { %v1567_v57 = vld [vmem:[%s3413_s24 + $0x3a0] sm:$0xf]  ;;  %v1919_v58 = vmax.bf16 %v1917_v46, %v1915_v47  ;;  %v1952_v59 = vsel %vm1623_vm0, %v1440_v44, 4286644096  ;;  %v1504_v61 = vld [vmem:[%s3413_s24 + $0x2a4] sm:$0xf] }
  0x9b   : > { %v1904_v60 = vmax.bf16 %v1902_v40, %v1900_v52  ;;  %v1925_v62 = vsel %vm1623_vm0, %v1503_v45, 4286644096  ;;  %v1950_v63 = vmax.bf16 %v1948_v55, %v1946_v54  ;;  %v1536_v0 = vld [vmem:[%s3413_s24 + $0x324] sm:$0xf]  ;;  %v1599_v1 = vld [vmem:[%s3413_s24 + $0x420] sm:$0xf] }
  0x9c   : > { %v1923_v2 = vmax.bf16 %v1921_v48, %v1919_v58  ;;  %v1956_v3 = vsel %vm1623_vm0, %v1472_v53, 4286644096  ;;  %v1568_v5 = vld [vmem:[%s3413_s24 + $0x3a4] sm:$0xf]  ;;  %v1929_v7 = vsel %vm1623_vm0, %v1535_v56, 4286644096 }
  0x9d   : > { %v2957_v4 = vcombine.low %v1869_v51, %v1904_v60  ;;  %v1600_v6 = vld [vmem:[%s3413_s24 + $0x424] sm:$0xf]  ;;  %v1933_v8 = vsel %vm1623_vm0, %v1567_v57, 4286644096  ;;  %v1954_v9 = vmax.bf16 %v1952_v59, %v1950_v63  ;;  %v1345_v10 = vld [vmem:[%s3413_s24 + $0x28] sm:$0xf] }
  0x9e   : > { %v1927_v11 = vmax.bf16 %v1925_v62, %v1923_v2  ;;  %v1960_v12 = vsel %vm1623_vm0, %v1504_v61, 4286644096  ;;  %v1377_v13 = vld [vmem:[%s3413_s24 + $0xa8] sm:$0xf]  ;;  %v1937_v15 = vsel %vm1623_vm0, %v1599_v1, 4286644096 }
  0x9f   : > { %v1409_v14 = vld [vmem:[%s3413_s24 + $0x128] sm:$0xf]  ;;  %2958 = vst [vmem:[%s3488_s30 + $0x18] sm:$0xff] %v2957_v4   ;;  %v1958_v16 = vmax.bf16 %v1956_v3, %v1954_v9  ;;  %v1964_v17 = vsel %vm1623_vm0, %v1536_v0, 4286644096 }
  0xa0   : > { %v1346_v18 = vld [vmem:[%s3413_s24 + $0x2c] sm:$0xf]  ;;  %v1931_v19 = vmax.bf16 %v1929_v7, %v1927_v11  ;;  %v1441_v21 = vld [vmem:[%s3413_s24 + $0x1a8] sm:$0xf]  ;;  %v1976_v22 = vsel %vm1623_vm0, %v1345_v10, 4286644096 }
  0xa1   : > { %v1378_v20 = vld [vmem:[%s3413_s24 + $0xac] sm:$0xf]  ;;  %v1962_v23 = vmax.bf16 %v1960_v12, %v1958_v16  ;;  %v1473_v24 = vld [vmem:[%s3413_s24 + $0x228] sm:$0xf]  ;;  %v1979_v25 = vsel %vm1623_vm0, %v1377_v13, 4286644096 }
  0xa2   : > { %v1983_v26 = vsel %vm1623_vm0, %v1409_v14, 4286644096  ;;  %v1935_v27 = vmax.bf16 %v1933_v8, %v1931_v19  ;;  %v1968_v28 = vsel %vm1623_vm0, %v1568_v5, 4286644096  ;;  %v1972_v29 = vsel %vm1623_vm0, %v1600_v6, 4286644096 }
  0xa3   : > { %v1410_v30 = vld [vmem:[%s3413_s24 + $0x12c] sm:$0xf]  ;;  %v1981_v31 = vmax.bf16 %v1979_v25, %v1976_v22  ;;  %v1966_v32 = vmax.bf16 %v1964_v17, %v1962_v23  ;;  %v1505_v34 = vld [vmem:[%s3413_s24 + $0x2a8] sm:$0xf]  ;;  %v1987_v35 = vsel %vm1623_vm0, %v1441_v21, 4286644096 }
  0xa4   : > { %v1442_v33 = vld [vmem:[%s3413_s24 + $0x1ac] sm:$0xf]  ;;  %v1991_v37 = vsel %vm1623_vm0, %v1473_v24, 4286644096  ;;  %v2011_v38 = vsel %vm1623_vm0, %v1346_v18, 4286644096  ;;  %v1939_v40 = vmax.bf16 %v1937_v15, %v1935_v27 }
  0xa5   : > { %v1985_v36 = vmax.bf16 %v1983_v26, %v1981_v31  ;;  %v2014_v39 = vsel %vm1623_vm0, %v1378_v20, 4286644096  ;;  %v1970_v41 = vmax.bf16 %v1968_v28, %v1966_v32  ;;  %v1474_v42 = vld [vmem:[%s3413_s24 + $0x22c] sm:$0xf]  ;;  %v2018_v44 = vsel %vm1623_vm0, %v1410_v30, 4286644096 }
  0xa6   : > { %v2016_v43 = vmax.bf16 %v2014_v39, %v2011_v38  ;;  %v1537_v45 = vld [vmem:[%s3413_s24 + $0x328] sm:$0xf]  ;;  %v2022_v48 = vsel %vm1623_vm0, %v1442_v33, 4286644096  ;;  %v1506_v50 = vld [vmem:[%s3413_s24 + $0x2ac] sm:$0xf] }
  0xa7   : > { %v1569_v46 = vld [vmem:[%s3413_s24 + $0x3a8] sm:$0xf]  ;;  %v1989_v47 = vmax.bf16 %v1987_v35, %v1985_v36  ;;  %v1974_v49 = vmax.bf16 %v1972_v29, %v1970_v41  ;;  %v1995_v51 = vsel %vm1623_vm0, %v1505_v34, 4286644096  ;;  %v1538_v53 = vld [vmem:[%s3413_s24 + $0x32c] sm:$0xf] }
  0xa8   : > { %v2020_v52 = vmax.bf16 %v2018_v44, %v2016_v43  ;;  %v1601_v54 = vld [vmem:[%s3413_s24 + $0x428] sm:$0xf]  ;;  %v2026_v56 = vsel %vm1623_vm0, %v1474_v42, 4286644096  ;;  %v1570_v58 = vld [vmem:[%s3413_s24 + $0x3ac] sm:$0xf] }
  0xa9   : > { %v1993_v55 = vmax.bf16 %v1991_v37, %v1989_v47  ;;  %v2959_v57 = vcombine.low %v1939_v40, %v1974_v49  ;;  %v1602_v59 = vld [vmem:[%s3413_s24 + $0x42c] sm:$0xf]  ;;  %v1999_v60 = vsel %vm1623_vm0, %v1537_v45, 4286644096  ;;  %v2003_v61 = vsel %vm1623_vm0, %v1569_v46, 4286644096 }
  0xaa   : > { %v2024_v62 = vmax.bf16 %v2022_v48, %v2020_v52  ;;  %v1347_v63 = vld [vmem:[%s3413_s24 + $0x30] sm:$0xf]  ;;  %v2030_v1 = vsel %vm1623_vm0, %v1506_v50, 4286644096  ;;  %v2007_v4 = vsel %vm1623_vm0, %v1601_v54, 4286644096 }
  0xab   : > { %v1997_v0 = vmax.bf16 %v1995_v51, %v1993_v55  ;;  %v1379_v2 = vld [vmem:[%s3413_s24 + $0xb0] sm:$0xf]  ;;  %2960 = vst [vmem:[%s3488_s30 + $0x20] sm:$0xff] %v2959_v57   ;;  %v2034_v6 = vsel %vm1623_vm0, %v1538_v53, 4286644096 }
  0xac   : > { %v1411_v3 = vld [vmem:[%s3413_s24 + $0x130] sm:$0xf]  ;;  %v2028_v5 = vmax.bf16 %v2026_v56, %v2024_v62  ;;  %v1348_v7 = vld [vmem:[%s3413_s24 + $0x34] sm:$0xf]  ;;  %v2046_v11 = vsel %vm1623_vm0, %v1347_v63, 4286644096 }
  0xad   : > { %v2001_v8 = vmax.bf16 %v1999_v60, %v1997_v0  ;;  %v1380_v9 = vld [vmem:[%s3413_s24 + $0xb4] sm:$0xf]  ;;  %v1443_v10 = vld [vmem:[%s3413_s24 + $0x1b0] sm:$0xf]  ;;  %v2049_v14 = vsel %vm1623_vm0, %v1379_v2, 4286644096 }
  0xae   : > { %v2032_v12 = vmax.bf16 %v2030_v1, %v2028_v5  ;;  %v1475_v13 = vld [vmem:[%s3413_s24 + $0x230] sm:$0xf]  ;;  %v2053_v15 = vsel %vm1623_vm0, %v1411_v3, 4286644096  ;;  %v2038_v17 = vsel %vm1623_vm0, %v1570_v58, 4286644096  ;;  %v2051_v20 = vmax.bf16 %v2049_v14, %v2046_v11 }
  0xaf   : > { %v2005_v16 = vmax.bf16 %v2003_v61, %v2001_v8  ;;  %v2042_v18 = vsel %vm1623_vm0, %v1602_v59, 4286644096  ;;  %v1412_v19 = vld [vmem:[%s3413_s24 + $0x134] sm:$0xf]  ;;  %v1507_v23 = vld [vmem:[%s3413_s24 + $0x2b0] sm:$0xf] }
  0xb0   : > { %v2036_v21 = vmax.bf16 %v2034_v6, %v2032_v12  ;;  %v1444_v22 = vld [vmem:[%s3413_s24 + $0x1b4] sm:$0xf]  ;;  %v2057_v24 = vsel %vm1623_vm0, %v1443_v10, 4286644096  ;;  %v2055_v25 = vmax.bf16 %v2053_v15, %v2051_v20  ;;  %v2061_v26 = vsel %vm1623_vm0, %v1475_v13, 4286644096 }
  0xb1   : > { %v2081_v27 = vsel %vm1623_vm0, %v1348_v7, 4286644096  ;;  %v2084_v28 = vsel %vm1623_vm0, %v1380_v9, 4286644096  ;;  %v2009_v29 = vmax.bf16 %v2007_v4, %v2005_v16  ;;  %v1476_v31 = vld [vmem:[%s3413_s24 + $0x234] sm:$0xf] }
  0xb2   : > { %v2040_v30 = vmax.bf16 %v2038_v17, %v2036_v21  ;;  %v2086_v32 = vmax.bf16 %v2084_v28, %v2081_v27  ;;  %v2088_v33 = vsel %vm1623_vm0, %v1412_v19, 4286644096  ;;  %v1539_v34 = vld [vmem:[%s3413_s24 + $0x330] sm:$0xf]  ;;  %v2059_v36 = vmax.bf16 %v2057_v24, %v2055_v25  ;;  %v1508_v39 = vld [vmem:[%s3413_s24 + $0x2b4] sm:$0xf] }
  0xb3   : > { %v1571_v35 = vld [vmem:[%s3413_s24 + $0x3b0] sm:$0xf]  ;;  %v2092_v37 = vsel %vm1623_vm0, %v1444_v22, 4286644096  ;;  %v2065_v40 = vsel %vm1623_vm0, %v1507_v23, 4286644096 }
  0xb4   : > { %v2044_v38 = vmax.bf16 %v2042_v18, %v2040_v30  ;;  %v2090_v41 = vmax.bf16 %v2088_v33, %v2086_v32  ;;  %v1540_v42 = vld [vmem:[%s3413_s24 + $0x334] sm:$0xf]  ;;  %v1603_v43 = vld [vmem:[%s3413_s24 + $0x430] sm:$0xf]  ;;  %v2063_v44 = vmax.bf16 %v2061_v26, %v2059_v36  ;;  %v2096_v45 = vsel %vm1623_vm0, %v1476_v31, 4286644096 }
  0xb5   : > { %v1572_v47 = vld [vmem:[%s3413_s24 + $0x3b4] sm:$0xf]  ;;  %v2069_v49 = vsel %vm1623_vm0, %v1539_v34, 4286644096  ;;  %v2073_v50 = vsel %vm1623_vm0, %v1571_v35, 4286644096 }
  0xb6   : > { %v2961_v46 = vcombine.low %v2009_v29, %v2044_v38  ;;  %v1604_v48 = vld [vmem:[%s3413_s24 + $0x434] sm:$0xf]  ;;  %v2094_v51 = vmax.bf16 %v2092_v37, %v2090_v41  ;;  %v1349_v52 = vld [vmem:[%s3413_s24 + $0x38] sm:$0xf]  ;;  %v2067_v53 = vmax.bf16 %v2065_v40, %v2063_v44  ;;  %v2100_v54 = vsel %vm1623_vm0, %v1508_v39, 4286644096 }
  0xb7   : > { %v1381_v55 = vld [vmem:[%s3413_s24 + $0xb8] sm:$0xf]  ;;  %v2077_v57 = vsel %vm1623_vm0, %v1603_v43, 4286644096  ;;  %v2104_v59 = vsel %vm1623_vm0, %v1540_v42, 4286644096 }
  0xb8   : > { %v1413_v56 = vld [vmem:[%s3413_s24 + $0x138] sm:$0xf]  ;;  %2962 = vst [vmem:[%s3488_s30 + $0x28] sm:$0xff] %v2961_v46   ;;  %v2098_v58 = vmax.bf16 %v2096_v45, %v2094_v51  ;;  %v1350_v60 = vld [vmem:[%s3413_s24 + $0x3c] sm:$0xf]  ;;  %v2071_v61 = vmax.bf16 %v2069_v49, %v2067_v53 }
  0xb9   : > { %v1382_v62 = vld [vmem:[%s3413_s24 + $0xbc] sm:$0xf]  ;;  %v1445_v63 = vld [vmem:[%s3413_s24 + $0x1b8] sm:$0xf]  ;;  %v2116_v0 = vsel %vm1623_vm0, %v1349_v52, 4286644096 }
  0xba   : > { %v2102_v1 = vmax.bf16 %v2100_v54, %v2098_v58  ;;  %v1477_v2 = vld [vmem:[%s3413_s24 + $0x238] sm:$0xf]  ;;  %v2119_v3 = vsel %vm1623_vm0, %v1381_v55, 4286644096  ;;  %v2123_v4 = vsel %vm1623_vm0, %v1413_v56, 4286644096  ;;  %v2075_v5 = vmax.bf16 %v2073_v50, %v2071_v61 }
  0xbb   : > { %v2108_v6 = vsel %vm1623_vm0, %v1572_v47, 4286644096  ;;  %v2112_v7 = vsel %vm1623_vm0, %v1604_v48, 4286644096  ;;  %v1414_v8 = vld [vmem:[%s3413_s24 + $0x13c] sm:$0xf]  ;;  %v2121_v9 = vmax.bf16 %v2119_v3, %v2116_v0 }
  0xbc   : > { %v2106_v10 = vmax.bf16 %v2104_v59, %v2102_v1  ;;  %v1446_v11 = vld [vmem:[%s3413_s24 + $0x1bc] sm:$0xf]  ;;  %v1509_v12 = vld [vmem:[%s3413_s24 + $0x2b8] sm:$0xf]  ;;  %v2127_v13 = vsel %vm1623_vm0, %v1445_v63, 4286644096  ;;  %v2079_v18 = vmax.bf16 %v2077_v57, %v2075_v5 }
  0xbd   : > { %v2125_v14 = vmax.bf16 %v2123_v4, %v2121_v9  ;;  %v2131_v15 = vsel %vm1623_vm0, %v1477_v2, 4286644096  ;;  %v2151_v16 = vsel %vm1623_vm0, %v1350_v60, 4286644096  ;;  %v2154_v17 = vsel %vm1623_vm0, %v1382_v62, 4286644096 }
  0xbe   : > { %v2110_v19 = vmax.bf16 %v2108_v6, %v2106_v10  ;;  %v1478_v20 = vld [vmem:[%s3413_s24 + $0x23c] sm:$0xf]  ;;  %v2156_v21 = vmax.bf16 %v2154_v17, %v2151_v16  ;;  %v2158_v22 = vsel %vm1623_vm0, %v1414_v8, 4286644096  ;;  %v1541_v23 = vld [vmem:[%s3413_s24 + $0x338] sm:$0xf] }
  0xbf   : > { %v1573_v24 = vld [vmem:[%s3413_s24 + $0x3b8] sm:$0xf]  ;;  %v2129_v25 = vmax.bf16 %v2127_v13, %v2125_v14  ;;  %v2162_v26 = vsel %vm1623_vm0, %v1446_v11, 4286644096  ;;  %v1510_v28 = vld [vmem:[%s3413_s24 + $0x2bc] sm:$0xf] }
  0xc0   : > { %v2114_v27 = vmax.bf16 %v2112_v7, %v2110_v19  ;;  %v2135_v29 = vsel %vm1623_vm0, %v1509_v12, 4286644096  ;;  %v2160_v30 = vmax.bf16 %v2158_v22, %v2156_v21  ;;  %v1542_v31 = vld [vmem:[%s3413_s24 + $0x33c] sm:$0xf]  ;;  %v1605_v32 = vld [vmem:[%s3413_s24 + $0x438] sm:$0xf] }
  0xc1   : > { %v2133_v33 = vmax.bf16 %v2131_v15, %v2129_v25  ;;  %v2166_v34 = vsel %vm1623_vm0, %v1478_v20, 4286644096  ;;  %v1574_v36 = vld [vmem:[%s3413_s24 + $0x3bc] sm:$0xf]  ;;  %v2139_v38 = vsel %vm1623_vm0, %v1541_v23, 4286644096 }
  0xc2   : > { %v2963_v35 = vcombine.low %v2079_v18, %v2114_v27  ;;  %v1606_v37 = vld [vmem:[%s3413_s24 + $0x43c] sm:$0xf]  ;;  %v2143_v39 = vsel %vm1623_vm0, %v1573_v24, 4286644096  ;;  %v2164_v40 = vmax.bf16 %v2162_v26, %v2160_v30  ;;  %v1351_v41 = vld [vmem:[%s3413_s24 + $0x40] sm:$0xf] }
  0xc3   : > { %v2137_v42 = vmax.bf16 %v2135_v29, %v2133_v33  ;;  %v2170_v43 = vsel %vm1623_vm0, %v1510_v28, 4286644096  ;;  %v1383_v44 = vld [vmem:[%s3413_s24 + $0xc0] sm:$0xf]  ;;  %v2147_v46 = vsel %vm1623_vm0, %v1605_v32, 4286644096 }
  0xc4   : > { %v1415_v45 = vld [vmem:[%s3413_s24 + $0x140] sm:$0xf]  ;;  %2964 = vst [vmem:[%s3488_s30 + $0x30] sm:$0xff] %v2963_v35   ;;  %v2168_v47 = vmax.bf16 %v2166_v34, %v2164_v40  ;;  %v2174_v48 = vsel %vm1623_vm0, %v1542_v31, 4286644096 }
  0xc5   : > { %v1352_v49 = vld [vmem:[%s3413_s24 + $0x44] sm:$0xf]  ;;  %v2141_v50 = vmax.bf16 %v2139_v38, %v2137_v42  ;;  %v1447_v52 = vld [vmem:[%s3413_s24 + $0x1c0] sm:$0xf]  ;;  %v2186_v53 = vsel %vm1623_vm0, %v1351_v41, 4286644096 }
  0xc6   : > { %v1384_v51 = vld [vmem:[%s3413_s24 + $0xc4] sm:$0xf]  ;;  %v2172_v54 = vmax.bf16 %v2170_v43, %v2168_v47  ;;  %v1479_v55 = vld [vmem:[%s3413_s24 + $0x240] sm:$0xf]  ;;  %v2189_v56 = vsel %vm1623_vm0, %v1383_v44, 4286644096 }
  0xc7   : > { %v2193_v57 = vsel %vm1623_vm0, %v1415_v45, 4286644096  ;;  %v2145_v58 = vmax.bf16 %v2143_v39, %v2141_v50  ;;  %v2178_v59 = vsel %vm1623_vm0, %v1574_v36, 4286644096  ;;  %v2182_v60 = vsel %vm1623_vm0, %v1606_v37, 4286644096 }
  0xc8   : > { %v1416_v61 = vld [vmem:[%s3413_s24 + $0x144] sm:$0xf]  ;;  %v2191_v62 = vmax.bf16 %v2189_v56, %v2186_v53  ;;  %v2176_v63 = vmax.bf16 %v2174_v48, %v2172_v54  ;;  %v1511_v1 = vld [vmem:[%s3413_s24 + $0x2c0] sm:$0xf]  ;;  %v2197_v2 = vsel %vm1623_vm0, %v1447_v52, 4286644096 }
  0xc9   : > { %v1448_v0 = vld [vmem:[%s3413_s24 + $0x1c4] sm:$0xf]  ;;  %v2201_v4 = vsel %vm1623_vm0, %v1479_v55, 4286644096  ;;  %v2221_v5 = vsel %vm1623_vm0, %v1352_v49, 4286644096  ;;  %v2149_v7 = vmax.bf16 %v2147_v46, %v2145_v58 }
  0xca   : > { %v2195_v3 = vmax.bf16 %v2193_v57, %v2191_v62  ;;  %v2224_v6 = vsel %vm1623_vm0, %v1384_v51, 4286644096  ;;  %v2180_v8 = vmax.bf16 %v2178_v59, %v2176_v63  ;;  %v1480_v9 = vld [vmem:[%s3413_s24 + $0x244] sm:$0xf]  ;;  %v2228_v11 = vsel %vm1623_vm0, %v1416_v61, 4286644096 }
  0xcb   : > { %v2226_v10 = vmax.bf16 %v2224_v6, %v2221_v5  ;;  %v1543_v12 = vld [vmem:[%s3413_s24 + $0x340] sm:$0xf]  ;;  %v2232_v15 = vsel %vm1623_vm0, %v1448_v0, 4286644096  ;;  %v1512_v17 = vld [vmem:[%s3413_s24 + $0x2c4] sm:$0xf] }
  0xcc   : > { %v1575_v13 = vld [vmem:[%s3413_s24 + $0x3c0] sm:$0xf]  ;;  %v2199_v14 = vmax.bf16 %v2197_v2, %v2195_v3  ;;  %v2184_v16 = vmax.bf16 %v2182_v60, %v2180_v8  ;;  %v2205_v18 = vsel %vm1623_vm0, %v1511_v1, 4286644096  ;;  %v1544_v20 = vld [vmem:[%s3413_s24 + $0x344] sm:$0xf] }
  0xcd   : > { %v2230_v19 = vmax.bf16 %v2228_v11, %v2226_v10  ;;  %v1607_v21 = vld [vmem:[%s3413_s24 + $0x440] sm:$0xf]  ;;  %v2236_v23 = vsel %vm1623_vm0, %v1480_v9, 4286644096  ;;  %v1576_v25 = vld [vmem:[%s3413_s24 + $0x3c4] sm:$0xf] }
  0xce   : > { %v2203_v22 = vmax.bf16 %v2201_v4, %v2199_v14  ;;  %v2965_v24 = vcombine.low %v2149_v7, %v2184_v16  ;;  %v1608_v26 = vld [vmem:[%s3413_s24 + $0x444] sm:$0xf]  ;;  %v2209_v27 = vsel %vm1623_vm0, %v1543_v12, 4286644096  ;;  %v2213_v28 = vsel %vm1623_vm0, %v1575_v13, 4286644096 }
  0xcf   : > { %v2234_v29 = vmax.bf16 %v2232_v15, %v2230_v19  ;;  %v1353_v30 = vld [vmem:[%s3413_s24 + $0x48] sm:$0xf]  ;;  %v2240_v32 = vsel %vm1623_vm0, %v1512_v17, 4286644096  ;;  %v2217_v35 = vsel %vm1623_vm0, %v1607_v21, 4286644096 }
  0xd0   : > { %v2207_v31 = vmax.bf16 %v2205_v18, %v2203_v22  ;;  %v1385_v33 = vld [vmem:[%s3413_s24 + $0xc8] sm:$0xf]  ;;  %2966 = vst [vmem:[%s3488_s30 + $0x38] sm:$0xff] %v2965_v24   ;;  %v2244_v37 = vsel %vm1623_vm0, %v1544_v20, 4286644096 }
  0xd1   : > { %v1417_v34 = vld [vmem:[%s3413_s24 + $0x148] sm:$0xf]  ;;  %v2238_v36 = vmax.bf16 %v2236_v23, %v2234_v29  ;;  %v1354_v38 = vld [vmem:[%s3413_s24 + $0x4c] sm:$0xf]  ;;  %v2256_v42 = vsel %vm1623_vm0, %v1353_v30, 4286644096 }
  0xd2   : > { %v2211_v39 = vmax.bf16 %v2209_v27, %v2207_v31  ;;  %v1386_v40 = vld [vmem:[%s3413_s24 + $0xcc] sm:$0xf]  ;;  %v1449_v41 = vld [vmem:[%s3413_s24 + $0x1c8] sm:$0xf]  ;;  %v2259_v45 = vsel %vm1623_vm0, %v1385_v33, 4286644096 }
  0xd3   : > { %v2242_v43 = vmax.bf16 %v2240_v32, %v2238_v36  ;;  %v1481_v44 = vld [vmem:[%s3413_s24 + $0x248] sm:$0xf]  ;;  %v2263_v46 = vsel %vm1623_vm0, %v1417_v34, 4286644096  ;;  %v2248_v48 = vsel %vm1623_vm0, %v1576_v25, 4286644096  ;;  %v2261_v51 = vmax.bf16 %v2259_v45, %v2256_v42 }
  0xd4   : > { %v2215_v47 = vmax.bf16 %v2213_v28, %v2211_v39  ;;  %v2252_v49 = vsel %vm1623_vm0, %v1608_v26, 4286644096  ;;  %v1418_v50 = vld [vmem:[%s3413_s24 + $0x14c] sm:$0xf]  ;;  %v1513_v54 = vld [vmem:[%s3413_s24 + $0x2c8] sm:$0xf] }
  0xd5   : > { %v2246_v52 = vmax.bf16 %v2244_v37, %v2242_v43  ;;  %v1450_v53 = vld [vmem:[%s3413_s24 + $0x1cc] sm:$0xf]  ;;  %v2267_v55 = vsel %vm1623_vm0, %v1449_v41, 4286644096  ;;  %v2265_v56 = vmax.bf16 %v2263_v46, %v2261_v51  ;;  %v2271_v57 = vsel %vm1623_vm0, %v1481_v44, 4286644096 }
  0xd6   : > { %v2291_v58 = vsel %vm1623_vm0, %v1354_v38, 4286644096  ;;  %v2294_v59 = vsel %vm1623_vm0, %v1386_v40, 4286644096  ;;  %v2219_v60 = vmax.bf16 %v2217_v35, %v2215_v47  ;;  %v1482_v62 = vld [vmem:[%s3413_s24 + $0x24c] sm:$0xf] }
  0xd7   : > { %v2250_v61 = vmax.bf16 %v2248_v48, %v2246_v52  ;;  %v2296_v63 = vmax.bf16 %v2294_v59, %v2291_v58  ;;  %v2298_v0 = vsel %vm1623_vm0, %v1418_v50, 4286644096  ;;  %v1545_v1 = vld [vmem:[%s3413_s24 + $0x348] sm:$0xf]  ;;  %v2269_v3 = vmax.bf16 %v2267_v55, %v2265_v56  ;;  %v1514_v6 = vld [vmem:[%s3413_s24 + $0x2cc] sm:$0xf] }
  0xd8   : > { %v1577_v2 = vld [vmem:[%s3413_s24 + $0x3c8] sm:$0xf]  ;;  %v2302_v4 = vsel %vm1623_vm0, %v1450_v53, 4286644096  ;;  %v2275_v7 = vsel %vm1623_vm0, %v1513_v54, 4286644096 }
  0xd9   : > { %v2254_v5 = vmax.bf16 %v2252_v49, %v2250_v61  ;;  %v2300_v8 = vmax.bf16 %v2298_v0, %v2296_v63  ;;  %v1546_v9 = vld [vmem:[%s3413_s24 + $0x34c] sm:$0xf]  ;;  %v1609_v10 = vld [vmem:[%s3413_s24 + $0x448] sm:$0xf]  ;;  %v2273_v11 = vmax.bf16 %v2271_v57, %v2269_v3  ;;  %v2306_v12 = vsel %vm1623_vm0, %v1482_v62, 4286644096 }
  0xda   : > { %v1578_v14 = vld [vmem:[%s3413_s24 + $0x3cc] sm:$0xf]  ;;  %v2279_v16 = vsel %vm1623_vm0, %v1545_v1, 4286644096  ;;  %v2283_v17 = vsel %vm1623_vm0, %v1577_v2, 4286644096 }
  0xdb   : > { %v2967_v13 = vcombine.low %v2219_v60, %v2254_v5  ;;  %v1610_v15 = vld [vmem:[%s3413_s24 + $0x44c] sm:$0xf]  ;;  %v2304_v18 = vmax.bf16 %v2302_v4, %v2300_v8  ;;  %v1355_v19 = vld [vmem:[%s3413_s24 + $0x50] sm:$0xf]  ;;  %v2277_v20 = vmax.bf16 %v2275_v7, %v2273_v11  ;;  %v2310_v21 = vsel %vm1623_vm0, %v1514_v6, 4286644096 }
  0xdc   : > { %v1387_v22 = vld [vmem:[%s3413_s24 + $0xd0] sm:$0xf]  ;;  %v2287_v24 = vsel %vm1623_vm0, %v1609_v10, 4286644096  ;;  %v2314_v26 = vsel %vm1623_vm0, %v1546_v9, 4286644096 }
  0xdd   : > { %v1419_v23 = vld [vmem:[%s3413_s24 + $0x150] sm:$0xf]  ;;  %2968 = vst [vmem:[%s3488_s30 + $0x40] sm:$0xff] %v2967_v13   ;;  %v2308_v25 = vmax.bf16 %v2306_v12, %v2304_v18  ;;  %v1356_v27 = vld [vmem:[%s3413_s24 + $0x54] sm:$0xf]  ;;  %v2281_v28 = vmax.bf16 %v2279_v16, %v2277_v20 }
  0xde   : > { %v1388_v29 = vld [vmem:[%s3413_s24 + $0xd4] sm:$0xf]  ;;  %v1451_v30 = vld [vmem:[%s3413_s24 + $0x1d0] sm:$0xf]  ;;  %v2326_v31 = vsel %vm1623_vm0, %v1355_v19, 4286644096 }
  0xdf   : > { %v2312_v32 = vmax.bf16 %v2310_v21, %v2308_v25  ;;  %v1483_v33 = vld [vmem:[%s3413_s24 + $0x250] sm:$0xf]  ;;  %v2329_v34 = vsel %vm1623_vm0, %v1387_v22, 4286644096  ;;  %v2333_v35 = vsel %vm1623_vm0, %v1419_v23, 4286644096  ;;  %v2285_v36 = vmax.bf16 %v2283_v17, %v2281_v28 }
  0xe0   : > { %v2318_v37 = vsel %vm1623_vm0, %v1578_v14, 4286644096  ;;  %v2322_v38 = vsel %vm1623_vm0, %v1610_v15, 4286644096  ;;  %v1420_v39 = vld [vmem:[%s3413_s24 + $0x154] sm:$0xf]  ;;  %v2331_v40 = vmax.bf16 %v2329_v34, %v2326_v31 }
  0xe1   : > { %v2316_v41 = vmax.bf16 %v2314_v26, %v2312_v32  ;;  %v1452_v42 = vld [vmem:[%s3413_s24 + $0x1d4] sm:$0xf]  ;;  %v1515_v43 = vld [vmem:[%s3413_s24 + $0x2d0] sm:$0xf]  ;;  %v2337_v44 = vsel %vm1623_vm0, %v1451_v30, 4286644096  ;;  %v2289_v49 = vmax.bf16 %v2287_v24, %v2285_v36 }
  0xe2   : > { %v2335_v45 = vmax.bf16 %v2333_v35, %v2331_v40  ;;  %v2341_v46 = vsel %vm1623_vm0, %v1483_v33, 4286644096  ;;  %v2361_v47 = vsel %vm1623_vm0, %v1356_v27, 4286644096  ;;  %v2364_v48 = vsel %vm1623_vm0, %v1388_v29, 4286644096 }
  0xe3   : > { %v2320_v50 = vmax.bf16 %v2318_v37, %v2316_v41  ;;  %v1484_v51 = vld [vmem:[%s3413_s24 + $0x254] sm:$0xf]  ;;  %v2366_v52 = vmax.bf16 %v2364_v48, %v2361_v47  ;;  %v2368_v53 = vsel %vm1623_vm0, %v1420_v39, 4286644096  ;;  %v1547_v54 = vld [vmem:[%s3413_s24 + $0x350] sm:$0xf] }
  0xe4   : > { %v1579_v55 = vld [vmem:[%s3413_s24 + $0x3d0] sm:$0xf]  ;;  %v2339_v56 = vmax.bf16 %v2337_v44, %v2335_v45  ;;  %v2372_v57 = vsel %vm1623_vm0, %v1452_v42, 4286644096  ;;  %v1516_v59 = vld [vmem:[%s3413_s24 + $0x2d4] sm:$0xf] }
  0xe5   : > { %v2324_v58 = vmax.bf16 %v2322_v38, %v2320_v50  ;;  %v2345_v60 = vsel %vm1623_vm0, %v1515_v43, 4286644096  ;;  %v2370_v61 = vmax.bf16 %v2368_v53, %v2366_v52  ;;  %v1548_v62 = vld [vmem:[%s3413_s24 + $0x354] sm:$0xf]  ;;  %v1611_v63 = vld [vmem:[%s3413_s24 + $0x450] sm:$0xf] }
  0xe6   : > { %v2343_v0 = vmax.bf16 %v2341_v46, %v2339_v56  ;;  %v2376_v1 = vsel %vm1623_vm0, %v1484_v51, 4286644096  ;;  %v1580_v3 = vld [vmem:[%s3413_s24 + $0x3d4] sm:$0xf]  ;;  %v2349_v5 = vsel %vm1623_vm0, %v1547_v54, 4286644096 }
  0xe7   : > { %v2969_v2 = vcombine.low %v2289_v49, %v2324_v58  ;;  %v1612_v4 = vld [vmem:[%s3413_s24 + $0x454] sm:$0xf]  ;;  %v2353_v6 = vsel %vm1623_vm0, %v1579_v55, 4286644096  ;;  %v2374_v7 = vmax.bf16 %v2372_v57, %v2370_v61  ;;  %v1357_v8 = vld [vmem:[%s3413_s24 + $0x58] sm:$0xf] }
  0xe8   : > { %v2347_v9 = vmax.bf16 %v2345_v60, %v2343_v0  ;;  %v2380_v10 = vsel %vm1623_vm0, %v1516_v59, 4286644096  ;;  %v1389_v11 = vld [vmem:[%s3413_s24 + $0xd8] sm:$0xf]  ;;  %v2357_v13 = vsel %vm1623_vm0, %v1611_v63, 4286644096 }
  0xe9   : > { %v1421_v12 = vld [vmem:[%s3413_s24 + $0x158] sm:$0xf]  ;;  %2970 = vst [vmem:[%s3488_s30 + $0x48] sm:$0xff] %v2969_v2   ;;  %v2378_v14 = vmax.bf16 %v2376_v1, %v2374_v7  ;;  %v2384_v15 = vsel %vm1623_vm0, %v1548_v62, 4286644096 }
  0xea   : > { %v1358_v16 = vld [vmem:[%s3413_s24 + $0x5c] sm:$0xf]  ;;  %v2351_v17 = vmax.bf16 %v2349_v5, %v2347_v9  ;;  %v1453_v19 = vld [vmem:[%s3413_s24 + $0x1d8] sm:$0xf]  ;;  %v2396_v20 = vsel %vm1623_vm0, %v1357_v8, 4286644096 }
  0xeb   : > { %v1390_v18 = vld [vmem:[%s3413_s24 + $0xdc] sm:$0xf]  ;;  %v2382_v21 = vmax.bf16 %v2380_v10, %v2378_v14  ;;  %v1485_v22 = vld [vmem:[%s3413_s24 + $0x258] sm:$0xf]  ;;  %v2399_v23 = vsel %vm1623_vm0, %v1389_v11, 4286644096 }
  0xec   : > { %v2403_v24 = vsel %vm1623_vm0, %v1421_v12, 4286644096  ;;  %v2355_v25 = vmax.bf16 %v2353_v6, %v2351_v17  ;;  %v2388_v26 = vsel %vm1623_vm0, %v1580_v3, 4286644096  ;;  %v2392_v27 = vsel %vm1623_vm0, %v1612_v4, 4286644096 }
  0xed   : > { %v1422_v28 = vld [vmem:[%s3413_s24 + $0x15c] sm:$0xf]  ;;  %v2401_v29 = vmax.bf16 %v2399_v23, %v2396_v20  ;;  %v2386_v30 = vmax.bf16 %v2384_v15, %v2382_v21  ;;  %v1517_v32 = vld [vmem:[%s3413_s24 + $0x2d8] sm:$0xf]  ;;  %v2407_v33 = vsel %vm1623_vm0, %v1453_v19, 4286644096 }
  0xee   : > { %v1454_v31 = vld [vmem:[%s3413_s24 + $0x1dc] sm:$0xf]  ;;  %v2411_v35 = vsel %vm1623_vm0, %v1485_v22, 4286644096  ;;  %v2431_v36 = vsel %vm1623_vm0, %v1358_v16, 4286644096  ;;  %v2359_v38 = vmax.bf16 %v2357_v13, %v2355_v25 }
  0xef   : > { %v2405_v34 = vmax.bf16 %v2403_v24, %v2401_v29  ;;  %v2434_v37 = vsel %vm1623_vm0, %v1390_v18, 4286644096  ;;  %v2390_v39 = vmax.bf16 %v2388_v26, %v2386_v30  ;;  %v1486_v40 = vld [vmem:[%s3413_s24 + $0x25c] sm:$0xf]  ;;  %v2438_v42 = vsel %vm1623_vm0, %v1422_v28, 4286644096 }
  0xf0   : > { %v2436_v41 = vmax.bf16 %v2434_v37, %v2431_v36  ;;  %v1549_v43 = vld [vmem:[%s3413_s24 + $0x358] sm:$0xf]  ;;  %v2442_v46 = vsel %vm1623_vm0, %v1454_v31, 4286644096  ;;  %v1518_v48 = vld [vmem:[%s3413_s24 + $0x2dc] sm:$0xf] }
  0xf1   : > { %v1581_v44 = vld [vmem:[%s3413_s24 + $0x3d8] sm:$0xf]  ;;  %v2409_v45 = vmax.bf16 %v2407_v33, %v2405_v34  ;;  %v2394_v47 = vmax.bf16 %v2392_v27, %v2390_v39  ;;  %v2415_v49 = vsel %vm1623_vm0, %v1517_v32, 4286644096  ;;  %v1550_v51 = vld [vmem:[%s3413_s24 + $0x35c] sm:$0xf] }
  0xf2   : > { %v2440_v50 = vmax.bf16 %v2438_v42, %v2436_v41  ;;  %v1613_v52 = vld [vmem:[%s3413_s24 + $0x458] sm:$0xf]  ;;  %v2446_v54 = vsel %vm1623_vm0, %v1486_v40, 4286644096  ;;  %v1582_v56 = vld [vmem:[%s3413_s24 + $0x3dc] sm:$0xf] }
  0xf3   : > { %v2413_v53 = vmax.bf16 %v2411_v35, %v2409_v45  ;;  %v2971_v55 = vcombine.low %v2359_v38, %v2394_v47  ;;  %v1614_v57 = vld [vmem:[%s3413_s24 + $0x45c] sm:$0xf]  ;;  %v2419_v58 = vsel %vm1623_vm0, %v1549_v43, 4286644096  ;;  %v2423_v59 = vsel %vm1623_vm0, %v1581_v44, 4286644096 }
  0xf4   : > { %v2444_v60 = vmax.bf16 %v2442_v46, %v2440_v50  ;;  %v1359_v61 = vld [vmem:[%s3413_s24 + $0x60] sm:$0xf]  ;;  %v2450_v63 = vsel %vm1623_vm0, %v1518_v48, 4286644096  ;;  %v2427_v2 = vsel %vm1623_vm0, %v1613_v52, 4286644096 }
  0xf5   : > { %v2417_v62 = vmax.bf16 %v2415_v49, %v2413_v53  ;;  %v1391_v0 = vld [vmem:[%s3413_s24 + $0xe0] sm:$0xf]  ;;  %2972 = vst [vmem:[%s3488_s30 + $0x50] sm:$0xff] %v2971_v55   ;;  %v2454_v4 = vsel %vm1623_vm0, %v1550_v51, 4286644096 }
  0xf6   : > { %v1423_v1 = vld [vmem:[%s3413_s24 + $0x160] sm:$0xf]  ;;  %v2448_v3 = vmax.bf16 %v2446_v54, %v2444_v60  ;;  %v1360_v5 = vld [vmem:[%s3413_s24 + $0x64] sm:$0xf]  ;;  %v2466_v9 = vsel %vm1623_vm0, %v1359_v61, 4286644096 }
  0xf7   : > { %v2421_v6 = vmax.bf16 %v2419_v58, %v2417_v62  ;;  %v1392_v7 = vld [vmem:[%s3413_s24 + $0xe4] sm:$0xf]  ;;  %v1455_v8 = vld [vmem:[%s3413_s24 + $0x1e0] sm:$0xf]  ;;  %v2469_v12 = vsel %vm1623_vm0, %v1391_v0, 4286644096 }
  0xf8   : > { %v2452_v10 = vmax.bf16 %v2450_v63, %v2448_v3  ;;  %v1487_v11 = vld [vmem:[%s3413_s24 + $0x260] sm:$0xf]  ;;  %v2473_v13 = vsel %vm1623_vm0, %v1423_v1, 4286644096  ;;  %v2458_v15 = vsel %vm1623_vm0, %v1582_v56, 4286644096  ;;  %v2471_v18 = vmax.bf16 %v2469_v12, %v2466_v9 }
  0xf9   : > { %v2425_v14 = vmax.bf16 %v2423_v59, %v2421_v6  ;;  %v2462_v16 = vsel %vm1623_vm0, %v1614_v57, 4286644096  ;;  %v1424_v17 = vld [vmem:[%s3413_s24 + $0x164] sm:$0xf]  ;;  %v1519_v21 = vld [vmem:[%s3413_s24 + $0x2e0] sm:$0xf] }
  0xfa   : > { %v2456_v19 = vmax.bf16 %v2454_v4, %v2452_v10  ;;  %v1456_v20 = vld [vmem:[%s3413_s24 + $0x1e4] sm:$0xf]  ;;  %v2477_v22 = vsel %vm1623_vm0, %v1455_v8, 4286644096  ;;  %v2475_v23 = vmax.bf16 %v2473_v13, %v2471_v18  ;;  %v2481_v24 = vsel %vm1623_vm0, %v1487_v11, 4286644096 }
  0xfb   : > { %v2501_v25 = vsel %vm1623_vm0, %v1360_v5, 4286644096  ;;  %v2504_v26 = vsel %vm1623_vm0, %v1392_v7, 4286644096  ;;  %v2429_v27 = vmax.bf16 %v2427_v2, %v2425_v14  ;;  %v1488_v29 = vld [vmem:[%s3413_s24 + $0x264] sm:$0xf] }
  0xfc   : > { %v2460_v28 = vmax.bf16 %v2458_v15, %v2456_v19  ;;  %v2506_v30 = vmax.bf16 %v2504_v26, %v2501_v25  ;;  %v2508_v31 = vsel %vm1623_vm0, %v1424_v17, 4286644096  ;;  %v1551_v32 = vld [vmem:[%s3413_s24 + $0x360] sm:$0xf]  ;;  %v2479_v34 = vmax.bf16 %v2477_v22, %v2475_v23  ;;  %v1520_v37 = vld [vmem:[%s3413_s24 + $0x2e4] sm:$0xf] }
  0xfd   : > { %v1583_v33 = vld [vmem:[%s3413_s24 + $0x3e0] sm:$0xf]  ;;  %v2512_v35 = vsel %vm1623_vm0, %v1456_v20, 4286644096  ;;  %v2485_v38 = vsel %vm1623_vm0, %v1519_v21, 4286644096 }
  0xfe   : > { %v2464_v36 = vmax.bf16 %v2462_v16, %v2460_v28  ;;  %v2510_v39 = vmax.bf16 %v2508_v31, %v2506_v30  ;;  %v1552_v40 = vld [vmem:[%s3413_s24 + $0x364] sm:$0xf]  ;;  %v1615_v41 = vld [vmem:[%s3413_s24 + $0x460] sm:$0xf]  ;;  %v2483_v42 = vmax.bf16 %v2481_v24, %v2479_v34  ;;  %v2516_v43 = vsel %vm1623_vm0, %v1488_v29, 4286644096 }
  0xff   : > { %v1584_v45 = vld [vmem:[%s3413_s24 + $0x3e4] sm:$0xf]  ;;  %v2489_v47 = vsel %vm1623_vm0, %v1551_v32, 4286644096  ;;  %v2493_v48 = vsel %vm1623_vm0, %v1583_v33, 4286644096 }
 0x100   : > { %v2973_v44 = vcombine.low %v2429_v27, %v2464_v36  ;;  %v1616_v46 = vld [vmem:[%s3413_s24 + $0x464] sm:$0xf]  ;;  %v2514_v49 = vmax.bf16 %v2512_v35, %v2510_v39  ;;  %v1361_v50 = vld [vmem:[%s3413_s24 + $0x68] sm:$0xf]  ;;  %v2487_v51 = vmax.bf16 %v2485_v38, %v2483_v42  ;;  %v2520_v52 = vsel %vm1623_vm0, %v1520_v37, 4286644096 }
 0x101   : > { %v1393_v53 = vld [vmem:[%s3413_s24 + $0xe8] sm:$0xf]  ;;  %v2497_v55 = vsel %vm1623_vm0, %v1615_v41, 4286644096  ;;  %v2524_v57 = vsel %vm1623_vm0, %v1552_v40, 4286644096 }
 0x102   : > { %v1425_v54 = vld [vmem:[%s3413_s24 + $0x168] sm:$0xf]  ;;  %2974 = vst [vmem:[%s3488_s30 + $0x58] sm:$0xff] %v2973_v44   ;;  %v2518_v56 = vmax.bf16 %v2516_v43, %v2514_v49  ;;  %v1362_v58 = vld [vmem:[%s3413_s24 + $0x6c] sm:$0xf]  ;;  %v2491_v59 = vmax.bf16 %v2489_v47, %v2487_v51 }
 0x103   : > { %v1394_v60 = vld [vmem:[%s3413_s24 + $0xec] sm:$0xf]  ;;  %v1457_v61 = vld [vmem:[%s3413_s24 + $0x1e8] sm:$0xf]  ;;  %v2536_v62 = vsel %vm1623_vm0, %v1361_v50, 4286644096 }
 0x104   : > { %v2522_v63 = vmax.bf16 %v2520_v52, %v2518_v56  ;;  %v1489_v0 = vld [vmem:[%s3413_s24 + $0x268] sm:$0xf]  ;;  %v2539_v1 = vsel %vm1623_vm0, %v1393_v53, 4286644096  ;;  %v2543_v2 = vsel %vm1623_vm0, %v1425_v54, 4286644096  ;;  %v2495_v3 = vmax.bf16 %v2493_v48, %v2491_v59 }
 0x105   : > { %v2528_v4 = vsel %vm1623_vm0, %v1584_v45, 4286644096  ;;  %v2532_v5 = vsel %vm1623_vm0, %v1616_v46, 4286644096  ;;  %v1426_v6 = vld [vmem:[%s3413_s24 + $0x16c] sm:$0xf]  ;;  %v2541_v7 = vmax.bf16 %v2539_v1, %v2536_v62 }
 0x106   : > { %v2526_v8 = vmax.bf16 %v2524_v57, %v2522_v63  ;;  %v1458_v9 = vld [vmem:[%s3413_s24 + $0x1ec] sm:$0xf]  ;;  %v1521_v10 = vld [vmem:[%s3413_s24 + $0x2e8] sm:$0xf]  ;;  %v2547_v11 = vsel %vm1623_vm0, %v1457_v61, 4286644096  ;;  %v2499_v16 = vmax.bf16 %v2497_v55, %v2495_v3 }
 0x107   : > { %v2545_v12 = vmax.bf16 %v2543_v2, %v2541_v7  ;;  %v2551_v13 = vsel %vm1623_vm0, %v1489_v0, 4286644096  ;;  %v2571_v14 = vsel %vm1623_vm0, %v1362_v58, 4286644096  ;;  %v2574_v15 = vsel %vm1623_vm0, %v1394_v60, 4286644096 }
 0x108   : > { %v2530_v17 = vmax.bf16 %v2528_v4, %v2526_v8  ;;  %v1490_v18 = vld [vmem:[%s3413_s24 + $0x26c] sm:$0xf]  ;;  %v2576_v19 = vmax.bf16 %v2574_v15, %v2571_v14  ;;  %v2578_v20 = vsel %vm1623_vm0, %v1426_v6, 4286644096  ;;  %v1553_v21 = vld [vmem:[%s3413_s24 + $0x368] sm:$0xf] }
 0x109   : > { %v1585_v22 = vld [vmem:[%s3413_s24 + $0x3e8] sm:$0xf]  ;;  %v2549_v23 = vmax.bf16 %v2547_v11, %v2545_v12  ;;  %v2582_v24 = vsel %vm1623_vm0, %v1458_v9, 4286644096  ;;  %v1522_v26 = vld [vmem:[%s3413_s24 + $0x2ec] sm:$0xf] }
 0x10a   : > { %v2534_v25 = vmax.bf16 %v2532_v5, %v2530_v17  ;;  %v2555_v27 = vsel %vm1623_vm0, %v1521_v10, 4286644096  ;;  %v2580_v28 = vmax.bf16 %v2578_v20, %v2576_v19  ;;  %v1554_v29 = vld [vmem:[%s3413_s24 + $0x36c] sm:$0xf]  ;;  %v1617_v30 = vld [vmem:[%s3413_s24 + $0x468] sm:$0xf] }
 0x10b   : > { %v2553_v31 = vmax.bf16 %v2551_v13, %v2549_v23  ;;  %v2586_v32 = vsel %vm1623_vm0, %v1490_v18, 4286644096  ;;  %v1586_v34 = vld [vmem:[%s3413_s24 + $0x3ec] sm:$0xf]  ;;  %v2559_v36 = vsel %vm1623_vm0, %v1553_v21, 4286644096 }
 0x10c   : > { %v2975_v33 = vcombine.low %v2499_v16, %v2534_v25  ;;  %v1618_v35 = vld [vmem:[%s3413_s24 + $0x46c] sm:$0xf]  ;;  %v2563_v37 = vsel %vm1623_vm0, %v1585_v22, 4286644096  ;;  %v2584_v38 = vmax.bf16 %v2582_v24, %v2580_v28  ;;  %v1363_v39 = vld [vmem:[%s3413_s24 + $0x70] sm:$0xf] }
 0x10d   : > { %v2557_v40 = vmax.bf16 %v2555_v27, %v2553_v31  ;;  %v2590_v41 = vsel %vm1623_vm0, %v1522_v26, 4286644096  ;;  %v1395_v42 = vld [vmem:[%s3413_s24 + $0xf0] sm:$0xf]  ;;  %v2567_v44 = vsel %vm1623_vm0, %v1617_v30, 4286644096 }
 0x10e   : > { %v1427_v43 = vld [vmem:[%s3413_s24 + $0x170] sm:$0xf]  ;;  %2976 = vst [vmem:[%s3488_s30 + $0x60] sm:$0xff] %v2975_v33   ;;  %v2588_v45 = vmax.bf16 %v2586_v32, %v2584_v38  ;;  %v2594_v46 = vsel %vm1623_vm0, %v1554_v29, 4286644096 }
 0x10f   : > { %v1364_v47 = vld [vmem:[%s3413_s24 + $0x74] sm:$0xf]  ;;  %v2561_v48 = vmax.bf16 %v2559_v36, %v2557_v40  ;;  %v1459_v50 = vld [vmem:[%s3413_s24 + $0x1f0] sm:$0xf]  ;;  %v2606_v51 = vsel %vm1623_vm0, %v1363_v39, 4286644096 }
 0x110   : > { %v1396_v49 = vld [vmem:[%s3413_s24 + $0xf4] sm:$0xf]  ;;  %v2592_v52 = vmax.bf16 %v2590_v41, %v2588_v45  ;;  %v1491_v53 = vld [vmem:[%s3413_s24 + $0x270] sm:$0xf]  ;;  %v2609_v54 = vsel %vm1623_vm0, %v1395_v42, 4286644096 }
 0x111   : > { %v2613_v55 = vsel %vm1623_vm0, %v1427_v43, 4286644096  ;;  %v2565_v56 = vmax.bf16 %v2563_v37, %v2561_v48  ;;  %v2598_v57 = vsel %vm1623_vm0, %v1586_v34, 4286644096  ;;  %v2602_v58 = vsel %vm1623_vm0, %v1618_v35, 4286644096 }
 0x112   : > { %v1428_v59 = vld [vmem:[%s3413_s24 + $0x174] sm:$0xf]  ;;  %v2611_v60 = vmax.bf16 %v2609_v54, %v2606_v51  ;;  %v2596_v61 = vmax.bf16 %v2594_v46, %v2592_v52  ;;  %v1523_v63 = vld [vmem:[%s3413_s24 + $0x2f0] sm:$0xf]  ;;  %v2617_v0 = vsel %vm1623_vm0, %v1459_v50, 4286644096 }
 0x113   : > { %v1460_v62 = vld [vmem:[%s3413_s24 + $0x1f4] sm:$0xf]  ;;  %v2621_v2 = vsel %vm1623_vm0, %v1491_v53, 4286644096  ;;  %v2641_v3 = vsel %vm1623_vm0, %v1364_v47, 4286644096  ;;  %v2569_v5 = vmax.bf16 %v2567_v44, %v2565_v56 }
 0x114   : > { %v2615_v1 = vmax.bf16 %v2613_v55, %v2611_v60  ;;  %v2644_v4 = vsel %vm1623_vm0, %v1396_v49, 4286644096  ;;  %v2600_v6 = vmax.bf16 %v2598_v57, %v2596_v61  ;;  %v1492_v7 = vld [vmem:[%s3413_s24 + $0x274] sm:$0xf]  ;;  %v2648_v9 = vsel %vm1623_vm0, %v1428_v59, 4286644096 }
 0x115   : > { %v2646_v8 = vmax.bf16 %v2644_v4, %v2641_v3  ;;  %v1555_v10 = vld [vmem:[%s3413_s24 + $0x370] sm:$0xf]  ;;  %v2652_v13 = vsel %vm1623_vm0, %v1460_v62, 4286644096  ;;  %v1524_v15 = vld [vmem:[%s3413_s24 + $0x2f4] sm:$0xf] }
 0x116   : > { %v1587_v11 = vld [vmem:[%s3413_s24 + $0x3f0] sm:$0xf]  ;;  %v2619_v12 = vmax.bf16 %v2617_v0, %v2615_v1  ;;  %v2604_v14 = vmax.bf16 %v2602_v58, %v2600_v6  ;;  %v2625_v16 = vsel %vm1623_vm0, %v1523_v63, 4286644096  ;;  %v1556_v18 = vld [vmem:[%s3413_s24 + $0x374] sm:$0xf] }
 0x117   : > { %v2650_v17 = vmax.bf16 %v2648_v9, %v2646_v8  ;;  %v1619_v19 = vld [vmem:[%s3413_s24 + $0x470] sm:$0xf]  ;;  %v2656_v21 = vsel %vm1623_vm0, %v1492_v7, 4286644096  ;;  %v1588_v23 = vld [vmem:[%s3413_s24 + $0x3f4] sm:$0xf] }
 0x118   : > { %v2623_v20 = vmax.bf16 %v2621_v2, %v2619_v12  ;;  %v2977_v22 = vcombine.low %v2569_v5, %v2604_v14  ;;  %v1620_v24 = vld [vmem:[%s3413_s24 + $0x474] sm:$0xf]  ;;  %v2629_v25 = vsel %vm1623_vm0, %v1555_v10, 4286644096  ;;  %v2633_v26 = vsel %vm1623_vm0, %v1587_v11, 4286644096 }
 0x119   : > { %v2654_v27 = vmax.bf16 %v2652_v13, %v2650_v17  ;;  %v1365_v28 = vld [vmem:[%s3413_s24 + $0x78] sm:$0xf]  ;;  %v2660_v30 = vsel %vm1623_vm0, %v1524_v15, 4286644096  ;;  %v2637_v33 = vsel %vm1623_vm0, %v1619_v19, 4286644096 }
 0x11a   : > { %v2627_v29 = vmax.bf16 %v2625_v16, %v2623_v20  ;;  %v1397_v31 = vld [vmem:[%s3413_s24 + $0xf8] sm:$0xf]  ;;  %2978 = vst [vmem:[%s3488_s30 + $0x68] sm:$0xff] %v2977_v22   ;;  %v2664_v35 = vsel %vm1623_vm0, %v1556_v18, 4286644096 }
 0x11b   : > { %v1429_v32 = vld [vmem:[%s3413_s24 + $0x178] sm:$0xf]  ;;  %v2658_v34 = vmax.bf16 %v2656_v21, %v2654_v27  ;;  %v1366_v36 = vld [vmem:[%s3413_s24 + $0x7c] sm:$0xf]  ;;  %v2676_v40 = vsel %vm1623_vm0, %v1365_v28, 4286644096 }
 0x11c   : > { %v2631_v37 = vmax.bf16 %v2629_v25, %v2627_v29  ;;  %v1398_v38 = vld [vmem:[%s3413_s24 + $0xfc] sm:$0xf]  ;;  %v1461_v39 = vld [vmem:[%s3413_s24 + $0x1f8] sm:$0xf]  ;;  %v2679_v43 = vsel %vm1623_vm0, %v1397_v31, 4286644096 }
 0x11d   : > { %v2662_v41 = vmax.bf16 %v2660_v30, %v2658_v34  ;;  %v1493_v42 = vld [vmem:[%s3413_s24 + $0x278] sm:$0xf]  ;;  %v2683_v44 = vsel %vm1623_vm0, %v1429_v32, 4286644096  ;;  %v2668_v46 = vsel %vm1623_vm0, %v1588_v23, 4286644096  ;;  %v2681_v49 = vmax.bf16 %v2679_v43, %v2676_v40 }
 0x11e   : > { %v2635_v45 = vmax.bf16 %v2633_v26, %v2631_v37  ;;  %v2672_v47 = vsel %vm1623_vm0, %v1620_v24, 4286644096  ;;  %v1430_v48 = vld [vmem:[%s3413_s24 + $0x17c] sm:$0xf]  ;;  %v1525_v52 = vld [vmem:[%s3413_s24 + $0x2f8] sm:$0xf] }
 0x11f   : > { %v2666_v50 = vmax.bf16 %v2664_v35, %v2662_v41  ;;  %v1462_v51 = vld [vmem:[%s3413_s24 + $0x1fc] sm:$0xf]  ;;  %v2687_v53 = vsel %vm1623_vm0, %v1461_v39, 4286644096  ;;  %v2685_v54 = vmax.bf16 %v2683_v44, %v2681_v49  ;;  %v2691_v55 = vsel %vm1623_vm0, %v1493_v42, 4286644096 }
 0x120   : > { %v2711_v56 = vsel %vm1623_vm0, %v1366_v36, 4286644096  ;;  %v2714_v57 = vsel %vm1623_vm0, %v1398_v38, 4286644096  ;;  %v2639_v58 = vmax.bf16 %v2637_v33, %v2635_v45  ;;  %v1494_v60 = vld [vmem:[%s3413_s24 + $0x27c] sm:$0xf] }
 0x121   : > { %v2670_v59 = vmax.bf16 %v2668_v46, %v2666_v50  ;;  %v2716_v61 = vmax.bf16 %v2714_v57, %v2711_v56  ;;  %v2718_v62 = vsel %vm1623_vm0, %v1430_v48, 4286644096  ;;  %v1557_v63 = vld [vmem:[%s3413_s24 + $0x378] sm:$0xf]  ;;  %v2689_v0 = vmax.bf16 %v2687_v53, %v2685_v54  ;;  %v1526_v3 = vld [vmem:[%s3413_s24 + $0x2fc] sm:$0xf] }
 0x122   : > { %v2722_v1 = vsel %vm1623_vm0, %v1462_v51, 4286644096  ;;  %v2695_v4 = vsel %vm1623_vm0, %v1525_v52, 4286644096  ;;  %v1589_v6 = vld [vmem:[%s3413_s24 + $0x3f8] sm:$0xf] }
 0x123   : > { %v2674_v2 = vmax.bf16 %v2672_v47, %v2670_v59  ;;  %v2720_v5 = vmax.bf16 %v2718_v62, %v2716_v61  ;;  %v2693_v7 = vmax.bf16 %v2691_v55, %v2689_v0  ;;  %v2726_v8 = vsel %vm1623_vm0, %v1494_v60, 4286644096  ;;  %v1558_v10 = vld [vmem:[%s3413_s24 + $0x37c] sm:$0xf]  ;;  %v1621_v16 = vld [vmem:[%s3413_s24 + $0x478] sm:$0xf] }
 0x124   : > { %v2699_v11 = vsel %vm1623_vm0, %v1557_v63, 4286644096  ;;  %v2730_v14 = vsel %vm1623_vm0, %v1526_v3, 4286644096  ;;  %v1590_v15 = vld [vmem:[%s3413_s24 + $0x3fc] sm:$0xf] }
 0x125   : > { %v2979_v9 = vcombine.low %v2639_v58, %v2674_v2  ;;  %v2724_v12 = vmax.bf16 %v2722_v1, %v2720_v5  ;;  %v2697_v13 = vmax.bf16 %v2695_v4, %v2693_v7  ;;  %v2703_v17 = vsel %vm1623_vm0, %v1589_v6, 4286644096  ;;  %v1622_v21 = vld [vmem:[%s3413_s24 + $0x47c] sm:$0xf] }
 0x126   : > { %v2734_v20 = vsel %vm1623_vm0, %v1558_v10, 4286644096  ;;  %v2707_v24 = vsel %vm1623_vm0, %v1621_v16, 4286644096  ;;  %v2738_v25 = vsel %vm1623_vm0, %v1590_v15, 4286644096 }
 0x127   : > { %2980 = vst [vmem:[%s3488_s30 + $0x70] sm:$0xff] %v2979_v9   ;;  %v2728_v18 = vmax.bf16 %v2726_v8, %v2724_v12  ;;  %v2701_v19 = vmax.bf16 %v2699_v11, %v2697_v13  ;;  %v2742_v27 = vsel %vm1623_vm0, %v1622_v21, 4286644096 }
 0x129   : > { %v2732_v22 = vmax.bf16 %v2730_v14, %v2728_v18  ;;  %v2705_v23 = vmax.bf16 %v2703_v17, %v2701_v19 }
 0x12b   : > { %v2736_v26 = vmax.bf16 %v2734_v20, %v2732_v22  ;;  %v2709_v28 = vmax.bf16 %v2707_v24, %v2705_v23 }
 0x12d   : > { %v2740_v29 = vmax.bf16 %v2738_v25, %v2736_v26 }
 0x12f   : > { %v2744_v30 = vmax.bf16 %v2742_v27, %v2740_v29 }
 0x131   : > { %v2981_v31 = vcombine.low %v2709_v28, %v2744_v30 }
 0x133   : > { %2982 = vst [vmem:[%s3488_s30 + $0x78] sm:$0xff] %v2981_v31  }
 0x134 PF: > { %s11_s10 = sadd.s32 1, %s3063_s10   ;;  %s4040_s6 = smov %s3051_s7 }
 0x135   : > { %p8_p10 = scmp.ge.s32.totalorder %s11_s10, 44   ;;  %s4041_s7 = smov %s3110_s14 }
 0x136   : > { %s4042_s8 = smov %s3059_s9  ;;  %s4043_s9 = smov %s4045_s11 }
 0x137   :  { %10 = sbr.rel (!%p8_p10) target bundleno = 3 (0x3), region = 100 }

// kernel: stem_fwd.11
= control target key start
LH: loop header
LB: loop body
LE: loop exit
PB: predicated region body
PF: predicated region fallthrough
CT: control target
= control target key end

     0   :  { %s2140_s15 = smov 0   ;;  %s2142_s16 = smov 0   ;;  %s2410_s0 = inlined_call_operand.vmem [shape: bf16[10752,128], index: 0, kind: input, shape index: {}]   ;;  %s2411_s1 = inlined_call_operand.vmem [shape: bf16[128,128], index: 1, kind: input, shape index: {}]   ;;  %s2412_s2 = inlined_call_operand.vmem [shape: f32[1,128], index: 2, kind: input, shape index: {}]   ;;  %s2413_s3 = inlined_call_operand.vmem [shape: f32[1,128], index: 3, kind: input, shape index: {}]   ;;  %s2414_s4 = inlined_call_operand.vmem [shape: bf16[10752,128], index: 4, kind: output, shape index: {}]  }
   0x1   :  { %s2144_s17 = smov 0  }
   0x2 LB: > { %s26_s18 = sadd.s32 1, %s2109_s16  ;;  %p1523_p0 = scmp.ge.s32.totalorder %s2113_s17, 1  ;;  %s2113_s17 = sphi %s2144_s17, %s14_s17   ;;  %s2109_s16 = sphi %s2142_s16, %s2416_s16   ;;  %s2105_s15 = sphi %s2140_s15, %s2415_s15  }
   0x3   : > { %p28_p1 = scmp.ge.s32.totalorder %s26_s18, 21  ;;  %p202_p2 = scmp.lt.s32.totalorder %s2113_s17, 22 }
   0x5   : > { %s2418_s18 = smov (%p28_p1, %s26_s18), 0  ;;  %p203_p3 = pnand %p1523_p0, %p202_p2 }
   0x6   : > { %s1524_s21 = sshll.u32 (!%p203_p3), %s2105_s15, 6 }
   0x7   : > { %206 = sbr.rel (%p203_p3) target bundleno = 309 (0x135), region = 36  ;;  %p242_p4 = scmp.lt.s32.totalorder (!%p203_p3), %s1524_s21, 1343 }
   0xc   : > { %v2051_v0 = vld [vmem:[%s2411_s1 + $0x38] sm:$0xff]   ;;  %v2052_v1 = vld [vmem:[%s2411_s1 + $0x30] sm:$0xff]   ;;  %s2420_s21 = smov (!%p242_p4, %s1524_s21), 1343  ;;  %v2053_v2 = vld [vmem:[%s2411_s1 + $0x28] sm:$0xff]  }
   0xd   : > { %1931 = vmatprep.subr.bf16.mxu0 %v2051_v0  ;;  %2011 = vmatprep.subr.bf16.mxu1 %v2051_v0  ;;  %s1525_s26 = sshll.u32 %s2420_s21, 2  ;;  %v2054_v3 = vld [vmem:[%s2411_s1 + $0x20] sm:$0xff]   ;;  %v2055_v6 = vld [vmem:[%s2411_s1 + $0x18] sm:$0xff]   ;;  %v2056_v7 = vld [vmem:[%s2411_s1 + $0x10] sm:$0xff]  }
   0xe   : > { %1932 = vmatpush3.bf16.msra.mxu0 %v2051_v0  ;;  %2019 = vmatpush3.bf16.msra.mxu1 %v2051_v0  ;;  %s2175_s29 = scalar_lea.vmem %s2410_s0, %s1525_s26  ;;  %v2057_v8 = vld [vmem:[%s2411_s1 + $0x8] sm:$0xff]   ;;  %v2058_v9 = vld [vmem:[%s2411_s1] sm:$0xff]   ;;  %s2257_s24 = scalar_lea.vmem %s2414_s4, %s1525_s26 }
   0xf   : > { %1933 = vmatprep.subr.bf16.mxu0 %v2052_v1  ;;  %2012 = vmatprep.subr.bf16.mxu1 %v2052_v1  ;;  %v2059_v4 = vld [vmem:[%s2175_s29] sm:$0xff]   ;;  %v2061_v10 = vld [vmem:[%s2175_s29 + $0x8] sm:$0xff]   ;;  %v2063_v12 = vld [vmem:[%s2175_s29 + $0x10] sm:$0xff]  }
  0x10   : > { %v2060_v5 = vld [vmem:[%s2175_s29 + $0x80] sm:$0xff]   ;;  %1947 = vmatprep.mubr.bf16.mxu0 %v2059_v4  ;;  %v2062_v11 = vld [vmem:[%s2175_s29 + $0x88] sm:$0xff]   ;;  %v2064_v13 = vld [vmem:[%s2175_s29 + $0x90] sm:$0xff]  }
  0x11   : > { %1979 = vmatprep.mubr.bf16.mxu1 %v2060_v5  ;;  %v2065_v14 = vld [vmem:[%s2175_s29 + $0x18] sm:$0xff]   ;;  %v2067_v16 = vld [vmem:[%s2175_s29 + $0x20] sm:$0xff]   ;;  %v2069_v18 = vld [vmem:[%s2175_s29 + $0x28] sm:$0xff]  }
  0x12   : > { %1934 = vmatpush3.bf16.msra.mxu0 %v2052_v1  ;;  %2020 = vmatpush3.bf16.msra.mxu1 %v2052_v1  ;;  %v2066_v15 = vld [vmem:[%s2175_s29 + $0x98] sm:$0xff]   ;;  %v2068_v17 = vld [vmem:[%s2175_s29 + $0xa0] sm:$0xff]   ;;  %v2070_v19 = vld [vmem:[%s2175_s29 + $0xa8] sm:$0xff]  }
  0x13   : > { %1935 = vmatprep.subr.bf16.mxu0 %v2053_v2  ;;  %2013 = vmatprep.subr.bf16.mxu1 %v2053_v2  ;;  %v2071_v20 = vld [vmem:[%s2175_s29 + $0x30] sm:$0xff]   ;;  %v2073_v22 = vld [vmem:[%s2175_s29 + $0x38] sm:$0xff]   ;;  %v2075_v24 = vld [vmem:[%s2175_s29 + $0x40] sm:$0xff]  }
  0x14   : > { %v2072_v21 = vld [vmem:[%s2175_s29 + $0xb0] sm:$0xff]   ;;  %v2074_v23 = vld [vmem:[%s2175_s29 + $0xb8] sm:$0xff]   ;;  %v2076_v25 = vld [vmem:[%s2175_s29 + $0xc0] sm:$0xff]  }
  0x15   : > { %v2077_v26 = vld [vmem:[%s2175_s29 + $0x48] sm:$0xff]   ;;  %v2079_v28 = vld [vmem:[%s2175_s29 + $0x50] sm:$0xff]   ;;  %v2081_v30 = vld [vmem:[%s2175_s29 + $0x58] sm:$0xff]  }
  0x16   : > { %1936 = vmatpush3.bf16.msra.mxu0 %v2053_v2  ;;  %2021 = vmatpush3.bf16.msra.mxu1 %v2053_v2  ;;  %v2078_v27 = vld [vmem:[%s2175_s29 + $0xc8] sm:$0xff]   ;;  %v2080_v29 = vld [vmem:[%s2175_s29 + $0xd0] sm:$0xff]   ;;  %v2082_v31 = vld [vmem:[%s2175_s29 + $0xd8] sm:$0xff]  }
  0x17   : > { %1937 = vmatprep.subr.bf16.mxu0 %v2054_v3  ;;  %2014 = vmatprep.subr.bf16.mxu1 %v2054_v3  ;;  %v2083_v32 = vld [vmem:[%s2175_s29 + $0x60] sm:$0xff]   ;;  %v2085_v34 = vld [vmem:[%s2175_s29 + $0x68] sm:$0xff]   ;;  %v2087_v36 = vld [vmem:[%s2175_s29 + $0x70] sm:$0xff]  }
  0x18   : > { %v2084_v33 = vld [vmem:[%s2175_s29 + $0xe0] sm:$0xff]   ;;  %v2086_v35 = vld [vmem:[%s2175_s29 + $0xe8] sm:$0xff]   ;;  %v2088_v37 = vld [vmem:[%s2175_s29 + $0xf0] sm:$0xff]  }
  0x19   : > { %v2089_v38 = vld [vmem:[%s2175_s29 + $0x78] sm:$0xff]   ;;  %v2227_v40 = vld [vmem:[%s2412_s2] ss:$0 sm:$0xff] }
  0x1a   : > { %1938 = vmatpush3.bf16.msra.mxu0 %v2054_v3  ;;  %2022 = vmatpush3.bf16.msra.mxu1 %v2054_v3  ;;  %v2090_v39 = vld [vmem:[%s2175_s29 + $0xf8] sm:$0xff]   ;;  %v2234_v45 = vld [vmem:[%s2413_s3] ss:$0 sm:$0xff] }
  0x1b   : > { %1939 = vmatprep.subr.bf16.mxu0 %v2055_v6  ;;  %2015 = vmatprep.subr.bf16.mxu1 %v2055_v6 }
  0x1e   : > { %1940 = vmatpush3.bf16.msra.mxu0 %v2055_v6  ;;  %2023 = vmatpush3.bf16.msra.mxu1 %v2055_v6 }
  0x1f   : > { %1941 = vmatprep.subr.bf16.mxu0 %v2056_v7  ;;  %2016 = vmatprep.subr.bf16.mxu1 %v2056_v7 }
  0x22   : > { %1942 = vmatpush3.bf16.msra.mxu0 %v2056_v7  ;;  %2024 = vmatpush3.bf16.msra.mxu1 %v2056_v7 }
  0x23   : > { %1943 = vmatprep.subr.bf16.mxu0 %v2057_v8  ;;  %2017 = vmatprep.subr.bf16.mxu1 %v2057_v8 }
  0x26   : > { %1944 = vmatpush3.bf16.msra.mxu0 %v2057_v8  ;;  %2025 = vmatpush3.bf16.msra.mxu1 %v2057_v8 }
  0x27   : > { %1945 = vmatprep.subr.bf16.mxu0 %v2058_v9  ;;  %2018 = vmatprep.subr.bf16.mxu1 %v2058_v9 }
  0x2a   : > { %1946 = vmatpush3.bf16.msra.mxu0 %v2058_v9  ;;  %2026 = vmatpush3.bf16.msra.mxu1 %v2058_v9 }
  0x2d   : > { %1948 = vmatmul.mubr.bf16.vlgmr.msra.gmra.mxu0 %v2061_v10  ;;  %1980 = vmatmul.mubr.bf16.vlgmr.msra.gmra.mxu1 %v2062_v11 }
  0x2e   : > { %1951 = vmatprep.mubr.bf16.mxu0 %v2063_v12  ;;  %1983 = vmatprep.mubr.bf16.mxu1 %v2064_v13 }
  0x35   : > { %1952 = vmatmul.mubr.bf16.gmra.mxu0 %v2065_v14  ;;  %1984 = vmatmul.mubr.bf16.gmra.mxu1 %v2066_v15 }
  0x36   : > { %1955 = vmatprep.mubr.bf16.mxu0 %v2067_v16  ;;  %1987 = vmatprep.mubr.bf16.mxu1 %v2068_v17 }
  0x3d   : > { %1956 = vmatmul.mubr.bf16.gmra.mxu0 %v2069_v18  ;;  %1988 = vmatmul.mubr.bf16.gmra.mxu1 %v2070_v19 }
  0x3e   : > { %1959 = vmatprep.mubr.bf16.mxu0 %v2071_v20  ;;  %1991 = vmatprep.mubr.bf16.mxu1 %v2072_v21 }
  0x45   : > { %1960 = vmatmul.mubr.bf16.gmra.mxu0 %v2073_v22  ;;  %1992 = vmatmul.mubr.bf16.gmra.mxu1 %v2074_v23 }
  0x46   : > { %1963 = vmatprep.mubr.bf16.mxu0 %v2075_v24  ;;  %1995 = vmatprep.mubr.bf16.mxu1 %v2076_v25 }
  0x4d   : > { %1964 = vmatmul.mubr.bf16.gmra.mxu0 %v2077_v26  ;;  %1996 = vmatmul.mubr.bf16.gmra.mxu1 %v2078_v27 }
  0x4e   : > { %1967 = vmatprep.mubr.bf16.mxu0 %v2079_v28  ;;  %1999 = vmatprep.mubr.bf16.mxu1 %v2080_v29 }
  0x55   : > { %1968 = vmatmul.mubr.bf16.gmra.mxu0 %v2081_v30  ;;  %2000 = vmatmul.mubr.bf16.gmra.mxu1 %v2082_v31 }
  0x56   : > { %1971 = vmatprep.mubr.bf16.mxu0 %v2083_v32  ;;  %2003 = vmatprep.mubr.bf16.mxu1 %v2084_v33 }
  0x5d   : > { %1972 = vmatmul.mubr.bf16.gmra.mxu0 %v2085_v34  ;;  %2004 = vmatmul.mubr.bf16.gmra.mxu1 %v2086_v35 }
  0x5e   : > { %1975 = vmatprep.mubr.bf16.mxu0 %v2087_v36  ;;  %2007 = vmatprep.mubr.bf16.mxu1 %v2088_v37 }
  0x65   : > { %1976 = vmatmul.mubr.bf16.gmra.mxu0 %v2089_v38  ;;  %2008 = vmatmul.mubr.bf16.gmra.mxu1 %v2090_v39 }
  0xed   : > { %v1949_v41 = vpop.f32.mrf.mxu0  ;;  %v1981_v42 = vpop.f32.mrf.mxu1 }
  0xee   : > { %v885_v43 = vmul.f32 %v1949_v41, %v2227_v40  ;;  %v917_v44 = vmul.f32 %v1981_v42, %v2227_v40 }
  0xef   : > { %v621_v46 = vpop.f32.mrf.mxu0  ;;  %v749_v47 = vpop.f32.mrf.mxu1 }
  0xf0   : > { %v883_v48 = vmul.f32 %v2227_v40, %v621_v46  ;;  %v915_v49 = vmul.f32 %v2227_v40, %v749_v47  ;;  %v956_v52 = vadd.f32 %v2234_v45, %v885_v43  ;;  %v988_v53 = vadd.f32 %v2234_v45, %v917_v44 }
  0xf1   : > { %v1950_v50 = vpop.f32.mrf.mxu0  ;;  %v1982_v51 = vpop.f32.mrf.mxu1 }
  0xf2   : > { %v886_v54 = vmul.f32 %v1950_v50, %v2227_v40  ;;  %v918_v55 = vmul.f32 %v1982_v51, %v2227_v40  ;;  %v954_v58 = vadd.f32 %v2234_v45, %v883_v48  ;;  %v986_v59 = vadd.f32 %v2234_v45, %v915_v49 }
  0xf3   : > { %v624_v56 = vpop.f32.mrf.mxu0  ;;  %v752_v57 = vpop.f32.mrf.mxu1  ;;  %v1020_v2 = vmax.f32 %v956_v52, 0.0  ;;  %v1052_v3 = vmax.f32 %v988_v53, 0.0 }
  0xf4   : > { %v884_v60 = vmul.f32 %v2227_v40, %v624_v56  ;;  %v916_v61 = vmul.f32 %v2227_v40, %v752_v57  ;;  %v957_v62 = vadd.f32 %v2234_v45, %v886_v54  ;;  %v989_v63 = vadd.f32 %v2234_v45, %v918_v55 }
  0xf5   : > { %v1953_v0 = vpop.f32.mrf.mxu0  ;;  %v1985_v1 = vpop.f32.mrf.mxu1  ;;  %v1018_v12 = vmax.f32 %v954_v58, 0.0  ;;  %v1050_v13 = vmax.f32 %v986_v59, 0.0 }
  0xf6   : > { %v955_v4 = vadd.f32 %v2234_v45, %v884_v60  ;;  %v987_v5 = vadd.f32 %v2234_v45, %v916_v61  ;;  %v1021_v6 = vmax.f32 %v957_v62, 0.0  ;;  %v1053_v7 = vmax.f32 %v989_v63, 0.0 }
  0xf7   : > { %v889_v8 = vmul.f32 %v1953_v0, %v2227_v40  ;;  %v921_v9 = vmul.f32 %v1985_v1, %v2227_v40  ;;  %v637_v10 = vpop.f32.mrf.mxu0  ;;  %v765_v11 = vpop.f32.mrf.mxu1 }
  0xf8   : > { %v1019_v14 = vmax.f32 %v955_v4, 0.0  ;;  %v1051_v15 = vmax.f32 %v987_v5, 0.0  ;;  %v1708_v16 = vpack.c.bf16 %v1021_v6, %v1020_v2  ;;  %v1788_v17 = vpack.c.bf16 %v1053_v7, %v1052_v3 }
  0xf9   : > { %v887_v18 = vmul.f32 %v2227_v40, %v637_v10  ;;  %v919_v19 = vmul.f32 %v2227_v40, %v765_v11  ;;  %v1954_v20 = vpop.f32.mrf.mxu0  ;;  %v1986_v21 = vpop.f32.mrf.mxu1  ;;  %v960_v24 = vadd.f32 %v2234_v45, %v889_v8  ;;  %v992_v25 = vadd.f32 %v2234_v45, %v921_v9 }
  0xfa   : > { %v1703_v22 = vpack.c.bf16 %v1019_v14, %v1018_v12  ;;  %v1783_v23 = vpack.c.bf16 %v1051_v15, %v1050_v13  ;;  %1860 = vst [vmem:[%s2257_s24 + $0x8] sm:$0xff] %v1708_v16   ;;  %1876 = vst [vmem:[%s2257_s24 + $0x88] sm:$0xff] %v1788_v17   ;;  %v890_v26 = vmul.f32 %v1954_v20, %v2227_v40 }
  0xfb   : > { %v922_v27 = vmul.f32 %v1986_v21, %v2227_v40  ;;  %v640_v28 = vpop.f32.mrf.mxu0  ;;  %v768_v29 = vpop.f32.mrf.mxu1  ;;  %v958_v30 = vadd.f32 %v2234_v45, %v887_v18  ;;  %v990_v31 = vadd.f32 %v2234_v45, %v919_v19  ;;  %v1024_v43 = vmax.f32 %v960_v24, 0.0 }
  0xfc   : > { %1704 = vst [vmem:[%s2257_s24] sm:$0xff] %v1703_v22   ;;  %1875 = vst [vmem:[%s2257_s24 + $0x80] sm:$0xff] %v1783_v23   ;;  %v888_v32 = vmul.f32 %v2227_v40, %v640_v28  ;;  %v920_v33 = vmul.f32 %v2227_v40, %v768_v29  ;;  %v961_v34 = vadd.f32 %v2234_v45, %v890_v26  ;;  %v1056_v44 = vmax.f32 %v992_v25, 0.0 }
  0xfd   : > { %v993_v35 = vadd.f32 %v2234_v45, %v922_v27  ;;  %v1957_v36 = vpop.f32.mrf.mxu0  ;;  %v1989_v37 = vpop.f32.mrf.mxu1  ;;  %v1022_v50 = vmax.f32 %v958_v30, 0.0  ;;  %v1054_v51 = vmax.f32 %v990_v31, 0.0 }
  0xfe   : > { %v959_v38 = vadd.f32 %v2234_v45, %v888_v32  ;;  %v991_v39 = vadd.f32 %v2234_v45, %v920_v33  ;;  %v893_v41 = vmul.f32 %v1957_v36, %v2227_v40  ;;  %v925_v42 = vmul.f32 %v1989_v37, %v2227_v40 }
  0xff   : > { %v1025_v46 = vmax.f32 %v961_v34, 0.0  ;;  %v1057_v47 = vmax.f32 %v993_v35, 0.0  ;;  %v653_v48 = vpop.f32.mrf.mxu0  ;;  %v781_v49 = vpop.f32.mrf.mxu1 }
 0x100   : > { %v1023_v52 = vmax.f32 %v959_v38, 0.0  ;;  %v1055_v53 = vmax.f32 %v991_v39, 0.0  ;;  %v891_v56 = vmul.f32 %v2227_v40, %v653_v48  ;;  %v923_v57 = vmul.f32 %v2227_v40, %v781_v49 }
 0x101   : > { %v1718_v54 = vpack.c.bf16 %v1025_v46, %v1024_v43  ;;  %v1798_v55 = vpack.c.bf16 %v1057_v47, %v1056_v44  ;;  %v1958_v58 = vpop.f32.mrf.mxu0  ;;  %v1990_v59 = vpop.f32.mrf.mxu1  ;;  %v964_v62 = vadd.f32 %v2234_v45, %v893_v41  ;;  %v996_v63 = vadd.f32 %v2234_v45, %v925_v42 }
 0x102   : > { %v1713_v60 = vpack.c.bf16 %v1023_v52, %v1022_v50  ;;  %v1793_v61 = vpack.c.bf16 %v1055_v53, %v1054_v51  ;;  %v894_v0 = vmul.f32 %v1958_v58, %v2227_v40  ;;  %v926_v1 = vmul.f32 %v1990_v59, %v2227_v40 }
 0x103   : > { %1862 = vst [vmem:[%s2257_s24 + $0x18] sm:$0xff] %v1718_v54   ;;  %1878 = vst [vmem:[%s2257_s24 + $0x98] sm:$0xff] %v1798_v55   ;;  %v656_v2 = vpop.f32.mrf.mxu0  ;;  %v784_v3 = vpop.f32.mrf.mxu1  ;;  %v962_v4 = vadd.f32 %v2234_v45, %v891_v56  ;;  %v994_v5 = vadd.f32 %v2234_v45, %v923_v57  ;;  %v1028_v12 = vmax.f32 %v964_v62, 0.0  ;;  %v1060_v13 = vmax.f32 %v996_v63, 0.0 }
 0x104   : > { %1861 = vst [vmem:[%s2257_s24 + $0x10] sm:$0xff] %v1713_v60   ;;  %1877 = vst [vmem:[%s2257_s24 + $0x90] sm:$0xff] %v1793_v61   ;;  %v892_v6 = vmul.f32 %v2227_v40, %v656_v2  ;;  %v924_v7 = vmul.f32 %v2227_v40, %v784_v3  ;;  %v965_v8 = vadd.f32 %v2234_v45, %v894_v0 }
 0x105   : > { %v997_v9 = vadd.f32 %v2234_v45, %v926_v1  ;;  %v1961_v10 = vpop.f32.mrf.mxu0  ;;  %v1993_v11 = vpop.f32.mrf.mxu1  ;;  %v1026_v22 = vmax.f32 %v962_v4, 0.0  ;;  %v1058_v23 = vmax.f32 %v994_v5, 0.0 }
 0x106   : > { %v963_v14 = vadd.f32 %v2234_v45, %v892_v6  ;;  %v995_v15 = vadd.f32 %v2234_v45, %v924_v7  ;;  %v1029_v16 = vmax.f32 %v965_v8, 0.0  ;;  %v897_v18 = vmul.f32 %v1961_v10, %v2227_v40 }
 0x107   : > { %v1061_v17 = vmax.f32 %v997_v9, 0.0  ;;  %v929_v19 = vmul.f32 %v1993_v11, %v2227_v40  ;;  %v669_v20 = vpop.f32.mrf.mxu0  ;;  %v797_v21 = vpop.f32.mrf.mxu1 }
 0x108   : > { %v1027_v24 = vmax.f32 %v963_v14, 0.0  ;;  %v1059_v25 = vmax.f32 %v995_v15, 0.0  ;;  %v1728_v26 = vpack.c.bf16 %v1029_v16, %v1028_v12  ;;  %v895_v28 = vmul.f32 %v2227_v40, %v669_v20 }
 0x109   : > { %v1808_v27 = vpack.c.bf16 %v1061_v17, %v1060_v13  ;;  %v927_v29 = vmul.f32 %v2227_v40, %v797_v21  ;;  %v1962_v30 = vpop.f32.mrf.mxu0  ;;  %v1994_v31 = vpop.f32.mrf.mxu1  ;;  %v968_v34 = vadd.f32 %v2234_v45, %v897_v18  ;;  %v1000_v35 = vadd.f32 %v2234_v45, %v929_v19 }
 0x10a   : > { %v1723_v32 = vpack.c.bf16 %v1027_v24, %v1026_v22  ;;  %v1803_v33 = vpack.c.bf16 %v1059_v25, %v1058_v23  ;;  %1864 = vst [vmem:[%s2257_s24 + $0x28] sm:$0xff] %v1728_v26   ;;  %v898_v36 = vmul.f32 %v1962_v30, %v2227_v40  ;;  %v930_v37 = vmul.f32 %v1994_v31, %v2227_v40 }
 0x10b   : > { %1880 = vst [vmem:[%s2257_s24 + $0xa8] sm:$0xff] %v1808_v27   ;;  %v672_v38 = vpop.f32.mrf.mxu0  ;;  %v800_v39 = vpop.f32.mrf.mxu1  ;;  %v966_v41 = vadd.f32 %v2234_v45, %v895_v28  ;;  %v998_v42 = vadd.f32 %v2234_v45, %v927_v29  ;;  %v1032_v54 = vmax.f32 %v968_v34, 0.0  ;;  %v1064_v55 = vmax.f32 %v1000_v35, 0.0 }
 0x10c   : > { %1863 = vst [vmem:[%s2257_s24 + $0x20] sm:$0xff] %v1723_v32   ;;  %1879 = vst [vmem:[%s2257_s24 + $0xa0] sm:$0xff] %v1803_v33   ;;  %v896_v43 = vmul.f32 %v2227_v40, %v672_v38  ;;  %v928_v44 = vmul.f32 %v2227_v40, %v800_v39  ;;  %v969_v46 = vadd.f32 %v2234_v45, %v898_v36 }
 0x10d   : > { %v1001_v47 = vadd.f32 %v2234_v45, %v930_v37  ;;  %v1965_v48 = vpop.f32.mrf.mxu0  ;;  %v1997_v49 = vpop.f32.mrf.mxu1  ;;  %v1030_v60 = vmax.f32 %v966_v41, 0.0  ;;  %v1062_v61 = vmax.f32 %v998_v42, 0.0 }
 0x10e   : > { %v967_v50 = vadd.f32 %v2234_v45, %v896_v43  ;;  %v999_v51 = vadd.f32 %v2234_v45, %v928_v44  ;;  %v901_v52 = vmul.f32 %v1965_v48, %v2227_v40  ;;  %v933_v53 = vmul.f32 %v1997_v49, %v2227_v40 }
 0x10f   : > { %v1033_v56 = vmax.f32 %v969_v46, 0.0  ;;  %v1065_v57 = vmax.f32 %v1001_v47, 0.0  ;;  %v685_v58 = vpop.f32.mrf.mxu0  ;;  %v813_v59 = vpop.f32.mrf.mxu1 }
 0x110   : > { %v1031_v62 = vmax.f32 %v967_v50, 0.0  ;;  %v1063_v63 = vmax.f32 %v999_v51, 0.0  ;;  %v899_v2 = vmul.f32 %v2227_v40, %v685_v58  ;;  %v931_v3 = vmul.f32 %v2227_v40, %v813_v59 }
 0x111   : > { %v1738_v0 = vpack.c.bf16 %v1033_v56, %v1032_v54  ;;  %v1818_v1 = vpack.c.bf16 %v1065_v57, %v1064_v55  ;;  %v1966_v4 = vpop.f32.mrf.mxu0  ;;  %v1998_v5 = vpop.f32.mrf.mxu1  ;;  %v972_v8 = vadd.f32 %v2234_v45, %v901_v52  ;;  %v1004_v9 = vadd.f32 %v2234_v45, %v933_v53 }
 0x112   : > { %v1733_v6 = vpack.c.bf16 %v1031_v62, %v1030_v60  ;;  %v1813_v7 = vpack.c.bf16 %v1063_v63, %v1062_v61  ;;  %v902_v10 = vmul.f32 %v1966_v4, %v2227_v40  ;;  %v934_v11 = vmul.f32 %v1998_v5, %v2227_v40 }
 0x113   : > { %1866 = vst [vmem:[%s2257_s24 + $0x38] sm:$0xff] %v1738_v0   ;;  %1882 = vst [vmem:[%s2257_s24 + $0xb8] sm:$0xff] %v1818_v1   ;;  %v688_v12 = vpop.f32.mrf.mxu0  ;;  %v816_v13 = vpop.f32.mrf.mxu1  ;;  %v970_v14 = vadd.f32 %v2234_v45, %v899_v2  ;;  %v1002_v15 = vadd.f32 %v2234_v45, %v931_v3  ;;  %v1036_v22 = vmax.f32 %v972_v8, 0.0  ;;  %v1068_v23 = vmax.f32 %v1004_v9, 0.0 }
 0x114   : > { %1865 = vst [vmem:[%s2257_s24 + $0x30] sm:$0xff] %v1733_v6   ;;  %1881 = vst [vmem:[%s2257_s24 + $0xb0] sm:$0xff] %v1813_v7   ;;  %v900_v16 = vmul.f32 %v2227_v40, %v688_v12  ;;  %v932_v17 = vmul.f32 %v2227_v40, %v816_v13  ;;  %v973_v18 = vadd.f32 %v2234_v45, %v902_v10 }
 0x115   : > { %v1005_v19 = vadd.f32 %v2234_v45, %v934_v11  ;;  %v1969_v20 = vpop.f32.mrf.mxu0  ;;  %v2001_v21 = vpop.f32.mrf.mxu1  ;;  %v1034_v32 = vmax.f32 %v970_v14, 0.0  ;;  %v1066_v33 = vmax.f32 %v1002_v15, 0.0 }
 0x116   : > { %v971_v24 = vadd.f32 %v2234_v45, %v900_v16  ;;  %v1003_v25 = vadd.f32 %v2234_v45, %v932_v17  ;;  %v1037_v26 = vmax.f32 %v973_v18, 0.0  ;;  %v905_v28 = vmul.f32 %v1969_v20, %v2227_v40 }
 0x117   : > { %v1069_v27 = vmax.f32 %v1005_v19, 0.0  ;;  %v937_v29 = vmul.f32 %v2001_v21, %v2227_v40  ;;  %v701_v30 = vpop.f32.mrf.mxu0  ;;  %v829_v31 = vpop.f32.mrf.mxu1 }
 0x118   : > { %v1035_v34 = vmax.f32 %v971_v24, 0.0  ;;  %v1067_v35 = vmax.f32 %v1003_v25, 0.0  ;;  %v1748_v36 = vpack.c.bf16 %v1037_v26, %v1036_v22  ;;  %v903_v38 = vmul.f32 %v2227_v40, %v701_v30 }
 0x119   : > { %v1828_v37 = vpack.c.bf16 %v1069_v27, %v1068_v23  ;;  %v935_v39 = vmul.f32 %v2227_v40, %v829_v31  ;;  %v1970_v41 = vpop.f32.mrf.mxu0  ;;  %v2002_v42 = vpop.f32.mrf.mxu1  ;;  %v976_v46 = vadd.f32 %v2234_v45, %v905_v28  ;;  %v1008_v47 = vadd.f32 %v2234_v45, %v937_v29 }
 0x11a   : > { %v1743_v43 = vpack.c.bf16 %v1035_v34, %v1034_v32  ;;  %v1823_v44 = vpack.c.bf16 %v1067_v35, %v1066_v33  ;;  %1868 = vst [vmem:[%s2257_s24 + $0x48] sm:$0xff] %v1748_v36   ;;  %v906_v48 = vmul.f32 %v1970_v41, %v2227_v40  ;;  %v938_v49 = vmul.f32 %v2002_v42, %v2227_v40 }
 0x11b   : > { %1884 = vst [vmem:[%s2257_s24 + $0xc8] sm:$0xff] %v1828_v37   ;;  %v704_v50 = vpop.f32.mrf.mxu0  ;;  %v832_v51 = vpop.f32.mrf.mxu1  ;;  %v974_v52 = vadd.f32 %v2234_v45, %v903_v38  ;;  %v1006_v53 = vadd.f32 %v2234_v45, %v935_v39  ;;  %v1040_v0 = vmax.f32 %v976_v46, 0.0  ;;  %v1072_v1 = vmax.f32 %v1008_v47, 0.0 }
 0x11c   : > { %1867 = vst [vmem:[%s2257_s24 + $0x40] sm:$0xff] %v1743_v43   ;;  %1883 = vst [vmem:[%s2257_s24 + $0xc0] sm:$0xff] %v1823_v44   ;;  %v904_v54 = vmul.f32 %v2227_v40, %v704_v50  ;;  %v936_v55 = vmul.f32 %v2227_v40, %v832_v51  ;;  %v977_v56 = vadd.f32 %v2234_v45, %v906_v48 }
 0x11d   : > { %v1009_v57 = vadd.f32 %v2234_v45, %v938_v49  ;;  %v1973_v58 = vpop.f32.mrf.mxu0  ;;  %v2005_v59 = vpop.f32.mrf.mxu1  ;;  %v1038_v6 = vmax.f32 %v974_v52, 0.0  ;;  %v1070_v7 = vmax.f32 %v1006_v53, 0.0 }
 0x11e   : > { %v975_v60 = vadd.f32 %v2234_v45, %v904_v54  ;;  %v1007_v61 = vadd.f32 %v2234_v45, %v936_v55  ;;  %v909_v62 = vmul.f32 %v1973_v58, %v2227_v40  ;;  %v941_v63 = vmul.f32 %v2005_v59, %v2227_v40 }
 0x11f   : > { %v1041_v2 = vmax.f32 %v977_v56, 0.0  ;;  %v1073_v3 = vmax.f32 %v1009_v57, 0.0  ;;  %v717_v4 = vpop.f32.mrf.mxu0  ;;  %v845_v5 = vpop.f32.mrf.mxu1 }
 0x120   : > { %v1039_v8 = vmax.f32 %v975_v60, 0.0  ;;  %v1071_v9 = vmax.f32 %v1007_v61, 0.0  ;;  %v907_v12 = vmul.f32 %v2227_v40, %v717_v4  ;;  %v939_v13 = vmul.f32 %v2227_v40, %v845_v5 }
 0x121   : > { %v1758_v10 = vpack.c.bf16 %v1041_v2, %v1040_v0  ;;  %v1838_v11 = vpack.c.bf16 %v1073_v3, %v1072_v1  ;;  %v1974_v14 = vpop.f32.mrf.mxu0  ;;  %v2006_v15 = vpop.f32.mrf.mxu1  ;;  %v980_v18 = vadd.f32 %v2234_v45, %v909_v62  ;;  %v1012_v19 = vadd.f32 %v2234_v45, %v941_v63 }
 0x122   : > { %v1753_v16 = vpack.c.bf16 %v1039_v8, %v1038_v6  ;;  %v1833_v17 = vpack.c.bf16 %v1071_v9, %v1070_v7  ;;  %v910_v20 = vmul.f32 %v1974_v14, %v2227_v40  ;;  %v942_v21 = vmul.f32 %v2006_v15, %v2227_v40 }
 0x123   : > { %1870 = vst [vmem:[%s2257_s24 + $0x58] sm:$0xff] %v1758_v10   ;;  %1886 = vst [vmem:[%s2257_s24 + $0xd8] sm:$0xff] %v1838_v11   ;;  %v720_v22 = vpop.f32.mrf.mxu0  ;;  %v848_v23 = vpop.f32.mrf.mxu1  ;;  %v978_v24 = vadd.f32 %v2234_v45, %v907_v12  ;;  %v1010_v25 = vadd.f32 %v2234_v45, %v939_v13  ;;  %v1044_v32 = vmax.f32 %v980_v18, 0.0  ;;  %v1076_v33 = vmax.f32 %v1012_v19, 0.0 }
 0x124   : > { %1869 = vst [vmem:[%s2257_s24 + $0x50] sm:$0xff] %v1753_v16   ;;  %1885 = vst [vmem:[%s2257_s24 + $0xd0] sm:$0xff] %v1833_v17   ;;  %v908_v26 = vmul.f32 %v2227_v40, %v720_v22  ;;  %v940_v27 = vmul.f32 %v2227_v40, %v848_v23  ;;  %v981_v28 = vadd.f32 %v2234_v45, %v910_v20 }
 0x125   : > { %v1013_v29 = vadd.f32 %v2234_v45, %v942_v21  ;;  %v1977_v30 = vpop.f32.mrf.mxu0  ;;  %v2009_v31 = vpop.f32.mrf.mxu1  ;;  %v1042_v43 = vmax.f32 %v978_v24, 0.0  ;;  %v1074_v44 = vmax.f32 %v1010_v25, 0.0 }
 0x126   : > { %v979_v34 = vadd.f32 %v2234_v45, %v908_v26  ;;  %v1011_v35 = vadd.f32 %v2234_v45, %v940_v27  ;;  %v1045_v36 = vmax.f32 %v981_v28, 0.0  ;;  %v913_v38 = vmul.f32 %v1977_v30, %v2227_v40 }
 0x127   : > { %v1077_v37 = vmax.f32 %v1013_v29, 0.0  ;;  %v945_v39 = vmul.f32 %v2009_v31, %v2227_v40  ;;  %v733_v41 = vpop.f32.mrf.mxu0  ;;  %v861_v42 = vpop.f32.mrf.mxu1 }
 0x128   : > { %v1043_v46 = vmax.f32 %v979_v34, 0.0  ;;  %v1075_v47 = vmax.f32 %v1011_v35, 0.0  ;;  %v1768_v48 = vpack.c.bf16 %v1045_v36, %v1044_v32  ;;  %v911_v50 = vmul.f32 %v2227_v40, %v733_v41 }
 0x129   : > { %v1848_v49 = vpack.c.bf16 %v1077_v37, %v1076_v33  ;;  %v943_v51 = vmul.f32 %v2227_v40, %v861_v42  ;;  %v1978_v52 = vpop.f32.mrf.mxu0  ;;  %v2010_v53 = vpop.f32.mrf.mxu1  ;;  %v984_v56 = vadd.f32 %v2234_v45, %v913_v38  ;;  %v1016_v57 = vadd.f32 %v2234_v45, %v945_v39 }
 0x12a   : > { %v1763_v54 = vpack.c.bf16 %v1043_v46, %v1042_v43  ;;  %v1843_v55 = vpack.c.bf16 %v1075_v47, %v1074_v44  ;;  %1872 = vst [vmem:[%s2257_s24 + $0x68] sm:$0xff] %v1768_v48   ;;  %v914_v58 = vmul.f32 %v1978_v52, %v2227_v40  ;;  %v946_v59 = vmul.f32 %v2010_v53, %v2227_v40 }
 0x12b   : > { %1888 = vst [vmem:[%s2257_s24 + $0xe8] sm:$0xff] %v1848_v49   ;;  %v736_v60 = vpop.f32.mrf.mxu0  ;;  %v864_v61 = vpop.f32.mrf.mxu1  ;;  %v982_v62 = vadd.f32 %v2234_v45, %v911_v50  ;;  %v1014_v63 = vadd.f32 %v2234_v45, %v943_v51  ;;  %v1048_v6 = vmax.f32 %v984_v56, 0.0  ;;  %v1080_v7 = vmax.f32 %v1016_v57, 0.0 }
 0x12c   : > { %1871 = vst [vmem:[%s2257_s24 + $0x60] sm:$0xff] %v1763_v54   ;;  %1887 = vst [vmem:[%s2257_s24 + $0xe0] sm:$0xff] %v1843_v55   ;;  %v912_v0 = vmul.f32 %v2227_v40, %v736_v60  ;;  %v944_v1 = vmul.f32 %v2227_v40, %v864_v61  ;;  %v985_v2 = vadd.f32 %v2234_v45, %v914_v58 }
 0x12d   : > { %v1017_v3 = vadd.f32 %v2234_v45, %v946_v59  ;;  %v1046_v10 = vmax.f32 %v982_v62, 0.0  ;;  %v1078_v11 = vmax.f32 %v1014_v63, 0.0 }
 0x12e   : > { %v983_v4 = vadd.f32 %v2234_v45, %v912_v0  ;;  %v1015_v5 = vadd.f32 %v2234_v45, %v944_v1  ;;  %v1049_v8 = vmax.f32 %v985_v2, 0.0 }
 0x12f   : > { %v1081_v9 = vmax.f32 %v1017_v3, 0.0 }
 0x130   : > { %v1047_v12 = vmax.f32 %v983_v4, 0.0  ;;  %v1079_v40 = vmax.f32 %v1015_v5, 0.0  ;;  %v1778_v13 = vpack.c.bf16 %v1049_v8, %v1048_v6 }
 0x131   : > { %v1858_v14 = vpack.c.bf16 %v1081_v9, %v1080_v7 }
 0x132   : > { %v1773_v15 = vpack.c.bf16 %v1047_v12, %v1046_v10  ;;  %v1853_v16 = vpack.c.bf16 %v1079_v40, %v1078_v11  ;;  %1874 = vst [vmem:[%s2257_s24 + $0x78] sm:$0xff] %v1778_v13  }
 0x133   : > { %1890 = vst [vmem:[%s2257_s24 + $0xf8] sm:$0xff] %v1858_v14  }
 0x134   : > { %1873 = vst [vmem:[%s2257_s24 + $0x70] sm:$0xff] %v1773_v15   ;;  %1889 = vst [vmem:[%s2257_s24 + $0xf0] sm:$0xff] %v1853_v16  }
 0x135 PF: > { %s14_s17 = sadd.s32 1, %s2113_s17   ;;  %s2415_s15 = smov %s2109_s16 }
 0x136   : > { %p11_p5 = scmp.ge.s32.totalorder %s14_s17, 23   ;;  %s2416_s16 = smov %s2418_s18 }
 0x138   :  { %13 = sbr.rel (!%p11_p5) target bundleno = 2 (0x2), region = 75 }

// kernel: stem_fwd.12
= control target key start
LH: loop header
LB: loop body
LE: loop exit
PB: predicated region body
PF: predicated region fallthrough
CT: control target
= control target key end

     0   :  { %s5025_s15 = smov 0   ;;  %s5027_s16 = smov 0   ;;  %s6267_s0 = inlined_call_operand.vmem [shape: bf16[10240,768], index: 0, kind: input, shape index: {}]   ;;  %s6268_s1 = inlined_call_operand.vmem [shape: bf16[768,256], index: 1, kind: input, shape index: {}]   ;;  %s6269_s2 = inlined_call_operand.vmem [shape: f32[1,256], index: 2, kind: input, shape index: {}]   ;;  %s6270_s3 = inlined_call_operand.vmem [shape: f32[1,256], index: 3, kind: input, shape index: {}]   ;;  %s6271_s4 = inlined_call_operand.vmem [shape: bf16[10240,256], index: 4, kind: output, shape index: {}]  }
   0x1   :  { %s5029_s17 = smov 0  }
   0x2 LB: > { %s26_s18 = sadd.s32 1, %s4994_s16  ;;  %p4062_p0 = scmp.ge.s32.totalorder %s4998_s17, 1  ;;  %s4998_s17 = sphi %s5029_s17, %s14_s17   ;;  %s4994_s16 = sphi %s5027_s16, %s6447_s16   ;;  %s4990_s15 = sphi %s5025_s15, %s6446_s15  }
   0x3   : > { %p28_p1 = scmp.ge.s32.totalorder %s26_s18, 20  ;;  %p209_p2 = scmp.lt.s32.totalorder %s4998_s17, 21 }
   0x5   : > { %s6449_s18 = smov (%p28_p1, %s26_s18), 0  ;;  %p210_p3 = pnand %p4062_p0, %p209_p2 }
   0x7   : > { %213 = sbr.rel (%p210_p3) target bundleno = 665 (0x299), region = 36 }
   0xc   : > { %v4544_v0 = vld [vmem:[%s6268_s1 + $0x74] ss:$8 sps:$4 sm:$0xff]   ;;  %v4546_v1 = vld [vmem:[%s6268_s1 + $0x70] ss:$8 sps:$4 sm:$0xff]   ;;  %v4547_v2 = vld [vmem:[%s6268_s1 + $0x64] ss:$8 sps:$4 sm:$0xff]  }
   0xd   : > { %2017 = vmatprep.subr.bf16.mxu0 %v4544_v0  ;;  %4487 = vmatprep.subr.bf16.mxu1 %v4544_v0  ;;  %v4549_v3 = vld [vmem:[%s6268_s1 + $0x60] ss:$8 sps:$4 sm:$0xff]   ;;  %v4550_v4 = vld [vmem:[%s6268_s1 + $0x54] ss:$8 sps:$4 sm:$0xff]   ;;  %s4063_s29 = sshll.u32 %s4990_s15, 6 }
   0xe   : > { %2018 = vmatpush1.bf16.msra.mxu0 %v4546_v1  ;;  %4503 = vmatpush1.bf16.msra.mxu1 %v4546_v1  ;;  %v4552_v5 = vld [vmem:[%s6268_s1 + $0x50] ss:$8 sps:$4 sm:$0xff]   ;;  %p255_p4 = scmp.lt.s32.totalorder %s4063_s29, 1279  ;;  %v4553_v6 = vld [vmem:[%s6268_s1 + $0x44] ss:$8 sps:$4 sm:$0xff]  }
   0xf   : > { %2019 = vmatprep.subr.bf16.mxu0 %v4547_v2  ;;  %4488 = vmatprep.subr.bf16.mxu1 %v4547_v2  ;;  %v4555_v7 = vld [vmem:[%s6268_s1 + $0x40] ss:$8 sps:$4 sm:$0xff]   ;;  %v4556_v8 = vld [vmem:[%s6268_s1 + $0x34] ss:$8 sps:$4 sm:$0xff]   ;;  %v4558_v9 = vld [vmem:[%s6268_s1 + $0x30] ss:$8 sps:$4 sm:$0xff]  }
  0x10   : > { %s6451_s29 = smov (!%p255_p4, %s4063_s29), 1279  ;;  %v4559_v10 = vld [vmem:[%s6268_s1 + $0x24] ss:$8 sps:$4 sm:$0xff]   ;;  %v4561_v11 = vld [vmem:[%s6268_s1 + $0x20] ss:$8 sps:$4 sm:$0xff]  }
  0x11   : > { %s4519_s14 = smul.u32 24, %s6451_s29  ;;  %v4562_v12 = vld [vmem:[%s6268_s1 + $0x14] ss:$8 sps:$4 sm:$0xff]   ;;  %v4564_v14 = vld [vmem:[%s6268_s1 + $0x10] ss:$8 sps:$4 sm:$0xff]   ;;  %s4422_s30 = sshll.u32 %s6451_s29, 3 }
  0x12   : > { %2020 = vmatpush1.bf16.msra.mxu0 %v4549_v3  ;;  %4504 = vmatpush1.bf16.msra.mxu1 %v4549_v3  ;;  %v4565_v16 = vld [vmem:[%s6268_s1 + $0x4] ss:$8 sps:$4 sm:$0xff]   ;;  %v4567_v17 = vld [vmem:[%s6268_s1] ss:$8 sps:$4 sm:$0xff]   ;;  %v4568_v18 = vld [vmem:[%s6268_s1 + $0xf4] ss:$8 sps:$4 sm:$0xff]   ;;  %s5799_s6 = scalar_lea.vmem %s6271_s4, %s4422_s30 }
  0x13   : > { %2021 = vmatprep.subr.bf16.mxu0 %v4550_v4  ;;  %4489 = vmatprep.subr.bf16.mxu1 %v4550_v4  ;;  %s5088_s24 = scalar_lea.vmem %s6267_s0, %s4519_s14  ;;  %v4570_v19 = vld [vmem:[%s6268_s1 + $0xf0] ss:$8 sps:$4 sm:$0xff]   ;;  %v4571_v20 = vld [vmem:[%s6268_s1 + $0xe4] ss:$8 sps:$4 sm:$0xff]   ;;  %v4573_v21 = vld [vmem:[%s6268_s1 + $0xe0] ss:$8 sps:$4 sm:$0xff]  }
  0x14   : > { %v4594_v13 = vld [vmem:[%s5088_s24 + $0x4] ss:$24 sps:$4 sm:$0xff]   ;;  %v4576_v23 = vld [vmem:[%s6268_s1 + $0xd0] ss:$8 sps:$4 sm:$0xff]   ;;  %v4579_v25 = vld [vmem:[%s6268_s1 + $0xc0] ss:$8 sps:$4 sm:$0xff]  }
  0x15   : > { %v4597_v15 = vld [vmem:[%s5088_s24 + $0x304] ss:$24 sps:$4 sm:$0xff]   ;;  %2049 = vmatprep.mubr.bf16.mxu0 %v4594_v13  ;;  %v4582_v27 = vld [vmem:[%s6268_s1 + $0xb0] ss:$8 sps:$4 sm:$0xff]   ;;  %v4585_v29 = vld [vmem:[%s6268_s1 + $0xa0] ss:$8 sps:$4 sm:$0xff]  }
  0x16   : > { %2022 = vmatpush1.bf16.msra.mxu0 %v4552_v5  ;;  %4505 = vmatpush1.bf16.msra.mxu1 %v4552_v5  ;;  %v4574_v22 = vld [vmem:[%s6268_s1 + $0xd4] ss:$8 sps:$4 sm:$0xff]   ;;  %v4577_v24 = vld [vmem:[%s6268_s1 + $0xc4] ss:$8 sps:$4 sm:$0xff]   ;;  %v4588_v31 = vld [vmem:[%s6268_s1 + $0x90] ss:$8 sps:$4 sm:$0xff]  }
  0x17   : > { %2023 = vmatprep.subr.bf16.mxu0 %v4553_v6  ;;  %4490 = vmatprep.subr.bf16.mxu1 %v4553_v6  ;;  %v4580_v26 = vld [vmem:[%s6268_s1 + $0xb4] ss:$8 sps:$4 sm:$0xff]   ;;  %v4583_v28 = vld [vmem:[%s6268_s1 + $0xa4] ss:$8 sps:$4 sm:$0xff]   ;;  %v4591_v33 = vld [vmem:[%s6268_s1 + $0x80] ss:$8 sps:$4 sm:$0xff]  }
  0x18   : > { %2209 = vmatprep.mubr.bf16.mxu1 %v4597_v15  ;;  %v4586_v30 = vld [vmem:[%s6268_s1 + $0x94] ss:$8 sps:$4 sm:$0xff]   ;;  %v4589_v32 = vld [vmem:[%s6268_s1 + $0x84] ss:$8 sps:$4 sm:$0xff]   ;;  %v4592_v34 = vld [vmem:[%s5088_s24] ss:$24 sps:$4 sm:$0xff]  }
  0x19   : > { %v4600_v35 = vld [vmem:[%s6268_s1 + $0x174] ss:$8 sps:$4 sm:$0xff]   ;;  %v4595_v37 = vld [vmem:[%s5088_s24 + $0x300] ss:$24 sps:$4 sm:$0xff]   ;;  %v4612_v42 = vld [vmem:[%s6268_s1 + $0x164] ss:$8 sps:$4 sm:$0xff]  }
  0x1a   : > { %2024 = vmatpush1.bf16.msra.mxu0 %v4555_v7  ;;  %4506 = vmatpush1.bf16.msra.mxu1 %v4555_v7  ;;  %v4603_v36 = vld [vmem:[%s6268_s1 + $0x274] ss:$8 sps:$4 sm:$0xff]   ;;  %v4598_v38 = vld [vmem:[%s6268_s1 + $0x170] ss:$8 sps:$4 sm:$0xff]   ;;  %v4615_v43 = vld [vmem:[%s6268_s1 + $0x264] ss:$8 sps:$4 sm:$0xff]  }
  0x1b   : > { %2025 = vmatprep.subr.bf16.mxu0 %v4556_v8  ;;  %4491 = vmatprep.subr.bf16.mxu1 %v4556_v8  ;;  %v4601_v39 = vld [vmem:[%s6268_s1 + $0x270] ss:$8 sps:$4 sm:$0xff]   ;;  %v4604_v40 = vld [vmem:[%s5088_s24 + $0x34] ss:$24 sps:$4 sm:$0xff]   ;;  %v4610_v44 = vld [vmem:[%s6268_s1 + $0x160] ss:$8 sps:$4 sm:$0xff]  }
  0x1c   : > { %v4606_v41 = vld [vmem:[%s5088_s24 + $0x334] ss:$24 sps:$4 sm:$0xff]   ;;  %v4613_v45 = vld [vmem:[%s6268_s1 + $0x260] ss:$8 sps:$4 sm:$0xff]   ;;  %v4616_v50 = vld [vmem:[%s5088_s24 + $0x64] ss:$24 sps:$4 sm:$0xff]  }
  0x1d   : > { %v4624_v46 = vld [vmem:[%s6268_s1 + $0x154] ss:$8 sps:$4 sm:$0xff]   ;;  %v4608_v47 = vld [vmem:[%s5088_s24 + $0x30] ss:$24 sps:$4 sm:$0xff]   ;;  %v4636_v54 = vld [vmem:[%s6268_s1 + $0x144] ss:$8 sps:$4 sm:$0xff]  }
  0x1e   : > { %2026 = vmatpush1.bf16.msra.mxu0 %v4558_v9  ;;  %4507 = vmatpush1.bf16.msra.mxu1 %v4558_v9  ;;  %v4627_v48 = vld [vmem:[%s6268_s1 + $0x254] ss:$8 sps:$4 sm:$0xff]   ;;  %v4609_v49 = vld [vmem:[%s5088_s24 + $0x330] ss:$24 sps:$4 sm:$0xff]   ;;  %v4639_v55 = vld [vmem:[%s6268_s1 + $0x244] ss:$8 sps:$4 sm:$0xff]  }
  0x1f   : > { %2027 = vmatprep.subr.bf16.mxu0 %v4559_v10  ;;  %4492 = vmatprep.subr.bf16.mxu1 %v4559_v10  ;;  %v4618_v51 = vld [vmem:[%s5088_s24 + $0x364] ss:$24 sps:$4 sm:$0xff]   ;;  %v4622_v52 = vld [vmem:[%s6268_s1 + $0x150] ss:$8 sps:$4 sm:$0xff]   ;;  %v4634_v56 = vld [vmem:[%s6268_s1 + $0x140] ss:$8 sps:$4 sm:$0xff]  }
  0x20   : > { %v4625_v53 = vld [vmem:[%s6268_s1 + $0x250] ss:$8 sps:$4 sm:$0xff]   ;;  %v4637_v59 = vld [vmem:[%s6268_s1 + $0x240] ss:$8 sps:$4 sm:$0xff]   ;;  %v4648_v60 = vld [vmem:[%s6268_s1 + $0x134] ss:$8 sps:$4 sm:$0xff]  }
  0x21   : > { %v4620_v57 = vld [vmem:[%s5088_s24 + $0x60] ss:$24 sps:$4 sm:$0xff]   ;;  %v4651_v61 = vld [vmem:[%s6268_s1 + $0x234] ss:$8 sps:$4 sm:$0xff]   ;;  %v4660_v2 = vld [vmem:[%s6268_s1 + $0x124] ss:$8 sps:$4 sm:$0xff]  }
  0x22   : > { %2028 = vmatpush1.bf16.msra.mxu0 %v4561_v11  ;;  %4508 = vmatpush1.bf16.msra.mxu1 %v4561_v11  ;;  %v4621_v58 = vld [vmem:[%s5088_s24 + $0x360] ss:$24 sps:$4 sm:$0xff]   ;;  %v4628_v62 = vld [vmem:[%s5088_s24 + $0x94] ss:$24 sps:$4 sm:$0xff]   ;;  %v4632_v6 = vld [vmem:[%s5088_s24 + $0x90] ss:$24 sps:$4 sm:$0xff]  }
  0x23   : > { %2029 = vmatprep.subr.bf16.mxu0 %v4562_v12  ;;  %4493 = vmatprep.subr.bf16.mxu1 %v4562_v12  ;;  %v4630_v63 = vld [vmem:[%s5088_s24 + $0x394] ss:$24 sps:$4 sm:$0xff]   ;;  %v4646_v0 = vld [vmem:[%s6268_s1 + $0x130] ss:$8 sps:$4 sm:$0xff]   ;;  %v4658_v4 = vld [vmem:[%s6268_s1 + $0x120] ss:$8 sps:$4 sm:$0xff]  }
  0x24   : > { %v4649_v1 = vld [vmem:[%s6268_s1 + $0x230] ss:$8 sps:$4 sm:$0xff]   ;;  %v4663_v3 = vld [vmem:[%s6268_s1 + $0x224] ss:$8 sps:$4 sm:$0xff]   ;;  %v4661_v5 = vld [vmem:[%s6268_s1 + $0x220] ss:$8 sps:$4 sm:$0xff]  }
  0x25   : > { %v4633_v7 = vld [vmem:[%s5088_s24 + $0x390] ss:$24 sps:$4 sm:$0xff]   ;;  %v4672_v8 = vld [vmem:[%s6268_s1 + $0x114] ss:$8 sps:$4 sm:$0xff]   ;;  %v4687_v15 = vld [vmem:[%s6268_s1 + $0x204] ss:$8 sps:$4 sm:$0xff]  }
  0x26   : > { %2030 = vmatpush1.bf16.msra.mxu0 %v4564_v14  ;;  %4509 = vmatpush1.bf16.msra.mxu1 %v4564_v14  ;;  %v4675_v9 = vld [vmem:[%s6268_s1 + $0x214] ss:$8 sps:$4 sm:$0xff]   ;;  %v4670_v12 = vld [vmem:[%s6268_s1 + $0x110] ss:$8 sps:$4 sm:$0xff]   ;;  %v4684_v14 = vld [vmem:[%s6268_s1 + $0x104] ss:$8 sps:$4 sm:$0xff]  }
  0x27   : > { %2031 = vmatprep.subr.bf16.mxu0 %v4565_v16  ;;  %4494 = vmatprep.subr.bf16.mxu1 %v4565_v16  ;;  %v4640_v10 = vld [vmem:[%s5088_s24 + $0xc4] ss:$24 sps:$4 sm:$0xff]   ;;  %v4673_v13 = vld [vmem:[%s6268_s1 + $0x210] ss:$8 sps:$4 sm:$0xff]   ;;  %v4682_v16 = vld [vmem:[%s6268_s1 + $0x100] ss:$8 sps:$4 sm:$0xff]  }
  0x28   : > { %v4642_v11 = vld [vmem:[%s5088_s24 + $0x3c4] ss:$24 sps:$4 sm:$0xff]  }
  0x2a   : > { %2032 = vmatpush1.bf16.msra.mxu0 %v4567_v17  ;;  %4510 = vmatpush1.bf16.msra.mxu1 %v4567_v17  ;;  %v4644_v17 = vld [vmem:[%s5088_s24 + $0xc0] ss:$24 sps:$4 sm:$0xff]  }
  0x2b   : > { %2033 = vmatprep.subr.bf16.mxu0 %v4568_v18  ;;  %4495 = vmatprep.subr.bf16.mxu1 %v4568_v18  ;;  %v4645_v18 = vld [vmem:[%s5088_s24 + $0x3c0] ss:$24 sps:$4 sm:$0xff]  }
  0x2e   : > { %2034 = vmatpush2.bf16.msra.mxu0 %v4570_v19  ;;  %4511 = vmatpush2.bf16.msra.mxu1 %v4570_v19  ;;  %v4685_v19 = vld [vmem:[%s6268_s1 + $0x200] ss:$8 sps:$4 sm:$0xff]  }
  0x2f   : > { %2035 = vmatprep.subr.bf16.mxu0 %v4571_v20  ;;  %4496 = vmatprep.subr.bf16.mxu1 %v4571_v20  ;;  %v4696_v20 = vld [vmem:[%s6268_s1 + $0x1f4] ss:$8 sps:$4 sm:$0xff]  }
  0x32   : > { %2036 = vmatpush2.bf16.msra.mxu0 %v4573_v21  ;;  %4512 = vmatpush2.bf16.msra.mxu1 %v4573_v21  ;;  %v4699_v21 = vld [vmem:[%s6268_s1 + $0x2f4] ss:$8 sps:$4 sm:$0xff]  }
  0x33   : > { %2037 = vmatprep.subr.bf16.mxu0 %v4574_v22  ;;  %4497 = vmatprep.subr.bf16.mxu1 %v4574_v22  ;;  %v4652_v22 = vld [vmem:[%s5088_s24 + $0xf4] ss:$24 sps:$4 sm:$0xff]  }
  0x36   : > { %2038 = vmatpush2.bf16.msra.mxu0 %v4576_v23  ;;  %4513 = vmatpush2.bf16.msra.mxu1 %v4576_v23  ;;  %v4654_v23 = vld [vmem:[%s5088_s24 + $0x3f4] ss:$24 sps:$4 sm:$0xff]  }
  0x37   : > { %2039 = vmatprep.subr.bf16.mxu0 %v4577_v24  ;;  %4498 = vmatprep.subr.bf16.mxu1 %v4577_v24  ;;  %v4694_v24 = vld [vmem:[%s6268_s1 + $0x1f0] ss:$8 sps:$4 sm:$0xff]  }
  0x3a   : > { %2040 = vmatpush2.bf16.msra.mxu0 %v4579_v25  ;;  %4514 = vmatpush2.bf16.msra.mxu1 %v4579_v25  ;;  %v4697_v25 = vld [vmem:[%s6268_s1 + $0x2f0] ss:$8 sps:$4 sm:$0xff]  }
  0x3b   : > { %2041 = vmatprep.subr.bf16.mxu0 %v4580_v26  ;;  %4499 = vmatprep.subr.bf16.mxu1 %v4580_v26  ;;  %v4708_v26 = vld [vmem:[%s6268_s1 + $0x1e4] ss:$8 sps:$4 sm:$0xff]  }
  0x3e   : > { %2042 = vmatpush2.bf16.msra.mxu0 %v4582_v27  ;;  %4515 = vmatpush2.bf16.msra.mxu1 %v4582_v27  ;;  %v4711_v27 = vld [vmem:[%s6268_s1 + $0x2e4] ss:$8 sps:$4 sm:$0xff]  }
  0x3f   : > { %2043 = vmatprep.subr.bf16.mxu0 %v4583_v28  ;;  %4500 = vmatprep.subr.bf16.mxu1 %v4583_v28  ;;  %v4706_v28 = vld [vmem:[%s6268_s1 + $0x1e0] ss:$8 sps:$4 sm:$0xff]  }
  0x42   : > { %2044 = vmatpush2.bf16.msra.mxu0 %v4585_v29  ;;  %4516 = vmatpush2.bf16.msra.mxu1 %v4585_v29  ;;  %v4709_v29 = vld [vmem:[%s6268_s1 + $0x2e0] ss:$8 sps:$4 sm:$0xff]  }
  0x43   : > { %2045 = vmatprep.subr.bf16.mxu0 %v4586_v30  ;;  %4501 = vmatprep.subr.bf16.mxu1 %v4586_v30  ;;  %v4656_v30 = vld [vmem:[%s5088_s24 + $0xf0] ss:$24 sps:$4 sm:$0xff]  }
  0x46   : > { %2046 = vmatpush2.bf16.msra.mxu0 %v4588_v31  ;;  %4517 = vmatpush2.bf16.msra.mxu1 %v4588_v31  ;;  %v4657_v31 = vld [vmem:[%s5088_s24 + $0x3f0] ss:$24 sps:$4 sm:$0xff]  }
  0x47   : > { %2047 = vmatprep.subr.bf16.mxu0 %v4589_v32  ;;  %4502 = vmatprep.subr.bf16.mxu1 %v4589_v32  ;;  %v4720_v32 = vld [vmem:[%s6268_s1 + $0x1d4] ss:$8 sps:$4 sm:$0xff]  }
  0x4a   : > { %2048 = vmatpush2.bf16.msra.mxu0 %v4591_v33  ;;  %4518 = vmatpush2.bf16.msra.mxu1 %v4591_v33  ;;  %v4723_v33 = vld [vmem:[%s6268_s1 + $0x2d4] ss:$8 sps:$4 sm:$0xff]  }
  0x4b   : > { %2370 = vmatprep.subr.bf16.mxu1 %v4600_v35  ;;  %2723 = vmatprep.subr.bf16.mxu0 %v4603_v36  ;;  %v4666_v35 = vld [vmem:[%s5088_s24 + $0x424] ss:$24 sps:$4 sm:$0xff]   ;;  %v4718_v36 = vld [vmem:[%s6268_s1 + $0x1d0] ss:$8 sps:$4 sm:$0xff]  }
  0x4d   : > { %2050 = vmatmul.mubr.bf16.vlgmr.msra.gmra.mxu0 %v4592_v34  ;;  %2210 = vmatmul.mubr.bf16.vlgmr.msra.gmra.mxu1 %v4595_v37  ;;  %v4664_v34 = vld [vmem:[%s5088_s24 + $0x124] ss:$24 sps:$4 sm:$0xff]   ;;  %v4721_v37 = vld [vmem:[%s6268_s1 + $0x2d0] ss:$8 sps:$4 sm:$0xff]  }
  0x4e   : > { %2371 = vmatpush1.bf16.msra.mxu1 %v4598_v38  ;;  %2724 = vmatpush1.bf16.msra.mxu0 %v4601_v39  ;;  %v4732_v38 = vld [vmem:[%s6268_s1 + $0x1c4] ss:$8 sps:$4 sm:$0xff]  }
  0x4f   : > { %2059 = vmatprep.mubr.bf16.mxu0 %v4604_v40  ;;  %2219 = vmatprep.mubr.bf16.mxu1 %v4606_v41  ;;  %v4735_v39 = vld [vmem:[%s6268_s1 + $0x2c4] ss:$8 sps:$4 sm:$0xff]   ;;  %v4730_v40 = vld [vmem:[%s6268_s1 + $0x1c0] ss:$8 sps:$4 sm:$0xff]  }
  0x50   : > { %2372 = vmatprep.subr.bf16.mxu1 %v4612_v42  ;;  %2725 = vmatprep.subr.bf16.mxu0 %v4615_v43  ;;  %v4733_v41 = vld [vmem:[%s6268_s1 + $0x2c0] ss:$8 sps:$4 sm:$0xff]  }
  0x51   : > { %v4668_v42 = vld [vmem:[%s5088_s24 + $0x120] ss:$24 sps:$4 sm:$0xff]  }
  0x52   : > { %2373 = vmatpush1.bf16.msra.mxu1 %v4610_v44  ;;  %2726 = vmatpush1.bf16.msra.mxu0 %v4613_v45  ;;  %v4669_v43 = vld [vmem:[%s5088_s24 + $0x420] ss:$24 sps:$4 sm:$0xff]   ;;  %v4744_v44 = vld [vmem:[%s6268_s1 + $0x1b4] ss:$8 sps:$4 sm:$0xff]  }
  0x53   : > { %2374 = vmatprep.subr.bf16.mxu1 %v4624_v46  ;;  %2727 = vmatprep.subr.bf16.mxu0 %v4627_v48  ;;  %v4747_v45 = vld [vmem:[%s6268_s1 + $0x2b4] ss:$8 sps:$4 sm:$0xff]   ;;  %v4742_v48 = vld [vmem:[%s6268_s1 + $0x1b0] ss:$8 sps:$4 sm:$0xff]  }
  0x54   : > { %v4676_v46 = vld [vmem:[%s5088_s24 + $0x154] ss:$24 sps:$4 sm:$0xff]  }
  0x55   : > { %2060 = vmatmul.mubr.bf16.gmra.mxu0 %v4608_v47  ;;  %2220 = vmatmul.mubr.bf16.gmra.mxu1 %v4609_v49  ;;  %v4678_v47 = vld [vmem:[%s5088_s24 + $0x454] ss:$24 sps:$4 sm:$0xff]   ;;  %v4745_v49 = vld [vmem:[%s6268_s1 + $0x2b0] ss:$8 sps:$4 sm:$0xff]  }
  0x56   : > { %2069 = vmatprep.mubr.bf16.mxu0 %v4616_v50  ;;  %2229 = vmatprep.mubr.bf16.mxu1 %v4618_v51  ;;  %v4756_v50 = vld [vmem:[%s6268_s1 + $0x1a4] ss:$8 sps:$4 sm:$0xff]  }
  0x57   : > { %2375 = vmatpush1.bf16.msra.mxu1 %v4622_v52  ;;  %2728 = vmatpush1.bf16.msra.mxu0 %v4625_v53  ;;  %v4759_v51 = vld [vmem:[%s6268_s1 + $0x2a4] ss:$8 sps:$4 sm:$0xff]   ;;  %v4754_v52 = vld [vmem:[%s6268_s1 + $0x1a0] ss:$8 sps:$4 sm:$0xff]  }
  0x58   : > { %2376 = vmatprep.subr.bf16.mxu1 %v4636_v54  ;;  %2729 = vmatprep.subr.bf16.mxu0 %v4639_v55  ;;  %v4680_v53 = vld [vmem:[%s5088_s24 + $0x150] ss:$24 sps:$4 sm:$0xff]  }
  0x59   : > { %v4681_v54 = vld [vmem:[%s5088_s24 + $0x450] ss:$24 sps:$4 sm:$0xff]  }
  0x5a   : > { %v4757_v55 = vld [vmem:[%s6268_s1 + $0x2a0] ss:$8 sps:$4 sm:$0xff]  }
  0x5b   : > { %2377 = vmatpush1.bf16.msra.mxu1 %v4634_v56  ;;  %2730 = vmatpush1.bf16.msra.mxu0 %v4637_v59  ;;  %v4768_v56 = vld [vmem:[%s6268_s1 + $0x194] ss:$8 sps:$4 sm:$0xff]  }
  0x5c   : > { %2378 = vmatprep.subr.bf16.mxu1 %v4648_v60  ;;  %2731 = vmatprep.subr.bf16.mxu0 %v4651_v61  ;;  %v4690_v59 = vld [vmem:[%s5088_s24 + $0x484] ss:$24 sps:$4 sm:$0xff]   ;;  %v4766_v60 = vld [vmem:[%s6268_s1 + $0x190] ss:$8 sps:$4 sm:$0xff]  }
  0x5d   : > { %2070 = vmatmul.mubr.bf16.gmra.mxu0 %v4620_v57  ;;  %2230 = vmatmul.mubr.bf16.gmra.mxu1 %v4621_v58  ;;  %v4771_v57 = vld [vmem:[%s6268_s1 + $0x294] ss:$8 sps:$4 sm:$0xff]   ;;  %v4769_v61 = vld [vmem:[%s6268_s1 + $0x290] ss:$8 sps:$4 sm:$0xff]  }
  0x5e   : > { %2079 = vmatprep.mubr.bf16.mxu0 %v4628_v62  ;;  %2239 = vmatprep.mubr.bf16.mxu1 %v4630_v63  ;;  %v4688_v58 = vld [vmem:[%s5088_s24 + $0x184] ss:$24 sps:$4 sm:$0xff]  }
  0x5f   : > { %2379 = vmatpush1.bf16.msra.mxu1 %v4646_v0  ;;  %2732 = vmatpush1.bf16.msra.mxu0 %v4649_v1  ;;  %v4780_v62 = vld [vmem:[%s6268_s1 + $0x184] ss:$8 sps:$4 sm:$0xff]   ;;  %v4778_v0 = vld [vmem:[%s6268_s1 + $0x180] ss:$8 sps:$4 sm:$0xff]  }
  0x60   : > { %2380 = vmatprep.subr.bf16.mxu1 %v4660_v2  ;;  %2733 = vmatprep.subr.bf16.mxu0 %v4663_v3  ;;  %v4783_v63 = vld [vmem:[%s6268_s1 + $0x284] ss:$8 sps:$4 sm:$0xff]   ;;  %v4781_v1 = vld [vmem:[%s6268_s1 + $0x280] ss:$8 sps:$4 sm:$0xff]  }
  0x61   : > { %v4692_v2 = vld [vmem:[%s5088_s24 + $0x180] ss:$24 sps:$4 sm:$0xff]  }
  0x62   : > { %v4693_v3 = vld [vmem:[%s5088_s24 + $0x480] ss:$24 sps:$4 sm:$0xff]  }
  0x63   : > { %2381 = vmatpush1.bf16.msra.mxu1 %v4658_v4  ;;  %2734 = vmatpush1.bf16.msra.mxu0 %v4661_v5  ;;  %v4700_v4 = vld [vmem:[%s5088_s24 + $0x1b4] ss:$24 sps:$4 sm:$0xff]  }
  0x64   : > { %2382 = vmatprep.subr.bf16.mxu1 %v4672_v8  ;;  %2735 = vmatprep.subr.bf16.mxu0 %v4675_v9  ;;  %v4702_v5 = vld [vmem:[%s5088_s24 + $0x4b4] ss:$24 sps:$4 sm:$0xff]   ;;  %v4712_v8 = vld [vmem:[%s5088_s24 + $0x1e4] ss:$24 sps:$4 sm:$0xff]  }
  0x65   : > { %2080 = vmatmul.mubr.bf16.gmra.mxu0 %v4632_v6  ;;  %2240 = vmatmul.mubr.bf16.gmra.mxu1 %v4633_v7  ;;  %v4704_v6 = vld [vmem:[%s5088_s24 + $0x1b0] ss:$24 sps:$4 sm:$0xff]   ;;  %v4714_v9 = vld [vmem:[%s5088_s24 + $0x4e4] ss:$24 sps:$4 sm:$0xff]  }
  0x66   : > { %2089 = vmatprep.mubr.bf16.mxu0 %v4640_v10  ;;  %2249 = vmatprep.mubr.bf16.mxu1 %v4642_v11  ;;  %v4705_v7 = vld [vmem:[%s5088_s24 + $0x4b0] ss:$24 sps:$4 sm:$0xff]   ;;  %v4716_v10 = vld [vmem:[%s5088_s24 + $0x1e0] ss:$24 sps:$4 sm:$0xff]  }
  0x67   : > { %2383 = vmatpush1.bf16.msra.mxu1 %v4670_v12  ;;  %2736 = vmatpush1.bf16.msra.mxu0 %v4673_v13  ;;  %v4717_v11 = vld [vmem:[%s5088_s24 + $0x4e0] ss:$24 sps:$4 sm:$0xff]   ;;  %v4724_v12 = vld [vmem:[%s5088_s24 + $0x214] ss:$24 sps:$4 sm:$0xff]  }
  0x68   : > { %2384 = vmatprep.subr.bf16.mxu1 %v4684_v14  ;;  %2737 = vmatprep.subr.bf16.mxu0 %v4687_v15  ;;  %v4726_v13 = vld [vmem:[%s5088_s24 + $0x514] ss:$24 sps:$4 sm:$0xff]   ;;  %v4728_v14 = vld [vmem:[%s5088_s24 + $0x210] ss:$24 sps:$4 sm:$0xff]  }
  0x69   : > { %v4729_v15 = vld [vmem:[%s5088_s24 + $0x510] ss:$24 sps:$4 sm:$0xff]  }
  0x6b   : > { %2385 = vmatpush1.bf16.msra.mxu1 %v4682_v16  ;;  %2738 = vmatpush1.bf16.msra.mxu0 %v4685_v19  ;;  %v4736_v16 = vld [vmem:[%s5088_s24 + $0x244] ss:$24 sps:$4 sm:$0xff]   ;;  %v4741_v19 = vld [vmem:[%s5088_s24 + $0x540] ss:$24 sps:$4 sm:$0xff]  }
  0x6c   : > { %2386 = vmatprep.subr.bf16.mxu1 %v4696_v20  ;;  %2739 = vmatprep.subr.bf16.mxu0 %v4699_v21  ;;  %v4748_v20 = vld [vmem:[%s5088_s24 + $0x274] ss:$24 sps:$4 sm:$0xff]  }
  0x6d   : > { %2090 = vmatmul.mubr.bf16.gmra.mxu0 %v4644_v17  ;;  %2250 = vmatmul.mubr.bf16.gmra.mxu1 %v4645_v18  ;;  %v4738_v17 = vld [vmem:[%s5088_s24 + $0x544] ss:$24 sps:$4 sm:$0xff]   ;;  %v4740_v18 = vld [vmem:[%s5088_s24 + $0x240] ss:$24 sps:$4 sm:$0xff]   ;;  %v4750_v21 = vld [vmem:[%s5088_s24 + $0x574] ss:$24 sps:$4 sm:$0xff]  }
  0x6e   : > { %2099 = vmatprep.mubr.bf16.mxu0 %v4652_v22  ;;  %2259 = vmatprep.mubr.bf16.mxu1 %v4654_v23  ;;  %v4752_v22 = vld [vmem:[%s5088_s24 + $0x270] ss:$24 sps:$4 sm:$0xff]  }
  0x6f   : > { %2387 = vmatpush2.bf16.msra.mxu1 %v4694_v24  ;;  %2740 = vmatpush2.bf16.msra.mxu0 %v4697_v25  ;;  %v4753_v23 = vld [vmem:[%s5088_s24 + $0x570] ss:$24 sps:$4 sm:$0xff]   ;;  %v4760_v24 = vld [vmem:[%s5088_s24 + $0x2a4] ss:$24 sps:$4 sm:$0xff]  }
  0x70   : > { %2388 = vmatprep.subr.bf16.mxu1 %v4708_v26  ;;  %2741 = vmatprep.subr.bf16.mxu0 %v4711_v27  ;;  %v4762_v25 = vld [vmem:[%s5088_s24 + $0x5a4] ss:$24 sps:$4 sm:$0xff]   ;;  %v4764_v26 = vld [vmem:[%s5088_s24 + $0x2a0] ss:$24 sps:$4 sm:$0xff]  }
  0x71   : > { %v4765_v27 = vld [vmem:[%s5088_s24 + $0x5a0] ss:$24 sps:$4 sm:$0xff]  }
  0x73   : > { %2389 = vmatpush2.bf16.msra.mxu1 %v4706_v28  ;;  %2742 = vmatpush2.bf16.msra.mxu0 %v4709_v29  ;;  %v4772_v28 = vld [vmem:[%s5088_s24 + $0x2d4] ss:$24 sps:$4 sm:$0xff]  }
  0x74   : > { %2390 = vmatprep.subr.bf16.mxu1 %v4720_v32  ;;  %2743 = vmatprep.subr.bf16.mxu0 %v4723_v33  ;;  %v4774_v29 = vld [vmem:[%s5088_s24 + $0x5d4] ss:$24 sps:$4 sm:$0xff]  }
  0x75   : > { %2100 = vmatmul.mubr.bf16.gmra.mxu0 %v4656_v30  ;;  %2260 = vmatmul.mubr.bf16.gmra.mxu1 %v4657_v31  ;;  %v4776_v30 = vld [vmem:[%s5088_s24 + $0x2d0] ss:$24 sps:$4 sm:$0xff]   ;;  %v4786_v32 = vld [vmem:[%s5088_s24 + $0xc] ss:$24 sps:$4 sm:$0xff]  }
  0x76   : > { %2109 = vmatprep.mubr.bf16.mxu0 %v4664_v34  ;;  %2269 = vmatprep.mubr.bf16.mxu1 %v4666_v35  ;;  %v4777_v31 = vld [vmem:[%s5088_s24 + $0x5d0] ss:$24 sps:$4 sm:$0xff]   ;;  %v4789_v33 = vld [vmem:[%s5088_s24 + $0x14] ss:$24 sps:$4 sm:$0xff]  }
  0x77   : > { %2391 = vmatpush2.bf16.msra.mxu1 %v4718_v36  ;;  %2744 = vmatpush2.bf16.msra.mxu0 %v4721_v37  ;;  %v4784_v34 = vld [vmem:[%s5088_s24 + $0x8] ss:$24 sps:$4 sm:$0xff]   ;;  %v4790_v36 = vld [vmem:[%s5088_s24 + $0x3c] ss:$24 sps:$4 sm:$0xff]  }
  0x78   : > { %2392 = vmatprep.subr.bf16.mxu1 %v4732_v38  ;;  %2745 = vmatprep.subr.bf16.mxu0 %v4735_v39  ;;  %v4787_v35 = vld [vmem:[%s5088_s24 + $0x10] ss:$24 sps:$4 sm:$0xff]   ;;  %v4792_v37 = vld [vmem:[%s5088_s24 + $0x44] ss:$24 sps:$4 sm:$0xff]   ;;  %v4795_v39 = vld [vmem:[%s5088_s24 + $0x40] ss:$24 sps:$4 sm:$0xff]  }
  0x79   : > { %v4794_v38 = vld [vmem:[%s5088_s24 + $0x38] ss:$24 sps:$4 sm:$0xff]  }
  0x7b   : > { %2393 = vmatpush2.bf16.msra.mxu1 %v4730_v40  ;;  %2746 = vmatpush2.bf16.msra.mxu0 %v4733_v41  ;;  %v4796_v40 = vld [vmem:[%s5088_s24 + $0x6c] ss:$24 sps:$4 sm:$0xff]  }
  0x7c   : > { %2394 = vmatprep.subr.bf16.mxu1 %v4744_v44  ;;  %2747 = vmatprep.subr.bf16.mxu0 %v4747_v45  ;;  %v4798_v41 = vld [vmem:[%s5088_s24 + $0x74] ss:$24 sps:$4 sm:$0xff]   ;;  %v4804_v45 = vld [vmem:[%s5088_s24 + $0xa4] ss:$24 sps:$4 sm:$0xff]  }
  0x7d   : > { %2110 = vmatmul.mubr.bf16.gmra.mxu0 %v4668_v42  ;;  %2270 = vmatmul.mubr.bf16.gmra.mxu1 %v4669_v43  ;;  %v4800_v42 = vld [vmem:[%s5088_s24 + $0x68] ss:$24 sps:$4 sm:$0xff]   ;;  %v4802_v44 = vld [vmem:[%s5088_s24 + $0x9c] ss:$24 sps:$4 sm:$0xff]  }
  0x7e   : > { %2119 = vmatprep.mubr.bf16.mxu0 %v4676_v46  ;;  %2279 = vmatprep.mubr.bf16.mxu1 %v4678_v47  ;;  %v4801_v43 = vld [vmem:[%s5088_s24 + $0x70] ss:$24 sps:$4 sm:$0xff]   ;;  %v4807_v47 = vld [vmem:[%s5088_s24 + $0xa0] ss:$24 sps:$4 sm:$0xff]  }
  0x7f   : > { %2395 = vmatpush2.bf16.msra.mxu1 %v4742_v48  ;;  %2748 = vmatpush2.bf16.msra.mxu0 %v4745_v49  ;;  %v4806_v46 = vld [vmem:[%s5088_s24 + $0x98] ss:$24 sps:$4 sm:$0xff]   ;;  %v4808_v48 = vld [vmem:[%s5088_s24 + $0xcc] ss:$24 sps:$4 sm:$0xff]  }
  0x80   : > { %2396 = vmatprep.subr.bf16.mxu1 %v4756_v50  ;;  %2749 = vmatprep.subr.bf16.mxu0 %v4759_v51  ;;  %v4810_v49 = vld [vmem:[%s5088_s24 + $0xd4] ss:$24 sps:$4 sm:$0xff]   ;;  %v4812_v50 = vld [vmem:[%s5088_s24 + $0xc8] ss:$24 sps:$4 sm:$0xff]  }
  0x81   : > { %v4813_v51 = vld [vmem:[%s5088_s24 + $0xd0] ss:$24 sps:$4 sm:$0xff]  }
  0x83   : > { %2397 = vmatpush2.bf16.msra.mxu1 %v4754_v52  ;;  %2750 = vmatpush2.bf16.msra.mxu0 %v4757_v55  ;;  %v4814_v52 = vld [vmem:[%s5088_s24 + $0xfc] ss:$24 sps:$4 sm:$0xff]   ;;  %v4819_v55 = vld [vmem:[%s5088_s24 + $0x100] ss:$24 sps:$4 sm:$0xff]  }
  0x84   : > { %2398 = vmatprep.subr.bf16.mxu1 %v4768_v56  ;;  %2751 = vmatprep.subr.bf16.mxu0 %v4771_v57  ;;  %v4820_v56 = vld [vmem:[%s5088_s24 + $0x12c] ss:$24 sps:$4 sm:$0xff]  }
  0x85   : > { %2120 = vmatmul.mubr.bf16.gmra.mxu0 %v4680_v53  ;;  %2280 = vmatmul.mubr.bf16.gmra.mxu1 %v4681_v54  ;;  %v4816_v53 = vld [vmem:[%s5088_s24 + $0x104] ss:$24 sps:$4 sm:$0xff]   ;;  %v4818_v54 = vld [vmem:[%s5088_s24 + $0xf8] ss:$24 sps:$4 sm:$0xff]   ;;  %v4822_v57 = vld [vmem:[%s5088_s24 + $0x134] ss:$24 sps:$4 sm:$0xff]  }
  0x86   : > { %2129 = vmatprep.mubr.bf16.mxu0 %v4688_v58  ;;  %2289 = vmatprep.mubr.bf16.mxu1 %v4690_v59  ;;  %v4824_v58 = vld [vmem:[%s5088_s24 + $0x128] ss:$24 sps:$4 sm:$0xff]  }
  0x87   : > { %2399 = vmatpush2.bf16.msra.mxu1 %v4766_v60  ;;  %2752 = vmatpush2.bf16.msra.mxu0 %v4769_v61  ;;  %v4825_v59 = vld [vmem:[%s5088_s24 + $0x130] ss:$24 sps:$4 sm:$0xff]   ;;  %v4826_v60 = vld [vmem:[%s5088_s24 + $0x15c] ss:$24 sps:$4 sm:$0xff]  }
  0x88   : > { %2400 = vmatprep.subr.bf16.mxu1 %v4780_v62  ;;  %2753 = vmatprep.subr.bf16.mxu0 %v4783_v63  ;;  %v4828_v61 = vld [vmem:[%s5088_s24 + $0x164] ss:$24 sps:$4 sm:$0xff]   ;;  %v4830_v62 = vld [vmem:[%s5088_s24 + $0x158] ss:$24 sps:$4 sm:$0xff]  }
  0x89   : > { %v4831_v63 = vld [vmem:[%s5088_s24 + $0x160] ss:$24 sps:$4 sm:$0xff]  }
  0x8b   : > { %2401 = vmatpush2.bf16.msra.mxu1 %v4778_v0  ;;  %2754 = vmatpush2.bf16.msra.mxu0 %v4781_v1  ;;  %v4832_v0 = vld [vmem:[%s5088_s24 + $0x18c] ss:$24 sps:$4 sm:$0xff]  }
  0x8c   : > { %v4834_v1 = vld [vmem:[%s5088_s24 + $0x194] ss:$24 sps:$4 sm:$0xff]  }
  0x8d   : > { %2130 = vmatmul.mubr.bf16.gmra.mxu0 %v4692_v2  ;;  %2290 = vmatmul.mubr.bf16.gmra.mxu1 %v4693_v3  ;;  %v4836_v2 = vld [vmem:[%s5088_s24 + $0x188] ss:$24 sps:$4 sm:$0xff]  }
  0x8e   : > { %2139 = vmatprep.mubr.bf16.mxu0 %v4700_v4  ;;  %2299 = vmatprep.mubr.bf16.mxu1 %v4702_v5  ;;  %v4837_v3 = vld [vmem:[%s5088_s24 + $0x190] ss:$24 sps:$4 sm:$0xff]   ;;  %v4838_v4 = vld [vmem:[%s5088_s24 + $0x1bc] ss:$24 sps:$4 sm:$0xff]  }
  0x8f   : > { %v4840_v5 = vld [vmem:[%s5088_s24 + $0x1c4] ss:$24 sps:$4 sm:$0xff]  }
  0x95   : > { %2140 = vmatmul.mubr.bf16.gmra.mxu0 %v4704_v6  ;;  %2300 = vmatmul.mubr.bf16.gmra.mxu1 %v4705_v7 }
  0x96   : > { %2149 = vmatprep.mubr.bf16.mxu0 %v4712_v8  ;;  %2309 = vmatprep.mubr.bf16.mxu1 %v4714_v9 }
  0x9d   : > { %2150 = vmatmul.mubr.bf16.gmra.mxu0 %v4716_v10  ;;  %2310 = vmatmul.mubr.bf16.gmra.mxu1 %v4717_v11 }
  0x9e   : > { %2159 = vmatprep.mubr.bf16.mxu0 %v4724_v12  ;;  %2319 = vmatprep.mubr.bf16.mxu1 %v4726_v13  ;;  %v4842_v12 = vld [vmem:[%s5088_s24 + $0x1b8] ss:$24 sps:$4 sm:$0xff]  }
  0x9f   : > { %v4843_v13 = vld [vmem:[%s5088_s24 + $0x1c0] ss:$24 sps:$4 sm:$0xff]  }
  0xa5   : > { %2160 = vmatmul.mubr.bf16.gmra.mxu0 %v4728_v14  ;;  %2320 = vmatmul.mubr.bf16.gmra.mxu1 %v4729_v15  ;;  %v4844_v14 = vld [vmem:[%s5088_s24 + $0x1ec] ss:$24 sps:$4 sm:$0xff]  }
  0xa6   : > { %2169 = vmatprep.mubr.bf16.mxu0 %v4736_v16  ;;  %2329 = vmatprep.mubr.bf16.mxu1 %v4738_v17  ;;  %v4846_v15 = vld [vmem:[%s5088_s24 + $0x1f4] ss:$24 sps:$4 sm:$0xff]  }
  0xad   : > { %2170 = vmatmul.mubr.bf16.gmra.mxu0 %v4740_v18  ;;  %2330 = vmatmul.mubr.bf16.gmra.mxu1 %v4741_v19 }
  0xae   : > { %2179 = vmatprep.mubr.bf16.mxu0 %v4748_v20  ;;  %2339 = vmatprep.mubr.bf16.mxu1 %v4750_v21 }
  0xb5   : > { %2180 = vmatmul.mubr.bf16.gmra.mxu0 %v4752_v22  ;;  %2340 = vmatmul.mubr.bf16.gmra.mxu1 %v4753_v23 }
  0xb6   : > { %2189 = vmatprep.mubr.bf16.mxu0 %v4760_v24  ;;  %2349 = vmatprep.mubr.bf16.mxu1 %v4762_v25  ;;  %v4848_v24 = vld [vmem:[%s5088_s24 + $0x1e8] ss:$24 sps:$4 sm:$0xff]  }
  0xb7   : > { %v4849_v25 = vld [vmem:[%s5088_s24 + $0x1f0] ss:$24 sps:$4 sm:$0xff]  }
  0xbd   : > { %2190 = vmatmul.mubr.bf16.gmra.mxu0 %v4764_v26  ;;  %2350 = vmatmul.mubr.bf16.gmra.mxu1 %v4765_v27  ;;  %v4850_v26 = vld [vmem:[%s5088_s24 + $0x21c] ss:$24 sps:$4 sm:$0xff]  }
  0xbe   : > { %2199 = vmatprep.mubr.bf16.mxu0 %v4772_v28  ;;  %2359 = vmatprep.mubr.bf16.mxu1 %v4774_v29  ;;  %v4852_v27 = vld [vmem:[%s5088_s24 + $0x224] ss:$24 sps:$4 sm:$0xff]  }
  0xc5   : > { %2200 = vmatmul.mubr.bf16.gmra.mxu0 %v4776_v30  ;;  %2360 = vmatmul.mubr.bf16.gmra.mxu1 %v4777_v31 }
  0xc6   : > { %2402 = vmatprep.mubr.bf16.mxu1 %v4786_v32  ;;  %2755 = vmatprep.mubr.bf16.mxu0 %v4789_v33 }
  0xcd   : > { %2403 = vmatmul.mubr.bf16.vlgmr.msra.gmra.mxu1 %v4784_v34  ;;  %2756 = vmatmul.mubr.bf16.vlgmr.msra.gmra.mxu0 %v4787_v35 }
  0xce   : > { %2412 = vmatprep.mubr.bf16.mxu1 %v4790_v36  ;;  %2765 = vmatprep.mubr.bf16.mxu0 %v4792_v37  ;;  %v4854_v36 = vld [vmem:[%s5088_s24 + $0x218] ss:$24 sps:$4 sm:$0xff]  }
  0xcf   : > { %v4855_v37 = vld [vmem:[%s5088_s24 + $0x220] ss:$24 sps:$4 sm:$0xff]  }
  0xd5   : > { %2413 = vmatmul.mubr.bf16.gmra.mxu1 %v4794_v38  ;;  %2766 = vmatmul.mubr.bf16.gmra.mxu0 %v4795_v39  ;;  %v4858_v38 = vld [vmem:[%s5088_s24 + $0x24c] ss:$24 sps:$4 sm:$0xff]  }
  0xd6   : > { %2422 = vmatprep.mubr.bf16.mxu1 %v4796_v40  ;;  %2775 = vmatprep.mubr.bf16.mxu0 %v4798_v41  ;;  %v4861_v39 = vld [vmem:[%s5088_s24 + $0x254] ss:$24 sps:$4 sm:$0xff]  }
  0xdd   : > { %2423 = vmatmul.mubr.bf16.gmra.mxu1 %v4800_v42  ;;  %2776 = vmatmul.mubr.bf16.gmra.mxu0 %v4801_v43 }
  0xde   : > { %2432 = vmatprep.mubr.bf16.mxu1 %v4802_v44  ;;  %2785 = vmatprep.mubr.bf16.mxu0 %v4804_v45 }
  0xe5   : > { %2433 = vmatmul.mubr.bf16.gmra.mxu1 %v4806_v46  ;;  %2786 = vmatmul.mubr.bf16.gmra.mxu0 %v4807_v47 }
  0xe6   : > { %2442 = vmatprep.mubr.bf16.mxu1 %v4808_v48  ;;  %2795 = vmatprep.mubr.bf16.mxu0 %v4810_v49  ;;  %v4856_v48 = vld [vmem:[%s5088_s24 + $0x248] ss:$24 sps:$4 sm:$0xff]  }
  0xe7   : > { %v4859_v49 = vld [vmem:[%s5088_s24 + $0x250] ss:$24 sps:$4 sm:$0xff]  }
  0xed   : > { %2443 = vmatmul.mubr.bf16.gmra.mxu1 %v4812_v50  ;;  %2796 = vmatmul.mubr.bf16.gmra.mxu0 %v4813_v51  ;;  %v4864_v50 = vld [vmem:[%s5088_s24 + $0x27c] ss:$24 sps:$4 sm:$0xff]  }
  0xee   : > { %2452 = vmatprep.mubr.bf16.mxu1 %v4814_v52  ;;  %2805 = vmatprep.mubr.bf16.mxu0 %v4816_v53  ;;  %v4867_v51 = vld [vmem:[%s5088_s24 + $0x284] ss:$24 sps:$4 sm:$0xff]  }
  0xf5   : > { %2453 = vmatmul.mubr.bf16.gmra.mxu1 %v4818_v54  ;;  %2806 = vmatmul.mubr.bf16.gmra.mxu0 %v4819_v55 }
  0xf6   : > { %2462 = vmatprep.mubr.bf16.mxu1 %v4820_v56  ;;  %2815 = vmatprep.mubr.bf16.mxu0 %v4822_v57 }
  0xfd   : > { %2463 = vmatmul.mubr.bf16.gmra.mxu1 %v4824_v58  ;;  %2816 = vmatmul.mubr.bf16.gmra.mxu0 %v4825_v59 }
  0xfe   : > { %2472 = vmatprep.mubr.bf16.mxu1 %v4826_v60  ;;  %2825 = vmatprep.mubr.bf16.mxu0 %v4828_v61  ;;  %v4862_v60 = vld [vmem:[%s5088_s24 + $0x278] ss:$24 sps:$4 sm:$0xff]  }
  0xff   : > { %v4865_v61 = vld [vmem:[%s5088_s24 + $0x280] ss:$24 sps:$4 sm:$0xff]  }
 0x105   : > { %2473 = vmatmul.mubr.bf16.gmra.mxu1 %v4830_v62  ;;  %2826 = vmatmul.mubr.bf16.gmra.mxu0 %v4831_v63  ;;  %v4870_v62 = vld [vmem:[%s5088_s24 + $0x2ac] ss:$24 sps:$4 sm:$0xff]  }
 0x106   : > { %2482 = vmatprep.mubr.bf16.mxu1 %v4832_v0  ;;  %2835 = vmatprep.mubr.bf16.mxu0 %v4834_v1  ;;  %v4873_v63 = vld [vmem:[%s5088_s24 + $0x2b4] ss:$24 sps:$4 sm:$0xff]  }
 0x10d   : > { %v5444_v6 = vpop.f32.mrf.mxu0  ;;  %v5446_v7 = vpop.f32.mrf.mxu1  ;;  %2483 = vmatmul.mubr.bf16.gmra.mxu1 %v4836_v2  ;;  %2836 = vmatmul.mubr.bf16.gmra.mxu0 %v4837_v3 }
 0x10e   : > { %6272 = vst [vmem:[#allocation2_spill] sm:$0xff] %v5446_v7  ;;  %2492 = vmatprep.mubr.bf16.mxu1 %v4838_v4  ;;  %2845 = vmatprep.mubr.bf16.mxu0 %v4840_v5  ;;  %v4916_v7 = vld [vmem:[%s5088_s24 + $0x428] ss:$24 sps:$4 sm:$0xff]  }
 0x10f   : > { %v5448_v8 = vpop.f32.mrf.mxu0  ;;  %v5450_v9 = vpop.f32.mrf.mxu1 }
 0x110   : > { %6273 = vst [vmem:[#allocation3_spill] sm:$0xff] %v5450_v9 }
 0x111   : > { %v5452_v10 = vpop.f32.mrf.mxu0  ;;  %v5454_v11 = vpop.f32.mrf.mxu1 }
 0x112   : > { %6274 = vst [vmem:[#allocation4_spill] sm:$0xff] %v5454_v11  ;;  %v4921_v11 = vld [vmem:[%s5088_s24 + $0x434] ss:$24 sps:$4 sm:$0xff]  }
 0x113   : > { %v5460_v16 = vpop.f32.mrf.mxu0  ;;  %v5462_v17 = vpop.f32.mrf.mxu1 }
 0x114   : > { %6275 = vst [vmem:[#allocation5_spill] sm:$0xff] %v5462_v17  ;;  %v4913_v17 = vld [vmem:[%s5088_s24 + $0x400] ss:$24 sps:$4 sm:$0xff]  }
 0x115   : > { %v5464_v18 = vpop.f32.mrf.mxu0  ;;  %v5466_v19 = vpop.f32.mrf.mxu1  ;;  %2493 = vmatmul.mubr.bf16.gmra.mxu1 %v4842_v12  ;;  %2846 = vmatmul.mubr.bf16.gmra.mxu0 %v4843_v13 }
 0x116   : > { %6276 = vst [vmem:[#allocation6_spill] sm:$0xff] %v5466_v19  ;;  %2502 = vmatprep.mubr.bf16.mxu1 %v4844_v14  ;;  %2855 = vmatprep.mubr.bf16.mxu0 %v4846_v15  ;;  %v4868_v14 = vld [vmem:[%s5088_s24 + $0x2a8] ss:$24 sps:$4 sm:$0xff]   ;;  %v4910_v19 = vld [vmem:[%s5088_s24 + $0x3f8] ss:$24 sps:$4 sm:$0xff]  }
 0x117   : > { %v5468_v20 = vpop.f32.mrf.mxu0  ;;  %v5470_v21 = vpop.f32.mrf.mxu1  ;;  %v4871_v15 = vld [vmem:[%s5088_s24 + $0x2b0] ss:$24 sps:$4 sm:$0xff]  }
 0x118   : > { %6277 = vst [vmem:[#allocation7_spill] sm:$0xff] %v5470_v21 }
 0x119   : > { %v5472_v22 = vpop.f32.mrf.mxu0  ;;  %v5474_v23 = vpop.f32.mrf.mxu1 }
 0x11a   : > { %6278 = vst [vmem:[#allocation8_spill] sm:$0xff] %v5474_v23  ;;  %v4915_v23 = vld [vmem:[%s5088_s24 + $0x404] ss:$24 sps:$4 sm:$0xff]  }
 0x11b   : > { %v5480_v28 = vpop.f32.mrf.mxu0  ;;  %v5482_v29 = vpop.f32.mrf.mxu1 }
 0x11c   : > { %6279 = vst [vmem:[#allocation9_spill] sm:$0xff] %v5482_v29  ;;  %v4907_v29 = vld [vmem:[%s5088_s24 + $0x3d0] ss:$24 sps:$4 sm:$0xff]  }
 0x11d   : > { %v5484_v30 = vpop.f32.mrf.mxu0  ;;  %v5486_v31 = vpop.f32.mrf.mxu1  ;;  %2503 = vmatmul.mubr.bf16.gmra.mxu1 %v4848_v24  ;;  %2856 = vmatmul.mubr.bf16.gmra.mxu0 %v4849_v25  ;;  %v4876_v24 = vld [vmem:[%s5088_s24 + $0x2dc] ss:$24 sps:$4 sm:$0xff]  }
 0x11e   : > { %6280 = vst [vmem:[#allocation10_spill] sm:$0xff] %v5486_v31  ;;  %2512 = vmatprep.mubr.bf16.mxu1 %v4850_v26  ;;  %2865 = vmatprep.mubr.bf16.mxu0 %v4852_v27  ;;  %v4879_v25 = vld [vmem:[%s5088_s24 + $0x2e4] ss:$24 sps:$4 sm:$0xff]   ;;  %v4904_v31 = vld [vmem:[%s5088_s24 + $0x3c8] ss:$24 sps:$4 sm:$0xff]  }
 0x11f   : > { %v5488_v32 = vpop.f32.mrf.mxu0  ;;  %v5490_v33 = vpop.f32.mrf.mxu1 }
 0x120   : > { %6281 = vst [vmem:[#allocation11_spill] sm:$0xff] %v5490_v33 }
 0x121   : > { %v5492_v34 = vpop.f32.mrf.mxu0  ;;  %v5494_v35 = vpop.f32.mrf.mxu1 }
 0x122   : > { %6282 = vst [vmem:[#allocation12_spill] sm:$0xff] %v5494_v35  ;;  %v4909_v35 = vld [vmem:[%s5088_s24 + $0x3d4] ss:$24 sps:$4 sm:$0xff]  }
 0x123   : > { %v5500_v40 = vpop.f32.mrf.mxu0  ;;  %v5502_v41 = vpop.f32.mrf.mxu1 }
 0x124   : > { %6283 = vst [vmem:[#allocation13_spill] sm:$0xff] %v5502_v41  ;;  %v4901_v41 = vld [vmem:[%s5088_s24 + $0x3a0] ss:$24 sps:$4 sm:$0xff]  }
 0x125   : > { %v5504_v42 = vpop.f32.mrf.mxu0  ;;  %v5506_v43 = vpop.f32.mrf.mxu1  ;;  %2513 = vmatmul.mubr.bf16.gmra.mxu1 %v4854_v36  ;;  %2866 = vmatmul.mubr.bf16.gmra.mxu0 %v4855_v37 }
 0x126   : > { %6284 = vst [vmem:[#allocation14_spill] sm:$0xff] %v5506_v43  ;;  %2522 = vmatprep.mubr.bf16.mxu1 %v4858_v38  ;;  %2875 = vmatprep.mubr.bf16.mxu0 %v4861_v39  ;;  %v4898_v43 = vld [vmem:[%s5088_s24 + $0x398] ss:$24 sps:$4 sm:$0xff]  }
 0x127   : > { %v5508_v44 = vpop.f32.mrf.mxu0  ;;  %v5510_v45 = vpop.f32.mrf.mxu1 }
 0x128   : > { %6285 = vst [vmem:[#allocation15_spill] sm:$0xff] %v5510_v45 }
 0x129   : > { %v5512_v46 = vpop.f32.mrf.mxu0  ;;  %v5514_v47 = vpop.f32.mrf.mxu1 }
 0x12a   : > { %6286 = vst [vmem:[#allocation16_spill] sm:$0xff] %v5514_v47  ;;  %v4903_v47 = vld [vmem:[%s5088_s24 + $0x3a4] ss:$24 sps:$4 sm:$0xff]  }
 0x12b   : > { %v5520_v52 = vpop.f32.mrf.mxu0  ;;  %v5522_v53 = vpop.f32.mrf.mxu1 }
 0x12c   : > { %6287 = vst [vmem:[#allocation17_spill] sm:$0xff] %v5522_v53  ;;  %v4895_v53 = vld [vmem:[%s5088_s24 + $0x370] ss:$24 sps:$4 sm:$0xff]  }
 0x12d   : > { %v5524_v54 = vpop.f32.mrf.mxu0  ;;  %v5526_v55 = vpop.f32.mrf.mxu1  ;;  %2523 = vmatmul.mubr.bf16.gmra.mxu1 %v4856_v48  ;;  %2876 = vmatmul.mubr.bf16.gmra.mxu0 %v4859_v49 }
 0x12e   : > { %6288 = vst [vmem:[#allocation18_spill] sm:$0xff] %v5526_v55  ;;  %2532 = vmatprep.mubr.bf16.mxu1 %v4864_v50  ;;  %2885 = vmatprep.mubr.bf16.mxu0 %v4867_v51  ;;  %v4874_v50 = vld [vmem:[%s5088_s24 + $0x2d8] ss:$24 sps:$4 sm:$0xff]   ;;  %v4892_v55 = vld [vmem:[%s5088_s24 + $0x368] ss:$24 sps:$4 sm:$0xff]  }
 0x12f   : > { %v5528_v56 = vpop.f32.mrf.mxu0  ;;  %v5530_v57 = vpop.f32.mrf.mxu1  ;;  %v4877_v51 = vld [vmem:[%s5088_s24 + $0x2e0] ss:$24 sps:$4 sm:$0xff]  }
 0x130   : > { %6289 = vst [vmem:[#allocation19_spill] sm:$0xff] %v5530_v57 }
 0x131   : > { %v5532_v58 = vpop.f32.mrf.mxu0  ;;  %v5534_v59 = vpop.f32.mrf.mxu1 }
 0x132   : > { %6290 = vst [vmem:[#allocation20_spill] sm:$0xff] %v5534_v59  ;;  %v4897_v59 = vld [vmem:[%s5088_s24 + $0x374] ss:$24 sps:$4 sm:$0xff]  }
 0x133   : > { %v5540_v0 = vpop.f32.mrf.mxu0  ;;  %v5542_v1 = vpop.f32.mrf.mxu1 }
 0x134   : > { %6291 = vst [vmem:[#allocation21_spill] sm:$0xff] %v5542_v1  ;;  %v4889_v1 = vld [vmem:[%s5088_s24 + $0x340] ss:$24 sps:$4 sm:$0xff]  }
 0x135   : > { %v5544_v2 = vpop.f32.mrf.mxu0  ;;  %v5546_v3 = vpop.f32.mrf.mxu1  ;;  %2533 = vmatmul.mubr.bf16.gmra.mxu1 %v4862_v60  ;;  %2886 = vmatmul.mubr.bf16.gmra.mxu0 %v4865_v61  ;;  %v4882_v60 = vld [vmem:[%s5088_s24 + $0x30c] ss:$24 sps:$4 sm:$0xff]  }
 0x136   : > { %6292 = vst [vmem:[#allocation22_spill] sm:$0xff] %v5546_v3  ;;  %2542 = vmatprep.mubr.bf16.mxu1 %v4870_v62  ;;  %2895 = vmatprep.mubr.bf16.mxu0 %v4873_v63  ;;  %v4885_v61 = vld [vmem:[%s5088_s24 + $0x314] ss:$24 sps:$4 sm:$0xff]   ;;  %v4886_v3 = vld [vmem:[%s5088_s24 + $0x338] ss:$24 sps:$4 sm:$0xff]  }
 0x137   : > { %v5548_v4 = vpop.f32.mrf.mxu0  ;;  %v5550_v5 = vpop.f32.mrf.mxu1 }
 0x138   : > { %6293 = vst [vmem:[#allocation23_spill] sm:$0xff] %v5550_v5 }
 0x139   : > { %v5552_v12 = vpop.f32.mrf.mxu0  ;;  %v5554_v13 = vpop.f32.mrf.mxu1 }
 0x13a   : > { %6294 = vst [vmem:[#allocation24_spill] sm:$0xff] %v5554_v13  ;;  %v4891_v13 = vld [vmem:[%s5088_s24 + $0x344] ss:$24 sps:$4 sm:$0xff]  }
 0x13b   : > { %v5560_v26 = vpop.f32.mrf.mxu0  ;;  %v5562_v27 = vpop.f32.mrf.mxu1 }
 0x13c   : > { %6295 = vst [vmem:[#allocation25_spill] sm:$0xff] %v5562_v27  ;;  %v4883_v27 = vld [vmem:[%s5088_s24 + $0x310] ss:$24 sps:$4 sm:$0xff]  }
 0x13d   : > { %v5564_v36 = vpop.f32.mrf.mxu0  ;;  %v5566_v37 = vpop.f32.mrf.mxu1  ;;  %2543 = vmatmul.mubr.bf16.gmra.mxu1 %v4868_v14  ;;  %2896 = vmatmul.mubr.bf16.gmra.mxu0 %v4871_v15 }
 0x13e   : > { %6296 = vst [vmem:[#allocation26_spill] sm:$0xff] %v5566_v37  ;;  %2552 = vmatprep.mubr.bf16.mxu1 %v4876_v24  ;;  %2905 = vmatprep.mubr.bf16.mxu0 %v4879_v25  ;;  %v4880_v37 = vld [vmem:[%s5088_s24 + $0x308] ss:$24 sps:$4 sm:$0xff]  }
 0x13f   : > { %v5568_v38 = vpop.f32.mrf.mxu0  ;;  %v5570_v39 = vpop.f32.mrf.mxu1 }
 0x140   : > { %6297 = vst [vmem:[#allocation27_spill] sm:$0xff] %v5570_v39 }
 0x141   : > { %v5572_v48 = vpop.f32.mrf.mxu0  ;;  %v5574_v49 = vpop.f32.mrf.mxu1 }
 0x142   : > { %6298 = vst [vmem:[#allocation28_spill] sm:$0xff] %v5574_v49 }
 0x143   : > { %v5580_v62 = vpop.f32.mrf.mxu0  ;;  %v5582_v63 = vpop.f32.mrf.mxu1 }
 0x144   : > { %6299 = vst [vmem:[#allocation29_spill] sm:$0xff] %v5582_v63  ;;  %v4888_v63 = vld [vmem:[%s5088_s24 + $0x33c] ss:$24 sps:$4 sm:$0xff]  }
 0x145   : > { %v5584_v14 = vpop.f32.mrf.mxu0  ;;  %v5586_v15 = vpop.f32.mrf.mxu1  ;;  %2553 = vmatmul.mubr.bf16.gmra.mxu1 %v4874_v50  ;;  %2906 = vmatmul.mubr.bf16.gmra.mxu0 %v4877_v51 }
 0x146   : > { %6300 = vst [vmem:[#allocation30_spill] sm:$0xff] %v5586_v15  ;;  %2562 = vmatprep.mubr.bf16.mxu1 %v4882_v60  ;;  %2915 = vmatprep.mubr.bf16.mxu0 %v4885_v61 }
 0x147   : > { %v5588_v24 = vpop.f32.mrf.mxu0  ;;  %v5590_v25 = vpop.f32.mrf.mxu1 }
 0x148   : > { %6301 = vst [vmem:[#allocation31_spill] sm:$0xff] %v5590_v25 }
 0x149   : > { %v5592_v49 = vpop.f32.mrf.mxu0  ;;  %v5594_v39 = vpop.f32.mrf.mxu1 }
 0x14a   : > { %6302 = vst [vmem:[#allocation32_spill] sm:$0xff] %v5594_v39 }
 0x14b   : > { %v5600_v50 = vpop.f32.mrf.mxu0  ;;  %v5602_v51 = vpop.f32.mrf.mxu1 }
 0x14c   : > { %6303 = vst [vmem:[#allocation33_spill] sm:$0xff] %v5602_v51  ;;  %v4894_v51 = vld [vmem:[%s5088_s24 + $0x36c] ss:$24 sps:$4 sm:$0xff]  }
 0x14d   : > { %v5604_v60 = vpop.f32.mrf.mxu0  ;;  %v5606_v61 = vpop.f32.mrf.mxu1  ;;  %2563 = vmatmul.mubr.bf16.gmra.mxu1 %v4880_v37  ;;  %2916 = vmatmul.mubr.bf16.gmra.mxu0 %v4883_v27 }
 0x14e   : > { %6304 = vst [vmem:[#allocation34_spill] sm:$0xff] %v5606_v61  ;;  %2572 = vmatprep.mubr.bf16.mxu1 %v4888_v63  ;;  %2925 = vmatprep.mubr.bf16.mxu0 %v4891_v13 }
 0x14f   : > { %v5608_v39 = vpop.f32.mrf.mxu0  ;;  %v5610_v25 = vpop.f32.mrf.mxu1 }
 0x150   : > { %6305 = vst [vmem:[#allocation35_spill] sm:$0xff] %v5610_v25 }
 0x151   : > { %v5612_v15 = vpop.f32.mrf.mxu0  ;;  %v5614_v5 = vpop.f32.mrf.mxu1 }
 0x152   : > { %6306 = vst [vmem:[#allocation36_spill] sm:$0xff] %v5614_v5 }
 0x153   : > { %v5620_v37 = vpop.f32.mrf.mxu0  ;;  %v5622_v27 = vpop.f32.mrf.mxu1 }
 0x154   : > { %6307 = vst [vmem:[#allocation37_spill] sm:$0xff] %v5622_v27  ;;  %v4900_v27 = vld [vmem:[%s5088_s24 + $0x39c] ss:$24 sps:$4 sm:$0xff]  }
 0x155   : > { %v5624_v13 = vpop.f32.mrf.mxu0  ;;  %v5626_v63 = vpop.f32.mrf.mxu1  ;;  %2573 = vmatmul.mubr.bf16.gmra.mxu1 %v4886_v3  ;;  %2926 = vmatmul.mubr.bf16.gmra.mxu0 %v4889_v1 }
 0x156   : > { %6308 = vst [vmem:[#allocation38_spill] sm:$0xff] %v5626_v63  ;;  %2582 = vmatprep.mubr.bf16.mxu1 %v4894_v51  ;;  %2935 = vmatprep.mubr.bf16.mxu0 %v4897_v59 }
 0x157   : > { %v5628_v5 = vpop.f32.mrf.mxu0  ;;  %v5630_v25 = vpop.f32.mrf.mxu1 }
 0x158   : > { %6309 = vst [vmem:[#allocation39_spill] sm:$0xff] %v5630_v25 }
 0x159   : > { %v5632_v61 = vpop.f32.mrf.mxu0  ;;  %v5634_v57 = vpop.f32.mrf.mxu1 }
 0x15a   : > { %6310 = vst [vmem:[#allocation40_spill] sm:$0xff] %v5634_v57 }
 0x15b   : > { %v5640_v3 = vpop.f32.mrf.mxu0  ;;  %v5642_v1 = vpop.f32.mrf.mxu1 }
 0x15c   : > { %6311 = vst [vmem:[#allocation41_spill] sm:$0xff] %v5642_v1  ;;  %v4906_v1 = vld [vmem:[%s5088_s24 + $0x3cc] ss:$24 sps:$4 sm:$0xff]  }
 0x15d   : > { %v5644_v59 = vpop.f32.mrf.mxu0  ;;  %v5646_v51 = vpop.f32.mrf.mxu1  ;;  %2583 = vmatmul.mubr.bf16.gmra.mxu1 %v4892_v55  ;;  %2936 = vmatmul.mubr.bf16.gmra.mxu0 %v4895_v53 }
 0x15e   : > { %6312 = vst [vmem:[#allocation42_spill] sm:$0xff] %v5646_v51  ;;  %2592 = vmatprep.mubr.bf16.mxu1 %v4900_v27  ;;  %2945 = vmatprep.mubr.bf16.mxu0 %v4903_v47 }
 0x15f   : > { %v5648_v57 = vpop.f32.mrf.mxu0  ;;  %v5650_v25 = vpop.f32.mrf.mxu1 }
 0x160   : > { %6313 = vst [vmem:[#allocation43_spill] sm:$0xff] %v5648_v57  ;;  %6314 = vst [vmem:[#allocation44_spill] sm:$0xff] %v5650_v25 }
 0x161   : > { %v5652_v63 = vpop.f32.mrf.mxu0  ;;  %v5654_v45 = vpop.f32.mrf.mxu1 }
 0x162   : > { %6315 = vst [vmem:[#allocation45_spill] sm:$0xff] %v5652_v63  ;;  %6316 = vst [vmem:[#allocation46_spill] sm:$0xff] %v5654_v45 }
 0x163   : > { %v5660_v55 = vpop.f32.mrf.mxu0  ;;  %v5662_v53 = vpop.f32.mrf.mxu1 }
 0x164   : > { %6317 = vst [vmem:[#allocation47_spill] sm:$0xff] %v5660_v55  ;;  %6318 = vst [vmem:[#allocation48_spill] sm:$0xff] %v5662_v53  ;;  %v4912_v53 = vld [vmem:[%s5088_s24 + $0x3fc] ss:$24 sps:$4 sm:$0xff]   ;;  %v4942_v55 = vld [vmem:[%s5088_s24 + $0x4ec] ss:$24 sps:$4 sm:$0xff]  }
 0x165   : > { %v5664_v47 = vpop.f32.mrf.mxu0  ;;  %v5666_v27 = vpop.f32.mrf.mxu1  ;;  %2593 = vmatmul.mubr.bf16.gmra.mxu1 %v4898_v43  ;;  %2946 = vmatmul.mubr.bf16.gmra.mxu0 %v4901_v41 }
 0x166   : > { %6319 = vst [vmem:[#allocation49_spill] sm:$0xff] %v5664_v47  ;;  %6320 = vst [vmem:[#allocation50_spill] sm:$0xff] %v5666_v27  ;;  %2602 = vmatprep.mubr.bf16.mxu1 %v4906_v1  ;;  %2955 = vmatprep.mubr.bf16.mxu0 %v4909_v35  ;;  %v4937_v47 = vld [vmem:[%s5088_s24 + $0x4c0] ss:$24 sps:$4 sm:$0xff]  }
 0x167   : > { %v5668_v45 = vpop.f32.mrf.mxu0  ;;  %v5670_v25 = vpop.f32.mrf.mxu1 }
 0x168   : > { %6321 = vst [vmem:[#allocation51_spill] sm:$0xff] %v5668_v45  ;;  %6322 = vst [vmem:[#allocation52_spill] sm:$0xff] %v5670_v25 }
 0x169   : > { %v5672_v51 = vpop.f32.mrf.mxu0  ;;  %v5674_v33 = vpop.f32.mrf.mxu1 }
 0x16a   : > { %6323 = vst [vmem:[#allocation53_spill] sm:$0xff] %v5672_v51  ;;  %6324 = vst [vmem:[#allocation54_spill] sm:$0xff] %v5674_v33 }
 0x16b   : > { %v5680_v43 = vpop.f32.mrf.mxu0  ;;  %v5682_v41 = vpop.f32.mrf.mxu1 }
 0x16c   : > { %6325 = vst [vmem:[#allocation55_spill] sm:$0xff] %v5680_v43  ;;  %6326 = vst [vmem:[#allocation56_spill] sm:$0xff] %v5682_v41  ;;  %v4918_v41 = vld [vmem:[%s5088_s24 + $0x42c] ss:$24 sps:$4 sm:$0xff]  }
 0x16d   : > { %v5684_v35 = vpop.f32.mrf.mxu0  ;;  %v5686_v1 = vpop.f32.mrf.mxu1  ;;  %2603 = vmatmul.mubr.bf16.gmra.mxu1 %v4904_v31  ;;  %2956 = vmatmul.mubr.bf16.gmra.mxu0 %v4907_v29 }
 0x16e   : > { %6327 = vst [vmem:[#allocation57_spill] sm:$0xff] %v5684_v35  ;;  %6328 = vst [vmem:[#allocation58_spill] sm:$0xff] %v5686_v1  ;;  %2612 = vmatprep.mubr.bf16.mxu1 %v4912_v53  ;;  %2965 = vmatprep.mubr.bf16.mxu0 %v4915_v23  ;;  %v4936_v35 = vld [vmem:[%s5088_s24 + $0x4bc] ss:$24 sps:$4 sm:$0xff]  }
 0x16f   : > { %v5688_v33 = vpop.f32.mrf.mxu0  ;;  %v5690_v25 = vpop.f32.mrf.mxu1 }
 0x170   : > { %6329 = vst [vmem:[#allocation59_spill] sm:$0xff] %v5688_v33  ;;  %6330 = vst [vmem:[#allocation60_spill] sm:$0xff] %v5690_v25 }
 0x171   : > { %v5692_v27 = vpop.f32.mrf.mxu0  ;;  %v5694_v21 = vpop.f32.mrf.mxu1 }
 0x172   : > { %6331 = vst [vmem:[#allocation61_spill] sm:$0xff] %v5692_v27  ;;  %6332 = vst [vmem:[#allocation62_spill] sm:$0xff] %v5694_v21  ;;  %v4930_v27 = vld [vmem:[%s5088_s24 + $0x48c] ss:$24 sps:$4 sm:$0xff]  }
 0x173   : > { %v5700_v31 = vpop.f32.mrf.mxu0  ;;  %v5702_v29 = vpop.f32.mrf.mxu1 }
 0x174   : > { %6333 = vst [vmem:[#allocation63_spill] sm:$0xff] %v5700_v31  ;;  %6334 = vst [vmem:[#allocation64_spill] sm:$0xff] %v5702_v29  ;;  %v4919_v31 = vld [vmem:[%s5088_s24 + $0x430] ss:$24 sps:$4 sm:$0xff]   ;;  %v4924_v29 = vld [vmem:[%s5088_s24 + $0x45c] ss:$24 sps:$4 sm:$0xff]  }
 0x175   : > { %v5704_v23 = vpop.f32.mrf.mxu0  ;;  %v5706_v53 = vpop.f32.mrf.mxu1  ;;  %2613 = vmatmul.mubr.bf16.gmra.mxu1 %v4910_v19  ;;  %2966 = vmatmul.mubr.bf16.gmra.mxu0 %v4913_v17 }
 0x176   : > { %6335 = vst [vmem:[#allocation65_spill] sm:$0xff] %v5704_v23  ;;  %6336 = vst [vmem:[#allocation66_spill] sm:$0xff] %v5706_v53  ;;  %2622 = vmatprep.mubr.bf16.mxu1 %v4918_v41  ;;  %2975 = vmatprep.mubr.bf16.mxu0 %v4921_v11  ;;  %v4927_v23 = vld [vmem:[%s5088_s24 + $0x464] ss:$24 sps:$4 sm:$0xff]  }
 0x177   : > { %v5708_v21 = vpop.f32.mrf.mxu0  ;;  %v5710_v25 = vpop.f32.mrf.mxu1 }
 0x178   : > { %6337 = vst [vmem:[#allocation67_spill] sm:$0xff] %v5708_v21  ;;  %6338 = vst [vmem:[#allocation68_spill] sm:$0xff] %v5710_v25  ;;  %v4922_v21 = vld [vmem:[%s5088_s24 + $0x458] ss:$24 sps:$4 sm:$0xff]  }
 0x179   : > { %v5712_v1 = vpop.f32.mrf.mxu0  ;;  %v5714_v9 = vpop.f32.mrf.mxu1 }
 0x17a   : > { %6339 = vst [vmem:[#allocation69_spill] sm:$0xff] %v5712_v1  ;;  %6340 = vst [vmem:[#allocation70_spill] sm:$0xff] %v5714_v9 }
 0x17b   : > { %v5720_v19 = vpop.f32.mrf.mxu0  ;;  %v5722_v17 = vpop.f32.mrf.mxu1 }
 0x17c   : > { %6341 = vst [vmem:[#allocation71_spill] sm:$0xff] %v5720_v19  ;;  %6342 = vst [vmem:[#allocation72_spill] sm:$0xff] %v5722_v17  ;;  %v4925_v19 = vld [vmem:[%s5088_s24 + $0x460] ss:$24 sps:$4 sm:$0xff]   ;;  %v4933_v17 = vld [vmem:[%s5088_s24 + $0x494] ss:$24 sps:$4 sm:$0xff]  }
 0x17d   : > { %v5724_v11 = vpop.f32.mrf.mxu0  ;;  %v5726_v41 = vpop.f32.mrf.mxu1  ;;  %2623 = vmatmul.mubr.bf16.gmra.mxu1 %v4916_v7  ;;  %2976 = vmatmul.mubr.bf16.gmra.mxu0 %v4919_v31 }
 0x17e   : > { %6343 = vst [vmem:[#allocation73_spill] sm:$0xff] %v5724_v11  ;;  %6344 = vst [vmem:[#allocation74_spill] sm:$0xff] %v5726_v41  ;;  %2632 = vmatprep.mubr.bf16.mxu1 %v4924_v29  ;;  %2985 = vmatprep.mubr.bf16.mxu0 %v4927_v23  ;;  %v3078_v11 = vlaneseq }
 0x17f   : > { %v5728_v9 = vpop.f32.mrf.mxu0  ;;  %v5730_v25 = vpop.f32.mrf.mxu1 }
 0x180   : > { %6345 = vst [vmem:[#allocation75_spill] sm:$0xff] %v5728_v9  ;;  %6346 = vst [vmem:[#allocation76_spill] sm:$0xff] %v5730_v25  ;;  %v3079_v23 = vshrl.u32 %v3078_v11, 7  ;;  %v4928_v9 = vld [vmem:[%s5088_s24 + $0x488] ss:$24 sps:$4 sm:$0xff]  }
 0x181   : > { %v5732_v53 = vpop.f32.mrf.mxu0  ;;  %v5734_v1 = vpop.f32.mrf.mxu1 }
 0x182   : > { %6347 = vst [vmem:[#allocation77_spill] sm:$0xff] %v5732_v53  ;;  %6348 = vst [vmem:[#allocation78_spill] sm:$0xff] %v5734_v1  ;;  %v3080_v33 = vsub.s32 0, %v3079_v23 }
 0x183   : > { %v5740_v41 = vpop.f32.mrf.mxu0  ;;  %v5742_v7 = vpop.f32.mrf.mxu1 }
 0x184   : > { %6349 = vst [vmem:[#allocation79_spill] sm:$0xff] %v5740_v41  ;;  %6350 = vst [vmem:[#allocation80_spill] sm:$0xff] %v5742_v7  ;;  %v4931_v7 = vld [vmem:[%s5088_s24 + $0x490] ss:$24 sps:$4 sm:$0xff]  }
 0x185   : > { %v5744_v31 = vpop.f32.mrf.mxu0  ;;  %v5746_v29 = vpop.f32.mrf.mxu1  ;;  %2633 = vmatmul.mubr.bf16.gmra.mxu1 %v4922_v21  ;;  %2986 = vmatmul.mubr.bf16.gmra.mxu0 %v4925_v19  ;;  %v3084_v19 = vsub.s32 1, %v3079_v23 }
 0x186   : > { %6351 = vst [vmem:[#allocation81_spill] sm:$0xff] %v5744_v31  ;;  %6352 = vst [vmem:[#allocation82_spill] sm:$0xff] %v5746_v29  ;;  %2642 = vmatprep.mubr.bf16.mxu1 %v4930_v27  ;;  %2995 = vmatprep.mubr.bf16.mxu0 %v4933_v17  ;;  %v4939_v31 = vld [vmem:[%s5088_s24 + $0x4c4] ss:$24 sps:$4 sm:$0xff]   ;;  %v3076_v27 = vld [vmem:[%s6269_s2] sm:$0x3] }
 0x187   : > { %v5748_v1 = vpop.f32.mrf.mxu0  ;;  %v5750_v25 = vpop.f32.mrf.mxu1  ;;  %v5771_v29 = vrot.slane %v3076_v27, %v3080_v33 }
 0x188   : > { %6353 = vst [vmem:[#allocation83_spill] sm:$0xff] %v5748_v1  ;;  %6354 = vst [vmem:[#allocation84_spill] sm:$0xff] %v5750_v25  ;;  %v5776_v1 = vrot.slane %v3076_v27, %v3084_v19 }
 0x189   : > { %v5752_v53 = vpop.f32.mrf.mxu0  ;;  %v5754_v41 = vpop.f32.mrf.mxu1 }
 0x18a   : > { %6355 = vst [vmem:[#allocation85_spill] sm:$0xff] %v5752_v53  ;;  %6356 = vst [vmem:[#allocation86_spill] sm:$0xff] %v5754_v41  ;;  %v3216_v41 = vld [vmem:[%s6270_s3] sm:$0x3] }
 0x18b   : > { %v5760_v43 = vpop.f32.mrf.mxu0  ;;  %v5762_v21 = vpop.f32.mrf.mxu1 }
 0x18c   : > { %6357 = vst [vmem:[#allocation87_spill] sm:$0xff] %v5760_v43  ;;  %6358 = vst [vmem:[#allocation88_spill] sm:$0xff] %v5762_v21 }
 0x18d   : > { %v2404_v17 = vpop.f32.mrf.mxu1  ;;  %2643 = vmatmul.mubr.bf16.gmra.mxu1 %v4928_v9  ;;  %v2757_v11 = vpop.f32.mrf.mxu0  ;;  %2996 = vmatmul.mubr.bf16.gmra.mxu0 %v4931_v7  ;;  %v5773_v9 = vrot.slane %v3216_v41, %v3080_v33  ;;  %v4934_v7 = vld [vmem:[%s5088_s24 + $0x4b8] ss:$24 sps:$4 sm:$0xff]  }
 0x18e   : > { %v2405_v25 = vadd.f32 %v2404_v17, %v5444_v6  ;;  %2652 = vmatprep.mubr.bf16.mxu1 %v4936_v35  ;;  %3005 = vmatprep.mubr.bf16.mxu0 %v4939_v31  ;;  %v5781_v17 = vrot.slane %v3216_v41, %v3084_v19 }
 0x18f   : > { %v2406_v21 = vpop.f32.mrf.mxu1  ;;  %v2759_v23 = vpop.f32.mrf.mxu0 }
 0x190   : > { %v2758_v43 = vadd.f32 %v2757_v11, %v2405_v25  ;;  %v2407_v53 = vadd.f32 %v2406_v21, %v5448_v8  ;;  %v4945_v25 = vld [vmem:[%s5088_s24 + $0x4f4] ss:$24 sps:$4 sm:$0xff]  }
 0x191   : > { %v2408_v51 = vpop.f32.mrf.mxu1  ;;  %v2761_v45 = vpop.f32.mrf.mxu0 }
 0x192   : > { %v3088_v6 = vmul.f32 %v5771_v29, %v2758_v43  ;;  %v2760_v35 = vadd.f32 %v2759_v23, %v2407_v53  ;;  %v2409_v31 = vadd.f32 %v2408_v51, %v5452_v10 }
 0x193   : > { %v2410_v33 = vpop.f32.mrf.mxu1  ;;  %v2763_v11 = vpop.f32.mrf.mxu0 }
 0x194   : > { %v3228_v8 = vadd.f32 %v5773_v9, %v3088_v6  ;;  %v3089_v21 = vmul.f32 %v5776_v1, %v2760_v35  ;;  %v2762_v27 = vadd.f32 %v2761_v45, %v2409_v31  ;;  %v2411_v63 = vadd.f32 %v2410_v33, %v5460_v16  ;;  %v4943_v35 = vld [vmem:[%s5088_s24 + $0x4f0] ss:$24 sps:$4 sm:$0xff]  }
 0x195   : > { %v2414_v57 = vpop.f32.mrf.mxu1  ;;  %2653 = vmatmul.mubr.bf16.gmra.mxu1 %v4934_v7  ;;  %v2767_v43 = vpop.f32.mrf.mxu0  ;;  %3006 = vmatmul.mubr.bf16.gmra.mxu0 %v4937_v47 }
 0x196   : > { %v3229_v53 = vadd.f32 %v5781_v17, %v3089_v21  ;;  %v3090_v10 = vmul.f32 %v5771_v29, %v2762_v27  ;;  %v2764_v51 = vadd.f32 %v2763_v11, %v2411_v63  ;;  %2662 = vmatprep.mubr.bf16.mxu1 %v4942_v55  ;;  %3015 = vmatprep.mubr.bf16.mxu0 %v4945_v25  ;;  %v3356_v41 = vmax.f32 %v3228_v8, 0.0  ;;  %v4948_v11 = vld [vmem:[%s5088_s24 + $0x51c] ss:$24 sps:$4 sm:$0xff]  }
 0x197   : > { %v2415_v19 = vadd.f32 %v2414_v57, %v5464_v18  ;;  %v2416_v45 = vpop.f32.mrf.mxu1  ;;  %v2769_v16 = vpop.f32.mrf.mxu0  ;;  %v4940_v57 = vld [vmem:[%s5088_s24 + $0x4e8] ss:$24 sps:$4 sm:$0xff]  }
 0x198   : > { %v3357_v23 = vmax.f32 %v3229_v53, 0.0  ;;  %v3230_v7 = vadd.f32 %v5773_v9, %v3090_v10  ;;  %v3091_v47 = vmul.f32 %v5776_v1, %v2764_v51  ;;  %v2417_v6 = vadd.f32 %v2416_v45, %v5468_v20  ;;  %v4951_v53 = vld [vmem:[%s5088_s24 + $0x524] ss:$24 sps:$4 sm:$0xff]  }
 0x199   : > { %v2768_v63 = vadd.f32 %v2767_v43, %v2415_v19  ;;  %v2418_v55 = vpop.f32.mrf.mxu1  ;;  %v2771_v18 = vpop.f32.mrf.mxu0 }
 0x19a   : > { %v4423_v31 = vpack.c.bf16 %v3357_v23, %v3356_v41  ;;  %v3231_v25 = vadd.f32 %v5781_v17, %v3091_v47  ;;  %v2770_v33 = vadd.f32 %v2769_v16, %v2417_v6  ;;  %v2419_v20 = vadd.f32 %v2418_v55, %v5472_v22 }
 0x19b   : > { %v3092_v8 = vmul.f32 %v5771_v29, %v2768_v63  ;;  %v2420_v21 = vpop.f32.mrf.mxu1  ;;  %v2773_v27 = vpop.f32.mrf.mxu0  ;;  %v3358_v10 = vmax.f32 %v3230_v7, 0.0 }
 0x19c   : > { %3868 = vst [vmem:[%s5799_s6] sm:$0xff] %v4423_v31  ;;  %v3359_v51 = vmax.f32 %v3231_v25, 0.0  ;;  %v3093_v43 = vmul.f32 %v5776_v1, %v2770_v33  ;;  %v2421_v19 = vadd.f32 %v2420_v21, %v5480_v28  ;;  %v2772_v45 = vadd.f32 %v2771_v18, %v2419_v20  ;;  %v4949_v20 = vld [vmem:[%s5088_s24 + $0x520] ss:$24 sps:$4 sm:$0xff]  }
 0x19d   : > { %v3232_v41 = vadd.f32 %v5773_v9, %v3092_v8  ;;  %v2424_v16 = vpop.f32.mrf.mxu1  ;;  %2663 = vmatmul.mubr.bf16.gmra.mxu1 %v4940_v57  ;;  %v2777_v23 = vpop.f32.mrf.mxu0  ;;  %3016 = vmatmul.mubr.bf16.gmra.mxu0 %v4943_v35  ;;  %v4946_v8 = vld [vmem:[%s5088_s24 + $0x518] ss:$24 sps:$4 sm:$0xff]  }
 0x19e   : > { %v4424_v47 = vpack.c.bf16 %v3359_v51, %v3358_v10  ;;  %v3233_v22 = vadd.f32 %v5781_v17, %v3093_v43  ;;  %v2774_v6 = vadd.f32 %v2773_v27, %v2421_v19  ;;  %v2425_v7 = vadd.f32 %v2424_v16, %v5484_v30  ;;  %2672 = vmatprep.mubr.bf16.mxu1 %v4948_v11  ;;  %v4954_v51 = vld [vmem:[%s5088_s24 + $0x54c] ss:$24 sps:$4 sm:$0xff]  }
 0x19f   : > { %v3360_v63 = vmax.f32 %v3232_v41, 0.0  ;;  %v3094_v28 = vmul.f32 %v5771_v29, %v2772_v45  ;;  %v2426_v55 = vpop.f32.mrf.mxu1  ;;  %v2779_v31 = vpop.f32.mrf.mxu0  ;;  %3025 = vmatprep.mubr.bf16.mxu0 %v4951_v53  ;;  %v4957_v43 = vld [vmem:[%s5088_s24 + $0x554] ss:$24 sps:$4 sm:$0xff]  }
 0x1a0   : > { %3869 = vst [vmem:[%s5799_s6 + $0x8] sm:$0xff] %v4424_v47  ;;  %v3361_v18 = vmax.f32 %v3233_v22, 0.0  ;;  %v3095_v57 = vmul.f32 %v5776_v1, %v2774_v6  ;;  %v2778_v35 = vadd.f32 %v2777_v23, %v2425_v7  ;;  %v2427_v25 = vadd.f32 %v2426_v55, %v5488_v32 }
 0x1a1   : > { %v3234_v30 = vadd.f32 %v5773_v9, %v3094_v28  ;;  %v2428_v33 = vpop.f32.mrf.mxu1  ;;  %v2781_v11 = vpop.f32.mrf.mxu0 }
 0x1a2   : > { %v4425_v21 = vpack.c.bf16 %v3361_v18, %v3360_v63  ;;  %v3235_v27 = vadd.f32 %v5781_v17, %v3095_v57  ;;  %v3096_v53 = vmul.f32 %v5771_v29, %v2778_v35  ;;  %v2780_v10 = vadd.f32 %v2779_v31, %v2427_v25 }
 0x1a3   : > { %v3362_v19 = vmax.f32 %v3234_v30, 0.0  ;;  %v2429_v41 = vadd.f32 %v2428_v33, %v5492_v34  ;;  %v2430_v45 = vpop.f32.mrf.mxu1  ;;  %v2783_v32 = vpop.f32.mrf.mxu0 }
 0x1a4   : > { %3870 = vst [vmem:[%s5799_s6 + $0x10] sm:$0xff] %v4425_v21  ;;  %v3363_v16 = vmax.f32 %v3235_v27, 0.0  ;;  %v3236_v23 = vadd.f32 %v5773_v9, %v3096_v53  ;;  %v3097_v47 = vmul.f32 %v5776_v1, %v2780_v10  ;;  %v2431_v22 = vadd.f32 %v2430_v45, %v5500_v40  ;;  %v4952_v27 = vld [vmem:[%s5088_s24 + $0x548] ss:$24 sps:$4 sm:$0xff]  }
 0x1a5   : > { %v2782_v6 = vadd.f32 %v2781_v11, %v2429_v41  ;;  %v2434_v7 = vpop.f32.mrf.mxu1  ;;  %2673 = vmatmul.mubr.bf16.gmra.mxu1 %v4946_v8  ;;  %v2787_v63 = vpop.f32.mrf.mxu0  ;;  %3026 = vmatmul.mubr.bf16.gmra.mxu0 %v4949_v20  ;;  %v4955_v53 = vld [vmem:[%s5088_s24 + $0x550] ss:$24 sps:$4 sm:$0xff]  }
 0x1a6   : > { %v4426_v28 = vpack.c.bf16 %v3363_v16, %v3362_v19  ;;  %v3237_v55 = vadd.f32 %v5781_v17, %v3097_v47  ;;  %v2784_v34 = vadd.f32 %v2783_v32, %v2431_v22  ;;  %2682 = vmatprep.mubr.bf16.mxu1 %v4954_v51  ;;  %3035 = vmatprep.mubr.bf16.mxu0 %v4957_v43  ;;  %v3364_v40 = vmax.f32 %v3236_v23, 0.0  ;;  %v4960_v19 = vld [vmem:[%s5088_s24 + $0x57c] ss:$24 sps:$4 sm:$0xff]  }
 0x1a7   : > { %v3098_v31 = vmul.f32 %v5771_v29, %v2782_v6  ;;  %v2435_v18 = vadd.f32 %v2434_v7, %v5504_v42  ;;  %v2436_v57 = vpop.f32.mrf.mxu1  ;;  %v2789_v35 = vpop.f32.mrf.mxu0  ;;  %v4963_v16 = vld [vmem:[%s5088_s24 + $0x584] ss:$24 sps:$4 sm:$0xff]  }
 0x1a8   : > { %3871 = vst [vmem:[%s5799_s6 + $0x18] sm:$0xff] %v4426_v28  ;;  %v3365_v25 = vmax.f32 %v3237_v55, 0.0  ;;  %v3099_v30 = vmul.f32 %v5776_v1, %v2784_v34  ;;  %v2437_v33 = vadd.f32 %v2436_v57, %v5508_v44 }
 0x1a9   : > { %v3238_v11 = vadd.f32 %v5773_v9, %v3098_v31  ;;  %v2788_v8 = vadd.f32 %v2787_v63, %v2435_v18  ;;  %v2438_v20 = vpop.f32.mrf.mxu1  ;;  %v2791_v21 = vpop.f32.mrf.mxu0 }
 0x1aa   : > { %v4427_v42 = vpack.c.bf16 %v3365_v25, %v3364_v40  ;;  %v3239_v10 = vadd.f32 %v5781_v17, %v3099_v30  ;;  %v2790_v51 = vadd.f32 %v2789_v35, %v2437_v33  ;;  %v2439_v43 = vadd.f32 %v2438_v20, %v5512_v46 }
 0x1ab   : > { %v3366_v41 = vmax.f32 %v3238_v11, 0.0  ;;  %v3100_v45 = vmul.f32 %v5771_v29, %v2788_v8  ;;  %v2440_v44 = vpop.f32.mrf.mxu1  ;;  %v2793_v32 = vpop.f32.mrf.mxu0 }
 0x1ac   : > { %3872 = vst [vmem:[%s5799_s6 + $0x20] sm:$0xff] %v4427_v42  ;;  %v3367_v23 = vmax.f32 %v3239_v10, 0.0  ;;  %v3101_v47 = vmul.f32 %v5776_v1, %v2790_v51  ;;  %v2792_v22 = vadd.f32 %v2791_v21, %v2439_v43  ;;  %v2441_v6 = vadd.f32 %v2440_v44, %v5520_v52  ;;  %v4958_v21 = vld [vmem:[%s5088_s24 + $0x578] ss:$24 sps:$4 sm:$0xff]   ;;  %v4966_v10 = vld [vmem:[%s5088_s24 + $0x5ac] ss:$24 sps:$4 sm:$0xff]  }
 0x1ad   : > { %v3240_v7 = vadd.f32 %v5773_v9, %v3100_v45  ;;  %v2444_v63 = vpop.f32.mrf.mxu1  ;;  %2683 = vmatmul.mubr.bf16.gmra.mxu1 %v4952_v27  ;;  %v2797_v46 = vpop.f32.mrf.mxu0  ;;  %3036 = vmatmul.mubr.bf16.gmra.mxu0 %v4955_v53  ;;  %v4961_v27 = vld [vmem:[%s5088_s24 + $0x580] ss:$24 sps:$4 sm:$0xff]   ;;  %v4969_v45 = vld [vmem:[%s5088_s24 + $0x5b4] ss:$24 sps:$4 sm:$0xff]  }
 0x1ae   : > { %v4428_v28 = vpack.c.bf16 %v3367_v23, %v3366_v41  ;;  %v3241_v55 = vadd.f32 %v5781_v17, %v3101_v47  ;;  %v3102_v34 = vmul.f32 %v5771_v29, %v2792_v22  ;;  %v2794_v31 = vadd.f32 %v2793_v32, %v2441_v6  ;;  %2692 = vmatprep.mubr.bf16.mxu1 %v4960_v19 }
 0x1af   : > { %v3368_v18 = vmax.f32 %v3240_v7, 0.0  ;;  %v2445_v57 = vadd.f32 %v2444_v63, %v5524_v54  ;;  %v2446_v52 = vpop.f32.mrf.mxu1  ;;  %v2799_v35 = vpop.f32.mrf.mxu0  ;;  %3045 = vmatprep.mubr.bf16.mxu0 %v4963_v16 }
 0x1b0   : > { %3873 = vst [vmem:[%s5799_s6 + $0x28] sm:$0xff] %v4428_v28  ;;  %v3369_v40 = vmax.f32 %v3241_v55, 0.0  ;;  %v3242_v25 = vadd.f32 %v5773_v9, %v3102_v34  ;;  %v3103_v30 = vmul.f32 %v5776_v1, %v2794_v31  ;;  %v2447_v33 = vadd.f32 %v2446_v52, %v5528_v56 }
 0x1b1   : > { %v2798_v11 = vadd.f32 %v2797_v46, %v2445_v57  ;;  %v2448_v8 = vpop.f32.mrf.mxu1  ;;  %v2801_v20 = vpop.f32.mrf.mxu0 }
 0x1b2   : > { %v4429_v54 = vpack.c.bf16 %v3369_v40, %v3368_v18  ;;  %v3243_v53 = vadd.f32 %v5781_v17, %v3103_v30  ;;  %v2800_v42 = vadd.f32 %v2799_v35, %v2447_v33  ;;  %v2449_v43 = vadd.f32 %v2448_v8, %v5532_v58  ;;  %v4967_v30 = vld [vmem:[%s5088_s24 + $0x5b0] ss:$24 sps:$4 sm:$0xff]  }
 0x1b3   : > { %v3104_v51 = vmul.f32 %v5771_v29, %v2798_v11  ;;  %v2450_v19 = vpop.f32.mrf.mxu1  ;;  %v2803_v41 = vpop.f32.mrf.mxu0  ;;  %v3370_v44 = vmax.f32 %v3242_v25, 0.0  ;;  %v4964_v25 = vld [vmem:[%s5088_s24 + $0x5a8] ss:$24 sps:$4 sm:$0xff]  }
 0x1b4   : > { %3874 = vst [vmem:[%s5799_s6 + $0x30] sm:$0xff] %v4429_v54  ;;  %v3371_v56 = vmax.f32 %v3243_v53, 0.0  ;;  %v3105_v32 = vmul.f32 %v5776_v1, %v2800_v42  ;;  %v2451_v16 = vadd.f32 %v2450_v19, %v5540_v0  ;;  %v2802_v47 = vadd.f32 %v2801_v20, %v2449_v43 }
 0x1b5   : > { %v3244_v23 = vadd.f32 %v5773_v9, %v3104_v51  ;;  %v2454_v22 = vpop.f32.mrf.mxu1  ;;  %2693 = vmatmul.mubr.bf16.gmra.mxu1 %v4958_v21  ;;  %v2807_v6 = vpop.f32.mrf.mxu0  ;;  %3046 = vmatmul.mubr.bf16.gmra.mxu0 %v4961_v27  ;;  %v4972_v21 = vld [vmem:[%s5088_s24 + $0x5dc] ss:$24 sps:$4 sm:$0xff]  }
 0x1b6   : > { %v4430_v7 = vpack.c.bf16 %v3371_v56, %v3370_v44  ;;  %v3245_v58 = vadd.f32 %v5781_v17, %v3105_v32  ;;  %v2804_v63 = vadd.f32 %v2803_v41, %v2451_v16  ;;  %v2455_v46 = vadd.f32 %v2454_v22, %v5544_v2  ;;  %2702 = vmatprep.mubr.bf16.mxu1 %v4966_v10  ;;  %v4975_v27 = vld [vmem:[%s5088_s24 + $0x5e4] ss:$24 sps:$4 sm:$0xff]  }
 0x1b7   : > { %v3372_v28 = vmax.f32 %v3244_v23, 0.0  ;;  %v3106_v0 = vmul.f32 %v5771_v29, %v2802_v47  ;;  %v2456_v55 = vpop.f32.mrf.mxu1  ;;  %v2809_v34 = vpop.f32.mrf.mxu0  ;;  %3055 = vmatprep.mubr.bf16.mxu0 %v4969_v45 }
 0x1b8   : > { %3875 = vst [vmem:[%s5799_s6 + $0x38] sm:$0xff] %v4430_v7  ;;  %v3373_v31 = vmax.f32 %v3245_v58, 0.0  ;;  %v3107_v18 = vmul.f32 %v5776_v1, %v2804_v63  ;;  %v2808_v57 = vadd.f32 %v2807_v6, %v2455_v46  ;;  %v2457_v52 = vadd.f32 %v2456_v55, %v5548_v4  ;;  %v4970_v55 = vld [vmem:[%s5088_s24 + $0x5d8] ss:$24 sps:$4 sm:$0xff]  }
 0x1b9   : > { %v3246_v2 = vadd.f32 %v5773_v9, %v3106_v0  ;;  %v2458_v35 = vpop.f32.mrf.mxu1  ;;  %v2811_v40 = vpop.f32.mrf.mxu0 }
 0x1ba   : > { %v4431_v33 = vpack.c.bf16 %v3373_v31, %v3372_v28  ;;  %v3247_v11 = vadd.f32 %v5781_v17, %v3107_v18  ;;  %v3108_v8 = vmul.f32 %v5771_v29, %v2808_v57  ;;  %v2810_v20 = vadd.f32 %v2809_v34, %v2457_v52  ;;  %v4973_v34 = vld [vmem:[%s5088_s24 + $0x5e0] ss:$24 sps:$4 sm:$0xff]  }
 0x1bb   : > { %v3374_v54 = vmax.f32 %v3246_v2, 0.0  ;;  %v2459_v53 = vadd.f32 %v2458_v35, %v5552_v12  ;;  %v2460_v42 = vpop.f32.mrf.mxu1  ;;  %v2813_v4 = vpop.f32.mrf.mxu0 }
 0x1bc   : > { %3876 = vst [vmem:[%s5799_s6 + $0x40] sm:$0xff] %v4431_v33  ;;  %v3375_v10 = vmax.f32 %v3247_v11, 0.0  ;;  %v3248_v51 = vadd.f32 %v5773_v9, %v3108_v8  ;;  %v3109_v43 = vmul.f32 %v5776_v1, %v2810_v20  ;;  %v2461_v19 = vadd.f32 %v2460_v42, %v5560_v26 }
 0x1bd   : > { %v2812_v41 = vadd.f32 %v2811_v40, %v2459_v53  ;;  %v2464_v45 = vpop.f32.mrf.mxu1  ;;  %2703 = vmatmul.mubr.bf16.gmra.mxu1 %v4964_v25  ;;  %v2817_v44 = vpop.f32.mrf.mxu0  ;;  %3056 = vmatmul.mubr.bf16.gmra.mxu0 %v4967_v30 }
 0x1be   : > { %v4432_v56 = vpack.c.bf16 %v3375_v10, %v3374_v54  ;;  %v3249_v32 = vadd.f32 %v5781_v17, %v3109_v43  ;;  %v2814_v12 = vadd.f32 %v2813_v4, %v2461_v19  ;;  %2712 = vmatprep.mubr.bf16.mxu1 %v4972_v21  ;;  %3065 = vmatprep.mubr.bf16.mxu0 %v4975_v27  ;;  %v3376_v26 = vmax.f32 %v3248_v51, 0.0 }
 0x1bf   : > { %v3110_v16 = vmul.f32 %v5771_v29, %v2812_v41  ;;  %v2465_v23 = vadd.f32 %v2464_v45, %v5564_v36  ;;  %v2466_v47 = vpop.f32.mrf.mxu1  ;;  %v2819_v22 = vpop.f32.mrf.mxu0 }
 0x1c0   : > { %3877 = vst [vmem:[%s5799_s6 + $0x48] sm:$0xff] %v4432_v56  ;;  %v3377_v6 = vmax.f32 %v3249_v32, 0.0  ;;  %v3111_v7 = vmul.f32 %v5776_v1, %v2814_v12  ;;  %v2467_v58 = vadd.f32 %v2466_v47, %v5568_v38 }
 0x1c1   : > { %v3250_v63 = vadd.f32 %v5773_v9, %v3110_v16  ;;  %v2818_v46 = vadd.f32 %v2817_v44, %v2465_v23  ;;  %v2468_v28 = vpop.f32.mrf.mxu1  ;;  %v2821_v0 = vpop.f32.mrf.mxu0 }
 0x1c2   : > { %v4433_v31 = vpack.c.bf16 %v3377_v6, %v3376_v26  ;;  %v3251_v36 = vadd.f32 %v5781_v17, %v3111_v7  ;;  %v2820_v18 = vadd.f32 %v2819_v22, %v2467_v58  ;;  %v2469_v57 = vadd.f32 %v2468_v28, %v5572_v48 }
 0x1c3   : > { %v3378_v52 = vmax.f32 %v3250_v63, 0.0  ;;  %v3112_v2 = vmul.f32 %v5771_v29, %v2818_v46  ;;  %v2470_v35 = vpop.f32.mrf.mxu1  ;;  %v2823_v40 = vpop.f32.mrf.mxu0 }
 0x1c4   : > { %3878 = vst [vmem:[%s5799_s6 + $0x50] sm:$0xff] %v4433_v31  ;;  %v3379_v38 = vmax.f32 %v3251_v36, 0.0  ;;  %v3113_v25 = vmul.f32 %v5776_v1, %v2820_v18  ;;  %v2822_v30 = vadd.f32 %v2821_v0, %v2469_v57  ;;  %v2471_v33 = vadd.f32 %v2470_v35, %v5580_v62 }
 0x1c5   : > { %v3252_v11 = vadd.f32 %v5773_v9, %v3112_v2  ;;  %v2474_v8 = vpop.f32.mrf.mxu1  ;;  %2713 = vmatmul.mubr.bf16.gmra.mxu1 %v4970_v55  ;;  %v2827_v20 = vpop.f32.mrf.mxu0  ;;  %3066 = vmatmul.mubr.bf16.gmra.mxu0 %v4973_v34 }
 0x1c6   : > { %v4434_v48 = vpack.c.bf16 %v3379_v38, %v3378_v52  ;;  %v3253_v21 = vadd.f32 %v5781_v17, %v3113_v25  ;;  %v3114_v27 = vmul.f32 %v5771_v29, %v2822_v30  ;;  %v2824_v54 = vadd.f32 %v2823_v40, %v2471_v33 }
 0x1c7   : > { %v3380_v53 = vmax.f32 %v3252_v11, 0.0  ;;  %v2475_v42 = vadd.f32 %v2474_v8, %v5584_v14  ;;  %v2476_v4 = vpop.f32.mrf.mxu1  ;;  %v2829_v10 = vpop.f32.mrf.mxu0 }
 0x1c8   : > { %3879 = vst [vmem:[%s5799_s6 + $0x58] sm:$0xff] %v4434_v48  ;;  %v3381_v62 = vmax.f32 %v3253_v21, 0.0  ;;  %v3254_v51 = vadd.f32 %v5773_v9, %v3114_v27  ;;  %v3115_v43 = vmul.f32 %v5776_v1, %v2824_v54  ;;  %v2477_v19 = vadd.f32 %v2476_v4, %v5588_v24 }
 0x1c9   : > { %v2828_v41 = vadd.f32 %v2827_v20, %v2475_v42  ;;  %v2478_v45 = vpop.f32.mrf.mxu1  ;;  %v2831_v44 = vpop.f32.mrf.mxu0 }
 0x1ca   : > { %v4435_v56 = vpack.c.bf16 %v3381_v62, %v3380_v53  ;;  %v3255_v32 = vadd.f32 %v5781_v17, %v3115_v43  ;;  %v2830_v12 = vadd.f32 %v2829_v10, %v2477_v19  ;;  %v2479_v16 = vadd.f32 %v2478_v45, %v5592_v49 }
 0x1cb   : > { %v3116_v14 = vmul.f32 %v5771_v29, %v2828_v41  ;;  %v2480_v23 = vpop.f32.mrf.mxu1  ;;  %v2833_v47 = vpop.f32.mrf.mxu0  ;;  %v3382_v22 = vmax.f32 %v3254_v51, 0.0 }
 0x1cc   : > { %3880 = vst [vmem:[%s5799_s6 + $0x60] sm:$0xff] %v4435_v56  ;;  %v3383_v26 = vmax.f32 %v3255_v32, 0.0  ;;  %v3117_v6 = vmul.f32 %v5776_v1, %v2830_v12  ;;  %v2481_v24 = vadd.f32 %v2480_v23, %v5600_v50  ;;  %v2832_v58 = vadd.f32 %v2831_v44, %v2479_v16 }
 0x1cd   : > { %v3256_v7 = vadd.f32 %v5773_v9, %v3116_v14  ;;  %v2484_v63 = vpop.f32.mrf.mxu1  ;;  %v2837_v46 = vpop.f32.mrf.mxu0 }
 0x1ce   : > { %v4436_v28 = vpack.c.bf16 %v3383_v26, %v3382_v22  ;;  %v3257_v0 = vadd.f32 %v5781_v17, %v3117_v6  ;;  %v2834_v55 = vadd.f32 %v2833_v47, %v2481_v24  ;;  %v2485_v49 = vadd.f32 %v2484_v63, %v5604_v60 }
 0x1cf   : > { %v3384_v34 = vmax.f32 %v3256_v7, 0.0  ;;  %v3118_v31 = vmul.f32 %v5771_v29, %v2832_v58  ;;  %v2486_v36 = vpop.f32.mrf.mxu1  ;;  %v2839_v18 = vpop.f32.mrf.mxu0 }
 0x1d0   : > { %3881 = vst [vmem:[%s5799_s6 + $0x68] sm:$0xff] %v4436_v28  ;;  %v3385_v57 = vmax.f32 %v3257_v0, 0.0  ;;  %v3119_v50 = vmul.f32 %v5776_v1, %v2834_v55  ;;  %v2838_v52 = vadd.f32 %v2837_v46, %v2485_v49  ;;  %v2487_v2 = vadd.f32 %v2486_v36, %v5608_v39 }
 0x1d1   : > { %v3258_v35 = vadd.f32 %v5773_v9, %v3118_v31  ;;  %v2488_v40 = vpop.f32.mrf.mxu1  ;;  %v2841_v38 = vpop.f32.mrf.mxu0 }
 0x1d2   : > { %v4437_v25 = vpack.c.bf16 %v3385_v57, %v3384_v34  ;;  %v3259_v60 = vadd.f32 %v5781_v17, %v3119_v50  ;;  %v3120_v30 = vmul.f32 %v5771_v29, %v2838_v52  ;;  %v2840_v33 = vadd.f32 %v2839_v18, %v2487_v2 }
 0x1d3   : > { %v3386_v11 = vmax.f32 %v3258_v35, 0.0  ;;  %v2489_v8 = vadd.f32 %v2488_v40, %v5612_v15  ;;  %v2490_v20 = vpop.f32.mrf.mxu1  ;;  %v2843_v48 = vpop.f32.mrf.mxu0  ;;  %v6359_v35 = vld [vmem:[#allocation43_spill] sm:$0xff] }
 0x1d4   : > { %3882 = vst [vmem:[%s5799_s6 + $0x70] sm:$0xff] %v4437_v25  ;;  %v3387_v21 = vmax.f32 %v3259_v60, 0.0  ;;  %v3260_v39 = vadd.f32 %v5773_v9, %v3120_v30  ;;  %v3121_v27 = vmul.f32 %v5776_v1, %v2840_v33  ;;  %v2491_v54 = vadd.f32 %v2490_v20, %v5620_v37 }
 0x1d5   : > { %v2842_v53 = vadd.f32 %v2841_v38, %v2489_v8  ;;  %v2494_v42 = vpop.f32.mrf.mxu1  ;;  %v2847_v4 = vpop.f32.mrf.mxu0  ;;  %v6360_v8 = vld [vmem:[#allocation45_spill] sm:$0xff] }
 0x1d6   : > { %v4438_v10 = vpack.c.bf16 %v3387_v21, %v3386_v11  ;;  %v3261_v62 = vadd.f32 %v5781_v17, %v3121_v27  ;;  %v2844_v51 = vadd.f32 %v2843_v48, %v2491_v54  ;;  %v2495_v43 = vadd.f32 %v2494_v42, %v5624_v13 }
 0x1d7   : > { %v3122_v15 = vmul.f32 %v5771_v29, %v2842_v53  ;;  %v2496_v19 = vpop.f32.mrf.mxu1  ;;  %v2849_v41 = vpop.f32.mrf.mxu0  ;;  %v3388_v45 = vmax.f32 %v3260_v39, 0.0  ;;  %v6361_v53 = vld [vmem:[#allocation47_spill] sm:$0xff] }
 0x1d8   : > { %3883 = vst [vmem:[%s5799_s6 + $0x78] sm:$0xff] %v4438_v10  ;;  %v3389_v44 = vmax.f32 %v3261_v62, 0.0  ;;  %v3123_v56 = vmul.f32 %v5776_v1, %v2844_v51  ;;  %v2497_v37 = vadd.f32 %v2496_v19, %v5628_v5  ;;  %v2848_v12 = vadd.f32 %v2847_v4, %v2495_v43 }
 0x1d9   : > { %v3262_v32 = vadd.f32 %v5773_v9, %v3122_v15  ;;  %v2498_v14 = vpop.f32.mrf.mxu1  ;;  %v2851_v16 = vpop.f32.mrf.mxu0 }
 0x1da   : > { %v4439_v23 = vpack.c.bf16 %v3389_v44, %v3388_v45  ;;  %v3263_v47 = vadd.f32 %v5781_v17, %v3123_v56  ;;  %v2850_v22 = vadd.f32 %v2849_v41, %v2497_v37  ;;  %v2499_v13 = vadd.f32 %v2498_v14, %v5632_v61  ;;  %v6362_v41 = vld [vmem:[#allocation49_spill] sm:$0xff] }
 0x1db   : > { %v3390_v26 = vmax.f32 %v3262_v32, 0.0  ;;  %v3124_v6 = vmul.f32 %v5771_v29, %v2848_v12  ;;  %v2500_v24 = vpop.f32.mrf.mxu1  ;;  %v2853_v7 = vpop.f32.mrf.mxu0 }
 0x1dc   : > { %3884 = vst [vmem:[%s5799_s6 + $0x80] sm:$0xff] %v4439_v23  ;;  %v3391_v58 = vmax.f32 %v3263_v47, 0.0  ;;  %v3125_v5 = vmul.f32 %v5776_v1, %v2850_v22  ;;  %v2852_v63 = vadd.f32 %v2851_v16, %v2499_v13  ;;  %v2501_v46 = vadd.f32 %v2500_v24, %v5640_v3  ;;  %v6363_v23 = vld [vmem:[#allocation51_spill] sm:$0xff] }
 0x1dd   : > { %v3264_v28 = vadd.f32 %v5773_v9, %v3124_v6  ;;  %v2504_v0 = vpop.f32.mrf.mxu1  ;;  %v2857_v55 = vpop.f32.mrf.mxu0 }
 0x1de   : > { %v4440_v49 = vpack.c.bf16 %v3391_v58, %v3390_v26  ;;  %v3265_v61 = vadd.f32 %v5781_v17, %v3125_v5  ;;  %v3126_v34 = vmul.f32 %v5771_v29, %v2852_v63  ;;  %v2854_v31 = vadd.f32 %v2853_v7, %v2501_v46  ;;  %v6364_v63 = vld [vmem:[#allocation53_spill] sm:$0xff] }
 0x1df   : > { %v3392_v36 = vmax.f32 %v3264_v28, 0.0  ;;  %v2505_v18 = vadd.f32 %v2504_v0, %v5644_v59  ;;  %v2506_v57 = vpop.f32.mrf.mxu1  ;;  %v2859_v50 = vpop.f32.mrf.mxu0 }
 0x1e0   : > { %3885 = vst [vmem:[%s5799_s6 + $0x88] sm:$0xff] %v4440_v49  ;;  %v3393_v52 = vmax.f32 %v3265_v61, 0.0  ;;  %v3266_v3 = vadd.f32 %v5773_v9, %v3126_v34  ;;  %v3127_v2 = vmul.f32 %v5776_v1, %v2854_v31  ;;  %v2507_v40 = vadd.f32 %v2506_v57, %v6359_v35  ;;  %v6365_v34 = vld [vmem:[#allocation55_spill] sm:$0xff]  ;;  %v6366_v35 = vld [vmem:[#allocation57_spill] sm:$0xff] }
 0x1e1   : > { %v2858_v38 = vadd.f32 %v2857_v55, %v2505_v18  ;;  %v2508_v25 = vpop.f32.mrf.mxu1  ;;  %v2861_v60 = vpop.f32.mrf.mxu0 }
 0x1e2   : > { %v4441_v30 = vpack.c.bf16 %v3393_v52, %v3392_v36  ;;  %v3267_v33 = vadd.f32 %v5781_v17, %v3127_v2  ;;  %v2860_v11 = vadd.f32 %v2859_v50, %v2507_v40  ;;  %v2509_v20 = vadd.f32 %v2508_v25, %v6360_v8 }
 0x1e3   : > { %v3128_v59 = vmul.f32 %v5771_v29, %v2858_v38  ;;  %v2510_v48 = vpop.f32.mrf.mxu1  ;;  %v2863_v21 = vpop.f32.mrf.mxu0  ;;  %v3394_v39 = vmax.f32 %v3266_v3, 0.0 }
 0x1e4   : > { %3886 = vst [vmem:[%s5799_s6 + $0x90] sm:$0xff] %v4441_v30  ;;  %v3395_v27 = vmax.f32 %v3267_v33, 0.0  ;;  %v3129_v54 = vmul.f32 %v5776_v1, %v2860_v11  ;;  %v2511_v42 = vadd.f32 %v2510_v48, %v6361_v53  ;;  %v2862_v10 = vadd.f32 %v2861_v60, %v2509_v20  ;;  %v6367_v11 = vld [vmem:[#allocation59_spill] sm:$0xff]  ;;  %v6368_v53 = vld [vmem:[#allocation61_spill] sm:$0xff] }
 0x1e5   : > { %v3268_v4 = vadd.f32 %v5773_v9, %v3128_v59  ;;  %v2514_v62 = vpop.f32.mrf.mxu1  ;;  %v2867_v51 = vpop.f32.mrf.mxu0 }
 0x1e6   : > { %v4442_v15 = vpack.c.bf16 %v3395_v27, %v3394_v39  ;;  %v3269_v43 = vadd.f32 %v5781_v17, %v3129_v54  ;;  %v2864_v19 = vadd.f32 %v2863_v21, %v2511_v42  ;;  %v2515_v45 = vadd.f32 %v2514_v62, %v6362_v41  ;;  %v6369_v41 = vld [vmem:[#allocation63_spill] sm:$0xff] }
 0x1e7   : > { %v3396_v44 = vmax.f32 %v3268_v4, 0.0  ;;  %v3130_v56 = vmul.f32 %v5771_v29, %v2862_v10  ;;  %v2516_v37 = vpop.f32.mrf.mxu1  ;;  %v2869_v32 = vpop.f32.mrf.mxu0 }
 0x1e8   : > { %3887 = vst [vmem:[%s5799_s6 + $0x98] sm:$0xff] %v4442_v15  ;;  %v3397_v12 = vmax.f32 %v3269_v43, 0.0  ;;  %v3131_v14 = vmul.f32 %v5776_v1, %v2864_v19  ;;  %v2868_v16 = vadd.f32 %v2867_v51, %v2515_v45  ;;  %v2517_v47 = vadd.f32 %v2516_v37, %v6363_v23 }
 0x1e9   : > { %v3270_v22 = vadd.f32 %v5773_v9, %v3130_v56  ;;  %v2518_v13 = vpop.f32.mrf.mxu1  ;;  %v2871_v26 = vpop.f32.mrf.mxu0 }
 0x1ea   : > { %v4443_v6 = vpack.c.bf16 %v3397_v12, %v3396_v44  ;;  %v3271_v24 = vadd.f32 %v5781_v17, %v3131_v14  ;;  %v3132_v7 = vmul.f32 %v5771_v29, %v2868_v16  ;;  %v2870_v58 = vadd.f32 %v2869_v32, %v2517_v47  ;;  %v6370_v47 = vld [vmem:[#allocation65_spill] sm:$0xff] }
 0x1eb   : > { %v3398_v5 = vmax.f32 %v3270_v22, 0.0  ;;  %v2519_v46 = vadd.f32 %v2518_v13, %v6364_v63  ;;  %v2520_v28 = vpop.f32.mrf.mxu1  ;;  %v2873_v0 = vpop.f32.mrf.mxu0 }
 0x1ec   : > { %3888 = vst [vmem:[%s5799_s6 + $0xa0] sm:$0xff] %v4443_v6  ;;  %v3399_v55 = vmax.f32 %v3271_v24, 0.0  ;;  %v3272_v49 = vadd.f32 %v5773_v9, %v3132_v7  ;;  %v3133_v61 = vmul.f32 %v5776_v1, %v2870_v58  ;;  %v2521_v31 = vadd.f32 %v2520_v28, %v6365_v34  ;;  %v6371_v58 = vld [vmem:[#allocation67_spill] sm:$0xff]  ;;  %v6372_v34 = vld [vmem:[#allocation69_spill] sm:$0xff] }
 0x1ed   : > { %v2872_v36 = vadd.f32 %v2871_v26, %v2519_v46  ;;  %v2524_v18 = vpop.f32.mrf.mxu1  ;;  %v2877_v57 = vpop.f32.mrf.mxu0 }
 0x1ee   : > { %v4444_v50 = vpack.c.bf16 %v3399_v55, %v3398_v5  ;;  %v3273_v52 = vadd.f32 %v5781_v17, %v3133_v61  ;;  %v2874_v3 = vadd.f32 %v2873_v0, %v2521_v31  ;;  %v2525_v40 = vadd.f32 %v2524_v18, %v6366_v35 }
 0x1ef   : > { %v3134_v2 = vmul.f32 %v5771_v29, %v2872_v36  ;;  %v2526_v38 = vpop.f32.mrf.mxu1  ;;  %v2879_v25 = vpop.f32.mrf.mxu0  ;;  %v3400_v60 = vmax.f32 %v3272_v49, 0.0 }
 0x1f0   : > { %3889 = vst [vmem:[%s5799_s6 + $0xa8] sm:$0xff] %v4444_v50  ;;  %v3401_v30 = vmax.f32 %v3273_v52, 0.0  ;;  %v3135_v33 = vmul.f32 %v5776_v1, %v2874_v3  ;;  %v2527_v59 = vadd.f32 %v2526_v38, %v6367_v11  ;;  %v2878_v20 = vadd.f32 %v2877_v57, %v2525_v40  ;;  %v6373_v3 = vld [vmem:[#allocation71_spill] sm:$0xff]  ;;  %v6374_v11 = vld [vmem:[#allocation73_spill] sm:$0xff] }
 0x1f1   : > { %v3274_v8 = vadd.f32 %v5773_v9, %v3134_v2  ;;  %v2528_v48 = vpop.f32.mrf.mxu1  ;;  %v2881_v21 = vpop.f32.mrf.mxu0 }
 0x1f2   : > { %v4445_v39 = vpack.c.bf16 %v3401_v30, %v3400_v60  ;;  %v3275_v27 = vadd.f32 %v5781_v17, %v3135_v33  ;;  %v2880_v54 = vadd.f32 %v2879_v25, %v2527_v59  ;;  %v2529_v42 = vadd.f32 %v2528_v48, %v6368_v53  ;;  %v6375_v53 = vld [vmem:[#allocation75_spill] sm:$0xff] }
 0x1f3   : > { %v3402_v4 = vmax.f32 %v3274_v8, 0.0  ;;  %v3136_v10 = vmul.f32 %v5771_v29, %v2878_v20  ;;  %v2530_v62 = vpop.f32.mrf.mxu1  ;;  %v2883_v51 = vpop.f32.mrf.mxu0 }
 0x1f4   : > { %3890 = vst [vmem:[%s5799_s6 + $0xb0] sm:$0xff] %v4445_v39  ;;  %v3403_v15 = vmax.f32 %v3275_v27, 0.0  ;;  %v3137_v43 = vmul.f32 %v5776_v1, %v2880_v54  ;;  %v2882_v19 = vadd.f32 %v2881_v21, %v2529_v42  ;;  %v2531_v45 = vadd.f32 %v2530_v62, %v6369_v41 }
 0x1f5   : > { %v3276_v44 = vadd.f32 %v5773_v9, %v3136_v10  ;;  %v2534_v56 = vpop.f32.mrf.mxu1  ;;  %v2887_v37 = vpop.f32.mrf.mxu0 }
 0x1f6   : > { %v4446_v32 = vpack.c.bf16 %v3403_v15, %v3402_v4  ;;  %v3277_v12 = vadd.f32 %v5781_v17, %v3137_v43  ;;  %v3138_v14 = vmul.f32 %v5771_v29, %v2882_v19  ;;  %v2884_v16 = vadd.f32 %v2883_v51, %v2531_v45  ;;  %v6376_v45 = vld [vmem:[#allocation77_spill] sm:$0xff] }
 0x1f7   : > { %v3404_v23 = vmax.f32 %v3276_v44, 0.0  ;;  %v2535_v22 = vadd.f32 %v2534_v56, %v6370_v47  ;;  %v2536_v13 = vpop.f32.mrf.mxu1  ;;  %v2889_v26 = vpop.f32.mrf.mxu0 }
 0x1f8   : > { %3891 = vst [vmem:[%s5799_s6 + $0xb8] sm:$0xff] %v4446_v32  ;;  %v3405_v6 = vmax.f32 %v3277_v12, 0.0  ;;  %v3278_v24 = vadd.f32 %v5773_v9, %v3138_v14  ;;  %v3139_v7 = vmul.f32 %v5776_v1, %v2884_v16  ;;  %v2537_v5 = vadd.f32 %v2536_v13, %v6371_v58  ;;  %v6377_v16 = vld [vmem:[#allocation79_spill] sm:$0xff]  ;;  %v6378_v58 = vld [vmem:[#allocation81_spill] sm:$0xff] }
 0x1f9   : > { %v2888_v63 = vadd.f32 %v2887_v37, %v2535_v22  ;;  %v2538_v46 = vpop.f32.mrf.mxu1  ;;  %v2891_v28 = vpop.f32.mrf.mxu0 }
 0x1fa   : > { %v4447_v0 = vpack.c.bf16 %v3405_v6, %v3404_v23  ;;  %v3279_v55 = vadd.f32 %v5781_v17, %v3139_v7  ;;  %v2890_v49 = vadd.f32 %v2889_v26, %v2537_v5  ;;  %v2539_v31 = vadd.f32 %v2538_v46, %v6372_v34 }
 0x1fb   : > { %v3140_v61 = vmul.f32 %v5771_v29, %v2888_v63  ;;  %v2540_v36 = vpop.f32.mrf.mxu1  ;;  %v2893_v18 = vpop.f32.mrf.mxu0  ;;  %v3406_v57 = vmax.f32 %v3278_v24, 0.0 }
 0x1fc   : > { %3892 = vst [vmem:[%s5799_s6 + $0xc0] sm:$0xff] %v4447_v0  ;;  %v3407_v50 = vmax.f32 %v3279_v55, 0.0  ;;  %v3141_v52 = vmul.f32 %v5776_v1, %v2890_v49  ;;  %v2541_v2 = vadd.f32 %v2540_v36, %v6373_v3  ;;  %v2892_v40 = vadd.f32 %v2891_v28, %v2539_v31  ;;  %v6379_v49 = vld [vmem:[#allocation83_spill] sm:$0xff]  ;;  %v6380_v3 = vld [vmem:[#allocation85_spill] sm:$0xff] }
 0x1fd   : > { %v3280_v35 = vadd.f32 %v5773_v9, %v3140_v61  ;;  %v2544_v38 = vpop.f32.mrf.mxu1  ;;  %v2897_v25 = vpop.f32.mrf.mxu0 }
 0x1fe   : > { %v4448_v60 = vpack.c.bf16 %v3407_v50, %v3406_v57  ;;  %v3281_v30 = vadd.f32 %v5781_v17, %v3141_v52  ;;  %v2894_v33 = vadd.f32 %v2893_v18, %v2541_v2  ;;  %v2545_v59 = vadd.f32 %v2544_v38, %v6374_v11  ;;  %v6381_v11 = vld [vmem:[#allocation87_spill] sm:$0xff] }
 0x1ff   : > { %v3408_v8 = vmax.f32 %v3280_v35, 0.0  ;;  %v3142_v20 = vmul.f32 %v5771_v29, %v2892_v40  ;;  %v2546_v48 = vpop.f32.mrf.mxu1  ;;  %v2899_v21 = vpop.f32.mrf.mxu0 }
 0x200   : > { %3893 = vst [vmem:[%s5799_s6 + $0xc8] sm:$0xff] %v4448_v60  ;;  %v3409_v39 = vmax.f32 %v3281_v30, 0.0  ;;  %v3143_v27 = vmul.f32 %v5776_v1, %v2894_v33  ;;  %v2898_v54 = vadd.f32 %v2897_v25, %v2545_v59  ;;  %v2547_v42 = vadd.f32 %v2546_v48, %v6375_v53 }
 0x201   : > { %v3282_v4 = vadd.f32 %v5773_v9, %v3142_v20  ;;  %v2548_v10 = vpop.f32.mrf.mxu1  ;;  %v2901_v62 = vpop.f32.mrf.mxu0 }
 0x202   : > { %v4449_v51 = vpack.c.bf16 %v3409_v39, %v3408_v8  ;;  %v3283_v15 = vadd.f32 %v5781_v17, %v3143_v27  ;;  %v3144_v43 = vmul.f32 %v5771_v29, %v2898_v54  ;;  %v2900_v19 = vadd.f32 %v2899_v21, %v2547_v42  ;;  %v6382_v42 = vld [vmem:[#allocation2_spill] sm:$0xff] }
 0x203   : > { %v3410_v41 = vmax.f32 %v3282_v4, 0.0  ;;  %v2549_v44 = vadd.f32 %v2548_v10, %v6376_v45  ;;  %v2550_v56 = vpop.f32.mrf.mxu1  ;;  %v2903_v37 = vpop.f32.mrf.mxu0 }
 0x204   : > { %3894 = vst [vmem:[%s5799_s6 + $0xd0] sm:$0xff] %v4449_v51  ;;  %v3411_v32 = vmax.f32 %v3283_v15, 0.0  ;;  %v3284_v12 = vadd.f32 %v5773_v9, %v3144_v43  ;;  %v3145_v14 = vmul.f32 %v5776_v1, %v2900_v19  ;;  %v2551_v23 = vadd.f32 %v2550_v56, %v6377_v16  ;;  %v6383_v19 = vld [vmem:[#allocation3_spill] sm:$0xff]  ;;  %v6384_v16 = vld [vmem:[#allocation4_spill] sm:$0xff] }
 0x205   : > { %v2902_v47 = vadd.f32 %v2901_v62, %v2549_v44  ;;  %v2554_v22 = vpop.f32.mrf.mxu1  ;;  %v2907_v13 = vpop.f32.mrf.mxu0 }
 0x206   : > { %v4450_v26 = vpack.c.bf16 %v3411_v32, %v3410_v41  ;;  %v3285_v6 = vadd.f32 %v5781_v17, %v3145_v14  ;;  %v2904_v24 = vadd.f32 %v2903_v37, %v2551_v23  ;;  %v2555_v5 = vadd.f32 %v2554_v22, %v6378_v58 }
 0x207   : > { %v3146_v7 = vmul.f32 %v5771_v29, %v2902_v47  ;;  %v2556_v63 = vpop.f32.mrf.mxu1  ;;  %v2909_v46 = vpop.f32.mrf.mxu0  ;;  %v3412_v28 = vmax.f32 %v3284_v12, 0.0 }
 0x208   : > { %3895 = vst [vmem:[%s5799_s6 + $0xd8] sm:$0xff] %v4450_v26  ;;  %v3413_v0 = vmax.f32 %v3285_v6, 0.0  ;;  %v3147_v55 = vmul.f32 %v5776_v1, %v2904_v24  ;;  %v2557_v61 = vadd.f32 %v2556_v63, %v6379_v49  ;;  %v2908_v31 = vadd.f32 %v2907_v13, %v2555_v5  ;;  %v6385_v24 = vld [vmem:[#allocation5_spill] sm:$0xff]  ;;  %v6386_v49 = vld [vmem:[#allocation6_spill] sm:$0xff] }
 0x209   : > { %v3286_v34 = vadd.f32 %v5773_v9, %v3146_v7  ;;  %v2558_v36 = vpop.f32.mrf.mxu1  ;;  %v2911_v18 = vpop.f32.mrf.mxu0 }
 0x20a   : > { %v4451_v57 = vpack.c.bf16 %v3413_v0, %v3412_v28  ;;  %v3287_v50 = vadd.f32 %v5781_v17, %v3147_v55  ;;  %v2910_v52 = vadd.f32 %v2909_v46, %v2557_v61  ;;  %v2559_v2 = vadd.f32 %v2558_v36, %v6380_v3  ;;  %v6387_v3 = vld [vmem:[#allocation7_spill] sm:$0xff] }
 0x20b   : > { %v3414_v35 = vmax.f32 %v3286_v34, 0.0  ;;  %v3148_v40 = vmul.f32 %v5771_v29, %v2908_v31  ;;  %v2560_v38 = vpop.f32.mrf.mxu1  ;;  %v2913_v25 = vpop.f32.mrf.mxu0 }
 0x20c   : > { %3896 = vst [vmem:[%s5799_s6 + $0xe0] sm:$0xff] %v4451_v57  ;;  %v3415_v60 = vmax.f32 %v3287_v50, 0.0  ;;  %v3149_v30 = vmul.f32 %v5776_v1, %v2910_v52  ;;  %v2912_v33 = vadd.f32 %v2911_v18, %v2559_v2  ;;  %v2561_v59 = vadd.f32 %v2560_v38, %v6381_v11 }
 0x20d   : > { %v3288_v8 = vadd.f32 %v5773_v9, %v3148_v40  ;;  %v2564_v20 = vpop.f32.mrf.mxu1  ;;  %v2917_v48 = vpop.f32.mrf.mxu0 }
 0x20e   : > { %v4452_v21 = vpack.c.bf16 %v3415_v60, %v3414_v35  ;;  %v3289_v39 = vadd.f32 %v5781_v17, %v3149_v30  ;;  %v3150_v27 = vmul.f32 %v5771_v29, %v2912_v33  ;;  %v2914_v54 = vadd.f32 %v2913_v25, %v2561_v59  ;;  %v6388_v59 = vld [vmem:[#allocation8_spill] sm:$0xff] }
 0x20f   : > { %v3416_v53 = vmax.f32 %v3288_v8, 0.0  ;;  %v2565_v4 = vadd.f32 %v2564_v20, %v6382_v42  ;;  %v2566_v10 = vpop.f32.mrf.mxu1  ;;  %v2919_v62 = vpop.f32.mrf.mxu0 }
 0x210   : > { %3897 = vst [vmem:[%s5799_s6 + $0xe8] sm:$0xff] %v4452_v21  ;;  %v3417_v51 = vmax.f32 %v3289_v39, 0.0  ;;  %v3290_v15 = vadd.f32 %v5773_v9, %v3150_v27  ;;  %v3151_v43 = vmul.f32 %v5776_v1, %v2914_v54  ;;  %v2567_v41 = vadd.f32 %v2566_v10, %v6383_v19  ;;  %v6389_v54 = vld [vmem:[#allocation9_spill] sm:$0xff]  ;;  %v6390_v19 = vld [vmem:[#allocation10_spill] sm:$0xff] }
 0x211   : > { %v2918_v45 = vadd.f32 %v2917_v48, %v2565_v4  ;;  %v2568_v44 = vpop.f32.mrf.mxu1  ;;  %v2921_v56 = vpop.f32.mrf.mxu0 }
 0x212   : > { %v4453_v37 = vpack.c.bf16 %v3417_v51, %v3416_v53  ;;  %v3291_v32 = vadd.f32 %v5781_v17, %v3151_v43  ;;  %v2920_v12 = vadd.f32 %v2919_v62, %v2567_v41  ;;  %v2569_v23 = vadd.f32 %v2568_v44, %v6384_v16 }
 0x213   : > { %v3152_v14 = vmul.f32 %v5771_v29, %v2918_v45  ;;  %v2570_v47 = vpop.f32.mrf.mxu1  ;;  %v2923_v22 = vpop.f32.mrf.mxu0  ;;  %v3418_v13 = vmax.f32 %v3290_v15, 0.0 }
 0x214   : > { %3898 = vst [vmem:[%s5799_s6 + $0xf0] sm:$0xff] %v4453_v37  ;;  %v3419_v26 = vmax.f32 %v3291_v32, 0.0  ;;  %v3153_v6 = vmul.f32 %v5776_v1, %v2920_v12  ;;  %v2571_v7 = vadd.f32 %v2570_v47, %v6385_v24  ;;  %v2922_v5 = vadd.f32 %v2921_v56, %v2569_v23  ;;  %v6391_v12 = vld [vmem:[#allocation11_spill] sm:$0xff]  ;;  %v6392_v24 = vld [vmem:[#allocation12_spill] sm:$0xff] }
 0x215   : > { %v3292_v58 = vadd.f32 %v5773_v9, %v3152_v14  ;;  %v2574_v63 = vpop.f32.mrf.mxu1  ;;  %v2927_v46 = vpop.f32.mrf.mxu0 }
 0x216   : > { %v4454_v28 = vpack.c.bf16 %v3419_v26, %v3418_v13  ;;  %v3293_v0 = vadd.f32 %v5781_v17, %v3153_v6  ;;  %v2924_v55 = vadd.f32 %v2923_v22, %v2571_v7  ;;  %v2575_v61 = vadd.f32 %v2574_v63, %v6386_v49  ;;  %v6393_v49 = vld [vmem:[#allocation13_spill] sm:$0xff] }
 0x217   : > { %v3420_v34 = vmax.f32 %v3292_v58, 0.0  ;;  %v3154_v31 = vmul.f32 %v5771_v29, %v2922_v5  ;;  %v2576_v36 = vpop.f32.mrf.mxu1  ;;  %v2929_v18 = vpop.f32.mrf.mxu0 }
 0x218   : > { %3899 = vst [vmem:[%s5799_s6 + $0xf8] sm:$0xff] %v4454_v28  ;;  %v3421_v57 = vmax.f32 %v3293_v0, 0.0  ;;  %v3155_v50 = vmul.f32 %v5776_v1, %v2924_v55  ;;  %v2928_v52 = vadd.f32 %v2927_v46, %v2575_v61  ;;  %v2577_v2 = vadd.f32 %v2576_v36, %v6387_v3 }
 0x219   : > { %v3294_v35 = vadd.f32 %v5773_v9, %v3154_v31  ;;  %v2578_v40 = vpop.f32.mrf.mxu1  ;;  %v2931_v38 = vpop.f32.mrf.mxu0 }
 0x21a   : > { %v4455_v25 = vpack.c.bf16 %v3421_v57, %v3420_v34  ;;  %v3295_v60 = vadd.f32 %v5781_v17, %v3155_v50  ;;  %v3156_v30 = vmul.f32 %v5771_v29, %v2928_v52  ;;  %v2930_v33 = vadd.f32 %v2929_v18, %v2577_v2  ;;  %v6394_v2 = vld [vmem:[#allocation14_spill] sm:$0xff] }
 0x21b   : > { %v3422_v11 = vmax.f32 %v3294_v35, 0.0  ;;  %v2579_v8 = vadd.f32 %v2578_v40, %v6388_v59  ;;  %v2580_v20 = vpop.f32.mrf.mxu1  ;;  %v2933_v48 = vpop.f32.mrf.mxu0 }
 0x21c   : > { %3900 = vst [vmem:[%s5799_s6 + $0x100] sm:$0xff] %v4455_v25  ;;  %v3423_v21 = vmax.f32 %v3295_v60, 0.0  ;;  %v3296_v39 = vadd.f32 %v5773_v9, %v3156_v30  ;;  %v3157_v27 = vmul.f32 %v5776_v1, %v2930_v33  ;;  %v2581_v53 = vadd.f32 %v2580_v20, %v6389_v54  ;;  %v6395_v33 = vld [vmem:[#allocation15_spill] sm:$0xff]  ;;  %v6396_v54 = vld [vmem:[#allocation16_spill] sm:$0xff] }
 0x21d   : > { %v2932_v42 = vadd.f32 %v2931_v38, %v2579_v8  ;;  %v2584_v4 = vpop.f32.mrf.mxu1  ;;  %v2937_v10 = vpop.f32.mrf.mxu0 }
 0x21e   : > { %v4456_v62 = vpack.c.bf16 %v3423_v21, %v3422_v11  ;;  %v3297_v51 = vadd.f32 %v5781_v17, %v3157_v27  ;;  %v2934_v15 = vadd.f32 %v2933_v48, %v2581_v53  ;;  %v2585_v41 = vadd.f32 %v2584_v4, %v6390_v19 }
 0x21f   : > { %v3158_v43 = vmul.f32 %v5771_v29, %v2932_v42  ;;  %v2586_v45 = vpop.f32.mrf.mxu1  ;;  %v2939_v44 = vpop.f32.mrf.mxu0  ;;  %v3424_v56 = vmax.f32 %v3296_v39, 0.0 }
 0x220   : > { %3901 = vst [vmem:[%s5799_s6 + $0x108] sm:$0xff] %v4456_v62  ;;  %v3425_v37 = vmax.f32 %v3297_v51, 0.0  ;;  %v3159_v32 = vmul.f32 %v5776_v1, %v2934_v15  ;;  %v2587_v14 = vadd.f32 %v2586_v45, %v6391_v12  ;;  %v2938_v23 = vadd.f32 %v2937_v10, %v2585_v41  ;;  %v6397_v15 = vld [vmem:[#allocation17_spill] sm:$0xff]  ;;  %v6398_v12 = vld [vmem:[#allocation18_spill] sm:$0xff] }
 0x221   : > { %v3298_v16 = vadd.f32 %v5773_v9, %v3158_v43  ;;  %v2588_v47 = vpop.f32.mrf.mxu1  ;;  %v2941_v22 = vpop.f32.mrf.mxu0 }
 0x222   : > { %v4457_v13 = vpack.c.bf16 %v3425_v37, %v3424_v56  ;;  %v3299_v26 = vadd.f32 %v5781_v17, %v3159_v32  ;;  %v2940_v6 = vadd.f32 %v2939_v44, %v2587_v14  ;;  %v2589_v7 = vadd.f32 %v2588_v47, %v6392_v24  ;;  %v6399_v24 = vld [vmem:[#allocation19_spill] sm:$0xff] }
 0x223   : > { %v3426_v58 = vmax.f32 %v3298_v16, 0.0  ;;  %v3160_v5 = vmul.f32 %v5771_v29, %v2938_v23  ;;  %v2590_v63 = vpop.f32.mrf.mxu1  ;;  %v2943_v46 = vpop.f32.mrf.mxu0 }
 0x224   : > { %3902 = vst [vmem:[%s5799_s6 + $0x110] sm:$0xff] %v4457_v13  ;;  %v3427_v28 = vmax.f32 %v3299_v26, 0.0  ;;  %v3161_v0 = vmul.f32 %v5776_v1, %v2940_v6  ;;  %v2942_v55 = vadd.f32 %v2941_v22, %v2589_v7  ;;  %v2591_v61 = vadd.f32 %v2590_v63, %v6393_v49 }
 0x225   : > { %v3300_v34 = vadd.f32 %v5773_v9, %v3160_v5  ;;  %v2594_v31 = vpop.f32.mrf.mxu1  ;;  %v2947_v36 = vpop.f32.mrf.mxu0 }
 0x226   : > { %v4458_v18 = vpack.c.bf16 %v3427_v28, %v3426_v58  ;;  %v3301_v57 = vadd.f32 %v5781_v17, %v3161_v0  ;;  %v3162_v50 = vmul.f32 %v5771_v29, %v2942_v55  ;;  %v2944_v52 = vadd.f32 %v2943_v46, %v2591_v61  ;;  %v6400_v61 = vld [vmem:[#allocation20_spill] sm:$0xff] }
 0x227   : > { %v3428_v3 = vmax.f32 %v3300_v34, 0.0  ;;  %v2595_v35 = vadd.f32 %v2594_v31, %v6394_v2  ;;  %v2596_v40 = vpop.f32.mrf.mxu1  ;;  %v2949_v38 = vpop.f32.mrf.mxu0 }
 0x228   : > { %3903 = vst [vmem:[%s5799_s6 + $0x118] sm:$0xff] %v4458_v18  ;;  %v3429_v25 = vmax.f32 %v3301_v57, 0.0  ;;  %v3302_v60 = vadd.f32 %v5773_v9, %v3162_v50  ;;  %v3163_v30 = vmul.f32 %v5776_v1, %v2944_v52  ;;  %v2597_v11 = vadd.f32 %v2596_v40, %v6395_v33  ;;  %v6401_v52 = vld [vmem:[#allocation21_spill] sm:$0xff]  ;;  %v6402_v33 = vld [vmem:[#allocation22_spill] sm:$0xff] }
 0x229   : > { %v2948_v59 = vadd.f32 %v2947_v36, %v2595_v35  ;;  %v2598_v8 = vpop.f32.mrf.mxu1  ;;  %v2951_v20 = vpop.f32.mrf.mxu0 }
 0x22a   : > { %v4459_v48 = vpack.c.bf16 %v3429_v25, %v3428_v3  ;;  %v3303_v21 = vadd.f32 %v5781_v17, %v3163_v30  ;;  %v2950_v39 = vadd.f32 %v2949_v38, %v2597_v11  ;;  %v2599_v53 = vadd.f32 %v2598_v8, %v6396_v54 }
 0x22b   : > { %v3164_v27 = vmul.f32 %v5771_v29, %v2948_v59  ;;  %v2600_v42 = vpop.f32.mrf.mxu1  ;;  %v2953_v4 = vpop.f32.mrf.mxu0  ;;  %v3430_v10 = vmax.f32 %v3302_v60, 0.0 }
 0x22c   : > { %3904 = vst [vmem:[%s5799_s6 + $0x120] sm:$0xff] %v4459_v48  ;;  %v3431_v62 = vmax.f32 %v3303_v21, 0.0  ;;  %v3165_v51 = vmul.f32 %v5776_v1, %v2950_v39  ;;  %v2601_v43 = vadd.f32 %v2600_v42, %v6397_v15  ;;  %v2952_v41 = vadd.f32 %v2951_v20, %v2599_v53  ;;  %v6403_v39 = vld [vmem:[#allocation23_spill] sm:$0xff]  ;;  %v6404_v15 = vld [vmem:[#allocation24_spill] sm:$0xff] }
 0x22d   : > { %v3304_v19 = vadd.f32 %v5773_v9, %v3164_v27  ;;  %v2604_v45 = vpop.f32.mrf.mxu1  ;;  %v2957_v44 = vpop.f32.mrf.mxu0 }
 0x22e   : > { %v4460_v56 = vpack.c.bf16 %v3431_v62, %v3430_v10  ;;  %v3305_v37 = vadd.f32 %v5781_v17, %v3165_v51  ;;  %v2954_v32 = vadd.f32 %v2953_v4, %v2601_v43  ;;  %v2605_v14 = vadd.f32 %v2604_v45, %v6398_v12  ;;  %v6405_v12 = vld [vmem:[#allocation25_spill] sm:$0xff] }
 0x22f   : > { %v3432_v16 = vmax.f32 %v3304_v19, 0.0  ;;  %v3166_v23 = vmul.f32 %v5771_v29, %v2952_v41  ;;  %v2606_v47 = vpop.f32.mrf.mxu1  ;;  %v2959_v22 = vpop.f32.mrf.mxu0 }
 0x230   : > { %3905 = vst [vmem:[%s5799_s6 + $0x128] sm:$0xff] %v4460_v56  ;;  %v3433_v13 = vmax.f32 %v3305_v37, 0.0  ;;  %v3167_v26 = vmul.f32 %v5776_v1, %v2954_v32  ;;  %v2958_v6 = vadd.f32 %v2957_v44, %v2605_v14  ;;  %v2607_v7 = vadd.f32 %v2606_v47, %v6399_v24 }
 0x231   : > { %v3306_v58 = vadd.f32 %v5773_v9, %v3166_v23  ;;  %v2608_v5 = vpop.f32.mrf.mxu1  ;;  %v2961_v63 = vpop.f32.mrf.mxu0 }
 0x232   : > { %v4461_v46 = vpack.c.bf16 %v3433_v13, %v3432_v16  ;;  %v3307_v28 = vadd.f32 %v5781_v17, %v3167_v26  ;;  %v3168_v0 = vmul.f32 %v5771_v29, %v2958_v6  ;;  %v2960_v55 = vadd.f32 %v2959_v22, %v2607_v7  ;;  %v6406_v7 = vld [vmem:[#allocation26_spill] sm:$0xff] }
 0x233   : > { %v3434_v49 = vmax.f32 %v3306_v58, 0.0  ;;  %v2609_v34 = vadd.f32 %v2608_v5, %v6400_v61  ;;  %v2610_v31 = vpop.f32.mrf.mxu1  ;;  %v2963_v36 = vpop.f32.mrf.mxu0 }
 0x234   : > { %3906 = vst [vmem:[%s5799_s6 + $0x130] sm:$0xff] %v4461_v46  ;;  %v3435_v18 = vmax.f32 %v3307_v28, 0.0  ;;  %v3308_v57 = vadd.f32 %v5773_v9, %v3168_v0  ;;  %v3169_v50 = vmul.f32 %v5776_v1, %v2960_v55  ;;  %v2611_v3 = vadd.f32 %v2610_v31, %v6401_v52  ;;  %v6407_v55 = vld [vmem:[#allocation27_spill] sm:$0xff]  ;;  %v6408_v52 = vld [vmem:[#allocation28_spill] sm:$0xff] }
 0x235   : > { %v2962_v2 = vadd.f32 %v2961_v63, %v2609_v34  ;;  %v2614_v35 = vpop.f32.mrf.mxu1  ;;  %v2967_v40 = vpop.f32.mrf.mxu0 }
 0x236   : > { %v4462_v38 = vpack.c.bf16 %v3435_v18, %v3434_v49  ;;  %v3309_v25 = vadd.f32 %v5781_v17, %v3169_v50  ;;  %v2964_v60 = vadd.f32 %v2963_v36, %v2611_v3  ;;  %v2615_v11 = vadd.f32 %v2614_v35, %v6402_v33 }
 0x237   : > { %v3170_v30 = vmul.f32 %v5771_v29, %v2962_v2  ;;  %v2616_v59 = vpop.f32.mrf.mxu1  ;;  %v2969_v8 = vpop.f32.mrf.mxu0  ;;  %v3436_v20 = vmax.f32 %v3308_v57, 0.0 }
 0x238   : > { %3907 = vst [vmem:[%s5799_s6 + $0x138] sm:$0xff] %v4462_v38  ;;  %v3437_v48 = vmax.f32 %v3309_v25, 0.0  ;;  %v3171_v21 = vmul.f32 %v5776_v1, %v2964_v60  ;;  %v2617_v27 = vadd.f32 %v2616_v59, %v6403_v39  ;;  %v2968_v53 = vadd.f32 %v2967_v40, %v2615_v11  ;;  %v6409_v60 = vld [vmem:[#allocation29_spill] sm:$0xff]  ;;  %v6410_v39 = vld [vmem:[#allocation30_spill] sm:$0xff] }
 0x239   : > { %v3310_v54 = vadd.f32 %v5773_v9, %v3170_v30  ;;  %v2618_v42 = vpop.f32.mrf.mxu1  ;;  %v2971_v4 = vpop.f32.mrf.mxu0 }
 0x23a   : > { %v4463_v10 = vpack.c.bf16 %v3437_v48, %v3436_v20  ;;  %v3311_v62 = vadd.f32 %v5781_v17, %v3171_v21  ;;  %v2970_v51 = vadd.f32 %v2969_v8, %v2617_v27  ;;  %v2619_v43 = vadd.f32 %v2618_v42, %v6404_v15  ;;  %v6411_v15 = vld [vmem:[#allocation31_spill] sm:$0xff] }
 0x23b   : > { %v3438_v19 = vmax.f32 %v3310_v54, 0.0  ;;  %v3172_v41 = vmul.f32 %v5771_v29, %v2968_v53  ;;  %v2620_v45 = vpop.f32.mrf.mxu1  ;;  %v2973_v44 = vpop.f32.mrf.mxu0 }
 0x23c   : > { %3908 = vst [vmem:[%s5799_s6 + $0x140] sm:$0xff] %v4463_v10  ;;  %v3439_v56 = vmax.f32 %v3311_v62, 0.0  ;;  %v3173_v37 = vmul.f32 %v5776_v1, %v2970_v51  ;;  %v2972_v32 = vadd.f32 %v2971_v4, %v2619_v43  ;;  %v2621_v14 = vadd.f32 %v2620_v45, %v6405_v12 }
 0x23d   : > { %v3312_v16 = vadd.f32 %v5773_v9, %v3172_v41  ;;  %v2624_v23 = vpop.f32.mrf.mxu1  ;;  %v2977_v47 = vpop.f32.mrf.mxu0 }
 0x23e   : > { %v4464_v22 = vpack.c.bf16 %v3439_v56, %v3438_v19  ;;  %v3313_v13 = vadd.f32 %v5781_v17, %v3173_v37  ;;  %v3174_v26 = vmul.f32 %v5771_v29, %v2972_v32  ;;  %v2974_v6 = vadd.f32 %v2973_v44, %v2621_v14  ;;  %v6412_v14 = vld [vmem:[#allocation32_spill] sm:$0xff] }
 0x23f   : > { %v3440_v24 = vmax.f32 %v3312_v16, 0.0  ;;  %v2625_v58 = vadd.f32 %v2624_v23, %v6406_v7  ;;  %v2626_v5 = vpop.f32.mrf.mxu1  ;;  %v2979_v63 = vpop.f32.mrf.mxu0 }
 0x240   : > { %3909 = vst [vmem:[%s5799_s6 + $0x148] sm:$0xff] %v4464_v22  ;;  %v3441_v46 = vmax.f32 %v3313_v13, 0.0  ;;  %v3314_v28 = vadd.f32 %v5773_v9, %v3174_v26  ;;  %v3175_v0 = vmul.f32 %v5776_v1, %v2974_v6  ;;  %v2627_v49 = vadd.f32 %v2626_v5, %v6407_v55  ;;  %v6413_v6 = vld [vmem:[#allocation33_spill] sm:$0xff]  ;;  %v6414_v55 = vld [vmem:[#allocation34_spill] sm:$0xff] }
 0x241   : > { %v2978_v61 = vadd.f32 %v2977_v47, %v2625_v58  ;;  %v2628_v34 = vpop.f32.mrf.mxu1  ;;  %v2981_v31 = vpop.f32.mrf.mxu0 }
 0x242   : > { %v4465_v36 = vpack.c.bf16 %v3441_v46, %v3440_v24  ;;  %v3315_v18 = vadd.f32 %v5781_v17, %v3175_v0  ;;  %v2980_v57 = vadd.f32 %v2979_v63, %v2627_v49  ;;  %v2629_v3 = vadd.f32 %v2628_v34, %v6408_v52 }
 0x243   : > { %v3176_v50 = vmul.f32 %v5771_v29, %v2978_v61  ;;  %v2630_v2 = vpop.f32.mrf.mxu1  ;;  %v2983_v35 = vpop.f32.mrf.mxu0  ;;  %v3442_v40 = vmax.f32 %v3314_v28, 0.0 }
 0x244   : > { %3910 = vst [vmem:[%s5799_s6 + $0x150] sm:$0xff] %v4465_v36  ;;  %v3443_v38 = vmax.f32 %v3315_v18, 0.0  ;;  %v3177_v25 = vmul.f32 %v5776_v1, %v2980_v57  ;;  %v2631_v30 = vadd.f32 %v2630_v2, %v6409_v60  ;;  %v2982_v11 = vadd.f32 %v2981_v31, %v2629_v3  ;;  %v6415_v57 = vld [vmem:[#allocation35_spill] sm:$0xff]  ;;  %v6416_v60 = vld [vmem:[#allocation36_spill] sm:$0xff] }
 0x245   : > { %v3316_v33 = vadd.f32 %v5773_v9, %v3176_v50  ;;  %v2634_v59 = vpop.f32.mrf.mxu1  ;;  %v2987_v8 = vpop.f32.mrf.mxu0 }
 0x246   : > { %v4466_v20 = vpack.c.bf16 %v3443_v38, %v3442_v40  ;;  %v3317_v48 = vadd.f32 %v5781_v17, %v3177_v25  ;;  %v2984_v21 = vadd.f32 %v2983_v35, %v2631_v30  ;;  %v2635_v27 = vadd.f32 %v2634_v59, %v6410_v39  ;;  %v6417_v39 = vld [vmem:[#allocation37_spill] sm:$0xff] }
 0x247   : > { %v3444_v54 = vmax.f32 %v3316_v33, 0.0  ;;  %v3178_v53 = vmul.f32 %v5771_v29, %v2982_v11  ;;  %v2636_v42 = vpop.f32.mrf.mxu1  ;;  %v2989_v4 = vpop.f32.mrf.mxu0 }
 0x248   : > { %3911 = vst [vmem:[%s5799_s6 + $0x158] sm:$0xff] %v4466_v20  ;;  %v3445_v10 = vmax.f32 %v3317_v48, 0.0  ;;  %v3179_v62 = vmul.f32 %v5776_v1, %v2984_v21  ;;  %v2988_v51 = vadd.f32 %v2987_v8, %v2635_v27  ;;  %v2637_v43 = vadd.f32 %v2636_v42, %v6411_v15 }
 0x249   : > { %v3318_v19 = vadd.f32 %v5773_v9, %v3178_v53  ;;  %v2638_v41 = vpop.f32.mrf.mxu1  ;;  %v2991_v45 = vpop.f32.mrf.mxu0 }
 0x24a   : > { %v4467_v44 = vpack.c.bf16 %v3445_v10, %v3444_v54  ;;  %v3319_v56 = vadd.f32 %v5781_v17, %v3179_v62  ;;  %v3180_v37 = vmul.f32 %v5771_v29, %v2988_v51  ;;  %v2990_v32 = vadd.f32 %v2989_v4, %v2637_v43  ;;  %v6418_v43 = vld [vmem:[#allocation38_spill] sm:$0xff] }
 0x24b   : > { %v3446_v12 = vmax.f32 %v3318_v19, 0.0  ;;  %v2639_v16 = vadd.f32 %v2638_v41, %v6412_v14  ;;  %v2640_v23 = vpop.f32.mrf.mxu1  ;;  %v2993_v47 = vpop.f32.mrf.mxu0 }
 0x24c   : > { %3912 = vst [vmem:[%s5799_s6 + $0x160] sm:$0xff] %v4467_v44  ;;  %v3447_v22 = vmax.f32 %v3319_v56, 0.0  ;;  %v3320_v13 = vadd.f32 %v5773_v9, %v3180_v37  ;;  %v3181_v26 = vmul.f32 %v5776_v1, %v2990_v32  ;;  %v2641_v24 = vadd.f32 %v2640_v23, %v6413_v6  ;;  %v6419_v32 = vld [vmem:[#allocation39_spill] sm:$0xff]  ;;  %v6420_v6 = vld [vmem:[#allocation40_spill] sm:$0xff] }
 0x24d   : > { %v2992_v7 = vadd.f32 %v2991_v45, %v2639_v16  ;;  %v2644_v58 = vpop.f32.mrf.mxu1  ;;  %v2997_v5 = vpop.f32.mrf.mxu0 }
 0x24e   : > { %v4468_v63 = vpack.c.bf16 %v3447_v22, %v3446_v12  ;;  %v3321_v46 = vadd.f32 %v5781_v17, %v3181_v26  ;;  %v2994_v28 = vadd.f32 %v2993_v47, %v2641_v24  ;;  %v2645_v49 = vadd.f32 %v2644_v58, %v6414_v55 }
 0x24f   : > { %v3182_v0 = vmul.f32 %v5771_v29, %v2992_v7  ;;  %v2646_v61 = vpop.f32.mrf.mxu1  ;;  %v2999_v34 = vpop.f32.mrf.mxu0  ;;  %v3448_v31 = vmax.f32 %v3320_v13, 0.0 }
 0x250   : > { %3913 = vst [vmem:[%s5799_s6 + $0x168] sm:$0xff] %v4468_v63  ;;  %v3449_v36 = vmax.f32 %v3321_v46, 0.0  ;;  %v3183_v18 = vmul.f32 %v5776_v1, %v2994_v28  ;;  %v2647_v50 = vadd.f32 %v2646_v61, %v6415_v57  ;;  %v2998_v3 = vadd.f32 %v2997_v5, %v2645_v49  ;;  %v6421_v28 = vld [vmem:[#allocation41_spill] sm:$0xff]  ;;  %v6422_v57 = vld [vmem:[#allocation42_spill] sm:$0xff] }
 0x251   : > { %v3322_v52 = vadd.f32 %v5773_v9, %v3182_v0  ;;  %v2648_v2 = vpop.f32.mrf.mxu1  ;;  %v3001_v35 = vpop.f32.mrf.mxu0 }
 0x252   : > { %v4469_v40 = vpack.c.bf16 %v3449_v36, %v3448_v31  ;;  %v3323_v38 = vadd.f32 %v5781_v17, %v3183_v18  ;;  %v3000_v25 = vadd.f32 %v2999_v34, %v2647_v50  ;;  %v2649_v30 = vadd.f32 %v2648_v2, %v6416_v60  ;;  %v6423_v60 = vld [vmem:[#allocation44_spill] sm:$0xff] }
 0x253   : > { %v3450_v33 = vmax.f32 %v3322_v52, 0.0  ;;  %v3184_v11 = vmul.f32 %v5771_v29, %v2998_v3  ;;  %v2650_v59 = vpop.f32.mrf.mxu1  ;;  %v3003_v8 = vpop.f32.mrf.mxu0 }
 0x254   : > { %3914 = vst [vmem:[%s5799_s6 + $0x170] sm:$0xff] %v4469_v40  ;;  %v3451_v20 = vmax.f32 %v3323_v38, 0.0  ;;  %v3185_v48 = vmul.f32 %v5776_v1, %v3000_v25  ;;  %v3002_v21 = vadd.f32 %v3001_v35, %v2649_v30  ;;  %v2651_v27 = vadd.f32 %v2650_v59, %v6417_v39 }
 0x255   : > { %v3324_v54 = vadd.f32 %v5773_v9, %v3184_v11  ;;  %v2654_v53 = vpop.f32.mrf.mxu1  ;;  %v3007_v42 = vpop.f32.mrf.mxu0 }
 0x256   : > { %v4470_v4 = vpack.c.bf16 %v3451_v20, %v3450_v33  ;;  %v3325_v10 = vadd.f32 %v5781_v17, %v3185_v48  ;;  %v3186_v62 = vmul.f32 %v5771_v29, %v3002_v21  ;;  %v3004_v51 = vadd.f32 %v3003_v8, %v2651_v27  ;;  %v6424_v27 = vld [vmem:[#allocation46_spill] sm:$0xff] }
 0x257   : > { %v3452_v15 = vmax.f32 %v3324_v54, 0.0  ;;  %v2655_v19 = vadd.f32 %v2654_v53, %v6418_v43  ;;  %v2656_v41 = vpop.f32.mrf.mxu1  ;;  %v3009_v45 = vpop.f32.mrf.mxu0 }
 0x258   : > { %3915 = vst [vmem:[%s5799_s6 + $0x178] sm:$0xff] %v4470_v4  ;;  %v3453_v44 = vmax.f32 %v3325_v10, 0.0  ;;  %v3326_v56 = vadd.f32 %v5773_v9, %v3186_v62  ;;  %v3187_v37 = vmul.f32 %v5776_v1, %v3004_v51  ;;  %v2657_v12 = vadd.f32 %v2656_v41, %v6419_v32  ;;  %v6425_v51 = vld [vmem:[#allocation48_spill] sm:$0xff]  ;;  %v6426_v32 = vld [vmem:[#allocation50_spill] sm:$0xff] }
 0x259   : > { %v3008_v14 = vadd.f32 %v3007_v42, %v2655_v19  ;;  %v2658_v16 = vpop.f32.mrf.mxu1  ;;  %v3011_v23 = vpop.f32.mrf.mxu0 }
 0x25a   : > { %v4471_v47 = vpack.c.bf16 %v3453_v44, %v3452_v15  ;;  %v3327_v22 = vadd.f32 %v5781_v17, %v3187_v37  ;;  %v3010_v13 = vadd.f32 %v3009_v45, %v2657_v12  ;;  %v2659_v24 = vadd.f32 %v2658_v16, %v6420_v6 }
 0x25b   : > { %v3188_v26 = vmul.f32 %v5771_v29, %v3008_v14  ;;  %v2660_v7 = vpop.f32.mrf.mxu1  ;;  %v3013_v58 = vpop.f32.mrf.mxu0  ;;  %v3454_v5 = vmax.f32 %v3326_v56, 0.0 }
 0x25c   : > { %3916 = vst [vmem:[%s5799_s6 + $0x180] sm:$0xff] %v4471_v47  ;;  %v3455_v63 = vmax.f32 %v3327_v22, 0.0  ;;  %v3189_v46 = vmul.f32 %v5776_v1, %v3010_v13  ;;  %v2661_v0 = vadd.f32 %v2660_v7, %v6421_v28  ;;  %v3012_v49 = vadd.f32 %v3011_v23, %v2659_v24  ;;  %v6427_v13 = vld [vmem:[#allocation52_spill] sm:$0xff]  ;;  %v6428_v28 = vld [vmem:[#allocation54_spill] sm:$0xff] }
 0x25d   : > { %v3328_v55 = vadd.f32 %v5773_v9, %v3188_v26  ;;  %v2664_v61 = vpop.f32.mrf.mxu1  ;;  %v3017_v34 = vpop.f32.mrf.mxu0 }
 0x25e   : > { %v4472_v31 = vpack.c.bf16 %v3455_v63, %v3454_v5  ;;  %v3329_v36 = vadd.f32 %v5781_v17, %v3189_v46  ;;  %v3014_v18 = vadd.f32 %v3013_v58, %v2661_v0  ;;  %v2665_v50 = vadd.f32 %v2664_v61, %v6422_v57  ;;  %v6429_v57 = vld [vmem:[#allocation56_spill] sm:$0xff] }
 0x25f   : > { %v3456_v52 = vmax.f32 %v3328_v55, 0.0  ;;  %v3190_v3 = vmul.f32 %v5771_v29, %v3012_v49  ;;  %v2666_v2 = vpop.f32.mrf.mxu1  ;;  %v3019_v35 = vpop.f32.mrf.mxu0 }
 0x260   : > { %3917 = vst [vmem:[%s5799_s6 + $0x188] sm:$0xff] %v4472_v31  ;;  %v3457_v40 = vmax.f32 %v3329_v36, 0.0  ;;  %v3191_v38 = vmul.f32 %v5776_v1, %v3014_v18  ;;  %v3018_v25 = vadd.f32 %v3017_v34, %v2665_v50  ;;  %v2667_v30 = vadd.f32 %v2666_v2, %v6423_v60 }
 0x261   : > { %v3330_v33 = vadd.f32 %v5773_v9, %v3190_v3  ;;  %v2668_v11 = vpop.f32.mrf.mxu1  ;;  %v3021_v59 = vpop.f32.mrf.mxu0 }
 0x262   : > { %v4473_v8 = vpack.c.bf16 %v3457_v40, %v3456_v52  ;;  %v3331_v20 = vadd.f32 %v5781_v17, %v3191_v38  ;;  %v3192_v48 = vmul.f32 %v5771_v29, %v3018_v25  ;;  %v3020_v21 = vadd.f32 %v3019_v35, %v2667_v30  ;;  %v6430_v30 = vld [vmem:[#allocation58_spill] sm:$0xff] }
 0x263   : > { %v3458_v39 = vmax.f32 %v3330_v33, 0.0  ;;  %v2669_v54 = vadd.f32 %v2668_v11, %v6424_v27  ;;  %v2670_v53 = vpop.f32.mrf.mxu1  ;;  %v3023_v42 = vpop.f32.mrf.mxu0 }
 0x264   : > { %3918 = vst [vmem:[%s5799_s6 + $0x190] sm:$0xff] %v4473_v8  ;;  %v3459_v4 = vmax.f32 %v3331_v20, 0.0  ;;  %v3332_v10 = vadd.f32 %v5773_v9, %v3192_v48  ;;  %v3193_v62 = vmul.f32 %v5776_v1, %v3020_v21  ;;  %v2671_v15 = vadd.f32 %v2670_v53, %v6425_v51  ;;  %v6431_v21 = vld [vmem:[#allocation60_spill] sm:$0xff]  ;;  %v6432_v51 = vld [vmem:[#allocation62_spill] sm:$0xff] }
 0x265   : > { %v3022_v43 = vadd.f32 %v3021_v59, %v2669_v54  ;;  %v2674_v19 = vpop.f32.mrf.mxu1  ;;  %v3027_v41 = vpop.f32.mrf.mxu0 }
 0x266   : > { %v4474_v45 = vpack.c.bf16 %v3459_v4, %v3458_v39  ;;  %v3333_v44 = vadd.f32 %v5781_v17, %v3193_v62  ;;  %v3024_v56 = vadd.f32 %v3023_v42, %v2671_v15  ;;  %v2675_v12 = vadd.f32 %v2674_v19, %v6426_v32 }
 0x267   : > { %v3194_v37 = vmul.f32 %v5771_v29, %v3022_v43  ;;  %v2676_v14 = vpop.f32.mrf.mxu1  ;;  %v3029_v16 = vpop.f32.mrf.mxu0  ;;  %v3460_v23 = vmax.f32 %v3332_v10, 0.0 }
 0x268   : > { %3919 = vst [vmem:[%s5799_s6 + $0x198] sm:$0xff] %v4474_v45  ;;  %v3461_v47 = vmax.f32 %v3333_v44, 0.0  ;;  %v3195_v22 = vmul.f32 %v5776_v1, %v3024_v56  ;;  %v2677_v26 = vadd.f32 %v2676_v14, %v6427_v13  ;;  %v3028_v24 = vadd.f32 %v3027_v41, %v2675_v12  ;;  %v6433_v56 = vld [vmem:[#allocation64_spill] sm:$0xff]  ;;  %v6434_v13 = vld [vmem:[#allocation66_spill] sm:$0xff] }
 0x269   : > { %v3334_v6 = vadd.f32 %v5773_v9, %v3194_v37  ;;  %v2678_v7 = vpop.f32.mrf.mxu1  ;;  %v3031_v58 = vpop.f32.mrf.mxu0 }
 0x26a   : > { %v4475_v5 = vpack.c.bf16 %v3461_v47, %v3460_v23  ;;  %v3335_v63 = vadd.f32 %v5781_v17, %v3195_v22  ;;  %v3030_v46 = vadd.f32 %v3029_v16, %v2677_v26  ;;  %v2679_v0 = vadd.f32 %v2678_v7, %v6428_v28  ;;  %v6435_v28 = vld [vmem:[#allocation68_spill] sm:$0xff] }
 0x26b   : > { %v3462_v55 = vmax.f32 %v3334_v6, 0.0  ;;  %v3196_v49 = vmul.f32 %v5771_v29, %v3028_v24  ;;  %v2680_v61 = vpop.f32.mrf.mxu1  ;;  %v3033_v34 = vpop.f32.mrf.mxu0 }
 0x26c   : > { %3920 = vst [vmem:[%s5799_s6 + $0x1a0] sm:$0xff] %v4475_v5  ;;  %v3463_v31 = vmax.f32 %v3335_v63, 0.0  ;;  %v3197_v36 = vmul.f32 %v5776_v1, %v3030_v46  ;;  %v3032_v18 = vadd.f32 %v3031_v58, %v2679_v0  ;;  %v2681_v50 = vadd.f32 %v2680_v61, %v6429_v57 }
 0x26d   : > { %v3336_v52 = vadd.f32 %v5773_v9, %v3196_v49  ;;  %v2684_v3 = vpop.f32.mrf.mxu1  ;;  %v3037_v2 = vpop.f32.mrf.mxu0 }
 0x26e   : > { %v4476_v35 = vpack.c.bf16 %v3463_v31, %v3462_v55  ;;  %v3337_v40 = vadd.f32 %v5781_v17, %v3197_v36  ;;  %v3198_v38 = vmul.f32 %v5771_v29, %v3032_v18  ;;  %v3034_v25 = vadd.f32 %v3033_v34, %v2681_v50  ;;  %v6436_v50 = vld [vmem:[#allocation70_spill] sm:$0xff] }
 0x26f   : > { %v3464_v60 = vmax.f32 %v3336_v52, 0.0  ;;  %v2685_v33 = vadd.f32 %v2684_v3, %v6430_v30  ;;  %v2686_v11 = vpop.f32.mrf.mxu1  ;;  %v3039_v59 = vpop.f32.mrf.mxu0 }
 0x270   : > { %3921 = vst [vmem:[%s5799_s6 + $0x1a8] sm:$0xff] %v4476_v35  ;;  %v3465_v8 = vmax.f32 %v3337_v40, 0.0  ;;  %v3338_v20 = vadd.f32 %v5773_v9, %v3198_v38  ;;  %v3199_v48 = vmul.f32 %v5776_v1, %v3034_v25  ;;  %v2687_v39 = vadd.f32 %v2686_v11, %v6431_v21  ;;  %v6437_v25 = vld [vmem:[#allocation72_spill] sm:$0xff]  ;;  %v6438_v21 = vld [vmem:[#allocation74_spill] sm:$0xff] }
 0x271   : > { %v3038_v27 = vadd.f32 %v3037_v2, %v2685_v33  ;;  %v2688_v54 = vpop.f32.mrf.mxu1  ;;  %v3041_v53 = vpop.f32.mrf.mxu0 }
 0x272   : > { %v4477_v42 = vpack.c.bf16 %v3465_v8, %v3464_v60  ;;  %v3339_v4 = vadd.f32 %v5781_v17, %v3199_v48  ;;  %v3040_v10 = vadd.f32 %v3039_v59, %v2687_v39  ;;  %v2689_v15 = vadd.f32 %v2688_v54, %v6432_v51 }
 0x273   : > { %v3200_v62 = vmul.f32 %v5771_v29, %v3038_v27  ;;  %v2690_v43 = vpop.f32.mrf.mxu1  ;;  %v3043_v19 = vpop.f32.mrf.mxu0  ;;  %v3466_v41 = vmax.f32 %v3338_v20, 0.0 }
 0x274   : > { %3922 = vst [vmem:[%s5799_s6 + $0x1b0] sm:$0xff] %v4477_v42  ;;  %v3467_v45 = vmax.f32 %v3339_v4, 0.0  ;;  %v3201_v44 = vmul.f32 %v5776_v1, %v3040_v10  ;;  %v2691_v37 = vadd.f32 %v2690_v43, %v6433_v56  ;;  %v3042_v12 = vadd.f32 %v3041_v53, %v2689_v15  ;;  %v6439_v10 = vld [vmem:[#allocation76_spill] sm:$0xff]  ;;  %v6440_v56 = vld [vmem:[#allocation78_spill] sm:$0xff] }
 0x275   : > { %v3340_v32 = vadd.f32 %v5773_v9, %v3200_v62  ;;  %v2694_v14 = vpop.f32.mrf.mxu1  ;;  %v3047_v16 = vpop.f32.mrf.mxu0 }
 0x276   : > { %v4478_v23 = vpack.c.bf16 %v3467_v45, %v3466_v41  ;;  %v3341_v47 = vadd.f32 %v5781_v17, %v3201_v44  ;;  %v3044_v22 = vadd.f32 %v3043_v19, %v2691_v37  ;;  %v2695_v26 = vadd.f32 %v2694_v14, %v6434_v13  ;;  %v6441_v13 = vld [vmem:[#allocation80_spill] sm:$0xff] }
 0x277   : > { %v3468_v6 = vmax.f32 %v3340_v32, 0.0  ;;  %v3202_v24 = vmul.f32 %v5771_v29, %v3042_v12  ;;  %v2696_v7 = vpop.f32.mrf.mxu1  ;;  %v3049_v58 = vpop.f32.mrf.mxu0 }
 0x278   : > { %3923 = vst [vmem:[%s5799_s6 + $0x1b8] sm:$0xff] %v4478_v23  ;;  %v3469_v5 = vmax.f32 %v3341_v47, 0.0  ;;  %v3203_v63 = vmul.f32 %v5776_v1, %v3044_v22  ;;  %v3048_v46 = vadd.f32 %v3047_v16, %v2695_v26  ;;  %v2697_v0 = vadd.f32 %v2696_v7, %v6435_v28 }
 0x279   : > { %v3342_v55 = vadd.f32 %v5773_v9, %v3202_v24  ;;  %v2698_v49 = vpop.f32.mrf.mxu1  ;;  %v3051_v61 = vpop.f32.mrf.mxu0 }
 0x27a   : > { %v4479_v34 = vpack.c.bf16 %v3469_v5, %v3468_v6  ;;  %v3343_v31 = vadd.f32 %v5781_v17, %v3203_v63  ;;  %v3204_v36 = vmul.f32 %v5771_v29, %v3048_v46  ;;  %v3050_v18 = vadd.f32 %v3049_v58, %v2697_v0  ;;  %v6442_v0 = vld [vmem:[#allocation82_spill] sm:$0xff] }
 0x27b   : > { %v3470_v57 = vmax.f32 %v3342_v55, 0.0  ;;  %v2699_v52 = vadd.f32 %v2698_v49, %v6436_v50  ;;  %v2700_v3 = vpop.f32.mrf.mxu1  ;;  %v3053_v2 = vpop.f32.mrf.mxu0 }
 0x27c   : > { %3924 = vst [vmem:[%s5799_s6 + $0x1c0] sm:$0xff] %v4479_v34  ;;  %v3471_v35 = vmax.f32 %v3343_v31, 0.0  ;;  %v3344_v40 = vadd.f32 %v5773_v9, %v3204_v36  ;;  %v3205_v38 = vmul.f32 %v5776_v1, %v3050_v18  ;;  %v2701_v60 = vadd.f32 %v2700_v3, %v6437_v25  ;;  %v6443_v18 = vld [vmem:[#allocation84_spill] sm:$0xff]  ;;  %v6444_v25 = vld [vmem:[#allocation86_spill] sm:$0xff] }
 0x27d   : > { %v3052_v30 = vadd.f32 %v3051_v61, %v2699_v52  ;;  %v2704_v33 = vpop.f32.mrf.mxu1  ;;  %v3057_v11 = vpop.f32.mrf.mxu0 }
 0x27e   : > { %v4480_v59 = vpack.c.bf16 %v3471_v35, %v3470_v57  ;;  %v3345_v8 = vadd.f32 %v5781_v17, %v3205_v38  ;;  %v3054_v20 = vadd.f32 %v3053_v2, %v2701_v60  ;;  %v2705_v39 = vadd.f32 %v2704_v33, %v6438_v21 }
 0x27f   : > { %v3206_v48 = vmul.f32 %v5771_v29, %v3052_v30  ;;  %v2706_v27 = vpop.f32.mrf.mxu1  ;;  %v3059_v54 = vpop.f32.mrf.mxu0  ;;  %v3472_v53 = vmax.f32 %v3344_v40, 0.0 }
 0x280   : > { %3925 = vst [vmem:[%s5799_s6 + $0x1c8] sm:$0xff] %v4480_v59  ;;  %v3473_v42 = vmax.f32 %v3345_v8, 0.0  ;;  %v3207_v4 = vmul.f32 %v5776_v1, %v3054_v20  ;;  %v2707_v62 = vadd.f32 %v2706_v27, %v6439_v10  ;;  %v3058_v15 = vadd.f32 %v3057_v11, %v2705_v39  ;;  %v6445_v8 = vld [vmem:[#allocation88_spill] sm:$0xff] }
 0x281   : > { %v3346_v51 = vadd.f32 %v5773_v9, %v3206_v48  ;;  %v2708_v43 = vpop.f32.mrf.mxu1  ;;  %v3061_v19 = vpop.f32.mrf.mxu0 }
 0x282   : > { %v4481_v41 = vpack.c.bf16 %v3473_v42, %v3472_v53  ;;  %v3347_v45 = vadd.f32 %v5781_v17, %v3207_v4  ;;  %v3060_v44 = vadd.f32 %v3059_v54, %v2707_v62  ;;  %v2709_v37 = vadd.f32 %v2708_v43, %v6440_v56 }
 0x283   : > { %v3474_v32 = vmax.f32 %v3346_v51, 0.0  ;;  %v3208_v12 = vmul.f32 %v5771_v29, %v3058_v15  ;;  %v2710_v14 = vpop.f32.mrf.mxu1  ;;  %v3063_v16 = vpop.f32.mrf.mxu0 }
 0x284   : > { %3926 = vst [vmem:[%s5799_s6 + $0x1d0] sm:$0xff] %v4481_v41  ;;  %v3475_v23 = vmax.f32 %v3347_v45, 0.0  ;;  %v3209_v47 = vmul.f32 %v5776_v1, %v3060_v44  ;;  %v3062_v22 = vadd.f32 %v3061_v19, %v2709_v37  ;;  %v2711_v26 = vadd.f32 %v2710_v14, %v6441_v13 }
 0x285   : > { %v3348_v6 = vadd.f32 %v5773_v9, %v3208_v12  ;;  %v2714_v24 = vpop.f32.mrf.mxu1  ;;  %v3067_v7 = vpop.f32.mrf.mxu0 }
 0x286   : > { %v4482_v58 = vpack.c.bf16 %v3475_v23, %v3474_v32  ;;  %v3349_v5 = vadd.f32 %v5781_v17, %v3209_v47  ;;  %v3210_v63 = vmul.f32 %v5771_v29, %v3062_v22  ;;  %v3064_v46 = vadd.f32 %v3063_v16, %v2711_v26 }
 0x287   : > { %v3476_v28 = vmax.f32 %v3348_v6, 0.0  ;;  %v2715_v55 = vadd.f32 %v2714_v24, %v6442_v0  ;;  %v2716_v49 = vpop.f32.mrf.mxu1  ;;  %v3069_v61 = vpop.f32.mrf.mxu0 }
 0x288   : > { %3927 = vst [vmem:[%s5799_s6 + $0x1d8] sm:$0xff] %v4482_v58  ;;  %v3477_v34 = vmax.f32 %v3349_v5, 0.0  ;;  %v3350_v31 = vadd.f32 %v5773_v9, %v3210_v63  ;;  %v3211_v36 = vmul.f32 %v5776_v1, %v3064_v46  ;;  %v2717_v57 = vadd.f32 %v2716_v49, %v6443_v18 }
 0x289   : > { %v3068_v50 = vadd.f32 %v3067_v7, %v2715_v55  ;;  %v2718_v52 = vpop.f32.mrf.mxu1  ;;  %v3071_v3 = vpop.f32.mrf.mxu0 }
 0x28a   : > { %v4483_v2 = vpack.c.bf16 %v3477_v34, %v3476_v28  ;;  %v3351_v35 = vadd.f32 %v5781_v17, %v3211_v36  ;;  %v3070_v40 = vadd.f32 %v3069_v61, %v2717_v57  ;;  %v2719_v60 = vadd.f32 %v2718_v52, %v6444_v25 }
 0x28b   : > { %v3212_v38 = vmul.f32 %v5771_v29, %v3068_v50  ;;  %v2720_v30 = vpop.f32.mrf.mxu1  ;;  %v3478_v33 = vmax.f32 %v3350_v31, 0.0  ;;  %v3073_v39 = vpop.f32.mrf.mxu0 }
 0x28c   : > { %3928 = vst [vmem:[%s5799_s6 + $0x1e0] sm:$0xff] %v4483_v2  ;;  %v3479_v11 = vmax.f32 %v3351_v35, 0.0  ;;  %v3213_v59 = vmul.f32 %v5776_v1, %v3070_v40  ;;  %v2721_v20 = vadd.f32 %v2720_v30, %v6445_v8  ;;  %v3072_v21 = vadd.f32 %v3071_v3, %v2719_v60 }
 0x28d   : > { %v3352_v48 = vadd.f32 %v5773_v9, %v3212_v38 }
 0x28e   : > { %v4484_v27 = vpack.c.bf16 %v3479_v11, %v3478_v33  ;;  %v3353_v54 = vadd.f32 %v5781_v17, %v3213_v59  ;;  %v3074_v53 = vadd.f32 %v3073_v39, %v2721_v20  ;;  %v3214_v42 = vmul.f32 %v5771_v29, %v3072_v21 }
 0x28f   : > { %v3480_v4 = vmax.f32 %v3352_v48, 0.0 }
 0x290   : > { %3929 = vst [vmem:[%s5799_s6 + $0x1e8] sm:$0xff] %v4484_v27  ;;  %v3481_v10 = vmax.f32 %v3353_v54, 0.0  ;;  %v3215_v62 = vmul.f32 %v5776_v1, %v3074_v53  ;;  %v3354_v51 = vadd.f32 %v5773_v9, %v3214_v42 }
 0x292   : > { %v4485_v15 = vpack.c.bf16 %v3481_v10, %v3480_v4  ;;  %v3355_v43 = vadd.f32 %v5781_v17, %v3215_v62  ;;  %v3482_v19 = vmax.f32 %v3354_v51, 0.0 }
 0x294   : > { %3930 = vst [vmem:[%s5799_s6 + $0x1f0] sm:$0xff] %v4485_v15  ;;  %v3483_v41 = vmax.f32 %v3355_v43, 0.0 }
 0x296   : > { %v4486_v45 = vpack.c.bf16 %v3483_v41, %v3482_v19 }
 0x298   : > { %3931 = vst [vmem:[%s5799_s6 + $0x1f8] sm:$0xff] %v4486_v45 }
 0x299 PF: > { %s14_s17 = sadd.s32 1, %s4998_s17   ;;  %s6446_s15 = smov %s4994_s16 }
 0x29a   : > { %p11_p5 = scmp.ge.s32.totalorder %s14_s17, 22   ;;  %s6447_s16 = smov %s6449_s18 }
 0x29c   :  { %13 = sbr.rel (!%p11_p5) target bundleno = 2 (0x2), region = 75 }

// kernel: stem_fwd.13
= control target key start
LH: loop header
LB: loop body
LE: loop exit
PB: predicated region body
PF: predicated region fallthrough
CT: control target
= control target key end

     0   :  { %s2111_s6 = smov 0   ;;  %s2113_s7 = smov 0   ;;  %s3089_s0 = inlined_call_operand.vmem [shape: bf16[9,2560,256], index: 0, kind: input, shape index: {}]   ;;  %s3090_s1 = inlined_call_operand.vmem [shape: bf16[2560,256], index: 1, kind: output, shape index: {}]  }
   0x1   :  { %s2115_s8 = smov 0   ;;  %s2117_s9 = smov 0  }
   0x2   :  { %s2119_s10 = smov 0  }
   0x3 LB: > { %s23_s11 = sadd.s32 1, %s2095_s9  ;;  %p39_p1 = scmp.ne.s32.totalorder %s2087_s7, %s2083_s6  ;;  %s2099_s10 = sphi %s2119_s10, %s11_s10   ;;  %s2095_s9 = sphi %s2117_s9, %s3095_s9   ;;  %s2091_s8 = sphi %s2115_s8, %s3094_s8   ;;  %s2087_s7 = sphi %s2113_s7, %s3093_s7   ;;  %s2083_s6 = sphi %s2111_s6, %s3092_s6  }
   0x4   : > { %p25_p0 = scmp.ge.s32.totalorder %s23_s11, 10  ;;  %p40_p2 = scmp.eq.s32.totalorder %s2099_s10, 0 }
   0x5   : > { %s32_s13 = sadd.s32 1, %s2087_s7  ;;  %p2006_p5 = scmp.ge.s32.totalorder %s2099_s10, 10 }
   0x6   : > { %s3097_s11 = smov (%p25_p0, %s23_s11), 0  ;;  %p41_p3 = por %p40_p2, %p39_p1 }
   0x7   : > { %s27_s12 = ssub.s32 %s2095_s9, %s3097_s11  ;;  %93 = sbr.rel (%p2006_p5) target bundleno = 161 (0xa1), region = 16 }
   0x8   : > { %p30_p4 = scmp.eq.s32.totalorder %s27_s12, 0 }
   0xa   : > { %s2146_s14 = scalar_select %p30_p4, %s2087_s7, %s32_s13  }
   0xc   : > { %96 = sbr.rel (!%p41_p3) target bundleno = 161 (0xa1), region = 20  ;;  %s98_s15 = sand.u32 (%p41_p3), 1, %s2087_s7  }
   0xd   : > { %s2017_s16 = sshll.u32 (%p41_p3), %s2095_s9, 8  ;;  %s2019_s17 = smul.u32 (%p41_p3), 2304, %s98_s15 }
   0xe   : > { %s2154_s20 = scalar_lea.vmem (%p41_p3), %s3089_s0, %s2017_s16 }
   0xf   : > { %v709_v0 = vld [vmem:[%s2154_s20] sm:$0xff] (%p41_p3)  ;;  %v711_v1 = vld [vmem:[%s2154_s20 + $0x8] sm:$0xff] (%p41_p3)  ;;  %v713_v2 = vld [vmem:[%s2154_s20 + $0x10] sm:$0xff] (%p41_p3)  ;;  %s2162_s21 = scalar_lea.vmem (%p41_p3), [#allocation2], %s2019_s17 }
  0x10   : > { %v715_v3 = vld [vmem:[%s2154_s20 + $0x18] sm:$0xff] (%p41_p3)  ;;  %v717_v4 = vld [vmem:[%s2154_s20 + $0x20] sm:$0xff] (%p41_p3)  ;;  %v719_v5 = vld [vmem:[%s2154_s20 + $0x28] sm:$0xff] (%p41_p3)  ;;  %710 = vst [vmem:[%s2162_s21] sm:$0xff] (%p41_p3), %v709_v0 }
  0x11   : > { %712 = vst [vmem:[%s2162_s21 + $0x8] sm:$0xff] %v711_v1  ;;  %714 = vst [vmem:[%s2162_s21 + $0x10] sm:$0xff] %v713_v2  ;;  %v721_v6 = vld [vmem:[%s2154_s20 + $0x30] sm:$0xff]  ;;  %v723_v7 = vld [vmem:[%s2154_s20 + $0x38] sm:$0xff] }
  0x12   : > { %716 = vst [vmem:[%s2162_s21 + $0x18] sm:$0xff] %v715_v3  ;;  %718 = vst [vmem:[%s2162_s21 + $0x20] sm:$0xff] %v717_v4  ;;  %v725_v8 = vld [vmem:[%s2154_s20 + $0x40] sm:$0xff]  ;;  %v727_v9 = vld [vmem:[%s2154_s20 + $0x48] sm:$0xff] }
  0x13   : > { %720 = vst [vmem:[%s2162_s21 + $0x28] sm:$0xff] %v719_v5  ;;  %722 = vst [vmem:[%s2162_s21 + $0x30] sm:$0xff] %v721_v6  ;;  %v729_v10 = vld [vmem:[%s2154_s20 + $0x50] sm:$0xff]  ;;  %v731_v11 = vld [vmem:[%s2154_s20 + $0x58] sm:$0xff] }
  0x14   : > { %724 = vst [vmem:[%s2162_s21 + $0x38] sm:$0xff] %v723_v7  ;;  %726 = vst [vmem:[%s2162_s21 + $0x40] sm:$0xff] %v725_v8  ;;  %v733_v12 = vld [vmem:[%s2154_s20 + $0x60] sm:$0xff]  ;;  %v735_v13 = vld [vmem:[%s2154_s20 + $0x68] sm:$0xff] }
  0x15   : > { %728 = vst [vmem:[%s2162_s21 + $0x48] sm:$0xff] %v727_v9  ;;  %730 = vst [vmem:[%s2162_s21 + $0x50] sm:$0xff] %v729_v10  ;;  %v737_v14 = vld [vmem:[%s2154_s20 + $0x70] sm:$0xff]  ;;  %v739_v15 = vld [vmem:[%s2154_s20 + $0x78] sm:$0xff] }
  0x16   : > { %732 = vst [vmem:[%s2162_s21 + $0x58] sm:$0xff] %v731_v11  ;;  %734 = vst [vmem:[%s2162_s21 + $0x60] sm:$0xff] %v733_v12  ;;  %v741_v16 = vld [vmem:[%s2154_s20 + $0x80] sm:$0xff]  ;;  %v743_v17 = vld [vmem:[%s2154_s20 + $0x88] sm:$0xff] }
  0x17   : > { %736 = vst [vmem:[%s2162_s21 + $0x68] sm:$0xff] %v735_v13  ;;  %738 = vst [vmem:[%s2162_s21 + $0x70] sm:$0xff] %v737_v14  ;;  %v745_v18 = vld [vmem:[%s2154_s20 + $0x90] sm:$0xff]  ;;  %v747_v19 = vld [vmem:[%s2154_s20 + $0x98] sm:$0xff] }
  0x18   : > { %740 = vst [vmem:[%s2162_s21 + $0x78] sm:$0xff] %v739_v15  ;;  %742 = vst [vmem:[%s2162_s21 + $0x80] sm:$0xff] %v741_v16  ;;  %v749_v20 = vld [vmem:[%s2154_s20 + $0xa0] sm:$0xff]  ;;  %v751_v21 = vld [vmem:[%s2154_s20 + $0xa8] sm:$0xff] }
  0x19   : > { %744 = vst [vmem:[%s2162_s21 + $0x88] sm:$0xff] %v743_v17  ;;  %746 = vst [vmem:[%s2162_s21 + $0x90] sm:$0xff] %v745_v18  ;;  %v753_v22 = vld [vmem:[%s2154_s20 + $0xb0] sm:$0xff]  ;;  %v755_v23 = vld [vmem:[%s2154_s20 + $0xb8] sm:$0xff] }
  0x1a   : > { %748 = vst [vmem:[%s2162_s21 + $0x98] sm:$0xff] %v747_v19  ;;  %750 = vst [vmem:[%s2162_s21 + $0xa0] sm:$0xff] %v749_v20  ;;  %v757_v24 = vld [vmem:[%s2154_s20 + $0xc0] sm:$0xff]  ;;  %v759_v25 = vld [vmem:[%s2154_s20 + $0xc8] sm:$0xff] }
  0x1b   : > { %752 = vst [vmem:[%s2162_s21 + $0xa8] sm:$0xff] %v751_v21  ;;  %754 = vst [vmem:[%s2162_s21 + $0xb0] sm:$0xff] %v753_v22  ;;  %v761_v26 = vld [vmem:[%s2154_s20 + $0xd0] sm:$0xff]  ;;  %v763_v27 = vld [vmem:[%s2154_s20 + $0xd8] sm:$0xff] }
  0x1c   : > { %756 = vst [vmem:[%s2162_s21 + $0xb8] sm:$0xff] %v755_v23  ;;  %758 = vst [vmem:[%s2162_s21 + $0xc0] sm:$0xff] %v757_v24  ;;  %v765_v28 = vld [vmem:[%s2154_s20 + $0xe0] sm:$0xff]  ;;  %v767_v29 = vld [vmem:[%s2154_s20 + $0xe8] sm:$0xff] }
  0x1d   : > { %760 = vst [vmem:[%s2162_s21 + $0xc8] sm:$0xff] %v759_v25  ;;  %762 = vst [vmem:[%s2162_s21 + $0xd0] sm:$0xff] %v761_v26  ;;  %v769_v30 = vld [vmem:[%s2154_s20 + $0xf0] sm:$0xff]  ;;  %v771_v31 = vld [vmem:[%s2154_s20 + $0xf8] sm:$0xff] }
  0x1e   : > { %764 = vst [vmem:[%s2162_s21 + $0xd8] sm:$0xff] %v763_v27  ;;  %766 = vst [vmem:[%s2162_s21 + $0xe0] sm:$0xff] %v765_v28  ;;  %v773_v32 = vld [vmem:[%s2154_s20 + $0xa00] sm:$0xff]  ;;  %v775_v33 = vld [vmem:[%s2154_s20 + $0xa08] sm:$0xff] }
  0x1f   : > { %768 = vst [vmem:[%s2162_s21 + $0xe8] sm:$0xff] %v767_v29  ;;  %770 = vst [vmem:[%s2162_s21 + $0xf0] sm:$0xff] %v769_v30  ;;  %v777_v34 = vld [vmem:[%s2154_s20 + $0xa10] sm:$0xff]  ;;  %v779_v35 = vld [vmem:[%s2154_s20 + $0xa18] sm:$0xff] }
  0x20   : > { %772 = vst [vmem:[%s2162_s21 + $0xf8] sm:$0xff] %v771_v31  ;;  %774 = vst [vmem:[%s2162_s21 + $0x100] sm:$0xff] %v773_v32  ;;  %v781_v36 = vld [vmem:[%s2154_s20 + $0xa20] sm:$0xff]  ;;  %v783_v37 = vld [vmem:[%s2154_s20 + $0xa28] sm:$0xff] }
  0x21   : > { %776 = vst [vmem:[%s2162_s21 + $0x108] sm:$0xff] %v775_v33  ;;  %778 = vst [vmem:[%s2162_s21 + $0x110] sm:$0xff] %v777_v34  ;;  %v785_v38 = vld [vmem:[%s2154_s20 + $0xa30] sm:$0xff]  ;;  %v787_v39 = vld [vmem:[%s2154_s20 + $0xa38] sm:$0xff] }
  0x22   : > { %780 = vst [vmem:[%s2162_s21 + $0x118] sm:$0xff] %v779_v35  ;;  %782 = vst [vmem:[%s2162_s21 + $0x120] sm:$0xff] %v781_v36  ;;  %v789_v40 = vld [vmem:[%s2154_s20 + $0xa40] sm:$0xff]  ;;  %v791_v41 = vld [vmem:[%s2154_s20 + $0xa48] sm:$0xff] }
  0x23   : > { %784 = vst [vmem:[%s2162_s21 + $0x128] sm:$0xff] %v783_v37  ;;  %786 = vst [vmem:[%s2162_s21 + $0x130] sm:$0xff] %v785_v38  ;;  %v793_v42 = vld [vmem:[%s2154_s20 + $0xa50] sm:$0xff]  ;;  %v795_v43 = vld [vmem:[%s2154_s20 + $0xa58] sm:$0xff] }
  0x24   : > { %788 = vst [vmem:[%s2162_s21 + $0x138] sm:$0xff] %v787_v39  ;;  %790 = vst [vmem:[%s2162_s21 + $0x140] sm:$0xff] %v789_v40  ;;  %v797_v44 = vld [vmem:[%s2154_s20 + $0xa60] sm:$0xff]  ;;  %v799_v45 = vld [vmem:[%s2154_s20 + $0xa68] sm:$0xff] }
  0x25   : > { %792 = vst [vmem:[%s2162_s21 + $0x148] sm:$0xff] %v791_v41  ;;  %794 = vst [vmem:[%s2162_s21 + $0x150] sm:$0xff] %v793_v42  ;;  %v801_v46 = vld [vmem:[%s2154_s20 + $0xa70] sm:$0xff]  ;;  %v803_v47 = vld [vmem:[%s2154_s20 + $0xa78] sm:$0xff] }
  0x26   : > { %796 = vst [vmem:[%s2162_s21 + $0x158] sm:$0xff] %v795_v43  ;;  %798 = vst [vmem:[%s2162_s21 + $0x160] sm:$0xff] %v797_v44  ;;  %v805_v48 = vld [vmem:[%s2154_s20 + $0xa80] sm:$0xff]  ;;  %v807_v49 = vld [vmem:[%s2154_s20 + $0xa88] sm:$0xff] }
  0x27   : > { %800 = vst [vmem:[%s2162_s21 + $0x168] sm:$0xff] %v799_v45  ;;  %802 = vst [vmem:[%s2162_s21 + $0x170] sm:$0xff] %v801_v46  ;;  %v809_v50 = vld [vmem:[%s2154_s20 + $0xa90] sm:$0xff]  ;;  %v811_v51 = vld [vmem:[%s2154_s20 + $0xa98] sm:$0xff] }
  0x28   : > { %804 = vst [vmem:[%s2162_s21 + $0x178] sm:$0xff] %v803_v47  ;;  %806 = vst [vmem:[%s2162_s21 + $0x180] sm:$0xff] %v805_v48  ;;  %v813_v52 = vld [vmem:[%s2154_s20 + $0xaa0] sm:$0xff]  ;;  %v815_v53 = vld [vmem:[%s2154_s20 + $0xaa8] sm:$0xff] }
  0x29   : > { %808 = vst [vmem:[%s2162_s21 + $0x188] sm:$0xff] %v807_v49  ;;  %810 = vst [vmem:[%s2162_s21 + $0x190] sm:$0xff] %v809_v50  ;;  %v817_v54 = vld [vmem:[%s2154_s20 + $0xab0] sm:$0xff]  ;;  %v819_v55 = vld [vmem:[%s2154_s20 + $0xab8] sm:$0xff] }
  0x2a   : > { %812 = vst [vmem:[%s2162_s21 + $0x198] sm:$0xff] %v811_v51  ;;  %814 = vst [vmem:[%s2162_s21 + $0x1a0] sm:$0xff] %v813_v52  ;;  %v821_v56 = vld [vmem:[%s2154_s20 + $0xac0] sm:$0xff]  ;;  %v823_v57 = vld [vmem:[%s2154_s20 + $0xac8] sm:$0xff] }
  0x2b   : > { %816 = vst [vmem:[%s2162_s21 + $0x1a8] sm:$0xff] %v815_v53  ;;  %818 = vst [vmem:[%s2162_s21 + $0x1b0] sm:$0xff] %v817_v54  ;;  %v825_v58 = vld [vmem:[%s2154_s20 + $0xad0] sm:$0xff]  ;;  %v827_v59 = vld [vmem:[%s2154_s20 + $0xad8] sm:$0xff] }
  0x2c   : > { %820 = vst [vmem:[%s2162_s21 + $0x1b8] sm:$0xff] %v819_v55  ;;  %822 = vst [vmem:[%s2162_s21 + $0x1c0] sm:$0xff] %v821_v56  ;;  %v829_v60 = vld [vmem:[%s2154_s20 + $0xae0] sm:$0xff]  ;;  %v831_v61 = vld [vmem:[%s2154_s20 + $0xae8] sm:$0xff] }
  0x2d   : > { %824 = vst [vmem:[%s2162_s21 + $0x1c8] sm:$0xff] %v823_v57  ;;  %826 = vst [vmem:[%s2162_s21 + $0x1d0] sm:$0xff] %v825_v58  ;;  %v833_v62 = vld [vmem:[%s2154_s20 + $0xaf0] sm:$0xff]  ;;  %v835_v63 = vld [vmem:[%s2154_s20 + $0xaf8] sm:$0xff] }
  0x2e   : > { %828 = vst [vmem:[%s2162_s21 + $0x1d8] sm:$0xff] %v827_v59  ;;  %830 = vst [vmem:[%s2162_s21 + $0x1e0] sm:$0xff] %v829_v60  ;;  %v837_v0 = vld [vmem:[%s2154_s20 + $0x1400] sm:$0xff]  ;;  %v839_v1 = vld [vmem:[%s2154_s20 + $0x1408] sm:$0xff] }
  0x2f   : > { %832 = vst [vmem:[%s2162_s21 + $0x1e8] sm:$0xff] %v831_v61  ;;  %834 = vst [vmem:[%s2162_s21 + $0x1f0] sm:$0xff] %v833_v62  ;;  %v841_v2 = vld [vmem:[%s2154_s20 + $0x1410] sm:$0xff]  ;;  %v843_v3 = vld [vmem:[%s2154_s20 + $0x1418] sm:$0xff] }
  0x30   : > { %836 = vst [vmem:[%s2162_s21 + $0x1f8] sm:$0xff] %v835_v63  ;;  %838 = vst [vmem:[%s2162_s21 + $0x200] sm:$0xff] %v837_v0  ;;  %v845_v4 = vld [vmem:[%s2154_s20 + $0x1420] sm:$0xff]  ;;  %v847_v5 = vld [vmem:[%s2154_s20 + $0x1428] sm:$0xff] }
  0x31   : > { %840 = vst [vmem:[%s2162_s21 + $0x208] sm:$0xff] %v839_v1  ;;  %842 = vst [vmem:[%s2162_s21 + $0x210] sm:$0xff] %v841_v2  ;;  %v849_v6 = vld [vmem:[%s2154_s20 + $0x1430] sm:$0xff]  ;;  %v851_v7 = vld [vmem:[%s2154_s20 + $0x1438] sm:$0xff] }
  0x32   : > { %844 = vst [vmem:[%s2162_s21 + $0x218] sm:$0xff] %v843_v3  ;;  %846 = vst [vmem:[%s2162_s21 + $0x220] sm:$0xff] %v845_v4  ;;  %v853_v8 = vld [vmem:[%s2154_s20 + $0x1440] sm:$0xff]  ;;  %v855_v9 = vld [vmem:[%s2154_s20 + $0x1448] sm:$0xff] }
  0x33   : > { %848 = vst [vmem:[%s2162_s21 + $0x228] sm:$0xff] %v847_v5  ;;  %850 = vst [vmem:[%s2162_s21 + $0x230] sm:$0xff] %v849_v6  ;;  %v857_v10 = vld [vmem:[%s2154_s20 + $0x1450] sm:$0xff]  ;;  %v859_v11 = vld [vmem:[%s2154_s20 + $0x1458] sm:$0xff] }
  0x34   : > { %852 = vst [vmem:[%s2162_s21 + $0x238] sm:$0xff] %v851_v7  ;;  %854 = vst [vmem:[%s2162_s21 + $0x240] sm:$0xff] %v853_v8  ;;  %v861_v12 = vld [vmem:[%s2154_s20 + $0x1460] sm:$0xff]  ;;  %v863_v13 = vld [vmem:[%s2154_s20 + $0x1468] sm:$0xff] }
  0x35   : > { %856 = vst [vmem:[%s2162_s21 + $0x248] sm:$0xff] %v855_v9  ;;  %858 = vst [vmem:[%s2162_s21 + $0x250] sm:$0xff] %v857_v10  ;;  %v865_v14 = vld [vmem:[%s2154_s20 + $0x1470] sm:$0xff]  ;;  %v867_v15 = vld [vmem:[%s2154_s20 + $0x1478] sm:$0xff] }
  0x36   : > { %860 = vst [vmem:[%s2162_s21 + $0x258] sm:$0xff] %v859_v11  ;;  %862 = vst [vmem:[%s2162_s21 + $0x260] sm:$0xff] %v861_v12  ;;  %v869_v16 = vld [vmem:[%s2154_s20 + $0x1480] sm:$0xff]  ;;  %v871_v17 = vld [vmem:[%s2154_s20 + $0x1488] sm:$0xff] }
  0x37   : > { %864 = vst [vmem:[%s2162_s21 + $0x268] sm:$0xff] %v863_v13  ;;  %866 = vst [vmem:[%s2162_s21 + $0x270] sm:$0xff] %v865_v14  ;;  %v873_v18 = vld [vmem:[%s2154_s20 + $0x1490] sm:$0xff]  ;;  %v875_v19 = vld [vmem:[%s2154_s20 + $0x1498] sm:$0xff] }
  0x38   : > { %868 = vst [vmem:[%s2162_s21 + $0x278] sm:$0xff] %v867_v15  ;;  %870 = vst [vmem:[%s2162_s21 + $0x280] sm:$0xff] %v869_v16  ;;  %v877_v20 = vld [vmem:[%s2154_s20 + $0x14a0] sm:$0xff]  ;;  %v879_v21 = vld [vmem:[%s2154_s20 + $0x14a8] sm:$0xff] }
  0x39   : > { %872 = vst [vmem:[%s2162_s21 + $0x288] sm:$0xff] %v871_v17  ;;  %874 = vst [vmem:[%s2162_s21 + $0x290] sm:$0xff] %v873_v18  ;;  %v881_v22 = vld [vmem:[%s2154_s20 + $0x14b0] sm:$0xff]  ;;  %v883_v23 = vld [vmem:[%s2154_s20 + $0x14b8] sm:$0xff] }
  0x3a   : > { %876 = vst [vmem:[%s2162_s21 + $0x298] sm:$0xff] %v875_v19  ;;  %878 = vst [vmem:[%s2162_s21 + $0x2a0] sm:$0xff] %v877_v20  ;;  %v885_v24 = vld [vmem:[%s2154_s20 + $0x14c0] sm:$0xff]  ;;  %v887_v25 = vld [vmem:[%s2154_s20 + $0x14c8] sm:$0xff] }
  0x3b   : > { %880 = vst [vmem:[%s2162_s21 + $0x2a8] sm:$0xff] %v879_v21  ;;  %882 = vst [vmem:[%s2162_s21 + $0x2b0] sm:$0xff] %v881_v22  ;;  %v889_v26 = vld [vmem:[%s2154_s20 + $0x14d0] sm:$0xff]  ;;  %v891_v27 = vld [vmem:[%s2154_s20 + $0x14d8] sm:$0xff] }
  0x3c   : > { %884 = vst [vmem:[%s2162_s21 + $0x2b8] sm:$0xff] %v883_v23  ;;  %886 = vst [vmem:[%s2162_s21 + $0x2c0] sm:$0xff] %v885_v24  ;;  %v893_v28 = vld [vmem:[%s2154_s20 + $0x14e0] sm:$0xff]  ;;  %v895_v29 = vld [vmem:[%s2154_s20 + $0x14e8] sm:$0xff] }
  0x3d   : > { %888 = vst [vmem:[%s2162_s21 + $0x2c8] sm:$0xff] %v887_v25  ;;  %890 = vst [vmem:[%s2162_s21 + $0x2d0] sm:$0xff] %v889_v26  ;;  %v897_v30 = vld [vmem:[%s2154_s20 + $0x14f0] sm:$0xff]  ;;  %v899_v31 = vld [vmem:[%s2154_s20 + $0x14f8] sm:$0xff] }
  0x3e   : > { %892 = vst [vmem:[%s2162_s21 + $0x2d8] sm:$0xff] %v891_v27  ;;  %894 = vst [vmem:[%s2162_s21 + $0x2e0] sm:$0xff] %v893_v28  ;;  %v901_v32 = vld [vmem:[%s2154_s20 + $0x1e00] sm:$0xff]  ;;  %v903_v33 = vld [vmem:[%s2154_s20 + $0x1e08] sm:$0xff] }
  0x3f   : > { %896 = vst [vmem:[%s2162_s21 + $0x2e8] sm:$0xff] %v895_v29  ;;  %898 = vst [vmem:[%s2162_s21 + $0x2f0] sm:$0xff] %v897_v30  ;;  %v905_v34 = vld [vmem:[%s2154_s20 + $0x1e10] sm:$0xff]  ;;  %v907_v35 = vld [vmem:[%s2154_s20 + $0x1e18] sm:$0xff] }
  0x40   : > { %900 = vst [vmem:[%s2162_s21 + $0x2f8] sm:$0xff] %v899_v31  ;;  %902 = vst [vmem:[%s2162_s21 + $0x300] sm:$0xff] %v901_v32  ;;  %v909_v36 = vld [vmem:[%s2154_s20 + $0x1e20] sm:$0xff]  ;;  %v911_v37 = vld [vmem:[%s2154_s20 + $0x1e28] sm:$0xff] }
  0x41   : > { %904 = vst [vmem:[%s2162_s21 + $0x308] sm:$0xff] %v903_v33  ;;  %906 = vst [vmem:[%s2162_s21 + $0x310] sm:$0xff] %v905_v34  ;;  %v913_v38 = vld [vmem:[%s2154_s20 + $0x1e30] sm:$0xff]  ;;  %v915_v39 = vld [vmem:[%s2154_s20 + $0x1e38] sm:$0xff] }
  0x42   : > { %908 = vst [vmem:[%s2162_s21 + $0x318] sm:$0xff] %v907_v35  ;;  %910 = vst [vmem:[%s2162_s21 + $0x320] sm:$0xff] %v909_v36  ;;  %v917_v40 = vld [vmem:[%s2154_s20 + $0x1e40] sm:$0xff]  ;;  %v919_v41 = vld [vmem:[%s2154_s20 + $0x1e48] sm:$0xff] }
  0x43   : > { %912 = vst [vmem:[%s2162_s21 + $0x328] sm:$0xff] %v911_v37  ;;  %914 = vst [vmem:[%s2162_s21 + $0x330] sm:$0xff] %v913_v38  ;;  %v921_v42 = vld [vmem:[%s2154_s20 + $0x1e50] sm:$0xff]  ;;  %v923_v43 = vld [vmem:[%s2154_s20 + $0x1e58] sm:$0xff] }
  0x44   : > { %916 = vst [vmem:[%s2162_s21 + $0x338] sm:$0xff] %v915_v39  ;;  %918 = vst [vmem:[%s2162_s21 + $0x340] sm:$0xff] %v917_v40  ;;  %v925_v44 = vld [vmem:[%s2154_s20 + $0x1e60] sm:$0xff]  ;;  %v927_v45 = vld [vmem:[%s2154_s20 + $0x1e68] sm:$0xff] }
  0x45   : > { %920 = vst [vmem:[%s2162_s21 + $0x348] sm:$0xff] %v919_v41  ;;  %922 = vst [vmem:[%s2162_s21 + $0x350] sm:$0xff] %v921_v42  ;;  %v929_v46 = vld [vmem:[%s2154_s20 + $0x1e70] sm:$0xff]  ;;  %v931_v47 = vld [vmem:[%s2154_s20 + $0x1e78] sm:$0xff] }
  0x46   : > { %924 = vst [vmem:[%s2162_s21 + $0x358] sm:$0xff] %v923_v43  ;;  %926 = vst [vmem:[%s2162_s21 + $0x360] sm:$0xff] %v925_v44  ;;  %v933_v48 = vld [vmem:[%s2154_s20 + $0x1e80] sm:$0xff]  ;;  %v935_v49 = vld [vmem:[%s2154_s20 + $0x1e88] sm:$0xff] }
  0x47   : > { %928 = vst [vmem:[%s2162_s21 + $0x368] sm:$0xff] %v927_v45  ;;  %930 = vst [vmem:[%s2162_s21 + $0x370] sm:$0xff] %v929_v46  ;;  %v937_v50 = vld [vmem:[%s2154_s20 + $0x1e90] sm:$0xff]  ;;  %v939_v51 = vld [vmem:[%s2154_s20 + $0x1e98] sm:$0xff] }
  0x48   : > { %932 = vst [vmem:[%s2162_s21 + $0x378] sm:$0xff] %v931_v47  ;;  %934 = vst [vmem:[%s2162_s21 + $0x380] sm:$0xff] %v933_v48  ;;  %v941_v52 = vld [vmem:[%s2154_s20 + $0x1ea0] sm:$0xff]  ;;  %v943_v53 = vld [vmem:[%s2154_s20 + $0x1ea8] sm:$0xff] }
  0x49   : > { %936 = vst [vmem:[%s2162_s21 + $0x388] sm:$0xff] %v935_v49  ;;  %938 = vst [vmem:[%s2162_s21 + $0x390] sm:$0xff] %v937_v50  ;;  %v945_v54 = vld [vmem:[%s2154_s20 + $0x1eb0] sm:$0xff]  ;;  %v947_v55 = vld [vmem:[%s2154_s20 + $0x1eb8] sm:$0xff] }
  0x4a   : > { %940 = vst [vmem:[%s2162_s21 + $0x398] sm:$0xff] %v939_v51  ;;  %942 = vst [vmem:[%s2162_s21 + $0x3a0] sm:$0xff] %v941_v52  ;;  %v949_v56 = vld [vmem:[%s2154_s20 + $0x1ec0] sm:$0xff]  ;;  %v951_v57 = vld [vmem:[%s2154_s20 + $0x1ec8] sm:$0xff] }
  0x4b   : > { %944 = vst [vmem:[%s2162_s21 + $0x3a8] sm:$0xff] %v943_v53  ;;  %946 = vst [vmem:[%s2162_s21 + $0x3b0] sm:$0xff] %v945_v54  ;;  %v953_v58 = vld [vmem:[%s2154_s20 + $0x1ed0] sm:$0xff]  ;;  %v955_v59 = vld [vmem:[%s2154_s20 + $0x1ed8] sm:$0xff] }
  0x4c   : > { %948 = vst [vmem:[%s2162_s21 + $0x3b8] sm:$0xff] %v947_v55  ;;  %950 = vst [vmem:[%s2162_s21 + $0x3c0] sm:$0xff] %v949_v56  ;;  %v957_v60 = vld [vmem:[%s2154_s20 + $0x1ee0] sm:$0xff]  ;;  %v959_v61 = vld [vmem:[%s2154_s20 + $0x1ee8] sm:$0xff] }
  0x4d   : > { %952 = vst [vmem:[%s2162_s21 + $0x3c8] sm:$0xff] %v951_v57  ;;  %954 = vst [vmem:[%s2162_s21 + $0x3d0] sm:$0xff] %v953_v58  ;;  %v961_v62 = vld [vmem:[%s2154_s20 + $0x1ef0] sm:$0xff]  ;;  %v963_v63 = vld [vmem:[%s2154_s20 + $0x1ef8] sm:$0xff] }
  0x4e   : > { %956 = vst [vmem:[%s2162_s21 + $0x3d8] sm:$0xff] %v955_v59  ;;  %958 = vst [vmem:[%s2162_s21 + $0x3e0] sm:$0xff] %v957_v60  ;;  %v965_v0 = vld [vmem:[%s2154_s20 + $0x2800] sm:$0xff]  ;;  %v967_v1 = vld [vmem:[%s2154_s20 + $0x2808] sm:$0xff] }
  0x4f   : > { %960 = vst [vmem:[%s2162_s21 + $0x3e8] sm:$0xff] %v959_v61  ;;  %962 = vst [vmem:[%s2162_s21 + $0x3f0] sm:$0xff] %v961_v62  ;;  %v969_v2 = vld [vmem:[%s2154_s20 + $0x2810] sm:$0xff]  ;;  %v971_v3 = vld [vmem:[%s2154_s20 + $0x2818] sm:$0xff] }
  0x50   : > { %964 = vst [vmem:[%s2162_s21 + $0x3f8] sm:$0xff] %v963_v63  ;;  %966 = vst [vmem:[%s2162_s21 + $0x400] sm:$0xff] %v965_v0  ;;  %v973_v4 = vld [vmem:[%s2154_s20 + $0x2820] sm:$0xff]  ;;  %v975_v5 = vld [vmem:[%s2154_s20 + $0x2828] sm:$0xff] }
  0x51   : > { %968 = vst [vmem:[%s2162_s21 + $0x408] sm:$0xff] %v967_v1  ;;  %970 = vst [vmem:[%s2162_s21 + $0x410] sm:$0xff] %v969_v2  ;;  %v977_v6 = vld [vmem:[%s2154_s20 + $0x2830] sm:$0xff]  ;;  %v979_v7 = vld [vmem:[%s2154_s20 + $0x2838] sm:$0xff] }
  0x52   : > { %972 = vst [vmem:[%s2162_s21 + $0x418] sm:$0xff] %v971_v3  ;;  %974 = vst [vmem:[%s2162_s21 + $0x420] sm:$0xff] %v973_v4  ;;  %v981_v8 = vld [vmem:[%s2154_s20 + $0x2840] sm:$0xff]  ;;  %v983_v9 = vld [vmem:[%s2154_s20 + $0x2848] sm:$0xff] }
  0x53   : > { %976 = vst [vmem:[%s2162_s21 + $0x428] sm:$0xff] %v975_v5  ;;  %978 = vst [vmem:[%s2162_s21 + $0x430] sm:$0xff] %v977_v6  ;;  %v985_v10 = vld [vmem:[%s2154_s20 + $0x2850] sm:$0xff]  ;;  %v987_v11 = vld [vmem:[%s2154_s20 + $0x2858] sm:$0xff] }
  0x54   : > { %980 = vst [vmem:[%s2162_s21 + $0x438] sm:$0xff] %v979_v7  ;;  %982 = vst [vmem:[%s2162_s21 + $0x440] sm:$0xff] %v981_v8  ;;  %v989_v12 = vld [vmem:[%s2154_s20 + $0x2860] sm:$0xff]  ;;  %v991_v13 = vld [vmem:[%s2154_s20 + $0x2868] sm:$0xff] }
  0x55   : > { %984 = vst [vmem:[%s2162_s21 + $0x448] sm:$0xff] %v983_v9  ;;  %986 = vst [vmem:[%s2162_s21 + $0x450] sm:$0xff] %v985_v10  ;;  %v993_v14 = vld [vmem:[%s2154_s20 + $0x2870] sm:$0xff]  ;;  %v995_v15 = vld [vmem:[%s2154_s20 + $0x2878] sm:$0xff] }
  0x56   : > { %988 = vst [vmem:[%s2162_s21 + $0x458] sm:$0xff] %v987_v11  ;;  %990 = vst [vmem:[%s2162_s21 + $0x460] sm:$0xff] %v989_v12  ;;  %v997_v16 = vld [vmem:[%s2154_s20 + $0x2880] sm:$0xff]  ;;  %v999_v17 = vld [vmem:[%s2154_s20 + $0x2888] sm:$0xff] }
  0x57   : > { %992 = vst [vmem:[%s2162_s21 + $0x468] sm:$0xff] %v991_v13  ;;  %994 = vst [vmem:[%s2162_s21 + $0x470] sm:$0xff] %v993_v14  ;;  %v1001_v18 = vld [vmem:[%s2154_s20 + $0x2890] sm:$0xff]  ;;  %v1003_v19 = vld [vmem:[%s2154_s20 + $0x2898] sm:$0xff] }
  0x58   : > { %996 = vst [vmem:[%s2162_s21 + $0x478] sm:$0xff] %v995_v15  ;;  %998 = vst [vmem:[%s2162_s21 + $0x480] sm:$0xff] %v997_v16  ;;  %v1005_v20 = vld [vmem:[%s2154_s20 + $0x28a0] sm:$0xff]  ;;  %v1007_v21 = vld [vmem:[%s2154_s20 + $0x28a8] sm:$0xff] }
  0x59   : > { %1000 = vst [vmem:[%s2162_s21 + $0x488] sm:$0xff] %v999_v17  ;;  %1002 = vst [vmem:[%s2162_s21 + $0x490] sm:$0xff] %v1001_v18  ;;  %v1009_v22 = vld [vmem:[%s2154_s20 + $0x28b0] sm:$0xff]  ;;  %v1011_v23 = vld [vmem:[%s2154_s20 + $0x28b8] sm:$0xff] }
  0x5a   : > { %1004 = vst [vmem:[%s2162_s21 + $0x498] sm:$0xff] %v1003_v19  ;;  %1006 = vst [vmem:[%s2162_s21 + $0x4a0] sm:$0xff] %v1005_v20  ;;  %v1013_v24 = vld [vmem:[%s2154_s20 + $0x28c0] sm:$0xff]  ;;  %v1015_v25 = vld [vmem:[%s2154_s20 + $0x28c8] sm:$0xff] }
  0x5b   : > { %1008 = vst [vmem:[%s2162_s21 + $0x4a8] sm:$0xff] %v1007_v21  ;;  %1010 = vst [vmem:[%s2162_s21 + $0x4b0] sm:$0xff] %v1009_v22  ;;  %v1017_v26 = vld [vmem:[%s2154_s20 + $0x28d0] sm:$0xff]  ;;  %v1019_v27 = vld [vmem:[%s2154_s20 + $0x28d8] sm:$0xff] }
  0x5c   : > { %1012 = vst [vmem:[%s2162_s21 + $0x4b8] sm:$0xff] %v1011_v23  ;;  %1014 = vst [vmem:[%s2162_s21 + $0x4c0] sm:$0xff] %v1013_v24  ;;  %v1021_v28 = vld [vmem:[%s2154_s20 + $0x28e0] sm:$0xff]  ;;  %v1023_v29 = vld [vmem:[%s2154_s20 + $0x28e8] sm:$0xff] }
  0x5d   : > { %1016 = vst [vmem:[%s2162_s21 + $0x4c8] sm:$0xff] %v1015_v25  ;;  %1018 = vst [vmem:[%s2162_s21 + $0x4d0] sm:$0xff] %v1017_v26  ;;  %v1025_v30 = vld [vmem:[%s2154_s20 + $0x28f0] sm:$0xff]  ;;  %v1027_v31 = vld [vmem:[%s2154_s20 + $0x28f8] sm:$0xff] }
  0x5e   : > { %1020 = vst [vmem:[%s2162_s21 + $0x4d8] sm:$0xff] %v1019_v27  ;;  %1022 = vst [vmem:[%s2162_s21 + $0x4e0] sm:$0xff] %v1021_v28  ;;  %v1029_v32 = vld [vmem:[%s2154_s20 + $0x3200] sm:$0xff]  ;;  %v1031_v33 = vld [vmem:[%s2154_s20 + $0x3208] sm:$0xff] }
  0x5f   : > { %1024 = vst [vmem:[%s2162_s21 + $0x4e8] sm:$0xff] %v1023_v29  ;;  %1026 = vst [vmem:[%s2162_s21 + $0x4f0] sm:$0xff] %v1025_v30  ;;  %v1033_v34 = vld [vmem:[%s2154_s20 + $0x3210] sm:$0xff]  ;;  %v1035_v35 = vld [vmem:[%s2154_s20 + $0x3218] sm:$0xff] }
  0x60   : > { %1028 = vst [vmem:[%s2162_s21 + $0x4f8] sm:$0xff] %v1027_v31  ;;  %1030 = vst [vmem:[%s2162_s21 + $0x500] sm:$0xff] %v1029_v32  ;;  %v1037_v36 = vld [vmem:[%s2154_s20 + $0x3220] sm:$0xff]  ;;  %v1039_v37 = vld [vmem:[%s2154_s20 + $0x3228] sm:$0xff] }
  0x61   : > { %1032 = vst [vmem:[%s2162_s21 + $0x508] sm:$0xff] %v1031_v33  ;;  %1034 = vst [vmem:[%s2162_s21 + $0x510] sm:$0xff] %v1033_v34  ;;  %v1041_v38 = vld [vmem:[%s2154_s20 + $0x3230] sm:$0xff]  ;;  %v1043_v39 = vld [vmem:[%s2154_s20 + $0x3238] sm:$0xff] }
  0x62   : > { %1036 = vst [vmem:[%s2162_s21 + $0x518] sm:$0xff] %v1035_v35  ;;  %1038 = vst [vmem:[%s2162_s21 + $0x520] sm:$0xff] %v1037_v36  ;;  %v1045_v40 = vld [vmem:[%s2154_s20 + $0x3240] sm:$0xff]  ;;  %v1047_v41 = vld [vmem:[%s2154_s20 + $0x3248] sm:$0xff] }
  0x63   : > { %1040 = vst [vmem:[%s2162_s21 + $0x528] sm:$0xff] %v1039_v37  ;;  %1042 = vst [vmem:[%s2162_s21 + $0x530] sm:$0xff] %v1041_v38  ;;  %v1049_v42 = vld [vmem:[%s2154_s20 + $0x3250] sm:$0xff]  ;;  %v1051_v43 = vld [vmem:[%s2154_s20 + $0x3258] sm:$0xff] }
  0x64   : > { %1044 = vst [vmem:[%s2162_s21 + $0x538] sm:$0xff] %v1043_v39  ;;  %1046 = vst [vmem:[%s2162_s21 + $0x540] sm:$0xff] %v1045_v40  ;;  %v1053_v44 = vld [vmem:[%s2154_s20 + $0x3260] sm:$0xff]  ;;  %v1055_v45 = vld [vmem:[%s2154_s20 + $0x3268] sm:$0xff] }
  0x65   : > { %1048 = vst [vmem:[%s2162_s21 + $0x548] sm:$0xff] %v1047_v41  ;;  %1050 = vst [vmem:[%s2162_s21 + $0x550] sm:$0xff] %v1049_v42  ;;  %v1057_v46 = vld [vmem:[%s2154_s20 + $0x3270] sm:$0xff]  ;;  %v1059_v47 = vld [vmem:[%s2154_s20 + $0x3278] sm:$0xff] }
  0x66   : > { %1052 = vst [vmem:[%s2162_s21 + $0x558] sm:$0xff] %v1051_v43  ;;  %1054 = vst [vmem:[%s2162_s21 + $0x560] sm:$0xff] %v1053_v44  ;;  %v1061_v48 = vld [vmem:[%s2154_s20 + $0x3280] sm:$0xff]  ;;  %v1063_v49 = vld [vmem:[%s2154_s20 + $0x3288] sm:$0xff] }
  0x67   : > { %1056 = vst [vmem:[%s2162_s21 + $0x568] sm:$0xff] %v1055_v45  ;;  %1058 = vst [vmem:[%s2162_s21 + $0x570] sm:$0xff] %v1057_v46  ;;  %v1065_v50 = vld [vmem:[%s2154_s20 + $0x3290] sm:$0xff]  ;;  %v1067_v51 = vld [vmem:[%s2154_s20 + $0x3298] sm:$0xff] }
  0x68   : > { %1060 = vst [vmem:[%s2162_s21 + $0x578] sm:$0xff] %v1059_v47  ;;  %1062 = vst [vmem:[%s2162_s21 + $0x580] sm:$0xff] %v1061_v48  ;;  %v1069_v52 = vld [vmem:[%s2154_s20 + $0x32a0] sm:$0xff]  ;;  %v1071_v53 = vld [vmem:[%s2154_s20 + $0x32a8] sm:$0xff] }
  0x69   : > { %1064 = vst [vmem:[%s2162_s21 + $0x588] sm:$0xff] %v1063_v49  ;;  %1066 = vst [vmem:[%s2162_s21 + $0x590] sm:$0xff] %v1065_v50  ;;  %v1073_v54 = vld [vmem:[%s2154_s20 + $0x32b0] sm:$0xff]  ;;  %v1075_v55 = vld [vmem:[%s2154_s20 + $0x32b8] sm:$0xff] }
  0x6a   : > { %1068 = vst [vmem:[%s2162_s21 + $0x598] sm:$0xff] %v1067_v51  ;;  %1070 = vst [vmem:[%s2162_s21 + $0x5a0] sm:$0xff] %v1069_v52  ;;  %v1077_v56 = vld [vmem:[%s2154_s20 + $0x32c0] sm:$0xff]  ;;  %v1079_v57 = vld [vmem:[%s2154_s20 + $0x32c8] sm:$0xff] }
  0x6b   : > { %1072 = vst [vmem:[%s2162_s21 + $0x5a8] sm:$0xff] %v1071_v53  ;;  %1074 = vst [vmem:[%s2162_s21 + $0x5b0] sm:$0xff] %v1073_v54  ;;  %v1081_v58 = vld [vmem:[%s2154_s20 + $0x32d0] sm:$0xff]  ;;  %v1083_v59 = vld [vmem:[%s2154_s20 + $0x32d8] sm:$0xff] }
  0x6c   : > { %1076 = vst [vmem:[%s2162_s21 + $0x5b8] sm:$0xff] %v1075_v55  ;;  %1078 = vst [vmem:[%s2162_s21 + $0x5c0] sm:$0xff] %v1077_v56  ;;  %v1085_v60 = vld [vmem:[%s2154_s20 + $0x32e0] sm:$0xff]  ;;  %v1087_v61 = vld [vmem:[%s2154_s20 + $0x32e8] sm:$0xff] }
  0x6d   : > { %1080 = vst [vmem:[%s2162_s21 + $0x5c8] sm:$0xff] %v1079_v57  ;;  %1082 = vst [vmem:[%s2162_s21 + $0x5d0] sm:$0xff] %v1081_v58  ;;  %v1089_v62 = vld [vmem:[%s2154_s20 + $0x32f0] sm:$0xff]  ;;  %v1091_v63 = vld [vmem:[%s2154_s20 + $0x32f8] sm:$0xff] }
  0x6e   : > { %1084 = vst [vmem:[%s2162_s21 + $0x5d8] sm:$0xff] %v1083_v59  ;;  %1086 = vst [vmem:[%s2162_s21 + $0x5e0] sm:$0xff] %v1085_v60  ;;  %v1093_v0 = vld [vmem:[%s2154_s20 + $0x3c00] sm:$0xff]  ;;  %v1095_v1 = vld [vmem:[%s2154_s20 + $0x3c08] sm:$0xff] }
  0x6f   : > { %1088 = vst [vmem:[%s2162_s21 + $0x5e8] sm:$0xff] %v1087_v61  ;;  %1090 = vst [vmem:[%s2162_s21 + $0x5f0] sm:$0xff] %v1089_v62  ;;  %v1097_v2 = vld [vmem:[%s2154_s20 + $0x3c10] sm:$0xff]  ;;  %v1099_v3 = vld [vmem:[%s2154_s20 + $0x3c18] sm:$0xff] }
  0x70   : > { %1092 = vst [vmem:[%s2162_s21 + $0x5f8] sm:$0xff] %v1091_v63  ;;  %1094 = vst [vmem:[%s2162_s21 + $0x600] sm:$0xff] %v1093_v0  ;;  %v1101_v4 = vld [vmem:[%s2154_s20 + $0x3c20] sm:$0xff]  ;;  %v1103_v5 = vld [vmem:[%s2154_s20 + $0x3c28] sm:$0xff] }
  0x71   : > { %1096 = vst [vmem:[%s2162_s21 + $0x608] sm:$0xff] %v1095_v1  ;;  %1098 = vst [vmem:[%s2162_s21 + $0x610] sm:$0xff] %v1097_v2  ;;  %v1105_v6 = vld [vmem:[%s2154_s20 + $0x3c30] sm:$0xff]  ;;  %v1107_v7 = vld [vmem:[%s2154_s20 + $0x3c38] sm:$0xff] }
  0x72   : > { %1100 = vst [vmem:[%s2162_s21 + $0x618] sm:$0xff] %v1099_v3  ;;  %1102 = vst [vmem:[%s2162_s21 + $0x620] sm:$0xff] %v1101_v4  ;;  %v1109_v8 = vld [vmem:[%s2154_s20 + $0x3c40] sm:$0xff]  ;;  %v1111_v9 = vld [vmem:[%s2154_s20 + $0x3c48] sm:$0xff] }
  0x73   : > { %1104 = vst [vmem:[%s2162_s21 + $0x628] sm:$0xff] %v1103_v5  ;;  %1106 = vst [vmem:[%s2162_s21 + $0x630] sm:$0xff] %v1105_v6  ;;  %v1113_v10 = vld [vmem:[%s2154_s20 + $0x3c50] sm:$0xff]  ;;  %v1115_v11 = vld [vmem:[%s2154_s20 + $0x3c58] sm:$0xff] }
  0x74   : > { %1108 = vst [vmem:[%s2162_s21 + $0x638] sm:$0xff] %v1107_v7  ;;  %1110 = vst [vmem:[%s2162_s21 + $0x640] sm:$0xff] %v1109_v8  ;;  %v1117_v12 = vld [vmem:[%s2154_s20 + $0x3c60] sm:$0xff]  ;;  %v1119_v13 = vld [vmem:[%s2154_s20 + $0x3c68] sm:$0xff] }
  0x75   : > { %1112 = vst [vmem:[%s2162_s21 + $0x648] sm:$0xff] %v1111_v9  ;;  %1114 = vst [vmem:[%s2162_s21 + $0x650] sm:$0xff] %v1113_v10  ;;  %v1121_v14 = vld [vmem:[%s2154_s20 + $0x3c70] sm:$0xff]  ;;  %v1123_v15 = vld [vmem:[%s2154_s20 + $0x3c78] sm:$0xff] }
  0x76   : > { %1116 = vst [vmem:[%s2162_s21 + $0x658] sm:$0xff] %v1115_v11  ;;  %1118 = vst [vmem:[%s2162_s21 + $0x660] sm:$0xff] %v1117_v12  ;;  %v1125_v16 = vld [vmem:[%s2154_s20 + $0x3c80] sm:$0xff]  ;;  %v1127_v17 = vld [vmem:[%s2154_s20 + $0x3c88] sm:$0xff] }
  0x77   : > { %1120 = vst [vmem:[%s2162_s21 + $0x668] sm:$0xff] %v1119_v13  ;;  %1122 = vst [vmem:[%s2162_s21 + $0x670] sm:$0xff] %v1121_v14  ;;  %v1129_v18 = vld [vmem:[%s2154_s20 + $0x3c90] sm:$0xff]  ;;  %v1131_v19 = vld [vmem:[%s2154_s20 + $0x3c98] sm:$0xff] }
  0x78   : > { %1124 = vst [vmem:[%s2162_s21 + $0x678] sm:$0xff] %v1123_v15  ;;  %1126 = vst [vmem:[%s2162_s21 + $0x680] sm:$0xff] %v1125_v16  ;;  %v1133_v20 = vld [vmem:[%s2154_s20 + $0x3ca0] sm:$0xff]  ;;  %v1135_v21 = vld [vmem:[%s2154_s20 + $0x3ca8] sm:$0xff] }
  0x79   : > { %1128 = vst [vmem:[%s2162_s21 + $0x688] sm:$0xff] %v1127_v17  ;;  %1130 = vst [vmem:[%s2162_s21 + $0x690] sm:$0xff] %v1129_v18  ;;  %v1137_v22 = vld [vmem:[%s2154_s20 + $0x3cb0] sm:$0xff]  ;;  %v1139_v23 = vld [vmem:[%s2154_s20 + $0x3cb8] sm:$0xff] }
  0x7a   : > { %1132 = vst [vmem:[%s2162_s21 + $0x698] sm:$0xff] %v1131_v19  ;;  %1134 = vst [vmem:[%s2162_s21 + $0x6a0] sm:$0xff] %v1133_v20  ;;  %v1141_v24 = vld [vmem:[%s2154_s20 + $0x3cc0] sm:$0xff]  ;;  %v1143_v25 = vld [vmem:[%s2154_s20 + $0x3cc8] sm:$0xff] }
  0x7b   : > { %1136 = vst [vmem:[%s2162_s21 + $0x6a8] sm:$0xff] %v1135_v21  ;;  %1138 = vst [vmem:[%s2162_s21 + $0x6b0] sm:$0xff] %v1137_v22  ;;  %v1145_v26 = vld [vmem:[%s2154_s20 + $0x3cd0] sm:$0xff]  ;;  %v1147_v27 = vld [vmem:[%s2154_s20 + $0x3cd8] sm:$0xff] }
  0x7c   : > { %1140 = vst [vmem:[%s2162_s21 + $0x6b8] sm:$0xff] %v1139_v23  ;;  %1142 = vst [vmem:[%s2162_s21 + $0x6c0] sm:$0xff] %v1141_v24  ;;  %v1149_v28 = vld [vmem:[%s2154_s20 + $0x3ce0] sm:$0xff]  ;;  %v1151_v29 = vld [vmem:[%s2154_s20 + $0x3ce8] sm:$0xff] }
  0x7d   : > { %1144 = vst [vmem:[%s2162_s21 + $0x6c8] sm:$0xff] %v1143_v25  ;;  %1146 = vst [vmem:[%s2162_s21 + $0x6d0] sm:$0xff] %v1145_v26  ;;  %v1153_v30 = vld [vmem:[%s2154_s20 + $0x3cf0] sm:$0xff]  ;;  %v1155_v31 = vld [vmem:[%s2154_s20 + $0x3cf8] sm:$0xff] }
  0x7e   : > { %1148 = vst [vmem:[%s2162_s21 + $0x6d8] sm:$0xff] %v1147_v27  ;;  %1150 = vst [vmem:[%s2162_s21 + $0x6e0] sm:$0xff] %v1149_v28  ;;  %v1157_v32 = vld [vmem:[%s2154_s20 + $0x4600] sm:$0xff]  ;;  %v1159_v33 = vld [vmem:[%s2154_s20 + $0x4608] sm:$0xff] }
  0x7f   : > { %1152 = vst [vmem:[%s2162_s21 + $0x6e8] sm:$0xff] %v1151_v29  ;;  %1154 = vst [vmem:[%s2162_s21 + $0x6f0] sm:$0xff] %v1153_v30  ;;  %v1161_v34 = vld [vmem:[%s2154_s20 + $0x4610] sm:$0xff]  ;;  %v1163_v35 = vld [vmem:[%s2154_s20 + $0x4618] sm:$0xff] }
  0x80   : > { %1156 = vst [vmem:[%s2162_s21 + $0x6f8] sm:$0xff] %v1155_v31  ;;  %1158 = vst [vmem:[%s2162_s21 + $0x700] sm:$0xff] %v1157_v32  ;;  %v1165_v36 = vld [vmem:[%s2154_s20 + $0x4620] sm:$0xff]  ;;  %v1167_v37 = vld [vmem:[%s2154_s20 + $0x4628] sm:$0xff] }
  0x81   : > { %1160 = vst [vmem:[%s2162_s21 + $0x708] sm:$0xff] %v1159_v33  ;;  %1162 = vst [vmem:[%s2162_s21 + $0x710] sm:$0xff] %v1161_v34  ;;  %v1169_v38 = vld [vmem:[%s2154_s20 + $0x4630] sm:$0xff]  ;;  %v1171_v39 = vld [vmem:[%s2154_s20 + $0x4638] sm:$0xff] }
  0x82   : > { %1164 = vst [vmem:[%s2162_s21 + $0x718] sm:$0xff] %v1163_v35  ;;  %1166 = vst [vmem:[%s2162_s21 + $0x720] sm:$0xff] %v1165_v36  ;;  %v1173_v40 = vld [vmem:[%s2154_s20 + $0x4640] sm:$0xff]  ;;  %v1175_v41 = vld [vmem:[%s2154_s20 + $0x4648] sm:$0xff] }
  0x83   : > { %1168 = vst [vmem:[%s2162_s21 + $0x728] sm:$0xff] %v1167_v37  ;;  %1170 = vst [vmem:[%s2162_s21 + $0x730] sm:$0xff] %v1169_v38  ;;  %v1177_v42 = vld [vmem:[%s2154_s20 + $0x4650] sm:$0xff]  ;;  %v1179_v43 = vld [vmem:[%s2154_s20 + $0x4658] sm:$0xff] }
  0x84   : > { %1172 = vst [vmem:[%s2162_s21 + $0x738] sm:$0xff] %v1171_v39  ;;  %1174 = vst [vmem:[%s2162_s21 + $0x740] sm:$0xff] %v1173_v40  ;;  %v1181_v44 = vld [vmem:[%s2154_s20 + $0x4660] sm:$0xff]  ;;  %v1183_v45 = vld [vmem:[%s2154_s20 + $0x4668] sm:$0xff] }
  0x85   : > { %1176 = vst [vmem:[%s2162_s21 + $0x748] sm:$0xff] %v1175_v41  ;;  %1178 = vst [vmem:[%s2162_s21 + $0x750] sm:$0xff] %v1177_v42  ;;  %v1185_v46 = vld [vmem:[%s2154_s20 + $0x4670] sm:$0xff]  ;;  %v1187_v47 = vld [vmem:[%s2154_s20 + $0x4678] sm:$0xff] }
  0x86   : > { %1180 = vst [vmem:[%s2162_s21 + $0x758] sm:$0xff] %v1179_v43  ;;  %1182 = vst [vmem:[%s2162_s21 + $0x760] sm:$0xff] %v1181_v44  ;;  %v1189_v48 = vld [vmem:[%s2154_s20 + $0x4680] sm:$0xff]  ;;  %v1191_v49 = vld [vmem:[%s2154_s20 + $0x4688] sm:$0xff] }
  0x87   : > { %1184 = vst [vmem:[%s2162_s21 + $0x768] sm:$0xff] %v1183_v45  ;;  %1186 = vst [vmem:[%s2162_s21 + $0x770] sm:$0xff] %v1185_v46  ;;  %v1193_v50 = vld [vmem:[%s2154_s20 + $0x4690] sm:$0xff]  ;;  %v1195_v51 = vld [vmem:[%s2154_s20 + $0x4698] sm:$0xff] }
  0x88   : > { %1188 = vst [vmem:[%s2162_s21 + $0x778] sm:$0xff] %v1187_v47  ;;  %1190 = vst [vmem:[%s2162_s21 + $0x780] sm:$0xff] %v1189_v48  ;;  %v1197_v52 = vld [vmem:[%s2154_s20 + $0x46a0] sm:$0xff]  ;;  %v1199_v53 = vld [vmem:[%s2154_s20 + $0x46a8] sm:$0xff] }
  0x89   : > { %1192 = vst [vmem:[%s2162_s21 + $0x788] sm:$0xff] %v1191_v49  ;;  %1194 = vst [vmem:[%s2162_s21 + $0x790] sm:$0xff] %v1193_v50  ;;  %v1201_v54 = vld [vmem:[%s2154_s20 + $0x46b0] sm:$0xff]  ;;  %v1203_v55 = vld [vmem:[%s2154_s20 + $0x46b8] sm:$0xff] }
  0x8a   : > { %1196 = vst [vmem:[%s2162_s21 + $0x798] sm:$0xff] %v1195_v51  ;;  %1198 = vst [vmem:[%s2162_s21 + $0x7a0] sm:$0xff] %v1197_v52  ;;  %v1205_v56 = vld [vmem:[%s2154_s20 + $0x46c0] sm:$0xff]  ;;  %v1207_v57 = vld [vmem:[%s2154_s20 + $0x46c8] sm:$0xff] }
  0x8b   : > { %1200 = vst [vmem:[%s2162_s21 + $0x7a8] sm:$0xff] %v1199_v53  ;;  %1202 = vst [vmem:[%s2162_s21 + $0x7b0] sm:$0xff] %v1201_v54  ;;  %v1209_v58 = vld [vmem:[%s2154_s20 + $0x46d0] sm:$0xff]  ;;  %v1211_v59 = vld [vmem:[%s2154_s20 + $0x46d8] sm:$0xff] }
  0x8c   : > { %1204 = vst [vmem:[%s2162_s21 + $0x7b8] sm:$0xff] %v1203_v55  ;;  %1206 = vst [vmem:[%s2162_s21 + $0x7c0] sm:$0xff] %v1205_v56  ;;  %v1213_v60 = vld [vmem:[%s2154_s20 + $0x46e0] sm:$0xff]  ;;  %v1215_v61 = vld [vmem:[%s2154_s20 + $0x46e8] sm:$0xff] }
  0x8d   : > { %1208 = vst [vmem:[%s2162_s21 + $0x7c8] sm:$0xff] %v1207_v57  ;;  %1210 = vst [vmem:[%s2162_s21 + $0x7d0] sm:$0xff] %v1209_v58  ;;  %v1217_v62 = vld [vmem:[%s2154_s20 + $0x46f0] sm:$0xff]  ;;  %v1219_v63 = vld [vmem:[%s2154_s20 + $0x46f8] sm:$0xff] }
  0x8e   : > { %1212 = vst [vmem:[%s2162_s21 + $0x7d8] sm:$0xff] %v1211_v59  ;;  %1214 = vst [vmem:[%s2162_s21 + $0x7e0] sm:$0xff] %v1213_v60  ;;  %v1221_v0 = vld [vmem:[%s2154_s20 + $0x5000] sm:$0xff]  ;;  %v1223_v1 = vld [vmem:[%s2154_s20 + $0x5008] sm:$0xff] }
  0x8f   : > { %1216 = vst [vmem:[%s2162_s21 + $0x7e8] sm:$0xff] %v1215_v61  ;;  %1218 = vst [vmem:[%s2162_s21 + $0x7f0] sm:$0xff] %v1217_v62  ;;  %v1225_v2 = vld [vmem:[%s2154_s20 + $0x5010] sm:$0xff]  ;;  %v1227_v3 = vld [vmem:[%s2154_s20 + $0x5018] sm:$0xff] }
  0x90   : > { %1220 = vst [vmem:[%s2162_s21 + $0x7f8] sm:$0xff] %v1219_v63  ;;  %1222 = vst [vmem:[%s2162_s21 + $0x800] sm:$0xff] %v1221_v0  ;;  %v1229_v4 = vld [vmem:[%s2154_s20 + $0x5020] sm:$0xff]  ;;  %v1231_v5 = vld [vmem:[%s2154_s20 + $0x5028] sm:$0xff] }
  0x91   : > { %1224 = vst [vmem:[%s2162_s21 + $0x808] sm:$0xff] %v1223_v1  ;;  %1226 = vst [vmem:[%s2162_s21 + $0x810] sm:$0xff] %v1225_v2  ;;  %v1233_v6 = vld [vmem:[%s2154_s20 + $0x5030] sm:$0xff]  ;;  %v1235_v7 = vld [vmem:[%s2154_s20 + $0x5038] sm:$0xff] }
  0x92   : > { %1228 = vst [vmem:[%s2162_s21 + $0x818] sm:$0xff] %v1227_v3  ;;  %1230 = vst [vmem:[%s2162_s21 + $0x820] sm:$0xff] %v1229_v4  ;;  %v1237_v8 = vld [vmem:[%s2154_s20 + $0x5040] sm:$0xff]  ;;  %v1239_v9 = vld [vmem:[%s2154_s20 + $0x5048] sm:$0xff] }
  0x93   : > { %1232 = vst [vmem:[%s2162_s21 + $0x828] sm:$0xff] %v1231_v5  ;;  %1234 = vst [vmem:[%s2162_s21 + $0x830] sm:$0xff] %v1233_v6  ;;  %v1241_v10 = vld [vmem:[%s2154_s20 + $0x5050] sm:$0xff]  ;;  %v1243_v11 = vld [vmem:[%s2154_s20 + $0x5058] sm:$0xff] }
  0x94   : > { %1236 = vst [vmem:[%s2162_s21 + $0x838] sm:$0xff] %v1235_v7  ;;  %1238 = vst [vmem:[%s2162_s21 + $0x840] sm:$0xff] %v1237_v8  ;;  %v1245_v12 = vld [vmem:[%s2154_s20 + $0x5060] sm:$0xff]  ;;  %v1247_v13 = vld [vmem:[%s2154_s20 + $0x5068] sm:$0xff] }
  0x95   : > { %1240 = vst [vmem:[%s2162_s21 + $0x848] sm:$0xff] %v1239_v9  ;;  %1242 = vst [vmem:[%s2162_s21 + $0x850] sm:$0xff] %v1241_v10  ;;  %v1249_v14 = vld [vmem:[%s2154_s20 + $0x5070] sm:$0xff]  ;;  %v1251_v15 = vld [vmem:[%s2154_s20 + $0x5078] sm:$0xff] }
  0x96   : > { %1244 = vst [vmem:[%s2162_s21 + $0x858] sm:$0xff] %v1243_v11  ;;  %1246 = vst [vmem:[%s2162_s21 + $0x860] sm:$0xff] %v1245_v12  ;;  %v1253_v16 = vld [vmem:[%s2154_s20 + $0x5080] sm:$0xff]  ;;  %v1255_v17 = vld [vmem:[%s2154_s20 + $0x5088] sm:$0xff] }
  0x97   : > { %1248 = vst [vmem:[%s2162_s21 + $0x868] sm:$0xff] %v1247_v13  ;;  %1250 = vst [vmem:[%s2162_s21 + $0x870] sm:$0xff] %v1249_v14  ;;  %v1257_v18 = vld [vmem:[%s2154_s20 + $0x5090] sm:$0xff]  ;;  %v1259_v19 = vld [vmem:[%s2154_s20 + $0x5098] sm:$0xff] }
  0x98   : > { %1252 = vst [vmem:[%s2162_s21 + $0x878] sm:$0xff] %v1251_v15  ;;  %1254 = vst [vmem:[%s2162_s21 + $0x880] sm:$0xff] %v1253_v16  ;;  %v1261_v20 = vld [vmem:[%s2154_s20 + $0x50a0] sm:$0xff]  ;;  %v1263_v21 = vld [vmem:[%s2154_s20 + $0x50a8] sm:$0xff] }
  0x99   : > { %1256 = vst [vmem:[%s2162_s21 + $0x888] sm:$0xff] %v1255_v17  ;;  %1258 = vst [vmem:[%s2162_s21 + $0x890] sm:$0xff] %v1257_v18  ;;  %v1265_v22 = vld [vmem:[%s2154_s20 + $0x50b0] sm:$0xff]  ;;  %v1267_v23 = vld [vmem:[%s2154_s20 + $0x50b8] sm:$0xff] }
  0x9a   : > { %1260 = vst [vmem:[%s2162_s21 + $0x898] sm:$0xff] %v1259_v19  ;;  %1262 = vst [vmem:[%s2162_s21 + $0x8a0] sm:$0xff] %v1261_v20  ;;  %v1269_v24 = vld [vmem:[%s2154_s20 + $0x50c0] sm:$0xff]  ;;  %v1271_v25 = vld [vmem:[%s2154_s20 + $0x50c8] sm:$0xff] }
  0x9b   : > { %1264 = vst [vmem:[%s2162_s21 + $0x8a8] sm:$0xff] %v1263_v21  ;;  %1266 = vst [vmem:[%s2162_s21 + $0x8b0] sm:$0xff] %v1265_v22  ;;  %v1273_v26 = vld [vmem:[%s2154_s20 + $0x50d0] sm:$0xff]  ;;  %v1275_v27 = vld [vmem:[%s2154_s20 + $0x50d8] sm:$0xff] }
  0x9c   : > { %1268 = vst [vmem:[%s2162_s21 + $0x8b8] sm:$0xff] %v1267_v23  ;;  %1270 = vst [vmem:[%s2162_s21 + $0x8c0] sm:$0xff] %v1269_v24  ;;  %v1277_v28 = vld [vmem:[%s2154_s20 + $0x50e0] sm:$0xff]  ;;  %v1279_v29 = vld [vmem:[%s2154_s20 + $0x50e8] sm:$0xff] }
  0x9d   : > { %1272 = vst [vmem:[%s2162_s21 + $0x8c8] sm:$0xff] %v1271_v25  ;;  %1274 = vst [vmem:[%s2162_s21 + $0x8d0] sm:$0xff] %v1273_v26  ;;  %v1281_v30 = vld [vmem:[%s2154_s20 + $0x50f0] sm:$0xff]  ;;  %v1283_v31 = vld [vmem:[%s2154_s20 + $0x50f8] sm:$0xff] }
  0x9e   : > { %1276 = vst [vmem:[%s2162_s21 + $0x8d8] sm:$0xff] %v1275_v27  ;;  %1278 = vst [vmem:[%s2162_s21 + $0x8e0] sm:$0xff] %v1277_v28 }
  0x9f   : > { %1280 = vst [vmem:[%s2162_s21 + $0x8e8] sm:$0xff] %v1279_v29  ;;  %1282 = vst [vmem:[%s2162_s21 + $0x8f0] sm:$0xff] %v1281_v30 }
  0xa0   : > { %1284 = vst [vmem:[%s2162_s21 + $0x8f8] sm:$0xff] %v1283_v31 }
  0xa1 PF: > { %p2010_p6 = scmp.ge.s32.totalorder %s2099_s10, 1  ;;  %p1289_p7 = scmp.lt.s32.totalorder %s2099_s10, 11 }
  0xa3   : > { %p1290_p8 = pnand %p2010_p6, %p1289_p7 }
  0xa4   : > { %s1296_s22 = sand.u32 (!%p1290_p8), 1, %s2083_s6   ;;  %s2011_s24 = sshll.u32 (!%p1290_p8), %s2091_s8, 5 }
  0xa5   : > { %1293 = sbr.rel (%p1290_p8) target bundleno = 279 (0x117), region = 58  ;;  %p2744_p9 = scmp.lt.s32.totalorder (!%p1290_p8), %s2011_s24, 319 }
  0xa6   : > { %s2020_s23 = smul.u32 (!%p1290_p8), 2304, %s1296_s22 }
  0xa8   : > { %s2738_s25 = scalar_lea.vmem (!%p1290_p8), [#allocation2], %s2020_s23 }
  0xaa   : > { %v1334_v32 = vld [vmem:[%s2738_s25] sm:$0xff]  ;;  %v1335_v38 = vld [vmem:[%s2738_s25 + $0x8] sm:$0xff]  ;;  %v1336_v47 = vld [vmem:[%s2738_s25 + $0x10] sm:$0xff]  ;;  %s3099_s24 = smov (!%p2744_p9, %s2011_s24), 319 }
  0xab   : > { %v1366_v33 = vld [vmem:[%s2738_s25 + $0x100] sm:$0xff]  ;;  %v1367_v39 = vld [vmem:[%s2738_s25 + $0x108] sm:$0xff]  ;;  %v1368_v48 = vld [vmem:[%s2738_s25 + $0x110] sm:$0xff]  ;;  %s2018_s27 = sshll.u32 %s3099_s24, 3 }
  0xac   : > { %v1398_v34 = vld [vmem:[%s2738_s25 + $0x200] sm:$0xff]  ;;  %v1622_v35 = vmax.bf16 %v1366_v33, %v1334_v32  ;;  %v1399_v40 = vld [vmem:[%s2738_s25 + $0x208] sm:$0xff]  ;;  %v1630_v42 = vmax.bf16 %v1367_v39, %v1335_v38  ;;  %v1400_v49 = vld [vmem:[%s2738_s25 + $0x210] sm:$0xff]  ;;  %v1638_v52 = vmax.bf16 %v1368_v48, %v1336_v47  ;;  %s2784_s30 = scalar_lea.vmem %s3090_s1, %s2018_s27 }
  0xad   : > { %v1430_v36 = vld [vmem:[%s2738_s25 + $0x300] sm:$0xff]  ;;  %v1431_v45 = vld [vmem:[%s2738_s25 + $0x308] sm:$0xff]  ;;  %v1432_v56 = vld [vmem:[%s2738_s25 + $0x310] sm:$0xff] }
  0xae   : > { %v1623_v37 = vmax.bf16 %v1622_v35, %v1398_v34  ;;  %v1462_v41 = vld [vmem:[%s2738_s25 + $0x400] sm:$0xff]  ;;  %v1631_v46 = vmax.bf16 %v1630_v42, %v1399_v40  ;;  %v1463_v51 = vld [vmem:[%s2738_s25 + $0x408] sm:$0xff]  ;;  %v1639_v58 = vmax.bf16 %v1638_v52, %v1400_v49  ;;  %v1337_v59 = vld [vmem:[%s2738_s25 + $0x18] sm:$0xff] }
  0xaf   : > { %v1494_v43 = vld [vmem:[%s2738_s25 + $0x500] sm:$0xff]  ;;  %v1495_v54 = vld [vmem:[%s2738_s25 + $0x508] sm:$0xff]  ;;  %v1369_v60 = vld [vmem:[%s2738_s25 + $0x118] sm:$0xff] }
  0xb0   : > { %v1624_v44 = vmax.bf16 %v1623_v37, %v1430_v36  ;;  %v1526_v53 = vld [vmem:[%s2738_s25 + $0x600] sm:$0xff]  ;;  %v1632_v55 = vmax.bf16 %v1631_v46, %v1431_v45  ;;  %v1401_v61 = vld [vmem:[%s2738_s25 + $0x218] sm:$0xff]  ;;  %v1464_v1 = vld [vmem:[%s2738_s25 + $0x410] sm:$0xff]  ;;  %v1646_v2 = vmax.bf16 %v1369_v60, %v1337_v59  ;;  %v1640_v6 = vmax.bf16 %v1639_v58, %v1432_v56 }
  0xb1   : > { %v1558_v62 = vld [vmem:[%s2738_s25 + $0x700] sm:$0xff]  ;;  %v1527_v4 = vld [vmem:[%s2738_s25 + $0x608] sm:$0xff]  ;;  %v1496_v5 = vld [vmem:[%s2738_s25 + $0x510] sm:$0xff] }
  0xb2   : > { %v1625_v50 = vmax.bf16 %v1624_v44, %v1462_v41  ;;  %v1590_v63 = vld [vmem:[%s2738_s25 + $0x800] sm:$0xff]  ;;  %v1633_v0 = vmax.bf16 %v1632_v55, %v1463_v51  ;;  %v1433_v7 = vld [vmem:[%s2738_s25 + $0x318] sm:$0xff]  ;;  %v1647_v9 = vmax.bf16 %v1646_v2, %v1401_v61  ;;  %v1559_v14 = vld [vmem:[%s2738_s25 + $0x708] sm:$0xff]  ;;  %v1641_v16 = vmax.bf16 %v1640_v6, %v1464_v1 }
  0xb3   : > { %v1338_v10 = vld [vmem:[%s2738_s25 + $0x20] sm:$0xff]  ;;  %v1591_v15 = vld [vmem:[%s2738_s25 + $0x808] sm:$0xff]  ;;  %v1465_v17 = vld [vmem:[%s2738_s25 + $0x418] sm:$0xff] }
  0xb4   : > { %v1626_v57 = vmax.bf16 %v1625_v50, %v1494_v43  ;;  %v1634_v8 = vmax.bf16 %v1633_v0, %v1495_v54  ;;  %v1370_v11 = vld [vmem:[%s2738_s25 + $0x120] sm:$0xff]  ;;  %v1528_v20 = vld [vmem:[%s2738_s25 + $0x610] sm:$0xff]  ;;  %v1497_v21 = vld [vmem:[%s2738_s25 + $0x518] sm:$0xff]  ;;  %v1648_v22 = vmax.bf16 %v1647_v9, %v1433_v7  ;;  %v1642_v25 = vmax.bf16 %v1641_v16, %v1496_v5 }
  0xb5   : > { %v1402_v12 = vld [vmem:[%s2738_s25 + $0x220] sm:$0xff]  ;;  %v1654_v18 = vmax.bf16 %v1370_v11, %v1338_v10  ;;  %v1339_v27 = vld [vmem:[%s2738_s25 + $0x28] sm:$0xff]  ;;  %v1560_v31 = vld [vmem:[%s2738_s25 + $0x710] sm:$0xff] }
  0xb6   : > { %v1627_v3 = vmax.bf16 %v1626_v57, %v1526_v53  ;;  %v1635_v19 = vmax.bf16 %v1634_v8, %v1527_v4  ;;  %v1434_v23 = vld [vmem:[%s2738_s25 + $0x320] sm:$0xff]  ;;  %v1371_v28 = vld [vmem:[%s2738_s25 + $0x128] sm:$0xff]  ;;  %v1592_v32 = vld [vmem:[%s2738_s25 + $0x810] sm:$0xff]  ;;  %v1649_v33 = vmax.bf16 %v1648_v22, %v1465_v17  ;;  %v1643_v36 = vmax.bf16 %v1642_v25, %v1528_v20 }
  0xb7   : > { %v1655_v26 = vmax.bf16 %v1654_v18, %v1402_v12  ;;  %v1403_v29 = vld [vmem:[%s2738_s25 + $0x228] sm:$0xff]  ;;  %v1466_v34 = vld [vmem:[%s2738_s25 + $0x420] sm:$0xff]  ;;  %v1662_v35 = vmax.bf16 %v1371_v28, %v1339_v27  ;;  %v1529_v37 = vld [vmem:[%s2738_s25 + $0x618] sm:$0xff] }
  0xb8   : > { %v1628_v13 = vmax.bf16 %v1627_v3, %v1558_v62  ;;  %v1636_v30 = vmax.bf16 %v1635_v19, %v1559_v14  ;;  %v1498_v38 = vld [vmem:[%s2738_s25 + $0x520] sm:$0xff]  ;;  %v1435_v40 = vld [vmem:[%s2738_s25 + $0x328] sm:$0xff]  ;;  %v1650_v42 = vmax.bf16 %v1649_v33, %v1497_v21  ;;  %v1340_v44 = vld [vmem:[%s2738_s25 + $0x30] sm:$0xff]  ;;  %v1644_v47 = vmax.bf16 %v1643_v36, %v1560_v31 }
  0xb9   : > { %v1656_v39 = vmax.bf16 %v1655_v26, %v1434_v23  ;;  %v1663_v43 = vmax.bf16 %v1662_v35, %v1403_v29  ;;  %v1372_v45 = vld [vmem:[%s2738_s25 + $0x130] sm:$0xff]  ;;  %v1561_v48 = vld [vmem:[%s2738_s25 + $0x718] sm:$0xff]  ;;  %v1467_v51 = vld [vmem:[%s2738_s25 + $0x428] sm:$0xff] }
  0xba   : > { %v1629_v24 = vmax.bf16 %v1628_v13, %v1590_v63  ;;  %v1637_v41 = vmax.bf16 %v1636_v30, %v1591_v15  ;;  %v1404_v46 = vld [vmem:[%s2738_s25 + $0x230] sm:$0xff]  ;;  %v1593_v49 = vld [vmem:[%s2738_s25 + $0x818] sm:$0xff]  ;;  %v1670_v52 = vmax.bf16 %v1372_v45, %v1340_v44  ;;  %v1651_v53 = vmax.bf16 %v1650_v42, %v1529_v37  ;;  %v1530_v54 = vld [vmem:[%s2738_s25 + $0x620] sm:$0xff] }
  0xbb   : > { %v1657_v50 = vmax.bf16 %v1656_v39, %v1466_v34  ;;  %v1499_v55 = vld [vmem:[%s2738_s25 + $0x528] sm:$0xff]  ;;  %v1664_v56 = vmax.bf16 %v1663_v43, %v1435_v40  ;;  %v1436_v57 = vld [vmem:[%s2738_s25 + $0x330] sm:$0xff]  ;;  %v1645_v58 = vmax.bf16 %v1644_v47, %v1592_v32  ;;  %v1341_v61 = vld [vmem:[%s2738_s25 + $0x38] sm:$0xff] }
  0xbc   : > { %1878 = vst [vmem:[%s2784_s30] sm:$0xff] %v1629_v24  ;;  %1879 = vst [vmem:[%s2784_s30 + $0x8] sm:$0xff] %v1637_v41  ;;  %v1671_v60 = vmax.bf16 %v1670_v52, %v1404_v46  ;;  %v1373_v62 = vld [vmem:[%s2738_s25 + $0x138] sm:$0xff]  ;;  %v1652_v0 = vmax.bf16 %v1651_v53, %v1561_v48  ;;  %v1562_v1 = vld [vmem:[%s2738_s25 + $0x720] sm:$0xff] }
  0xbd   : > { %v1658_v59 = vmax.bf16 %v1657_v50, %v1498_v38  ;;  %v1405_v63 = vld [vmem:[%s2738_s25 + $0x238] sm:$0xff]  ;;  %v1594_v2 = vld [vmem:[%s2738_s25 + $0x820] sm:$0xff]  ;;  %v1665_v3 = vmax.bf16 %v1664_v56, %v1467_v51  ;;  %v1468_v4 = vld [vmem:[%s2738_s25 + $0x430] sm:$0xff]  ;;  %v1678_v5 = vmax.bf16 %v1373_v62, %v1341_v61  ;;  %1880 = vst [vmem:[%s2784_s30 + $0x10] sm:$0xff] %v1645_v58 }
  0xbe   : > { %v1531_v7 = vld [vmem:[%s2738_s25 + $0x628] sm:$0xff]  ;;  %v1500_v8 = vld [vmem:[%s2738_s25 + $0x530] sm:$0xff]  ;;  %v1672_v9 = vmax.bf16 %v1671_v60, %v1436_v57  ;;  %v1437_v10 = vld [vmem:[%s2738_s25 + $0x338] sm:$0xff]  ;;  %v1653_v11 = vmax.bf16 %v1652_v0, %v1593_v49 }
  0xbf   : > { %v1659_v6 = vmax.bf16 %v1658_v59, %v1530_v54  ;;  %v1666_v12 = vmax.bf16 %v1665_v3, %v1499_v55  ;;  %v1679_v13 = vmax.bf16 %v1678_v5, %v1405_v63  ;;  %v1342_v14 = vld [vmem:[%s2738_s25 + $0x40] sm:$0xff]  ;;  %v1563_v18 = vld [vmem:[%s2738_s25 + $0x728] sm:$0xff]  ;;  %v1469_v21 = vld [vmem:[%s2738_s25 + $0x438] sm:$0xff] }
  0xc0   : > { %v1374_v15 = vld [vmem:[%s2738_s25 + $0x140] sm:$0xff]  ;;  %v1595_v19 = vld [vmem:[%s2738_s25 + $0x828] sm:$0xff]  ;;  %v1673_v20 = vmax.bf16 %v1672_v9, %v1468_v4  ;;  %1881 = vst [vmem:[%s2784_s30 + $0x18] sm:$0xff] %v1653_v11  ;;  %v1532_v24 = vld [vmem:[%s2738_s25 + $0x630] sm:$0xff] }
  0xc1   : > { %v1406_v16 = vld [vmem:[%s2738_s25 + $0x240] sm:$0xff]  ;;  %v1660_v17 = vmax.bf16 %v1659_v6, %v1562_v1  ;;  %v1686_v22 = vmax.bf16 %v1374_v15, %v1342_v14  ;;  %v1667_v23 = vmax.bf16 %v1666_v12, %v1531_v7  ;;  %v1501_v25 = vld [vmem:[%s2738_s25 + $0x538] sm:$0xff]  ;;  %v1680_v26 = vmax.bf16 %v1679_v13, %v1437_v10  ;;  %v1343_v31 = vld [vmem:[%s2738_s25 + $0x48] sm:$0xff] }
  0xc2   : > { %v1438_v27 = vld [vmem:[%s2738_s25 + $0x340] sm:$0xff]  ;;  %v1674_v29 = vmax.bf16 %v1673_v20, %v1500_v8  ;;  %v1375_v32 = vld [vmem:[%s2738_s25 + $0x148] sm:$0xff]  ;;  %v1564_v35 = vld [vmem:[%s2738_s25 + $0x730] sm:$0xff] }
  0xc3   : > { %v1661_v28 = vmax.bf16 %v1660_v17, %v1594_v2  ;;  %v1687_v30 = vmax.bf16 %v1686_v22, %v1406_v16  ;;  %v1407_v33 = vld [vmem:[%s2738_s25 + $0x248] sm:$0xff]  ;;  %v1668_v34 = vmax.bf16 %v1667_v23, %v1563_v18  ;;  %v1596_v36 = vld [vmem:[%s2738_s25 + $0x830] sm:$0xff]  ;;  %v1681_v37 = vmax.bf16 %v1680_v26, %v1469_v21  ;;  %v1470_v38 = vld [vmem:[%s2738_s25 + $0x440] sm:$0xff] }
  0xc4   : > { %v1694_v39 = vmax.bf16 %v1375_v32, %v1343_v31  ;;  %v1675_v40 = vmax.bf16 %v1674_v29, %v1532_v24  ;;  %v1533_v41 = vld [vmem:[%s2738_s25 + $0x638] sm:$0xff]  ;;  %v1502_v42 = vld [vmem:[%s2738_s25 + $0x540] sm:$0xff]  ;;  %v1439_v44 = vld [vmem:[%s2738_s25 + $0x348] sm:$0xff] }
  0xc5   : > { %1882 = vst [vmem:[%s2784_s30 + $0x20] sm:$0xff] %v1661_v28  ;;  %v1688_v43 = vmax.bf16 %v1687_v30, %v1438_v27  ;;  %v1669_v45 = vmax.bf16 %v1668_v34, %v1595_v19  ;;  %v1682_v46 = vmax.bf16 %v1681_v37, %v1501_v25  ;;  %v1344_v48 = vld [vmem:[%s2738_s25 + $0x50] sm:$0xff]  ;;  %v1565_v52 = vld [vmem:[%s2738_s25 + $0x738] sm:$0xff]  ;;  %v1471_v55 = vld [vmem:[%s2738_s25 + $0x448] sm:$0xff] }
  0xc6   : > { %v1695_v47 = vmax.bf16 %v1694_v39, %v1407_v33  ;;  %v1376_v49 = vld [vmem:[%s2738_s25 + $0x150] sm:$0xff]  ;;  %v1676_v51 = vmax.bf16 %v1675_v40, %v1564_v35  ;;  %v1597_v53 = vld [vmem:[%s2738_s25 + $0x838] sm:$0xff]  ;;  %v1534_v58 = vld [vmem:[%s2738_s25 + $0x640] sm:$0xff] }
  0xc7   : > { %v1408_v50 = vld [vmem:[%s2738_s25 + $0x250] sm:$0xff]  ;;  %v1689_v54 = vmax.bf16 %v1688_v43, %v1470_v38  ;;  %v1702_v56 = vmax.bf16 %v1376_v49, %v1344_v48  ;;  %1883 = vst [vmem:[%s2784_s30 + $0x28] sm:$0xff] %v1669_v45  ;;  %v1683_v57 = vmax.bf16 %v1682_v46, %v1533_v41  ;;  %v1503_v59 = vld [vmem:[%s2738_s25 + $0x548] sm:$0xff]  ;;  %v1345_v1 = vld [vmem:[%s2738_s25 + $0x58] sm:$0xff] }
  0xc8   : > { %v1696_v60 = vmax.bf16 %v1695_v47, %v1439_v44  ;;  %v1440_v61 = vld [vmem:[%s2738_s25 + $0x350] sm:$0xff]  ;;  %v1677_v62 = vmax.bf16 %v1676_v51, %v1596_v36  ;;  %v1377_v2 = vld [vmem:[%s2738_s25 + $0x158] sm:$0xff]  ;;  %v1566_v5 = vld [vmem:[%s2738_s25 + $0x740] sm:$0xff] }
  0xc9   : > { %v1690_v63 = vmax.bf16 %v1689_v54, %v1502_v42  ;;  %v1703_v0 = vmax.bf16 %v1702_v56, %v1408_v50  ;;  %v1409_v3 = vld [vmem:[%s2738_s25 + $0x258] sm:$0xff]  ;;  %v1684_v4 = vmax.bf16 %v1683_v57, %v1565_v52  ;;  %v1598_v6 = vld [vmem:[%s2738_s25 + $0x840] sm:$0xff]  ;;  %v1472_v8 = vld [vmem:[%s2738_s25 + $0x450] sm:$0xff]  ;;  %v1710_v9 = vmax.bf16 %v1377_v2, %v1345_v1 }
  0xca   : > { %v1697_v7 = vmax.bf16 %v1696_v60, %v1471_v55  ;;  %1884 = vst [vmem:[%s2784_s30 + $0x30] sm:$0xff] %v1677_v62  ;;  %v1535_v11 = vld [vmem:[%s2738_s25 + $0x648] sm:$0xff]  ;;  %v1504_v12 = vld [vmem:[%s2738_s25 + $0x550] sm:$0xff]  ;;  %v1441_v14 = vld [vmem:[%s2738_s25 + $0x358] sm:$0xff] }
  0xcb   : > { %v1691_v10 = vmax.bf16 %v1690_v63, %v1534_v58  ;;  %v1704_v13 = vmax.bf16 %v1703_v0, %v1440_v61  ;;  %v1685_v15 = vmax.bf16 %v1684_v4, %v1597_v53  ;;  %v1711_v17 = vmax.bf16 %v1710_v9, %v1409_v3  ;;  %v1346_v18 = vld [vmem:[%s2738_s25 + $0x60] sm:$0xff]  ;;  %v1567_v22 = vld [vmem:[%s2738_s25 + $0x748] sm:$0xff]  ;;  %v1473_v25 = vld [vmem:[%s2738_s25 + $0x458] sm:$0xff] }
  0xcc   : > { %v1698_v16 = vmax.bf16 %v1697_v7, %v1503_v59  ;;  %v1378_v19 = vld [vmem:[%s2738_s25 + $0x160] sm:$0xff]  ;;  %v1599_v23 = vld [vmem:[%s2738_s25 + $0x848] sm:$0xff]  ;;  %v1536_v28 = vld [vmem:[%s2738_s25 + $0x650] sm:$0xff] }
  0xcd   : > { %v1410_v20 = vld [vmem:[%s2738_s25 + $0x260] sm:$0xff]  ;;  %v1692_v21 = vmax.bf16 %v1691_v10, %v1566_v5  ;;  %v1705_v24 = vmax.bf16 %v1704_v13, %v1472_v8  ;;  %v1718_v26 = vmax.bf16 %v1378_v19, %v1346_v18  ;;  %1885 = vst [vmem:[%s2784_s30 + $0x38] sm:$0xff] %v1685_v15  ;;  %v1505_v29 = vld [vmem:[%s2738_s25 + $0x558] sm:$0xff]  ;;  %v1712_v30 = vmax.bf16 %v1711_v17, %v1441_v14  ;;  %v1347_v35 = vld [vmem:[%s2738_s25 + $0x68] sm:$0xff] }
  0xce   : > { %v1699_v27 = vmax.bf16 %v1698_v16, %v1535_v11  ;;  %v1442_v31 = vld [vmem:[%s2738_s25 + $0x360] sm:$0xff]  ;;  %v1379_v36 = vld [vmem:[%s2738_s25 + $0x168] sm:$0xff]  ;;  %v1568_v39 = vld [vmem:[%s2738_s25 + $0x750] sm:$0xff] }
  0xcf   : > { %v1693_v32 = vmax.bf16 %v1692_v21, %v1598_v6  ;;  %v1706_v33 = vmax.bf16 %v1705_v24, %v1504_v12  ;;  %v1719_v34 = vmax.bf16 %v1718_v26, %v1410_v20  ;;  %v1411_v37 = vld [vmem:[%s2738_s25 + $0x268] sm:$0xff]  ;;  %v1600_v40 = vld [vmem:[%s2738_s25 + $0x850] sm:$0xff]  ;;  %v1713_v41 = vmax.bf16 %v1712_v30, %v1473_v25  ;;  %v1474_v42 = vld [vmem:[%s2738_s25 + $0x460] sm:$0xff] }
  0xd0   : > { %v1700_v38 = vmax.bf16 %v1699_v27, %v1567_v22  ;;  %v1726_v43 = vmax.bf16 %v1379_v36, %v1347_v35  ;;  %v1537_v45 = vld [vmem:[%s2738_s25 + $0x658] sm:$0xff]  ;;  %v1506_v46 = vld [vmem:[%s2738_s25 + $0x560] sm:$0xff]  ;;  %v1443_v48 = vld [vmem:[%s2738_s25 + $0x368] sm:$0xff] }
  0xd1   : > { %1886 = vst [vmem:[%s2784_s30 + $0x40] sm:$0xff] %v1693_v32  ;;  %v1707_v44 = vmax.bf16 %v1706_v33, %v1536_v28  ;;  %v1720_v47 = vmax.bf16 %v1719_v34, %v1442_v31  ;;  %v1714_v50 = vmax.bf16 %v1713_v41, %v1505_v29  ;;  %v1348_v52 = vld [vmem:[%s2738_s25 + $0x70] sm:$0xff]  ;;  %v1569_v56 = vld [vmem:[%s2738_s25 + $0x758] sm:$0xff]  ;;  %v1475_v59 = vld [vmem:[%s2738_s25 + $0x468] sm:$0xff] }
  0xd2   : > { %v1701_v49 = vmax.bf16 %v1700_v38, %v1599_v23  ;;  %v1727_v51 = vmax.bf16 %v1726_v43, %v1411_v37  ;;  %v1380_v53 = vld [vmem:[%s2738_s25 + $0x170] sm:$0xff]  ;;  %v1601_v57 = vld [vmem:[%s2738_s25 + $0x858] sm:$0xff]  ;;  %v1538_v62 = vld [vmem:[%s2738_s25 + $0x660] sm:$0xff] }
  0xd3   : > { %v1412_v54 = vld [vmem:[%s2738_s25 + $0x270] sm:$0xff]  ;;  %v1708_v55 = vmax.bf16 %v1707_v44, %v1568_v39  ;;  %v1721_v58 = vmax.bf16 %v1720_v47, %v1474_v42  ;;  %v1734_v60 = vmax.bf16 %v1380_v53, %v1348_v52  ;;  %v1715_v61 = vmax.bf16 %v1714_v50, %v1537_v45  ;;  %v1507_v63 = vld [vmem:[%s2738_s25 + $0x568] sm:$0xff]  ;;  %v1349_v5 = vld [vmem:[%s2738_s25 + $0x78] sm:$0xff] }
  0xd4   : > { %1887 = vst [vmem:[%s2784_s30 + $0x48] sm:$0xff] %v1701_v49  ;;  %v1728_v0 = vmax.bf16 %v1727_v51, %v1443_v48  ;;  %v1444_v1 = vld [vmem:[%s2738_s25 + $0x370] sm:$0xff]  ;;  %v1381_v6 = vld [vmem:[%s2738_s25 + $0x178] sm:$0xff]  ;;  %v1570_v9 = vld [vmem:[%s2738_s25 + $0x760] sm:$0xff] }
  0xd5   : > { %v1709_v2 = vmax.bf16 %v1708_v55, %v1600_v40  ;;  %v1722_v3 = vmax.bf16 %v1721_v58, %v1506_v46  ;;  %v1735_v4 = vmax.bf16 %v1734_v60, %v1412_v54  ;;  %v1413_v7 = vld [vmem:[%s2738_s25 + $0x278] sm:$0xff]  ;;  %v1716_v8 = vmax.bf16 %v1715_v61, %v1569_v56  ;;  %v1602_v10 = vld [vmem:[%s2738_s25 + $0x860] sm:$0xff]  ;;  %v1476_v12 = vld [vmem:[%s2738_s25 + $0x470] sm:$0xff] }
  0xd6   : > { %v1729_v11 = vmax.bf16 %v1728_v0, %v1475_v59  ;;  %v1742_v13 = vmax.bf16 %v1381_v6, %v1349_v5  ;;  %v1539_v15 = vld [vmem:[%s2738_s25 + $0x668] sm:$0xff]  ;;  %v1508_v16 = vld [vmem:[%s2738_s25 + $0x570] sm:$0xff]  ;;  %v1445_v18 = vld [vmem:[%s2738_s25 + $0x378] sm:$0xff] }
  0xd7   : > { %1888 = vst [vmem:[%s2784_s30 + $0x50] sm:$0xff] %v1709_v2  ;;  %v1723_v14 = vmax.bf16 %v1722_v3, %v1538_v62  ;;  %v1736_v17 = vmax.bf16 %v1735_v4, %v1444_v1  ;;  %v1717_v19 = vmax.bf16 %v1716_v8, %v1601_v57  ;;  %v1350_v22 = vld [vmem:[%s2738_s25 + $0x80] sm:$0xff]  ;;  %v1571_v26 = vld [vmem:[%s2738_s25 + $0x768] sm:$0xff]  ;;  %v1477_v29 = vld [vmem:[%s2738_s25 + $0x478] sm:$0xff] }
  0xd8   : > { %v1730_v20 = vmax.bf16 %v1729_v11, %v1507_v63  ;;  %v1743_v21 = vmax.bf16 %v1742_v13, %v1413_v7  ;;  %v1382_v23 = vld [vmem:[%s2738_s25 + $0x180] sm:$0xff]  ;;  %v1603_v27 = vld [vmem:[%s2738_s25 + $0x868] sm:$0xff]  ;;  %v1540_v32 = vld [vmem:[%s2738_s25 + $0x670] sm:$0xff] }
  0xd9   : > { %v1414_v24 = vld [vmem:[%s2738_s25 + $0x280] sm:$0xff]  ;;  %v1724_v25 = vmax.bf16 %v1723_v14, %v1570_v9  ;;  %v1737_v28 = vmax.bf16 %v1736_v17, %v1476_v12  ;;  %v1750_v30 = vmax.bf16 %v1382_v23, %v1350_v22  ;;  %1889 = vst [vmem:[%s2784_s30 + $0x58] sm:$0xff] %v1717_v19  ;;  %v1509_v33 = vld [vmem:[%s2738_s25 + $0x578] sm:$0xff]  ;;  %v1351_v39 = vld [vmem:[%s2738_s25 + $0x88] sm:$0xff] }
  0xda   : > { %v1731_v31 = vmax.bf16 %v1730_v20, %v1539_v15  ;;  %v1744_v34 = vmax.bf16 %v1743_v21, %v1445_v18  ;;  %v1446_v35 = vld [vmem:[%s2738_s25 + $0x380] sm:$0xff]  ;;  %v1383_v40 = vld [vmem:[%s2738_s25 + $0x188] sm:$0xff]  ;;  %v1572_v43 = vld [vmem:[%s2738_s25 + $0x770] sm:$0xff] }
  0xdb   : > { %v1725_v36 = vmax.bf16 %v1724_v25, %v1602_v10  ;;  %v1738_v37 = vmax.bf16 %v1737_v28, %v1508_v16  ;;  %v1751_v38 = vmax.bf16 %v1750_v30, %v1414_v24  ;;  %v1415_v41 = vld [vmem:[%s2738_s25 + $0x288] sm:$0xff]  ;;  %v1604_v44 = vld [vmem:[%s2738_s25 + $0x870] sm:$0xff]  ;;  %v1478_v46 = vld [vmem:[%s2738_s25 + $0x480] sm:$0xff]  ;;  %v1758_v47 = vmax.bf16 %v1383_v40, %v1351_v39 }
  0xdc   : > { %v1732_v42 = vmax.bf16 %v1731_v31, %v1571_v26  ;;  %v1745_v45 = vmax.bf16 %v1744_v34, %v1477_v29  ;;  %v1541_v49 = vld [vmem:[%s2738_s25 + $0x678] sm:$0xff]  ;;  %v1510_v50 = vld [vmem:[%s2738_s25 + $0x580] sm:$0xff]  ;;  %v1447_v52 = vld [vmem:[%s2738_s25 + $0x388] sm:$0xff] }
  0xdd   : > { %1890 = vst [vmem:[%s2784_s30 + $0x60] sm:$0xff] %v1725_v36  ;;  %v1739_v48 = vmax.bf16 %v1738_v37, %v1540_v32  ;;  %v1752_v51 = vmax.bf16 %v1751_v38, %v1446_v35  ;;  %v1759_v55 = vmax.bf16 %v1758_v47, %v1415_v41  ;;  %v1352_v56 = vld [vmem:[%s2738_s25 + $0x90] sm:$0xff]  ;;  %v1573_v60 = vld [vmem:[%s2738_s25 + $0x778] sm:$0xff]  ;;  %v1479_v63 = vld [vmem:[%s2738_s25 + $0x488] sm:$0xff] }
  0xde   : > { %v1733_v53 = vmax.bf16 %v1732_v42, %v1603_v27  ;;  %v1746_v54 = vmax.bf16 %v1745_v45, %v1509_v33  ;;  %v1384_v57 = vld [vmem:[%s2738_s25 + $0x190] sm:$0xff]  ;;  %v1605_v61 = vld [vmem:[%s2738_s25 + $0x878] sm:$0xff]  ;;  %v1542_v2 = vld [vmem:[%s2738_s25 + $0x680] sm:$0xff] }
  0xdf   : > { %v1416_v58 = vld [vmem:[%s2738_s25 + $0x290] sm:$0xff]  ;;  %v1740_v59 = vmax.bf16 %v1739_v48, %v1572_v43  ;;  %v1753_v62 = vmax.bf16 %v1752_v51, %v1478_v46  ;;  %v1766_v0 = vmax.bf16 %v1384_v57, %v1352_v56  ;;  %v1511_v3 = vld [vmem:[%s2738_s25 + $0x588] sm:$0xff]  ;;  %v1760_v4 = vmax.bf16 %v1759_v55, %v1447_v52  ;;  %v1353_v9 = vld [vmem:[%s2738_s25 + $0x98] sm:$0xff] }
  0xe0   : > { %1891 = vst [vmem:[%s2784_s30 + $0x68] sm:$0xff] %v1733_v53  ;;  %v1747_v1 = vmax.bf16 %v1746_v54, %v1541_v49  ;;  %v1448_v5 = vld [vmem:[%s2738_s25 + $0x390] sm:$0xff]  ;;  %v1385_v10 = vld [vmem:[%s2738_s25 + $0x198] sm:$0xff]  ;;  %v1574_v13 = vld [vmem:[%s2738_s25 + $0x780] sm:$0xff] }
  0xe1   : > { %v1741_v6 = vmax.bf16 %v1740_v59, %v1604_v44  ;;  %v1754_v7 = vmax.bf16 %v1753_v62, %v1510_v50  ;;  %v1767_v8 = vmax.bf16 %v1766_v0, %v1416_v58  ;;  %v1417_v11 = vld [vmem:[%s2738_s25 + $0x298] sm:$0xff]  ;;  %v1606_v14 = vld [vmem:[%s2738_s25 + $0x880] sm:$0xff]  ;;  %v1761_v15 = vmax.bf16 %v1760_v4, %v1479_v63  ;;  %v1480_v16 = vld [vmem:[%s2738_s25 + $0x490] sm:$0xff] }
  0xe2   : > { %v1748_v12 = vmax.bf16 %v1747_v1, %v1573_v60  ;;  %v1774_v17 = vmax.bf16 %v1385_v10, %v1353_v9  ;;  %v1543_v19 = vld [vmem:[%s2738_s25 + $0x688] sm:$0xff]  ;;  %v1512_v20 = vld [vmem:[%s2738_s25 + $0x590] sm:$0xff]  ;;  %v1449_v22 = vld [vmem:[%s2738_s25 + $0x398] sm:$0xff] }
  0xe3   : > { %1892 = vst [vmem:[%s2784_s30 + $0x70] sm:$0xff] %v1741_v6  ;;  %v1755_v18 = vmax.bf16 %v1754_v7, %v1542_v2  ;;  %v1768_v21 = vmax.bf16 %v1767_v8, %v1448_v5  ;;  %v1762_v24 = vmax.bf16 %v1761_v15, %v1511_v3  ;;  %v1354_v26 = vld [vmem:[%s2738_s25 + $0xa0] sm:$0xff]  ;;  %v1575_v30 = vld [vmem:[%s2738_s25 + $0x788] sm:$0xff]  ;;  %v1481_v33 = vld [vmem:[%s2738_s25 + $0x498] sm:$0xff] }
  0xe4   : > { %v1749_v23 = vmax.bf16 %v1748_v12, %v1605_v61  ;;  %v1775_v25 = vmax.bf16 %v1774_v17, %v1417_v11  ;;  %v1386_v27 = vld [vmem:[%s2738_s25 + $0x1a0] sm:$0xff]  ;;  %v1607_v31 = vld [vmem:[%s2738_s25 + $0x888] sm:$0xff]  ;;  %v1544_v36 = vld [vmem:[%s2738_s25 + $0x690] sm:$0xff] }
  0xe5   : > { %v1418_v28 = vld [vmem:[%s2738_s25 + $0x2a0] sm:$0xff]  ;;  %v1756_v29 = vmax.bf16 %v1755_v18, %v1574_v13  ;;  %v1769_v32 = vmax.bf16 %v1768_v21, %v1480_v16  ;;  %v1782_v34 = vmax.bf16 %v1386_v27, %v1354_v26  ;;  %v1763_v35 = vmax.bf16 %v1762_v24, %v1543_v19  ;;  %v1513_v37 = vld [vmem:[%s2738_s25 + $0x598] sm:$0xff]  ;;  %v1355_v43 = vld [vmem:[%s2738_s25 + $0xa8] sm:$0xff] }
  0xe6   : > { %1893 = vst [vmem:[%s2784_s30 + $0x78] sm:$0xff] %v1749_v23  ;;  %v1776_v38 = vmax.bf16 %v1775_v25, %v1449_v22  ;;  %v1450_v39 = vld [vmem:[%s2738_s25 + $0x3a0] sm:$0xff]  ;;  %v1387_v44 = vld [vmem:[%s2738_s25 + $0x1a8] sm:$0xff]  ;;  %v1576_v47 = vld [vmem:[%s2738_s25 + $0x790] sm:$0xff] }
  0xe7   : > { %v1757_v40 = vmax.bf16 %v1756_v29, %v1606_v14  ;;  %v1770_v41 = vmax.bf16 %v1769_v32, %v1512_v20  ;;  %v1783_v42 = vmax.bf16 %v1782_v34, %v1418_v28  ;;  %v1419_v45 = vld [vmem:[%s2738_s25 + $0x2a8] sm:$0xff]  ;;  %v1764_v46 = vmax.bf16 %v1763_v35, %v1575_v30  ;;  %v1608_v48 = vld [vmem:[%s2738_s25 + $0x890] sm:$0xff]  ;;  %v1482_v50 = vld [vmem:[%s2738_s25 + $0x4a0] sm:$0xff] }
  0xe8   : > { %v1777_v49 = vmax.bf16 %v1776_v38, %v1481_v33  ;;  %v1790_v51 = vmax.bf16 %v1387_v44, %v1355_v43  ;;  %v1545_v53 = vld [vmem:[%s2738_s25 + $0x698] sm:$0xff]  ;;  %v1514_v54 = vld [vmem:[%s2738_s25 + $0x5a0] sm:$0xff]  ;;  %v1451_v56 = vld [vmem:[%s2738_s25 + $0x3a8] sm:$0xff] }
  0xe9   : > { %1894 = vst [vmem:[%s2784_s30 + $0x80] sm:$0xff] %v1757_v40  ;;  %v1771_v52 = vmax.bf16 %v1770_v41, %v1544_v36  ;;  %v1784_v55 = vmax.bf16 %v1783_v42, %v1450_v39  ;;  %v1765_v57 = vmax.bf16 %v1764_v46, %v1607_v31  ;;  %v1356_v60 = vld [vmem:[%s2738_s25 + $0xb0] sm:$0xff]  ;;  %v1577_v0 = vld [vmem:[%s2738_s25 + $0x798] sm:$0xff]  ;;  %v1483_v3 = vld [vmem:[%s2738_s25 + $0x4a8] sm:$0xff] }
  0xea   : > { %v1778_v58 = vmax.bf16 %v1777_v49, %v1513_v37  ;;  %v1791_v59 = vmax.bf16 %v1790_v51, %v1419_v45  ;;  %v1388_v61 = vld [vmem:[%s2738_s25 + $0x1b0] sm:$0xff]  ;;  %v1609_v1 = vld [vmem:[%s2738_s25 + $0x898] sm:$0xff]  ;;  %v1546_v6 = vld [vmem:[%s2738_s25 + $0x6a0] sm:$0xff] }
  0xeb   : > { %v1420_v62 = vld [vmem:[%s2738_s25 + $0x2b0] sm:$0xff]  ;;  %v1772_v63 = vmax.bf16 %v1771_v52, %v1576_v47  ;;  %v1785_v2 = vmax.bf16 %v1784_v55, %v1482_v50  ;;  %v1798_v4 = vmax.bf16 %v1388_v61, %v1356_v60  ;;  %1895 = vst [vmem:[%s2784_s30 + $0x88] sm:$0xff] %v1765_v57  ;;  %v1515_v7 = vld [vmem:[%s2738_s25 + $0x5a8] sm:$0xff]  ;;  %v1357_v13 = vld [vmem:[%s2738_s25 + $0xb8] sm:$0xff] }
  0xec   : > { %v1779_v5 = vmax.bf16 %v1778_v58, %v1545_v53  ;;  %v1792_v8 = vmax.bf16 %v1791_v59, %v1451_v56  ;;  %v1452_v9 = vld [vmem:[%s2738_s25 + $0x3b0] sm:$0xff]  ;;  %v1389_v14 = vld [vmem:[%s2738_s25 + $0x1b8] sm:$0xff]  ;;  %v1578_v17 = vld [vmem:[%s2738_s25 + $0x7a0] sm:$0xff] }
  0xed   : > { %v1773_v10 = vmax.bf16 %v1772_v63, %v1608_v48  ;;  %v1786_v11 = vmax.bf16 %v1785_v2, %v1514_v54  ;;  %v1799_v12 = vmax.bf16 %v1798_v4, %v1420_v62  ;;  %v1421_v15 = vld [vmem:[%s2738_s25 + $0x2b8] sm:$0xff]  ;;  %v1610_v18 = vld [vmem:[%s2738_s25 + $0x8a0] sm:$0xff]  ;;  %v1484_v20 = vld [vmem:[%s2738_s25 + $0x4b0] sm:$0xff]  ;;  %v1806_v21 = vmax.bf16 %v1389_v14, %v1357_v13 }
  0xee   : > { %v1780_v16 = vmax.bf16 %v1779_v5, %v1577_v0  ;;  %v1793_v19 = vmax.bf16 %v1792_v8, %v1483_v3  ;;  %v1547_v23 = vld [vmem:[%s2738_s25 + $0x6a8] sm:$0xff]  ;;  %v1516_v24 = vld [vmem:[%s2738_s25 + $0x5b0] sm:$0xff]  ;;  %v1453_v26 = vld [vmem:[%s2738_s25 + $0x3b8] sm:$0xff] }
  0xef   : > { %1896 = vst [vmem:[%s2784_s30 + $0x90] sm:$0xff] %v1773_v10  ;;  %v1787_v22 = vmax.bf16 %v1786_v11, %v1546_v6  ;;  %v1800_v25 = vmax.bf16 %v1799_v12, %v1452_v9  ;;  %v1807_v29 = vmax.bf16 %v1806_v21, %v1421_v15  ;;  %v1358_v30 = vld [vmem:[%s2738_s25 + $0xc0] sm:$0xff]  ;;  %v1579_v34 = vld [vmem:[%s2738_s25 + $0x7a8] sm:$0xff]  ;;  %v1485_v37 = vld [vmem:[%s2738_s25 + $0x4b8] sm:$0xff] }
  0xf0   : > { %v1781_v27 = vmax.bf16 %v1780_v16, %v1609_v1  ;;  %v1794_v28 = vmax.bf16 %v1793_v19, %v1515_v7  ;;  %v1390_v31 = vld [vmem:[%s2738_s25 + $0x1c0] sm:$0xff]  ;;  %v1611_v35 = vld [vmem:[%s2738_s25 + $0x8a8] sm:$0xff]  ;;  %v1548_v40 = vld [vmem:[%s2738_s25 + $0x6b0] sm:$0xff] }
  0xf1   : > { %v1422_v32 = vld [vmem:[%s2738_s25 + $0x2c0] sm:$0xff]  ;;  %v1788_v33 = vmax.bf16 %v1787_v22, %v1578_v17  ;;  %v1801_v36 = vmax.bf16 %v1800_v25, %v1484_v20  ;;  %v1814_v38 = vmax.bf16 %v1390_v31, %v1358_v30  ;;  %v1517_v41 = vld [vmem:[%s2738_s25 + $0x5b8] sm:$0xff]  ;;  %v1808_v42 = vmax.bf16 %v1807_v29, %v1453_v26  ;;  %v1359_v47 = vld [vmem:[%s2738_s25 + $0xc8] sm:$0xff] }
  0xf2   : > { %1897 = vst [vmem:[%s2784_s30 + $0x98] sm:$0xff] %v1781_v27  ;;  %v1795_v39 = vmax.bf16 %v1794_v28, %v1547_v23  ;;  %v1454_v43 = vld [vmem:[%s2738_s25 + $0x3c0] sm:$0xff]  ;;  %v1391_v48 = vld [vmem:[%s2738_s25 + $0x1c8] sm:$0xff]  ;;  %v1580_v51 = vld [vmem:[%s2738_s25 + $0x7b0] sm:$0xff] }
  0xf3   : > { %v1789_v44 = vmax.bf16 %v1788_v33, %v1610_v18  ;;  %v1802_v45 = vmax.bf16 %v1801_v36, %v1516_v24  ;;  %v1815_v46 = vmax.bf16 %v1814_v38, %v1422_v32  ;;  %v1423_v49 = vld [vmem:[%s2738_s25 + $0x2c8] sm:$0xff]  ;;  %v1612_v52 = vld [vmem:[%s2738_s25 + $0x8b0] sm:$0xff]  ;;  %v1809_v53 = vmax.bf16 %v1808_v42, %v1485_v37  ;;  %v1486_v54 = vld [vmem:[%s2738_s25 + $0x4c0] sm:$0xff] }
  0xf4   : > { %v1796_v50 = vmax.bf16 %v1795_v39, %v1579_v34  ;;  %v1822_v55 = vmax.bf16 %v1391_v48, %v1359_v47  ;;  %v1549_v57 = vld [vmem:[%s2738_s25 + $0x6b8] sm:$0xff]  ;;  %v1518_v58 = vld [vmem:[%s2738_s25 + $0x5c0] sm:$0xff]  ;;  %v1455_v60 = vld [vmem:[%s2738_s25 + $0x3c8] sm:$0xff] }
  0xf5   : > { %1898 = vst [vmem:[%s2784_s30 + $0xa0] sm:$0xff] %v1789_v44  ;;  %v1803_v56 = vmax.bf16 %v1802_v45, %v1548_v40  ;;  %v1816_v59 = vmax.bf16 %v1815_v46, %v1454_v43  ;;  %v1810_v62 = vmax.bf16 %v1809_v53, %v1517_v41  ;;  %v1360_v0 = vld [vmem:[%s2738_s25 + $0xd0] sm:$0xff]  ;;  %v1581_v4 = vld [vmem:[%s2738_s25 + $0x7b8] sm:$0xff]  ;;  %v1487_v7 = vld [vmem:[%s2738_s25 + $0x4c8] sm:$0xff] }
  0xf6   : > { %v1797_v61 = vmax.bf16 %v1796_v50, %v1611_v35  ;;  %v1823_v63 = vmax.bf16 %v1822_v55, %v1423_v49  ;;  %v1392_v1 = vld [vmem:[%s2738_s25 + $0x1d0] sm:$0xff]  ;;  %v1613_v5 = vld [vmem:[%s2738_s25 + $0x8b8] sm:$0xff]  ;;  %v1550_v10 = vld [vmem:[%s2738_s25 + $0x6c0] sm:$0xff] }
  0xf7   : > { %v1424_v2 = vld [vmem:[%s2738_s25 + $0x2d0] sm:$0xff]  ;;  %v1804_v3 = vmax.bf16 %v1803_v56, %v1580_v51  ;;  %v1817_v6 = vmax.bf16 %v1816_v59, %v1486_v54  ;;  %v1830_v8 = vmax.bf16 %v1392_v1, %v1360_v0  ;;  %v1811_v9 = vmax.bf16 %v1810_v62, %v1549_v57  ;;  %v1519_v11 = vld [vmem:[%s2738_s25 + $0x5c8] sm:$0xff]  ;;  %v1361_v17 = vld [vmem:[%s2738_s25 + $0xd8] sm:$0xff] }
  0xf8   : > { %1899 = vst [vmem:[%s2784_s30 + $0xa8] sm:$0xff] %v1797_v61  ;;  %v1824_v12 = vmax.bf16 %v1823_v63, %v1455_v60  ;;  %v1456_v13 = vld [vmem:[%s2738_s25 + $0x3d0] sm:$0xff]  ;;  %v1393_v18 = vld [vmem:[%s2738_s25 + $0x1d8] sm:$0xff]  ;;  %v1582_v21 = vld [vmem:[%s2738_s25 + $0x7c0] sm:$0xff] }
  0xf9   : > { %v1805_v14 = vmax.bf16 %v1804_v3, %v1612_v52  ;;  %v1818_v15 = vmax.bf16 %v1817_v6, %v1518_v58  ;;  %v1831_v16 = vmax.bf16 %v1830_v8, %v1424_v2  ;;  %v1425_v19 = vld [vmem:[%s2738_s25 + $0x2d8] sm:$0xff]  ;;  %v1812_v20 = vmax.bf16 %v1811_v9, %v1581_v4  ;;  %v1614_v22 = vld [vmem:[%s2738_s25 + $0x8c0] sm:$0xff]  ;;  %v1488_v24 = vld [vmem:[%s2738_s25 + $0x4d0] sm:$0xff] }
  0xfa   : > { %v1825_v23 = vmax.bf16 %v1824_v12, %v1487_v7  ;;  %v1838_v25 = vmax.bf16 %v1393_v18, %v1361_v17  ;;  %v1551_v27 = vld [vmem:[%s2738_s25 + $0x6c8] sm:$0xff]  ;;  %v1520_v28 = vld [vmem:[%s2738_s25 + $0x5d0] sm:$0xff]  ;;  %v1457_v30 = vld [vmem:[%s2738_s25 + $0x3d8] sm:$0xff] }
  0xfb   : > { %1900 = vst [vmem:[%s2784_s30 + $0xb0] sm:$0xff] %v1805_v14  ;;  %v1819_v26 = vmax.bf16 %v1818_v15, %v1550_v10  ;;  %v1832_v29 = vmax.bf16 %v1831_v16, %v1456_v13  ;;  %v1813_v31 = vmax.bf16 %v1812_v20, %v1613_v5  ;;  %v1362_v34 = vld [vmem:[%s2738_s25 + $0xe0] sm:$0xff]  ;;  %v1583_v38 = vld [vmem:[%s2738_s25 + $0x7c8] sm:$0xff]  ;;  %v1489_v41 = vld [vmem:[%s2738_s25 + $0x4d8] sm:$0xff] }
  0xfc   : > { %v1826_v32 = vmax.bf16 %v1825_v23, %v1519_v11  ;;  %v1839_v33 = vmax.bf16 %v1838_v25, %v1425_v19  ;;  %v1394_v35 = vld [vmem:[%s2738_s25 + $0x1e0] sm:$0xff]  ;;  %v1615_v39 = vld [vmem:[%s2738_s25 + $0x8c8] sm:$0xff]  ;;  %v1552_v44 = vld [vmem:[%s2738_s25 + $0x6d0] sm:$0xff] }
  0xfd   : > { %v1426_v36 = vld [vmem:[%s2738_s25 + $0x2e0] sm:$0xff]  ;;  %v1820_v37 = vmax.bf16 %v1819_v26, %v1582_v21  ;;  %v1833_v40 = vmax.bf16 %v1832_v29, %v1488_v24  ;;  %v1846_v42 = vmax.bf16 %v1394_v35, %v1362_v34  ;;  %1901 = vst [vmem:[%s2784_s30 + $0xb8] sm:$0xff] %v1813_v31  ;;  %v1521_v45 = vld [vmem:[%s2738_s25 + $0x5d8] sm:$0xff]  ;;  %v1363_v51 = vld [vmem:[%s2738_s25 + $0xe8] sm:$0xff] }
  0xfe   : > { %v1827_v43 = vmax.bf16 %v1826_v32, %v1551_v27  ;;  %v1840_v46 = vmax.bf16 %v1839_v33, %v1457_v30  ;;  %v1458_v47 = vld [vmem:[%s2738_s25 + $0x3e0] sm:$0xff]  ;;  %v1395_v52 = vld [vmem:[%s2738_s25 + $0x1e8] sm:$0xff]  ;;  %v1584_v55 = vld [vmem:[%s2738_s25 + $0x7d0] sm:$0xff] }
  0xff   : > { %v1821_v48 = vmax.bf16 %v1820_v37, %v1614_v22  ;;  %v1834_v49 = vmax.bf16 %v1833_v40, %v1520_v28  ;;  %v1847_v50 = vmax.bf16 %v1846_v42, %v1426_v36  ;;  %v1427_v53 = vld [vmem:[%s2738_s25 + $0x2e8] sm:$0xff]  ;;  %v1616_v56 = vld [vmem:[%s2738_s25 + $0x8d0] sm:$0xff]  ;;  %v1490_v58 = vld [vmem:[%s2738_s25 + $0x4e0] sm:$0xff]  ;;  %v1854_v59 = vmax.bf16 %v1395_v52, %v1363_v51 }
 0x100   : > { %v1828_v54 = vmax.bf16 %v1827_v43, %v1583_v38  ;;  %v1841_v57 = vmax.bf16 %v1840_v46, %v1489_v41  ;;  %v1553_v61 = vld [vmem:[%s2738_s25 + $0x6d8] sm:$0xff]  ;;  %v1522_v62 = vld [vmem:[%s2738_s25 + $0x5e0] sm:$0xff]  ;;  %v1459_v0 = vld [vmem:[%s2738_s25 + $0x3e8] sm:$0xff] }
 0x101   : > { %1902 = vst [vmem:[%s2784_s30 + $0xc0] sm:$0xff] %v1821_v48  ;;  %v1835_v60 = vmax.bf16 %v1834_v49, %v1552_v44  ;;  %v1848_v63 = vmax.bf16 %v1847_v50, %v1458_v47  ;;  %v1855_v3 = vmax.bf16 %v1854_v59, %v1427_v53  ;;  %v1364_v4 = vld [vmem:[%s2738_s25 + $0xf0] sm:$0xff]  ;;  %v1585_v8 = vld [vmem:[%s2738_s25 + $0x7d8] sm:$0xff]  ;;  %v1491_v11 = vld [vmem:[%s2738_s25 + $0x4e8] sm:$0xff] }
 0x102   : > { %v1829_v1 = vmax.bf16 %v1828_v54, %v1615_v39  ;;  %v1842_v2 = vmax.bf16 %v1841_v57, %v1521_v45  ;;  %v1396_v5 = vld [vmem:[%s2738_s25 + $0x1f0] sm:$0xff]  ;;  %v1617_v9 = vld [vmem:[%s2738_s25 + $0x8d8] sm:$0xff]  ;;  %v1554_v14 = vld [vmem:[%s2738_s25 + $0x6e0] sm:$0xff] }
 0x103   : > { %v1428_v6 = vld [vmem:[%s2738_s25 + $0x2f0] sm:$0xff]  ;;  %v1836_v7 = vmax.bf16 %v1835_v60, %v1584_v55  ;;  %v1849_v10 = vmax.bf16 %v1848_v63, %v1490_v58  ;;  %v1862_v12 = vmax.bf16 %v1396_v5, %v1364_v4  ;;  %v1523_v15 = vld [vmem:[%s2738_s25 + $0x5e8] sm:$0xff]  ;;  %v1856_v16 = vmax.bf16 %v1855_v3, %v1459_v0  ;;  %v1365_v21 = vld [vmem:[%s2738_s25 + $0xf8] sm:$0xff] }
 0x104   : > { %1903 = vst [vmem:[%s2784_s30 + $0xc8] sm:$0xff] %v1829_v1  ;;  %v1843_v13 = vmax.bf16 %v1842_v2, %v1553_v61  ;;  %v1460_v17 = vld [vmem:[%s2738_s25 + $0x3f0] sm:$0xff]  ;;  %v1397_v22 = vld [vmem:[%s2738_s25 + $0x1f8] sm:$0xff]  ;;  %v1586_v25 = vld [vmem:[%s2738_s25 + $0x7e0] sm:$0xff] }
 0x105   : > { %v1837_v18 = vmax.bf16 %v1836_v7, %v1616_v56  ;;  %v1850_v19 = vmax.bf16 %v1849_v10, %v1522_v62  ;;  %v1863_v20 = vmax.bf16 %v1862_v12, %v1428_v6  ;;  %v1429_v23 = vld [vmem:[%s2738_s25 + $0x2f8] sm:$0xff]  ;;  %v1857_v26 = vmax.bf16 %v1856_v16, %v1491_v11  ;;  %v1492_v27 = vld [vmem:[%s2738_s25 + $0x4f0] sm:$0xff]  ;;  %v1555_v30 = vld [vmem:[%s2738_s25 + $0x6e8] sm:$0xff] }
 0x106   : > { %v1844_v24 = vmax.bf16 %v1843_v13, %v1585_v8  ;;  %v1870_v28 = vmax.bf16 %v1397_v22, %v1365_v21  ;;  %v1461_v32 = vld [vmem:[%s2738_s25 + $0x3f8] sm:$0xff]  ;;  %v1618_v34 = vld [vmem:[%s2738_s25 + $0x8e0] sm:$0xff]  ;;  %v1524_v36 = vld [vmem:[%s2738_s25 + $0x5f0] sm:$0xff] }
 0x107   : > { %1904 = vst [vmem:[%s2784_s30 + $0xd0] sm:$0xff] %v1837_v18  ;;  %v1851_v29 = vmax.bf16 %v1850_v19, %v1554_v14  ;;  %v1864_v31 = vmax.bf16 %v1863_v20, %v1460_v17  ;;  %v1858_v35 = vmax.bf16 %v1857_v26, %v1523_v15  ;;  %v1587_v39 = vld [vmem:[%s2738_s25 + $0x7e8] sm:$0xff]  ;;  %v1493_v41 = vld [vmem:[%s2738_s25 + $0x4f8] sm:$0xff]  ;;  %v1556_v43 = vld [vmem:[%s2738_s25 + $0x6f0] sm:$0xff] }
 0x108   : > { %v1845_v33 = vmax.bf16 %v1844_v24, %v1617_v9  ;;  %v1871_v37 = vmax.bf16 %v1870_v28, %v1429_v23  ;;  %v1619_v46 = vld [vmem:[%s2738_s25 + $0x8e8] sm:$0xff]  ;;  %v1525_v48 = vld [vmem:[%s2738_s25 + $0x5f8] sm:$0xff]  ;;  %v1588_v50 = vld [vmem:[%s2738_s25 + $0x7f0] sm:$0xff] }
 0x109   : > { %v1852_v38 = vmax.bf16 %v1851_v29, %v1586_v25  ;;  %v1865_v40 = vmax.bf16 %v1864_v31, %v1492_v27  ;;  %v1859_v42 = vmax.bf16 %v1858_v35, %v1555_v30  ;;  %v1557_v53 = vld [vmem:[%s2738_s25 + $0x6f8] sm:$0xff]  ;;  %v1620_v55 = vld [vmem:[%s2738_s25 + $0x8f0] sm:$0xff] }
 0x10a   : > { %1905 = vst [vmem:[%s2784_s30 + $0xd8] sm:$0xff] %v1845_v33  ;;  %v1872_v44 = vmax.bf16 %v1871_v37, %v1461_v32  ;;  %v1589_v58 = vld [vmem:[%s2738_s25 + $0x7f8] sm:$0xff] }
 0x10b   : > { %v1853_v45 = vmax.bf16 %v1852_v38, %v1618_v34  ;;  %v1866_v47 = vmax.bf16 %v1865_v40, %v1524_v36  ;;  %v1860_v49 = vmax.bf16 %v1859_v42, %v1587_v39  ;;  %v1621_v61 = vld [vmem:[%s2738_s25 + $0x8f8] sm:$0xff] }
 0x10c   : > { %v1873_v51 = vmax.bf16 %v1872_v44, %v1493_v41 }
 0x10d   : > { %1906 = vst [vmem:[%s2784_s30 + $0xe0] sm:$0xff] %v1853_v45  ;;  %v1867_v52 = vmax.bf16 %v1866_v47, %v1556_v43  ;;  %v1861_v54 = vmax.bf16 %v1860_v49, %v1619_v46 }
 0x10e   : > { %v1874_v56 = vmax.bf16 %v1873_v51, %v1525_v48 }
 0x10f   : > { %v1868_v57 = vmax.bf16 %v1867_v52, %v1588_v50  ;;  %1907 = vst [vmem:[%s2784_s30 + $0xe8] sm:$0xff] %v1861_v54 }
 0x110   : > { %v1875_v59 = vmax.bf16 %v1874_v56, %v1557_v53 }
 0x111   : > { %v1869_v60 = vmax.bf16 %v1868_v57, %v1620_v55 }
 0x112   : > { %v1876_v62 = vmax.bf16 %v1875_v59, %v1589_v58 }
 0x113   : > { %1908 = vst [vmem:[%s2784_s30 + $0xf0] sm:$0xff] %v1869_v60 }
 0x114   : > { %v1877_v63 = vmax.bf16 %v1876_v62, %v1621_v61 }
 0x116   : > { %1909 = vst [vmem:[%s2784_s30 + $0xf8] sm:$0xff] %v1877_v63 }
 0x117 PF: > { %s11_s10 = sadd.s32 1, %s2099_s10   ;;  %s3092_s6 = smov %s2087_s7 }
 0x118   : > { %p8_p10 = scmp.ge.s32.totalorder %s11_s10, 12   ;;  %s3093_s7 = smov %s2146_s14 }
 0x119   : > { %s3094_s8 = smov %s2095_s9  ;;  %s3095_s9 = smov %s3097_s11 }
 0x11a   :  { %10 = sbr.rel (!%p8_p10) target bundleno = 3 (0x3), region = 97 }

</bundles_post_ra>
